<compile_context>
chip_gen: v7x
topology: tpu7x:2x2x1
jax: 0.10.0
libtpu: 0.0.40
codegen_flags: <defaults>
</compile_context>

<pallas_src>
import functools

import jax
import jax.numpy as jnp
from jax.experimental import pallas as pl
from jax.experimental.pallas import tpu as pltpu


# ---------------------------------------------------------------------------
# Packed-bias lane offsets (all 128-aligned so in-kernel slices stay tile
# aligned).  One (1, _B_WIDTH) f32 operand replaces ~18 tiny bias operands.
# ---------------------------------------------------------------------------
_B_PRE = 0        # [b_conv1 (64) | b_cnn (32)]
_B_E1 = 128       # b_e_conv1 (64)
_B_C2E2 = 256     # [b_conv2 (128) | b_e_conv2 (128)]
_B_C5 = 512       # b_conv5 (512)
_B_C6 = 1024      # b_conv6 (1024)
_B_H1 = 2048      # [b_conv1_r (640) | b_conv1_t (640)]
_B_R2 = 3328      # b_conv2_r (256)
_B_T2 = 3584      # b_conv2_t (256)
_B_R3 = 3840      # b_conv3_r (128)
_B_T3 = 3968      # b_conv3_t (128)
_B_RT4 = 4096     # [b_conv4_r (4) | b_conv4_t (3) | 0]
_B_FC = 4224      # [b_fc_rotation (4) | b_fc_translation (3) | 0]
_B_WIDTH = 4352


# ---------------------------------------------------------------------------
# Fused Pallas kernel: the entire PoseNet forward
# ---------------------------------------------------------------------------
def _posenet_kernel(
    pp_ref,                                   # (N, 6) f32: [pts | chosen pixels]
    w_pre, w_e1, w_c2e2, w_c5,                # small VMEM-resident weights
    w_c6_hbm, w_h1pf_hbm, w_h1ap_hbm,         # big late weights, left in HBM
    w_rt2, w_rt3, w_rt4, w_fc, bias_ref,
    pred_r_ref, pred_t_ref,                   # outputs (1,4), (1,3)
    w_c6_v, w_h1pf_v, w_h1ap_v, sems,         # VMEM scratch + DMA semaphores
):
    f32 = jnp.float32
    bf16 = jnp.bfloat16

    # Start DMAs of the late-layer weights immediately so they overlap the
    # conv1..conv5 compute (manual prefetch; the remaining operands are only
    # ~1.3 MB so the kernel body can start early).
    cp_c6 = pltpu.make_async_copy(w_c6_hbm, w_c6_v, sems.at[0])
    cp_pf = pltpu.make_async_copy(w_h1pf_hbm, w_h1pf_v, sems.at[1])
    cp_ap = pltpu.make_async_copy(w_h1ap_hbm, w_h1ap_v, sems.at[2])
    cp_c6.start()
    cp_pf.start()
    cp_ap.start()

    def mm(a, w):
        # bf16 MXU matmul with f32 accumulation.
        return jnp.dot(a.astype(bf16), w, preferred_element_type=f32)

    def relu_bf16(v):
        # Keep hidden activations in bf16 (halves VMEM / spill traffic; every
        # consumer matmul re-casts to bf16 anyway).
        return jnp.maximum(v, 0.0).astype(bf16)

    def bias(off, width):
        return bias_ref[:, off:off + width]

    # ---- stage 0: block-diag [conv1 | cnn-stand-in] on [pts | pix] ----
    eo = relu_bf16(mm(pp_ref[...], w_pre[...]) + bias(_B_PRE, 96))   # (N, 96)
    x1 = eo[:, 0:64]                                                 # conv1 out
    emb = eo[:, 64:96]                                               # cnn out

    # ---- PoseNetFeat ----
    e1 = relu_bf16(mm(emb, w_e1[...]) + bias(_B_E1, 64))             # (N, 64)
    x1e1 = jnp.concatenate([x1, e1], axis=1)                         # pointfeat_1 (N,128)

    x2 = mm(x1, w_c2e2[0])
    e2 = mm(e1, w_c2e2[1])
    x2e2 = relu_bf16(jnp.concatenate([x2, e2], axis=1)
                     + bias(_B_C2E2, 256))                           # pointfeat_2 (N,256)

    # conv5 as a single deep-K (K=256) matmul on the concatenated features.
    x5 = relu_bf16(mm(x2e2, w_c5[...]) + bias(_B_C5, 512))           # (N, 512)

    cp_c6.wait()
    x6 = jnp.maximum(mm(x5, w_c6_v[...]) + bias(_B_C6, 1024), 0.0)   # (N,1024) f32
    # fused AvgPool1d(num_points): f32 accumulation, exact divide by true N.
    ap = jnp.sum(x6, axis=0, keepdims=True) * (1.0 / x6.shape[0])    # (1,1024) f32

    # ---- merged rotation|translation head, layer 1 ----
    # ap_x = [x1|e1|x2|e2|repeat(ap)] is never materialized: the point-feature
    # block is one K=384 matmul; the repeated avg-pool block collapses to a
    # rank-1 (1,1024)x(1024,1280) term broadcast over points.
    pf = jnp.concatenate([x1e1, x2e2], axis=1)                       # (N, 384)
    cp_pf.wait()
    cp_ap.wait()
    h1 = relu_bf16(mm(pf, w_h1pf_v[...]) + mm(ap, w_h1ap_v[...])
                   + bias(_B_H1, 1280))                              # (N, 1280)

    rx = relu_bf16(mm(h1[:, 0:640], w_rt2[0]) + bias(_B_R2, 256))    # (N, 256)
    tx = relu_bf16(mm(h1[:, 640:1280], w_rt2[1]) + bias(_B_T2, 256)) # (N, 256)
    rx = relu_bf16(mm(rx, w_rt3[0]) + bias(_B_R3, 128))              # (N, 128)
    tx = relu_bf16(mm(tx, w_rt3[1]) + bias(_B_T3, 128))              # (N, 128)

    # conv4_r / conv4_t merged into one block-diagonal (256 -> 8) matmul.
    rt = jnp.concatenate([rx, tx], axis=1)                           # (N, 256)
    out_rt = mm(rt, w_rt4[...]) + bias(_B_RT4, 8)                    # (N, 8) f32
    # lanes 0:4 = conv4_r output, lanes 4:7 = conv4_t output, lane 7 = 0.

    # ---- fused fc_rotation / fc_translation ----
    # PyTorch: pred[o] = sum_{c,p} out[c, p] * Wfc[o, c*N + p] + b[o].
    # Wfc is pre-reshaped (wrapper) to (N, 32) so the big contraction over the
    # point axis is one f32 TN dot_general; the tiny (8, 32) result is folded
    # with static slices — no lane-sparse HBM stores, no transpose.
    tn = (((0,), (0,)), ((), ()))
    d = jax.lax.dot_general(out_rt, w_fc[...], tn,
                            preferred_element_type=f32)              # (8, 32)
    b_fc = bias(_B_FC, 8)
    pred_r_ref[...] = (d[0:1, 0:4] + d[1:2, 4:8] + d[2:3, 8:12]
                       + d[3:4, 12:16] + b_fc[:, 0:4])               # (1, 4)
    pred_t_ref[...] = (d[4:5, 16:19] + d[5:6, 19:22] + d[6:7, 22:25]
                       + b_fc[:, 4:7])                               # (1, 3)


# ---------------------------------------------------------------------------
# Parameter initialization (deterministic, synthetic)
# ---------------------------------------------------------------------------
def init_params(key, num_points):
    # Weight stored as (Cin, Cout) = transpose of PyTorch's Conv1d/Linear weight.
    # NOTE: the reference hard-codes Linear(4*500, 4) / Linear(3*500, 3); here
    # the fc dims follow num_points so the channel-major flatten matches.
    specs = {
        "cnn":            (3, 32),        # stand-in for ModifiedResnet output (di=32)
        "feat.conv1":     (3, 64),
        "feat.e_conv1":   (32, 64),
        "feat.conv2":     (64, 128),
        "feat.e_conv2":   (64, 128),
        "feat.conv5":     (256, 512),
        "feat.conv6":     (512, 1024),
        "conv1_r":        (1408, 640),
        "conv1_t":        (1408, 640),
        "conv2_r":        (640, 256),
        "conv2_t":        (640, 256),
        "conv3_r":        (256, 128),
        "conv3_t":        (256, 128),
        "conv4_r":        (128, 4),
        "conv4_t":        (128, 3),
        "fc_rotation":    (4 * num_points, 4),
        "fc_translation": (3 * num_points, 3),
    }
    keys = jax.random.split(key, len(specs))
    params = {}
    for k_, (name, (cin, cout)) in zip(keys, specs.items()):
        kw, kb = jax.random.split(k_)
        w = jax.random.normal(kw, (cin, cout), jnp.float32) / jnp.sqrt(float(cin))
        b = jax.random.normal(kb, (1, cout), jnp.float32) * 0.01
        params[name] = (w, b)
    return params


def prepare_params(params, num_points):
    """One-time weight re-layout for the fused kernel: bf16 cast, block-diag
    merges, deep-K concatenations, packed biases, fc reshapes."""
    wdt = jnp.bfloat16
    n = num_points

    def w(name):
        return params[name][0]

    def b(name):
        return params[name][1]

    # Stage-0 block-diagonal weight: [pts | pix] (N,6) -> [x1 (64) | emb (32)].
    w_pre = jnp.zeros((6, 96), jnp.float32)
    w_pre = w_pre.at[0:3, 0:64].set(w("feat.conv1"))
    w_pre = w_pre.at[3:6, 64:96].set(w("cnn"))

    # conv2 / e_conv2 stacked into one operand (same shape, different inputs).
    w_c2e2 = jnp.stack([w("feat.conv2"), w("feat.e_conv2")], axis=0)

    # Merged rotation|translation first head layer (1408, 1280) split into the
    # point-feature rows (single deep-K=384 matmul) and the avg-pool rows
    # (rank-1 term shared by all points).
    w_h1 = jnp.concatenate([w("conv1_r"), w("conv1_t")], axis=1)
    b_h1 = jnp.concatenate([b("conv1_r"), b("conv1_t")], axis=1)

    w_rt2 = jnp.stack([w("conv2_r"), w("conv2_t")], axis=0)
    w_rt3 = jnp.stack([w("conv3_r"), w("conv3_t")], axis=0)

    # Block-diagonal conv4_r / conv4_t: concat[rx|tx] (N,256) -> (N,8).
    w_rt4 = jnp.zeros((256, 8), jnp.float32)
    w_rt4 = w_rt4.at[0:128, 0:4].set(w("conv4_r"))
    w_rt4 = w_rt4.at[128:256, 4:7].set(w("conv4_t"))

    # fc weights: row index of the PyTorch weight is c*N + p (channel-major
    # flatten).  Re-lay to (N, 32): cols 0:16 rotation (c*4+o), 16:25 translation.
    wfc_r = w("fc_rotation").reshape(4, n, 4).transpose(1, 0, 2).reshape(n, 16)
    wfc_t = w("fc_translation").reshape(3, n, 3).transpose(1, 0, 2).reshape(n, 9)
    w_fc = jnp.zeros((n, 32), jnp.float32)
    w_fc = w_fc.at[:, 0:16].set(wfc_r)
    w_fc = w_fc.at[:, 16:25].set(wfc_t)

    # All biases packed into one lane-offset-aligned f32 operand.
    def put(buf, off, vec):
        return buf.at[:, off:off + vec.shape[1]].set(vec)

    bias = jnp.zeros((1, _B_WIDTH), jnp.float32)
    bias = put(bias, _B_PRE, jnp.concatenate([b("feat.conv1"), b("cnn")], axis=1))
    bias = put(bias, _B_E1, b("feat.e_conv1"))
    bias = put(bias, _B_C2E2,
               jnp.concatenate([b("feat.conv2"), b("feat.e_conv2")], axis=1))
    bias = put(bias, _B_C5, b("feat.conv5"))
    bias = put(bias, _B_C6, b("feat.conv6"))
    bias = put(bias, _B_H1, b_h1)
    bias = put(bias, _B_R2, b("conv2_r"))
    bias = put(bias, _B_T2, b("conv2_t"))
    bias = put(bias, _B_R3, b("conv3_r"))
    bias = put(bias, _B_T3, b("conv3_t"))
    bias = put(bias, _B_RT4, jnp.concatenate([b("conv4_r"), b("conv4_t")], axis=1))
    bias = put(bias, _B_FC,
               jnp.concatenate([b("fc_rotation"), b("fc_translation")], axis=1))

    return dict(
        w_pre=w_pre.astype(wdt),
        w_e1=w("feat.e_conv1").astype(wdt),
        w_c2e2=w_c2e2.astype(wdt),
        w_c5=w("feat.conv5").astype(wdt),
        w_c6=w("feat.conv6").astype(wdt),          # stays in HBM, DMA'd in-kernel
        w_h1_pf=w_h1[0:384].astype(wdt),           # stays in HBM, DMA'd in-kernel
        w_h1_ap=w_h1[384:1408].astype(wdt),        # stays in HBM, DMA'd in-kernel
        w_rt2=w_rt2.astype(wdt),
        w_rt3=w_rt3.astype(wdt),
        w_rt4=w_rt4.astype(wdt),
        w_fc=w_fc,                                 # f32 for the final contraction
        bias=bias,
    )


# ---------------------------------------------------------------------------
# Forward pass
# ---------------------------------------------------------------------------
def posenet_forward(prep, img, x, choose, *, num_points):
    bs, c_img, hh, ww = img.shape
    # fc_rotation / fc_translation flatten the whole batch with .view(-1),
    # so the original module only works with bs == 1.
    assert bs == 1
    assert x.shape[1] == num_points

    # ---- self.cnn(img) + torch.gather(emb, 2, choose) ----
    # TODO(synk): the PSPNet/ResNet18 backbone (ModifiedResnet) is an external
    # dependency not defined in the reference source; it is replaced by a
    # deterministic per-pixel 1x1 conv producing the 32-channel embedding.
    # Because that stand-in is pointwise, gathering the chosen pixels first and
    # running the conv inside the fused kernel is numerically identical to
    # conv-then-gather, and only touches the N selected pixels.
    pix = jnp.transpose(img[0], (1, 2, 0)).reshape(hh * ww, c_img)   # (HW, 3)
    pix_sel = jnp.take(pix, choose[0, 0], axis=0)                    # (N, 3)
    pts = x[0]                                                       # (N, 3)
    pp = jnp.concatenate([pts, pix_sel], axis=1)                     # (N, 6)

    p = prep
    vspec = pl.BlockSpec(memory_space=pltpu.MemorySpace.VMEM)
    hbmspec = pl.BlockSpec(memory_space=pl.ANY)   # manual DMA inside the kernel

    # Single fused kernel, no grid: weights + activations fit VMEM on
    # v5e/v6e/v7x (~8 MB peak), so the kernel is launch/DMA-latency bound.
    # The three largest late-layer weights are prefetched in-kernel so the
    # body starts after ~1.3 MB of operand DMA instead of ~6 MB.
    # TODO(synk): on v7x the second TensorCore could take half the point axis
    # (partial ap / fc sums + tiny cross-core combine) for ~2x on the front end.
    # TODO(synk): at N=128 the 256-deep v6e/v7x MXU is at 50% M-occupancy;
    # stacking two frames per call would fill it if serving allows.
    pred_r, pred_t = pl.pallas_call(
        _posenet_kernel,
        out_shape=(jax.ShapeDtypeStruct((1, 4), jnp.float32),
                   jax.ShapeDtypeStruct((1, 3), jnp.float32)),
        in_specs=[vspec, vspec, vspec, vspec, vspec,
                  hbmspec, hbmspec, hbmspec,
                  vspec, vspec, vspec, vspec, vspec],
        out_specs=(vspec, vspec),
        scratch_shapes=[
            pltpu.VMEM((512, 1024), jnp.bfloat16),    # conv6 weight
            pltpu.VMEM((384, 1280), jnp.bfloat16),    # head-1 point-feature rows
            pltpu.VMEM((1024, 1280), jnp.bfloat16),   # head-1 avg-pool rows
            pltpu.SemaphoreType.DMA((3,)),
        ],
        compiler_params=pltpu.CompilerParams(
            vmem_limit_bytes=32 * 1024 * 1024),
    )(pp, p["w_pre"], p["w_e1"], p["w_c2e2"], p["w_c5"],
      p["w_c6"], p["w_h1_pf"], p["w_h1_ap"],
      p["w_rt2"], p["w_rt3"], p["w_rt4"], p["w_fc"], p["bias"])

    pred_r = pred_r.reshape(-1, 4, 1)
    pred_t = pred_t.reshape(-1, 3, 1)
    return pred_r, pred_t


# ---------------------------------------------------------------------------
# Main
# ---------------------------------------------------------------------------
if __name__ == "__main__":
    key = jax.random.PRNGKey(0)
    num_points = 128          # original uses 500; fc dims scale with num_points
    H = W = 16

    k_param, k_img, k_pts, k_choose = jax.random.split(key, 4)
    params = init_params(k_param, num_points)
    prep = prepare_params(params, num_points)

    img = jax.random.normal(k_img, (1, 3, H, W), jnp.float32)          # NCHW
    x_pts = jax.random.normal(k_pts, (1, num_points, 3), jnp.float32)  # (bs, N, 3)
    choose = jax.random.randint(k_choose, (1, 1, num_points), 0, H * W,
                                dtype=jnp.int32)

    fwd = jax.jit(functools.partial(posenet_forward, num_points=num_points))
    pred_r, pred_t = fwd(prep, img, x_pts, choose)
    jax.block_until_ready((pred_r, pred_t))

    assert pred_r.shape == (1, 4, 1), pred_r.shape
    assert pred_t.shape == (1, 3, 1), pred_t.shape
    assert jnp.all(jnp.isfinite(pred_r)) and jnp.all(jnp.isfinite(pred_t))
    print("KERNEL_OK")
</pallas_src>

<mosaic_0001>
module attributes {stable_mosaic.version = 11 : i64} {
  func.func @_posenet_kernel(%arg0: memref<128x6xf32, #tpu.memory_space<vmem>>, %arg1: memref<6x96xbf16, #tpu.memory_space<vmem>>, %arg2: memref<32x64xbf16, #tpu.memory_space<vmem>>, %arg3: memref<2x64x128xbf16, #tpu.memory_space<vmem>>, %arg4: memref<256x512xbf16, #tpu.memory_space<vmem>>, %arg5: memref<512x1024xbf16, #tpu.memory_space<any>>, %arg6: memref<384x1280xbf16, #tpu.memory_space<any>>, %arg7: memref<1024x1280xbf16, #tpu.memory_space<any>>, %arg8: memref<2x640x256xbf16, #tpu.memory_space<vmem>>, %arg9: memref<2x256x128xbf16, #tpu.memory_space<vmem>>, %arg10: memref<256x8xbf16, #tpu.memory_space<vmem>>, %arg11: memref<128x32xf32, #tpu.memory_space<vmem>>, %arg12: memref<1x4352xf32, #tpu.memory_space<vmem>>, %arg13: memref<1x4xf32, #tpu.memory_space<vmem>>, %arg14: memref<1x3xf32, #tpu.memory_space<vmem>>, %arg15: memref<512x1024xbf16, #tpu.memory_space<vmem>>, %arg16: memref<384x1280xbf16, #tpu.memory_space<vmem>>, %arg17: memref<1024x1280xbf16, #tpu.memory_space<vmem>>, %arg18: memref<3x!tpu.dma_semaphore, #tpu.memory_space<semaphore_mem>>) attributes {dimension_semantics = [], scalar_prefetch = 0 : i64, scratch_operands = 4 : i64, tpu.core_type = #tpu.core_type<tc>} {
    %c0_i32 = arith.constant 0 : i32
    %0 = tpu.memref_slice %arg18[%c0_i32] : memref<3x!tpu.dma_semaphore, #tpu.memory_space<semaphore_mem>> -> memref<1x!tpu.dma_semaphore, #tpu.memory_space<semaphore_mem>>
    %1 = tpu.memref_squeeze %0 : memref<1x!tpu.dma_semaphore, #tpu.memory_space<semaphore_mem>> -> memref<!tpu.dma_semaphore, #tpu.memory_space<semaphore_mem>>
    tpu.enqueue_dma source(%arg5 : memref<512x1024xbf16, #tpu.memory_space<any>>) target(%arg15 : memref<512x1024xbf16, #tpu.memory_space<vmem>>) target_semaphore(%1 : memref<!tpu.dma_semaphore, #tpu.memory_space<semaphore_mem>>)
    %c1_i32 = arith.constant 1 : i32
    %2 = tpu.memref_slice %arg18[%c1_i32] : memref<3x!tpu.dma_semaphore, #tpu.memory_space<semaphore_mem>> -> memref<1x!tpu.dma_semaphore, #tpu.memory_space<semaphore_mem>>
    %3 = tpu.memref_squeeze %2 : memref<1x!tpu.dma_semaphore, #tpu.memory_space<semaphore_mem>> -> memref<!tpu.dma_semaphore, #tpu.memory_space<semaphore_mem>>
    tpu.enqueue_dma source(%arg6 : memref<384x1280xbf16, #tpu.memory_space<any>>) target(%arg16 : memref<384x1280xbf16, #tpu.memory_space<vmem>>) target_semaphore(%3 : memref<!tpu.dma_semaphore, #tpu.memory_space<semaphore_mem>>)
    %c2_i32 = arith.constant 2 : i32
    %4 = tpu.memref_slice %arg18[%c2_i32] : memref<3x!tpu.dma_semaphore, #tpu.memory_space<semaphore_mem>> -> memref<1x!tpu.dma_semaphore, #tpu.memory_space<semaphore_mem>>
    %5 = tpu.memref_squeeze %4 : memref<1x!tpu.dma_semaphore, #tpu.memory_space<semaphore_mem>> -> memref<!tpu.dma_semaphore, #tpu.memory_space<semaphore_mem>>
    tpu.enqueue_dma source(%arg7 : memref<1024x1280xbf16, #tpu.memory_space<any>>) target(%arg17 : memref<1024x1280xbf16, #tpu.memory_space<vmem>>) target_semaphore(%5 : memref<!tpu.dma_semaphore, #tpu.memory_space<semaphore_mem>>)
    %c0 = arith.constant 0 : index
    %c0_0 = arith.constant 0 : index
    %6 = vector.load %arg0[%c0, %c0_0] : memref<128x6xf32, #tpu.memory_space<vmem>>, vector<128x6xf32>
    %c0_1 = arith.constant 0 : index
    %c0_2 = arith.constant 0 : index
    %7 = vector.load %arg1[%c0_1, %c0_2] : memref<6x96xbf16, #tpu.memory_space<vmem>>, vector<6x96xbf16>
    %8 = arith.truncf %6 : vector<128x6xf32> to vector<128x6xbf16>
    %cst = arith.constant dense<0.000000e+00> : vector<128x96xf32>
    %9 = tpu.matmul %8, %7, %cst {dimension_numbers = #tpu.dot_dimension_numbers<[1], [0], [0], [1], [0, 0, 1, 1], [], []>} : vector<128x6xbf16>, vector<6x96xbf16>, vector<128x96xf32> -> vector<128x96xf32>
    %c0_3 = arith.constant 0 : index
    %c0_4 = arith.constant 0 : index
    %10 = vector.load %arg12[%c0_3, %c0_4] : memref<1x4352xf32, #tpu.memory_space<vmem>>, vector<1x96xf32>
    %11 = vector.broadcast %10 : vector<1x96xf32> to vector<128x96xf32>
    %12 = arith.addf %9, %11 : vector<128x96xf32>
    %cst_5 = arith.constant 0.000000e+00 : f32
    %13 = vector.broadcast %cst_5 : f32 to vector<128x96xf32>
    %14 = arith.maximumf %12, %13 : vector<128x96xf32>
    %15 = arith.truncf %14 : vector<128x96xf32> to vector<128x96xbf16>
    %16 = vector.extract_strided_slice %15 {offsets = [0, 0], sizes = [128, 64], strides = [1, 1]} : vector<128x96xbf16> to vector<128x64xbf16>
    %17 = vector.extract_strided_slice %15 {offsets = [0, 64], sizes = [128, 32], strides = [1, 1]} : vector<128x96xbf16> to vector<128x32xbf16>
    %c0_6 = arith.constant 0 : index
    %c0_7 = arith.constant 0 : index
    %18 = vector.load %arg2[%c0_6, %c0_7] : memref<32x64xbf16, #tpu.memory_space<vmem>>, vector<32x64xbf16>
    %cst_8 = arith.constant dense<0.000000e+00> : vector<128x64xf32>
    %19 = tpu.matmul %17, %18, %cst_8 {dimension_numbers = #tpu.dot_dimension_numbers<[1], [0], [0], [1], [0, 0, 1, 1], [], []>} : vector<128x32xbf16>, vector<32x64xbf16>, vector<128x64xf32> -> vector<128x64xf32>
    %c0_9 = arith.constant 0 : index
    %c128 = arith.constant 128 : index
    %20 = vector.load %arg12[%c0_9, %c128] : memref<1x4352xf32, #tpu.memory_space<vmem>>, vector<1x64xf32>
    %21 = vector.broadcast %20 : vector<1x64xf32> to vector<128x64xf32>
    %22 = arith.addf %19, %21 : vector<128x64xf32>
    %cst_10 = arith.constant 0.000000e+00 : f32
    %23 = vector.broadcast %cst_10 : f32 to vector<128x64xf32>
    %24 = arith.maximumf %22, %23 : vector<128x64xf32>
    %25 = arith.truncf %24 : vector<128x64xf32> to vector<128x64xbf16>
    %26 = tpu.concatenate %16, %25 in 1 : vector<128x64xbf16>, vector<128x64xbf16> -> vector<128x128xbf16>
    %c0_11 = arith.constant 0 : index
    %c0_12 = arith.constant 0 : index
    %c0_13 = arith.constant 0 : index
    %27 = vector.load %arg3[%c0_11, %c0_12, %c0_13] : memref<2x64x128xbf16, #tpu.memory_space<vmem>>, vector<1x64x128xbf16>
    %28 = vector.shape_cast %27 : vector<1x64x128xbf16> to vector<64x128xbf16>
    %cst_14 = arith.constant dense<0.000000e+00> : vector<128x128xf32>
    %29 = tpu.matmul %16, %28, %cst_14 {dimension_numbers = #tpu.dot_dimension_numbers<[1], [0], [0], [1], [0, 0, 1, 1], [], []>} : vector<128x64xbf16>, vector<64x128xbf16>, vector<128x128xf32> -> vector<128x128xf32>
    %c1 = arith.constant 1 : index
    %c0_15 = arith.constant 0 : index
    %c0_16 = arith.constant 0 : index
    %30 = vector.load %arg3[%c1, %c0_15, %c0_16] : memref<2x64x128xbf16, #tpu.memory_space<vmem>>, vector<1x64x128xbf16>
    %31 = vector.shape_cast %30 : vector<1x64x128xbf16> to vector<64x128xbf16>
    %cst_17 = arith.constant dense<0.000000e+00> : vector<128x128xf32>
    %32 = tpu.matmul %25, %31, %cst_17 {dimension_numbers = #tpu.dot_dimension_numbers<[1], [0], [0], [1], [0, 0, 1, 1], [], []>} : vector<128x64xbf16>, vector<64x128xbf16>, vector<128x128xf32> -> vector<128x128xf32>
    %33 = tpu.concatenate %29, %32 in 1 : vector<128x128xf32>, vector<128x128xf32> -> vector<128x256xf32>
    %c0_18 = arith.constant 0 : index
    %c256 = arith.constant 256 : index
    %34 = vector.load %arg12[%c0_18, %c256] : memref<1x4352xf32, #tpu.memory_space<vmem>>, vector<1x256xf32>
    %35 = vector.broadcast %34 : vector<1x256xf32> to vector<128x256xf32>
    %36 = arith.addf %33, %35 : vector<128x256xf32>
    %cst_19 = arith.constant 0.000000e+00 : f32
    %37 = vector.broadcast %cst_19 : f32 to vector<128x256xf32>
    %38 = arith.maximumf %36, %37 : vector<128x256xf32>
    %39 = arith.truncf %38 : vector<128x256xf32> to vector<128x256xbf16>
    %c0_20 = arith.constant 0 : index
    %c0_21 = arith.constant 0 : index
    %40 = vector.load %arg4[%c0_20, %c0_21] : memref<256x512xbf16, #tpu.memory_space<vmem>>, vector<256x512xbf16>
    %cst_22 = arith.constant dense<0.000000e+00> : vector<128x512xf32>
    %41 = tpu.matmul %39, %40, %cst_22 {dimension_numbers = #tpu.dot_dimension_numbers<[1], [0], [0], [1], [0, 0, 1, 1], [], []>} : vector<128x256xbf16>, vector<256x512xbf16>, vector<128x512xf32> -> vector<128x512xf32>
    %c0_23 = arith.constant 0 : index
    %c512 = arith.constant 512 : index
    %42 = vector.load %arg12[%c0_23, %c512] : memref<1x4352xf32, #tpu.memory_space<vmem>>, vector<1x512xf32>
    %43 = vector.broadcast %42 : vector<1x512xf32> to vector<128x512xf32>
    %44 = arith.addf %41, %43 : vector<128x512xf32>
    %cst_24 = arith.constant 0.000000e+00 : f32
    %45 = vector.broadcast %cst_24 : f32 to vector<128x512xf32>
    %46 = arith.maximumf %44, %45 : vector<128x512xf32>
    %47 = arith.truncf %46 : vector<128x512xf32> to vector<128x512xbf16>
    %c0_i32_25 = arith.constant 0 : i32
    %48 = tpu.memref_slice %arg18[%c0_i32_25] : memref<3x!tpu.dma_semaphore, #tpu.memory_space<semaphore_mem>> -> memref<1x!tpu.dma_semaphore, #tpu.memory_space<semaphore_mem>>
    %49 = tpu.memref_squeeze %48 : memref<1x!tpu.dma_semaphore, #tpu.memory_space<semaphore_mem>> -> memref<!tpu.dma_semaphore, #tpu.memory_space<semaphore_mem>>
    tpu.wait_dma2 semaphore(%49 : memref<!tpu.dma_semaphore, #tpu.memory_space<semaphore_mem>>) src(%arg5 : memref<512x1024xbf16, #tpu.memory_space<any>>) dst(%arg15 : memref<512x1024xbf16, #tpu.memory_space<vmem>>)
    %c0_26 = arith.constant 0 : index
    %c0_27 = arith.constant 0 : index
    %50 = vector.load %arg15[%c0_26, %c0_27] : memref<512x1024xbf16, #tpu.memory_space<vmem>>, vector<512x1024xbf16>
    %cst_28 = arith.constant dense<0.000000e+00> : vector<128x1024xf32>
    %51 = tpu.matmul %47, %50, %cst_28 {dimension_numbers = #tpu.dot_dimension_numbers<[1], [0], [0], [1], [0, 0, 1, 1], [], []>} : vector<128x512xbf16>, vector<512x1024xbf16>, vector<128x1024xf32> -> vector<128x1024xf32>
    %c0_29 = arith.constant 0 : index
    %c1024 = arith.constant 1024 : index
    %52 = vector.load %arg12[%c0_29, %c1024] : memref<1x4352xf32, #tpu.memory_space<vmem>>, vector<1x1024xf32>
    %53 = vector.broadcast %52 : vector<1x1024xf32> to vector<128x1024xf32>
    %54 = arith.addf %51, %53 : vector<128x1024xf32>
    %cst_30 = arith.constant 0.000000e+00 : f32
    %55 = vector.broadcast %cst_30 : f32 to vector<128x1024xf32>
    %56 = arith.maximumf %54, %55 : vector<128x1024xf32>
    %cst_31 = arith.constant dense<0.000000e+00> : vector<1024xf32>
    %57 = vector.multi_reduction <add>, %56, %cst_31 [0] : vector<128x1024xf32> to vector<1024xf32>
    %58 = vector.shape_cast %57 : vector<1024xf32> to vector<1x1024xf32>
    %cst_32 = arith.constant 7.812500e-03 : f32
    %59 = vector.broadcast %cst_32 : f32 to vector<1x1024xf32>
    %60 = arith.mulf %58, %59 : vector<1x1024xf32>
    %61 = tpu.concatenate %26, %39 in 1 : vector<128x128xbf16>, vector<128x256xbf16> -> vector<128x384xbf16>
    %c1_i32_33 = arith.constant 1 : i32
    %62 = tpu.memref_slice %arg18[%c1_i32_33] : memref<3x!tpu.dma_semaphore, #tpu.memory_space<semaphore_mem>> -> memref<1x!tpu.dma_semaphore, #tpu.memory_space<semaphore_mem>>
    %63 = tpu.memref_squeeze %62 : memref<1x!tpu.dma_semaphore, #tpu.memory_space<semaphore_mem>> -> memref<!tpu.dma_semaphore, #tpu.memory_space<semaphore_mem>>
    tpu.wait_dma2 semaphore(%63 : memref<!tpu.dma_semaphore, #tpu.memory_space<semaphore_mem>>) src(%arg6 : memref<384x1280xbf16, #tpu.memory_space<any>>) dst(%arg16 : memref<384x1280xbf16, #tpu.memory_space<vmem>>)
    %c2_i32_34 = arith.constant 2 : i32
    %64 = tpu.memref_slice %arg18[%c2_i32_34] : memref<3x!tpu.dma_semaphore, #tpu.memory_space<semaphore_mem>> -> memref<1x!tpu.dma_semaphore, #tpu.memory_space<semaphore_mem>>
    %65 = tpu.memref_squeeze %64 : memref<1x!tpu.dma_semaphore, #tpu.memory_space<semaphore_mem>> -> memref<!tpu.dma_semaphore, #tpu.memory_space<semaphore_mem>>
    tpu.wait_dma2 semaphore(%65 : memref<!tpu.dma_semaphore, #tpu.memory_space<semaphore_mem>>) src(%arg7 : memref<1024x1280xbf16, #tpu.memory_space<any>>) dst(%arg17 : memref<1024x1280xbf16, #tpu.memory_space<vmem>>)
    %c0_35 = arith.constant 0 : index
    %c0_36 = arith.constant 0 : index
    %66 = vector.load %arg16[%c0_35, %c0_36] : memref<384x1280xbf16, #tpu.memory_space<vmem>>, vector<384x1280xbf16>
    %cst_37 = arith.constant dense<0.000000e+00> : vector<128x1280xf32>
    %67 = tpu.matmul %61, %66, %cst_37 {dimension_numbers = #tpu.dot_dimension_numbers<[1], [0], [0], [1], [0, 0, 1, 1], [], []>} : vector<128x384xbf16>, vector<384x1280xbf16>, vector<128x1280xf32> -> vector<128x1280xf32>
    %c0_38 = arith.constant 0 : index
    %c0_39 = arith.constant 0 : index
    %68 = vector.load %arg17[%c0_38, %c0_39] : memref<1024x1280xbf16, #tpu.memory_space<vmem>>, vector<1024x1280xbf16>
    %69 = arith.truncf %60 : vector<1x1024xf32> to vector<1x1024xbf16>
    %cst_40 = arith.constant dense<0.000000e+00> : vector<1x1280xf32>
    %70 = tpu.matmul %69, %68, %cst_40 {dimension_numbers = #tpu.dot_dimension_numbers<[1], [0], [0], [1], [0, 0, 1, 1], [], []>} : vector<1x1024xbf16>, vector<1024x1280xbf16>, vector<1x1280xf32> -> vector<1x1280xf32>
    %71 = vector.broadcast %70 : vector<1x1280xf32> to vector<128x1280xf32>
    %72 = arith.addf %67, %71 : vector<128x1280xf32>
    %c0_41 = arith.constant 0 : index
    %c2048 = arith.constant 2048 : index
    %73 = vector.load %arg12[%c0_41, %c2048] : memref<1x4352xf32, #tpu.memory_space<vmem>>, vector<1x1280xf32>
    %74 = vector.broadcast %73 : vector<1x1280xf32> to vector<128x1280xf32>
    %75 = arith.addf %72, %74 : vector<128x1280xf32>
    %cst_42 = arith.constant 0.000000e+00 : f32
    %76 = vector.broadcast %cst_42 : f32 to vector<128x1280xf32>
    %77 = arith.maximumf %75, %76 : vector<128x1280xf32>
    %78 = arith.truncf %77 : vector<128x1280xf32> to vector<128x1280xbf16>
    %79 = vector.extract_strided_slice %78 {offsets = [0, 0], sizes = [128, 640], strides = [1, 1]} : vector<128x1280xbf16> to vector<128x640xbf16>
    %c0_43 = arith.constant 0 : index
    %c0_44 = arith.constant 0 : index
    %c0_45 = arith.constant 0 : index
    %80 = vector.load %arg8[%c0_43, %c0_44, %c0_45] : memref<2x640x256xbf16, #tpu.memory_space<vmem>>, vector<1x640x256xbf16>
    %81 = vector.shape_cast %80 : vector<1x640x256xbf16> to vector<640x256xbf16>
    %cst_46 = arith.constant dense<0.000000e+00> : vector<128x256xf32>
    %82 = tpu.matmul %79, %81, %cst_46 {dimension_numbers = #tpu.dot_dimension_numbers<[1], [0], [0], [1], [0, 0, 1, 1], [], []>} : vector<128x640xbf16>, vector<640x256xbf16>, vector<128x256xf32> -> vector<128x256xf32>
    %c0_47 = arith.constant 0 : index
    %c3328 = arith.constant 3328 : index
    %83 = vector.load %arg12[%c0_47, %c3328] : memref<1x4352xf32, #tpu.memory_space<vmem>>, vector<1x256xf32>
    %84 = vector.broadcast %83 : vector<1x256xf32> to vector<128x256xf32>
    %85 = arith.addf %82, %84 : vector<128x256xf32>
    %cst_48 = arith.constant 0.000000e+00 : f32
    %86 = vector.broadcast %cst_48 : f32 to vector<128x256xf32>
    %87 = arith.maximumf %85, %86 : vector<128x256xf32>
    %88 = arith.truncf %87 : vector<128x256xf32> to vector<128x256xbf16>
    %89 = vector.extract_strided_slice %78 {offsets = [0, 640], sizes = [128, 640], strides = [1, 1]} : vector<128x1280xbf16> to vector<128x640xbf16>
    %c1_49 = arith.constant 1 : index
    %c0_50 = arith.constant 0 : index
    %c0_51 = arith.constant 0 : index
    %90 = vector.load %arg8[%c1_49, %c0_50, %c0_51] : memref<2x640x256xbf16, #tpu.memory_space<vmem>>, vector<1x640x256xbf16>
    %91 = vector.shape_cast %90 : vector<1x640x256xbf16> to vector<640x256xbf16>
    %cst_52 = arith.constant dense<0.000000e+00> : vector<128x256xf32>
    %92 = tpu.matmul %89, %91, %cst_52 {dimension_numbers = #tpu.dot_dimension_numbers<[1], [0], [0], [1], [0, 0, 1, 1], [], []>} : vector<128x640xbf16>, vector<640x256xbf16>, vector<128x256xf32> -> vector<128x256xf32>
    %c0_53 = arith.constant 0 : index
    %c3584 = arith.constant 3584 : index
    %93 = vector.load %arg12[%c0_53, %c3584] : memref<1x4352xf32, #tpu.memory_space<vmem>>, vector<1x256xf32>
    %94 = vector.broadcast %93 : vector<1x256xf32> to vector<128x256xf32>
    %95 = arith.addf %92, %94 : vector<128x256xf32>
    %cst_54 = arith.constant 0.000000e+00 : f32
    %96 = vector.broadcast %cst_54 : f32 to vector<128x256xf32>
    %97 = arith.maximumf %95, %96 : vector<128x256xf32>
    %98 = arith.truncf %97 : vector<128x256xf32> to vector<128x256xbf16>
    %c0_55 = arith.constant 0 : index
    %c0_56 = arith.constant 0 : index
    %c0_57 = arith.constant 0 : index
    %99 = vector.load %arg9[%c0_55, %c0_56, %c0_57] : memref<2x256x128xbf16, #tpu.memory_space<vmem>>, vector<1x256x128xbf16>
    %100 = vector.shape_cast %99 : vector<1x256x128xbf16> to vector<256x128xbf16>
    %cst_58 = arith.constant dense<0.000000e+00> : vector<128x128xf32>
    %101 = tpu.matmul %88, %100, %cst_58 {dimension_numbers = #tpu.dot_dimension_numbers<[1], [0], [0], [1], [0, 0, 1, 1], [], []>} : vector<128x256xbf16>, vector<256x128xbf16>, vector<128x128xf32> -> vector<128x128xf32>
    %c0_59 = arith.constant 0 : index
    %c3840 = arith.constant 3840 : index
    %102 = vector.load %arg12[%c0_59, %c3840] : memref<1x4352xf32, #tpu.memory_space<vmem>>, vector<1x128xf32>
    %103 = vector.broadcast %102 : vector<1x128xf32> to vector<128x128xf32>
    %104 = arith.addf %101, %103 : vector<128x128xf32>
    %cst_60 = arith.constant 0.000000e+00 : f32
    %105 = vector.broadcast %cst_60 : f32 to vector<128x128xf32>
    %106 = arith.maximumf %104, %105 : vector<128x128xf32>
    %107 = arith.truncf %106 : vector<128x128xf32> to vector<128x128xbf16>
    %c1_61 = arith.constant 1 : index
    %c0_62 = arith.constant 0 : index
    %c0_63 = arith.constant 0 : index
    %108 = vector.load %arg9[%c1_61, %c0_62, %c0_63] : memref<2x256x128xbf16, #tpu.memory_space<vmem>>, vector<1x256x128xbf16>
    %109 = vector.shape_cast %108 : vector<1x256x128xbf16> to vector<256x128xbf16>
    %cst_64 = arith.constant dense<0.000000e+00> : vector<128x128xf32>
    %110 = tpu.matmul %98, %109, %cst_64 {dimension_numbers = #tpu.dot_dimension_numbers<[1], [0], [0], [1], [0, 0, 1, 1], [], []>} : vector<128x256xbf16>, vector<256x128xbf16>, vector<128x128xf32> -> vector<128x128xf32>
    %c0_65 = arith.constant 0 : index
    %c3968 = arith.constant 3968 : index
    %111 = vector.load %arg12[%c0_65, %c3968] : memref<1x4352xf32, #tpu.memory_space<vmem>>, vector<1x128xf32>
    %112 = vector.broadcast %111 : vector<1x128xf32> to vector<128x128xf32>
    %113 = arith.addf %110, %112 : vector<128x128xf32>
    %cst_66 = arith.constant 0.000000e+00 : f32
    %114 = vector.broadcast %cst_66 : f32 to vector<128x128xf32>
    %115 = arith.maximumf %113, %114 : vector<128x128xf32>
    %116 = arith.truncf %115 : vector<128x128xf32> to vector<128x128xbf16>
    %117 = tpu.concatenate %107, %116 in 1 : vector<128x128xbf16>, vector<128x128xbf16> -> vector<128x256xbf16>
    %c0_67 = arith.constant 0 : index
    %c0_68 = arith.constant 0 : index
    %118 = vector.load %arg10[%c0_67, %c0_68] : memref<256x8xbf16, #tpu.memory_space<vmem>>, vector<256x8xbf16>
    %cst_69 = arith.constant dense<0.000000e+00> : vector<128x8xf32>
    %119 = tpu.matmul %117, %118, %cst_69 {dimension_numbers = #tpu.dot_dimension_numbers<[1], [0], [0], [1], [0, 0, 1, 1], [], []>} : vector<128x256xbf16>, vector<256x8xbf16>, vector<128x8xf32> -> vector<128x8xf32>
    %c0_70 = arith.constant 0 : index
    %c4096 = arith.constant 4096 : index
    %120 = vector.load %arg12[%c0_70, %c4096] : memref<1x4352xf32, #tpu.memory_space<vmem>>, vector<1x8xf32>
    %121 = vector.broadcast %120 : vector<1x8xf32> to vector<128x8xf32>
    %122 = arith.addf %119, %121 : vector<128x8xf32>
    %c0_71 = arith.constant 0 : index
    %c0_72 = arith.constant 0 : index
    %123 = vector.load %arg11[%c0_71, %c0_72] : memref<128x32xf32, #tpu.memory_space<vmem>>, vector<128x32xf32>
    %cst_73 = arith.constant dense<0.000000e+00> : vector<8x32xf32>
    %124 = tpu.matmul %122, %123, %cst_73 {dimension_numbers = #tpu.dot_dimension_numbers<[0], [0], [1], [1], [0, 1, 1, 1], [], []>} : vector<128x8xf32>, vector<128x32xf32>, vector<8x32xf32> -> vector<8x32xf32>
    %c0_74 = arith.constant 0 : index
    %c4224 = arith.constant 4224 : index
    %125 = vector.load %arg12[%c0_74, %c4224] : memref<1x4352xf32, #tpu.memory_space<vmem>>, vector<1x8xf32>
    %126 = vector.extract_strided_slice %124 {offsets = [0, 0], sizes = [1, 4], strides = [1, 1]} : vector<8x32xf32> to vector<1x4xf32>
    %127 = vector.extract_strided_slice %124 {offsets = [1, 4], sizes = [1, 4], strides = [1, 1]} : vector<8x32xf32> to vector<1x4xf32>
    %128 = arith.addf %126, %127 : vector<1x4xf32>
    %129 = vector.extract_strided_slice %124 {offsets = [2, 8], sizes = [1, 4], strides = [1, 1]} : vector<8x32xf32> to vector<1x4xf32>
    %130 = arith.addf %128, %129 : vector<1x4xf32>
    %131 = vector.extract_strided_slice %124 {offsets = [3, 12], sizes = [1, 4], strides = [1, 1]} : vector<8x32xf32> to vector<1x4xf32>
    %132 = arith.addf %130, %131 : vector<1x4xf32>
    %133 = vector.extract_strided_slice %125 {offsets = [0, 0], sizes = [1, 4], strides = [1, 1]} : vector<1x8xf32> to vector<1x4xf32>
    %134 = arith.addf %132, %133 : vector<1x4xf32>
    %c0_75 = arith.constant 0 : index
    %c0_76 = arith.constant 0 : index
    %135 = vector.load %arg13[%c0_75, %c0_76] : memref<1x4xf32, #tpu.memory_space<vmem>>, vector<1x4xf32>
    tpu.vector_store %arg13[%c0_75, %c0_76], %134 {strides = array<i32>} : memref<1x4xf32, #tpu.memory_space<vmem>>, vector<1x4xf32>,
    %136 = vector.extract_strided_slice %124 {offsets = [4, 16], sizes = [1, 3], strides = [1, 1]} : vector<8x32xf32> to vector<1x3xf32>
    %137 = vector.extract_strided_slice %124 {offsets = [5, 19], sizes = [1, 3], strides = [1, 1]} : vector<8x32xf32> to vector<1x3xf32>
    %138 = arith.addf %136, %137 : vector<1x3xf32>
    %139 = vector.extract_strided_slice %124 {offsets = [6, 22], sizes = [1, 3], strides = [1, 1]} : vector<8x32xf32> to vector<1x3xf32>
    %140 = arith.addf %138, %139 : vector<1x3xf32>
    %141 = vector.extract_strided_slice %125 {offsets = [0, 4], sizes = [1, 3], strides = [1, 1]} : vector<1x8xf32> to vector<1x3xf32>
    %142 = arith.addf %140, %141 : vector<1x3xf32>
    %c0_77 = arith.constant 0 : index
    %c0_78 = arith.constant 0 : index
    %143 = vector.load %arg14[%c0_77, %c0_78] : memref<1x3xf32, #tpu.memory_space<vmem>>, vector<1x3xf32>
    tpu.vector_store %arg14[%c0_77, %c0_78], %142 {strides = array<i32>} : memref<1x3xf32, #tpu.memory_space<vmem>>, vector<1x3xf32>,
    return
  }
}

</mosaic_0001>

<bundles_post_ra>
// kernel: posenet_forward.1
= control target key start
LH: loop header
LB: loop body
LE: loop exit
PB: predicated region body
PF: predicated region fallthrough
CT: control target
= control target key end

     0   :  { %20 = vsyncpa [#allocation7], 0  ;;  %s13648_s0 = inlined_call_operand.vmem [shape: f32[128,6], index: 0, kind: input, shape index: {}]   ;;  %s13649_s1 = inlined_call_operand.hbm [shape: bf16[6,96], index: 1, kind: input, shape index: {}]   ;;  %s13650_s2 = inlined_call_operand.hbm [shape: bf16[32,64], index: 2, kind: input, shape index: {}]   ;;  %s13651_s3 = inlined_call_operand.hbm [shape: bf16[2,64,128], index: 3, kind: input, shape index: {}]   ;;  %s13652_s4 = inlined_call_operand.hbm [shape: bf16[256,512], index: 4, kind: input, shape index: {}]   ;;  %s13653_s5 = inlined_call_operand.hbm [shape: bf16[512,1024], index: 5, kind: input, shape index: {}]   ;;  %s13654_s6 = inlined_call_operand.hbm [shape: bf16[384,1280], index: 6, kind: input, shape index: {}]   ;;  %s13655_s7 = inlined_call_operand.hbm [shape: bf16[1024,1280], index: 7, kind: input, shape index: {}]   ;;  %s13656_s8 = inlined_call_operand.hbm [shape: bf16[2,640,256], index: 8, kind: input, shape index: {}]   ;;  %s13657_s9 = inlined_call_operand.hbm [shape: bf16[2,256,128], index: 9, kind: input, shape index: {}]   ;;  %s13658_s10 = inlined_call_operand.vmem [shape: bf16[256,8], index: 10, kind: input, shape index: {}]   ;;  %s13659_s11 = inlined_call_operand.vmem [shape: f32[128,32], index: 11, kind: input, shape index: {}]   ;;  %s13660_s12 = inlined_call_operand.hbm [shape: f32[1,4352], index: 12, kind: input, shape index: {}]   ;;  %s13661_s13 = inlined_call_operand.hbm [shape: f32[1,4], index: 13, kind: output, shape index: {0}]   ;;  %s13662_s14 = inlined_call_operand.hbm [shape: f32[1,3], index: 14, kind: output, shape index: {1}]  }
   0x1   :  { %21 = vsyncpa [#allocation10], 0 }
   0x2   :  { %22 = vsyncpa [#allocation13], 0 }
   0x3   :  { %23 = vsyncpa [#allocation16], 0 }
   0x4   :  { %24 = vsyncpa [#allocation8], 0 }
   0x5   :  { %25 = vsyncpa [#allocation20], 0  ;;  %s11563_s29 = smov [#allocation9]   ;;  %s11347_s17 = scalar_lea.hbm %s13650_s2, 256 }
   0x6   :  { %s43_s30 = sshll.u32 %s11563_s29, 4  ;;  %p11348_p0 = scmp.ne.s32.totalorder %s13650_s2, %s11347_s17  ;;  %s44_s30 = int_to_ptr.vmem [resolvable:$true] %s43_s30 }
   0x7   :  { %p11351_p1 = scmp.lt.u32.totalorder %s11347_s17, %s13650_s2 }
   0x9   :  { %p11353_p2 = pnand %p11351_p1, %p11348_p0 }
   0xb   :  { %11356 = shalt.err (!%p11353_p2)
}
   0xc   :  { %s11357_s22 = scalar_lea.vmem %s44_s30, 256  ;;  %p11362_p4 = scmp.lt.s32.totalorder %s44_s30, %s44_s30 }
   0xd   :  { %p11358_p3 = scmp.ne.s32.totalorder %s44_s30, %s11357_s22  ;;  %p11363_p5 = scmp.lt.s32.totalorder %s11357_s22, %s11357_s22 }
   0xf   :  { %p11364_p6 = por %p11363_p5, %p11362_p4 }
  0x11   :  { %p11365_p7 = pnand %p11364_p6, %p11358_p3 }
  0x13   :  { %11368 = shalt.err (!%p11365_p7)
}
  0x14   :  { %s13663_s23 = smov 64   ;;  %s11565_s24 = smov 4  }
  0x15   :  { %49 = dma.hbm_to_vmem [thread:$0]  %s13650_s2, 256, %s44_s30, [#allocation10], %s13663_s23, %s13663_s23, %s11565_s24  }
  0x16   :  { %s11566_s27 = smov [#allocation12]   ;;  %s11369_s16 = scalar_lea.hbm %s13652_s4, 8192 }
  0x17   :  { %s67_s28 = sshll.u32 %s11566_s27, 4  ;;  %p11370_p8 = scmp.ne.s32.totalorder %s13652_s4, %s11369_s16  ;;  %s68_s28 = int_to_ptr.vmem [resolvable:$true] %s67_s28 }
  0x18   :  { %p11373_p9 = scmp.lt.u32.totalorder %s11369_s16, %s13652_s4 }
  0x1a   :  { %p11375_p10 = pnand %p11373_p9, %p11370_p8 }
  0x1c   :  { %11378 = shalt.err (!%p11375_p10)
}
  0x1d   :  { %s11379_s21 = scalar_lea.vmem %s68_s28, 8192  ;;  %p11384_p12 = scmp.lt.s32.totalorder %s68_s28, %s68_s28 }
  0x1e   :  { %p11380_p11 = scmp.ne.s32.totalorder %s68_s28, %s11379_s21  ;;  %p11385_p13 = scmp.lt.s32.totalorder %s11379_s21, %s11379_s21 }
  0x20   :  { %p11386_p0 = por %p11385_p13, %p11384_p12 }
  0x22   :  { %p11387_p1 = pnand %p11386_p0, %p11380_p11 }
  0x24   :  { %11390 = shalt.err (!%p11387_p1)
}
  0x25   :  { %s11567_s2 = smov 256   ;;  %s11568_s30 = smov 16  }
  0x26   :  { %73 = dma.hbm_to_vmem [thread:$0]  %s13652_s4, 8192, %s68_s28, [#allocation13], %s11567_s2, %s11567_s2, %s11568_s30  }
  0x27   :  { %s11569_s26 = smov [#allocation15]   ;;  %s11570_s29 = smov [#allocation6]  }
  0x28   :  { %s91_s27 = sshll.u32 %s11569_s26, 4  ;;  %s34_s15 = sshll.u32 %s11570_s29, 4  ;;  %s92_s27 = int_to_ptr.vmem [resolvable:$true] %s91_s27  ;;  %s35_s15 = int_to_ptr.vmem [resolvable:$true] %s34_s15 }
  0x29   :  { %s11391_s18 = scalar_lea.hbm %s13657_s9, 4096 }
  0x2a   :  { %p11392_p2 = scmp.ne.s32.totalorder %s13657_s9, %s11391_s18  ;;  %p11395_p3 = scmp.lt.u32.totalorder %s11391_s18, %s13657_s9 }
  0x2c   :  { %p11397_p4 = pnand %p11395_p3, %p11392_p2 }
  0x2e   :  { %11400 = shalt.err (!%p11397_p4)
}
  0x2f   :  { %s11401_s4 = scalar_lea.vmem %s92_s27, 4096  ;;  %p11406_p6 = scmp.lt.s32.totalorder %s92_s27, %s92_s27 }
  0x30   :  { %p11402_p5 = scmp.ne.s32.totalorder %s92_s27, %s11401_s4  ;;  %p11407_p7 = scmp.lt.s32.totalorder %s11401_s4, %s11401_s4 }
  0x32   :  { %p11408_p8 = por %p11407_p7, %p11406_p6 }
  0x34   :  { %p11409_p9 = pnand %p11408_p8, %p11402_p5 }
  0x36   :  { %11412 = shalt.err (!%p11409_p9)
}
  0x37   :  { %s13710_s28 = smov 64   ;;  %s11413_s23 = scalar_lea.hbm %s13649_s1, 64 }
  0x38   :  { %97 = dma.hbm_to_vmem [thread:$0]  %s13657_s9, 4096, %s92_s27, [#allocation16], %s13710_s28, %s13710_s28, %s11565_s24  }
  0x39   :  { %p11414_p10 = scmp.ne.s32.totalorder %s13649_s1, %s11413_s23  ;;  %p11417_p11 = scmp.lt.u32.totalorder %s11413_s23, %s13649_s1 }
  0x3b   :  { %p11419_p12 = pnand %p11417_p11, %p11414_p10 }
  0x3d   :  { %11422 = shalt.err (!%p11419_p12)
}
  0x3e   :  { %s11423_s18 = scalar_lea.vmem %s35_s15, 64  ;;  %p11428_p0 = scmp.lt.s32.totalorder %s35_s15, %s35_s15 }
  0x3f   :  { %p11424_p13 = scmp.ne.s32.totalorder %s35_s15, %s11423_s18  ;;  %p11429_p1 = scmp.lt.s32.totalorder %s11423_s18, %s11423_s18 }
  0x41   :  { %p11430_p2 = por %p11429_p1, %p11428_p0 }
  0x43   :  { %p11431_p3 = pnand %p11430_p2, %p11424_p13 }
  0x45   :  { %11434 = shalt.err (!%p11431_p3)
}
  0x46   :  { %37 = dma.hbm_to_vmem [thread:$0]  %s13649_s1, 64, %s35_s15, [#allocation7]  }
  0x47   :  { %s11571_s19 = smov [#allocation11]   ;;  %s11572_s21 = smov [#allocation14]  }
  0x48   :  { %s55_s20 = sshll.u32 %s11571_s19, 4  ;;  %s79_s4 = sshll.u32 %s11572_s21, 4  ;;  %s56_s20 = int_to_ptr.vmem [resolvable:$true] %s55_s20  ;;  %s11733_s4 = int_to_ptr.vmem [resolvable:$true] %s79_s4 }
  0x49   :  { %s11435_s22 = scalar_lea.hbm %s13651_s3, 1024 }
  0x4a   :  { %p11436_p4 = scmp.ne.s32.totalorder %s13651_s3, %s11435_s22  ;;  %p11439_p5 = scmp.lt.u32.totalorder %s11435_s22, %s13651_s3 }
  0x4c   :  { %p11441_p6 = pnand %p11439_p5, %p11436_p4 }
  0x4e   :  { %11444 = shalt.err (!%p11441_p6)
}
  0x4f   :  { %s11445_s1 = scalar_lea.vmem %s56_s20, 1024  ;;  %p11450_p8 = scmp.lt.s32.totalorder %s56_s20, %s56_s20 }
  0x50   :  { %p11446_p7 = scmp.ne.s32.totalorder %s56_s20, %s11445_s1  ;;  %p11451_p9 = scmp.lt.s32.totalorder %s11445_s1, %s11445_s1 }
  0x52   :  { %p11452_p10 = por %p11451_p9, %p11450_p8 }
  0x54   :  { %p11453_p11 = pnand %p11452_p10, %p11446_p7 }
  0x56   :  { %11456 = shalt.err (!%p11453_p11)
}
  0x57   :  { %61 = dma.hbm_to_vmem [thread:$0]  %s13651_s3, 1024, %s56_s20, [#allocation10], %s13710_s28, %s13710_s28, %s11565_s24  }
  0x58   :  { %s11457_s9 = scalar_lea.hbm %s13656_s8, 20480 }
  0x59   :  { %p11458_p12 = scmp.ne.s32.totalorder %s13656_s8, %s11457_s9  ;;  %p11461_p13 = scmp.lt.u32.totalorder %s11457_s9, %s13656_s8 }
  0x5b   :  { %p11463_p0 = pnand %p11461_p13, %p11458_p12 }
  0x5d   :  { %11466 = shalt.err (!%p11463_p0)
}
  0x5e   :  { %s11467_s30 = scalar_lea.vmem %s11733_s4, 20480  ;;  %p11472_p2 = scmp.lt.s32.totalorder %s11733_s4, %s11733_s4 }
  0x5f   :  { %p11468_p1 = scmp.ne.s32.totalorder %s11733_s4, %s11467_s30  ;;  %p11473_p3 = scmp.lt.s32.totalorder %s11467_s30, %s11467_s30 }
  0x61   :  { %p11474_p4 = por %p11473_p3, %p11472_p2 }
  0x63   :  { %p11475_p5 = pnand %p11474_p4, %p11468_p1 }
  0x65   :  { %11478 = shalt.err (!%p11475_p5)
}
  0x66   :  { %s11573_s3 = smov 128   ;;  %s11574_s20 = smov 8  }
  0x67   :  { %85 = dma.hbm_to_vmem [thread:$0]  %s13656_s8, 20480, %s11733_s4, [#allocation13], %s11573_s3, %s11573_s3, %s11574_s20  }
  0x68   :  { %s11575_s23 = smov [#allocation17]   ;;  %s11479_s15 = scalar_lea.hbm %s13660_s12, 544 }
  0x69   :  { %s108_s26 = sshll.u32 %s11575_s23, 4  ;;  %p11480_p6 = scmp.ne.s32.totalorder %s13660_s12, %s11479_s15  ;;  %s109_s26 = int_to_ptr.vmem [resolvable:$true] %s108_s26 }
  0x6a   :  { %p11483_p7 = scmp.lt.u32.totalorder %s11479_s15, %s13660_s12 }
  0x6c   :  { %p11485_p8 = pnand %p11483_p7, %p11480_p6 }
  0x6e   :  { %11488 = shalt.err (!%p11485_p8)
}
  0x6f   :  { %s11489_s27 = scalar_lea.vmem %s109_s26, 544  ;;  %p11494_p10 = scmp.lt.s32.totalorder %s109_s26, %s109_s26 }
  0x70   :  { %p11490_p9 = scmp.ne.s32.totalorder %s109_s26, %s11489_s27  ;;  %p11495_p11 = scmp.lt.s32.totalorder %s11489_s27, %s11489_s27 }
  0x72   :  { %p11496_p12 = por %p11495_p11, %p11494_p10 }
  0x74   :  { %p11497_p13 = pnand %p11496_p12, %p11490_p9 }
  0x76   :  { %11500 = shalt.err (!%p11497_p13)
}
  0x77   :  { %111 = dma.hbm_to_vmem [thread:$0]  %s13660_s12, 544, %s109_s26, [#allocation16]  }
  0x78   :  { %11545 = dma.done.wait [#allocation7], 64  }
  0x79   :  { %11546 = vsyncadd [#allocation7], 4294967232 }
  0x7a   :  { %11547 = dma.done.wait [#allocation10], 1280  }
  0x7b   :  { %11548 = vsyncadd [#allocation10], 4294966016 }
  0x7c   :  { %11549 = dma.done.wait [#allocation13], 28672  }
  0x7d   :  { %11550 = vsyncadd [#allocation13], 4294938624 }
  0x7e   :  { %11551 = dma.done.wait [#allocation16], 4640  }
  0x7f   :  { %11552 = vsyncadd [#allocation16], 4294962656  ;;  %s138_s19 = sld [smem:[#allocation0]]   ;;  %s11576_s21 = smov 1024   ;;  %vm296_vm0 = vcmask 1042432   ;;  %vm271_vm1 = vcmask 48128  }
  0x80   :  { %150 = sst [smem:[#allocation22]] %s11576_s21  ;;  %s11577_s2 = smov [#allocation2]   ;;  %vm468_vm2 = vcmask 261120   ;;  %vm638_vm3 = vcmask 523264  }
  0x81   :  { %152 = sst [smem:[#allocation22 + $0x1]] %s11576_s21  ;;  %s146_s30 = sshll.u32 %s11577_s2, 4  ;;  %s147_s30 = int_to_ptr.vmem [resolvable:$true] %s146_s30 }
  0x82   :  { %154 = sst [smem:[#allocation22 + $0x2]] %s11574_s20  ;;  %s11578_s12 = smov 512  }
  0x83   :  { %156 = sst [smem:[#allocation22 + $0x3]] %s13710_s28  ;;  %s11579_s23 = smov 2  }
  0x84   :  { %158 = sst [smem:[#allocation22 + $0x4]] %s11573_s3  ;;  %s11580_s20 = smov [#allocation5]  }
  0x85   :  { %162 = sst [smem:[#allocation22 + $0x6]] %s11578_s12  ;;  %s9357_s22 = sshll.u32 %s138_s19, 26 }
  0x86   :  { %164 = sst [smem:[#allocation22 + $0x7]] %s13710_s28  ;;  %s11786_s25 = sadd.s32 134217728, %s9357_s22 }
  0x87   :  { %166 = sst [smem:[#allocation22 + $0x8]] %s11565_s24  ;;  %s11581_s26 = smov [#allocation21]  }
  0x88   :  { %160 = sst [smem:[#allocation22 + $0x5]] %s11579_s23  ;;  %s11582_s15 = smov 1280  }
  0x89   :  { %168 = dma.general %s13653_s5, 32768, %s147_s30, %s11580_s20, %s11581_s26, [#allocation22], %s11786_s25, 0  }
  0x8a   :  { %185 = sst [smem:[#allocation24]] %s11582_s15  ;;  %s11583_s16 = smov 10  }
  0x8b   :  { %187 = sst [smem:[#allocation24 + $0x1]] %s11582_s15  ;;  %s11584_s17 = smov [#allocation3]  }
  0x8c   :  { %189 = sst [smem:[#allocation24 + $0x2]] %s11583_s16  ;;  %s181_s18 = sshll.u32 %s11584_s17, 4  ;;  %s182_s18 = int_to_ptr.vmem [resolvable:$true] %s181_s18 }
  0x8d   :  { %191 = sst [smem:[#allocation24 + $0x3]] %s13710_s28  ;;  %s11585_s9 = smov 640  }
  0x8e   :  { %193 = sst [smem:[#allocation24 + $0x4]] %s11573_s3  ;;  %s11586_s5 = smov [#allocation5 + $0x1]  }
  0x8f   :  { %195 = sst [smem:[#allocation24 + $0x5]] %s11579_s23  ;;  %s11587_s27 = smov [#allocation23]  }
  0x90   :  { %197 = sst [smem:[#allocation24 + $0x6]] %s11585_s9  ;;  %s11588_s19 = smov [#allocation4]  }
  0x91   :  { %199 = sst [smem:[#allocation24 + $0x7]] %s13710_s28  ;;  %s216_s21 = sshll.u32 %s11588_s19, 4  ;;  %s217_s21 = int_to_ptr.vmem [resolvable:$true] %s216_s21 }
  0x92   :  { %201 = sst [smem:[#allocation24 + $0x8]] %s11565_s24  ;;  %s11589_s2 = smov [#allocation5 + $0x2]  }
  0x93   :  { %203 = dma.general %s13654_s6, 30720, %s182_s18, %s11586_s5, %s11587_s27, [#allocation24], %s11786_s25, 0  }
  0x94   :  { %220 = sst [smem:[#allocation26]] %s11582_s15  ;;  %s11590_s30 = smov [#allocation25]  }
  0x95   :  { %222 = sst [smem:[#allocation26 + $0x1]] %s11582_s15 }
  0x96   :  { %224 = sst [smem:[#allocation26 + $0x2]] %s11583_s16 }
  0x97   :  { %226 = sst [smem:[#allocation26 + $0x3]] %s13710_s28 }
  0x98   :  { %228 = sst [smem:[#allocation26 + $0x4]] %s11573_s3 }
  0x99   :  { %230 = sst [smem:[#allocation26 + $0x5]] %s11579_s23 }
  0x9a   :  { %232 = sst [smem:[#allocation26 + $0x6]] %s11585_s9 }
  0x9b   :  { %234 = sst [smem:[#allocation26 + $0x7]] %s13710_s28 }
  0x9c   :  { %236 = sst [smem:[#allocation26 + $0x8]] %s11565_s24 }
  0x9d   :  { %238 = dma.general %s13655_s7, 81920, %s217_s21, %s11589_s2, %s11590_s30, [#allocation26], %s11786_s25, 0  }
  0x9e   :  { %v255_v0 = vld [vmem:[#allocation6] sm:$0x7]  ;;  %v240_v2 = vld [vmem:[%s13648_s0 + $0x8] sm:$0xff]  ;;  %v241_v5 = vld [vmem:[%s13648_s0 + $0x10] sm:$0xff] }
  0x9f   :  { %v239_v1 = vld [vmem:[%s13648_s0] sm:$0xff]  ;;  %10910 = vmatprep.subr.msk.bf16.mxu0 %vm296_vm0, %v255_v0  ;;  %v298_v3 = vsel %vm296_vm0, %v255_v0, 0  ;;  %v242_v6 = vld [vmem:[%s13648_s0 + $0x18] sm:$0xff]  ;;  %v244_v9 = vld [vmem:[%s13648_s0 + $0x28] sm:$0xff] }
  0xa0   :  { %v256_v4 = vpack.c.bf16 %v240_v2, %v239_v1  ;;  %v243_v7 = vld [vmem:[%s13648_s0 + $0x20] sm:$0xff]  ;;  %9938 = vmatpush3.bf16.msra.mxu0 %v298_v3  ;;  %v257_v8 = vpack.c.bf16 %v242_v6, %v241_v5  ;;  %v245_v11 = vld [vmem:[%s13648_s0 + $0x30] sm:$0xff]  ;;  %v246_v12 = vld [vmem:[%s13648_s0 + $0x38] sm:$0xff] }
  0xa1   :  { %v258_v10 = vpack.c.bf16 %v244_v9, %v243_v7  ;;  %v247_v13 = vld [vmem:[%s13648_s0 + $0x40] sm:$0xff]  ;;  %v248_v14 = vld [vmem:[%s13648_s0 + $0x48] sm:$0xff]  ;;  %v259_v15 = vpack.c.bf16 %v246_v12, %v245_v11  ;;  %v249_v17 = vld [vmem:[%s13648_s0 + $0x50] sm:$0xff] }
  0xa2   :  { %9939 = vmatprep.mubr.msk.bf16.mxu0 %vm271_vm1, %v256_v4  ;;  %v260_v16 = vpack.c.bf16 %v248_v14, %v247_v13  ;;  %v250_v18 = vld [vmem:[%s13648_s0 + $0x58] sm:$0xff]  ;;  %v251_v19 = vld [vmem:[%s13648_s0 + $0x60] sm:$0xff]  ;;  %v252_v20 = vld [vmem:[%s13648_s0 + $0x68] sm:$0xff] }
  0xa3   :  { %9940 = vmatmul.mubr.msk.bf16.vlgmr.msra.gmra.mrb[0].mxu0 %vm271_vm1, %v257_v8  ;;  %v261_v21 = vpack.c.bf16 %v250_v18, %v249_v17  ;;  %v262_v22 = vpack.c.bf16 %v252_v20, %v251_v19  ;;  %v253_v23 = vld [vmem:[%s13648_s0 + $0x70] sm:$0xff]  ;;  %v254_v24 = vld [vmem:[%s13648_s0 + $0x78] sm:$0xff]  ;;  %v10952_v26 = vld [vmem:[#allocation9] sm:$0xff]  }
  0xa4   :  { %9943 = vmatprep.mubr.msk.bf16.mxu0 %vm271_vm1, %v258_v10  ;;  %v263_v25 = vpack.c.bf16 %v254_v24, %v253_v23  ;;  %9955 = vmatprep.subr.bf16.mxu1 %v10952_v26  ;;  %v10953_v27 = vld [vmem:[#allocation9 + $0x8] sm:$0xff]   ;;  %v9363_v28 = vld [vmem:[#allocation17] ss:$0 sm:$0xff]  ;;  %v10955_v23 = vld [vmem:[#allocation11 + $0x8] sm:$0xff]  }
  0xa5   :  { %9956 = vmatpush3.bf16.msra.mxu1 %v10952_v26  ;;  %v10954_v56 = vld [vmem:[#allocation11] sm:$0xff]  }
  0xa6   :  { %9957 = vmatprep.subr.bf16.mxu1 %v10953_v27 }
  0xa9   :  { %9958 = vmatpush3.bf16.msra.mxu1 %v10953_v27  ;;  %v10957_v27 = vld [vmem:[#allocation11 + $0x18] sm:$0xff]  }
  0xaa   :  { %9975 = vmatprep.subr.bf16.mxu1 %v10954_v56 }
  0xab   :  { %9944 = vmatmul.mubr.msk.bf16.gmra.mrb[4].mxu0 %vm271_vm1, %v259_v15 }
  0xac   :  { %9947 = vmatprep.mubr.msk.bf16.mxu0 %vm271_vm1, %v260_v16 }
  0xb3   :  { %9948 = vmatmul.mubr.msk.bf16.gmra.mrb[8].mxu0 %vm271_vm1, %v261_v21 }
  0xb4   :  { %9951 = vmatprep.mubr.msk.bf16.mxu0 %vm271_vm1, %v262_v22 }
  0xbb   :  { %9952 = vmatmul.mubr.msk.bf16.gmra.mrb[12].mxu0 %vm271_vm1, %v263_v25  ;;  %v10956_v25 = vld [vmem:[#allocation11 + $0x10] sm:$0xff]  }
 0x176   :  { %v9941_v29 = vpop.f32.mrb[0].mxu0 }
 0x177   :  { %v343_v30 = vadd.f32 %v9941_v29, %v9363_v28  ;;  %v334_v31 = vpop.f32.mrb[1].mxu0  ;;  %v10958_v29 = vld [vmem:[#allocation11 + $0x20] sm:$0xff]  }
 0x178   :  { %v335_v32 = vadd.f32 %v9363_v28, %v334_v31  ;;  %v9942_v33 = vpop.f32.mrb[2].mxu0 }
 0x179   :  { %v346_v34 = vadd.f32 %v9942_v33, %v9363_v28  ;;  %v337_v35 = vpop.f32.mrb[3].mxu0  ;;  %v399_v37 = vmax.f32 %v343_v30, 0.0 }
 0x17a   :  { %v338_v36 = vadd.f32 %v9363_v28, %v337_v35  ;;  %v397_v39 = vmax.f32 %v335_v32, 0.0  ;;  %v10960_v35 = vld [vmem:[#allocation11 + $0x30] sm:$0xff]  }
 0x17b   :  { %v400_v38 = vmax.f32 %v346_v34, 0.0  ;;  %v10959_v34 = vld [vmem:[#allocation11 + $0x28] sm:$0xff]  }
 0x17c   :  { %v398_v40 = vmax.f32 %v338_v36, 0.0  ;;  %v10961_v36 = vld [vmem:[#allocation11 + $0x38] sm:$0xff]  }
 0x17d   :  { %v11868_v41 = vpack.c.bf16 %v400_v38, %v399_v37  ;;  %v11924_v37 = vld [vmem:[#allocation17 + $0x1] ss:$0 sm:$0xff] }
 0x17e   :  { %v11870_v42 = vpack.c.bf16 %v398_v40, %v397_v39  ;;  %v9945_v43 = vpop.f32.mrb[4].mxu0 }
 0x17f   :  { %v359_v44 = vadd.f32 %v9945_v43, %v9363_v28  ;;  %v350_v45 = vpop.f32.mrb[5].mxu0 }
 0x180   :  { %v351_v46 = vadd.f32 %v9363_v28, %v350_v45  ;;  %v9946_v47 = vpop.f32.mrb[6].mxu0  ;;  %440 = vrot.lane.b32.xlu0 %v11870_v42, %s13710_s28 }
 0x181   :  { %v403_v48 = vmax.f32 %v359_v44, 0.0  ;;  %v362_v49 = vadd.f32 %v9946_v47, %v9363_v28  ;;  %v353_v50 = vpop.f32.mrb[7].mxu0 }
 0x182   :  { %v401_v51 = vmax.f32 %v351_v46, 0.0  ;;  %v354_v52 = vadd.f32 %v9363_v28, %v353_v50 }
 0x183   :  { %v404_v53 = vmax.f32 %v362_v49, 0.0 }
 0x184   :  { %v402_v54 = vmax.f32 %v354_v52, 0.0  ;;  %442 = vrot.lane.b32.xlu0 %v11868_v41, %s13710_s28 }
 0x185   :  { %v11876_v55 = vpack.c.bf16 %v404_v53, %v403_v48 }
 0x186   :  { %v11878_v57 = vpack.c.bf16 %v402_v54, %v401_v51  ;;  %v9949_v58 = vpop.f32.mrb[8].mxu0 }
 0x187   :  { %v375_v59 = vadd.f32 %v9949_v58, %v9363_v28  ;;  %v366_v60 = vpop.f32.mrb[9].mxu0 }
 0x188   :  { %444 = vrot.lane.b32.xlu1 %v11878_v57, %s13710_s28  ;;  %v367_v61 = vadd.f32 %v9363_v28, %v366_v60  ;;  %v9950_v62 = vpop.f32.mrb[10].mxu0 }
 0x189   :  { %v407_v63 = vmax.f32 %v375_v59, 0.0  ;;  %v378_v0 = vadd.f32 %v9950_v62, %v9363_v28  ;;  %v369_v1 = vpop.f32.mrb[11].mxu0 }
 0x18a   :  { %v405_v2 = vmax.f32 %v367_v61, 0.0  ;;  %v370_v3 = vadd.f32 %v9363_v28, %v369_v1 }
 0x18b   :  { %v408_v4 = vmax.f32 %v378_v0, 0.0 }
 0x18c   :  { %v406_v5 = vmax.f32 %v370_v3, 0.0  ;;  %446 = vrot.lane.b32.xlu1 %v11876_v55, %s13710_s28 }
 0x18d   :  { %v11884_v6 = vpack.c.bf16 %v408_v4, %v407_v63 }
 0x18e   :  { %v11886_v7 = vpack.c.bf16 %v406_v5, %v405_v2  ;;  %v9953_v8 = vpop.f32.mrb[12].mxu0 }
 0x18f   :  { %v391_v9 = vadd.f32 %v9953_v8, %v9363_v28  ;;  %v382_v10 = vpop.f32.mrb[13].mxu0 }
 0x190   :  { %v383_v11 = vadd.f32 %v9363_v28, %v382_v10  ;;  %v9954_v12 = vpop.f32.mrb[14].mxu0  ;;  %448 = vrot.lane.b32.xlu0 %v11886_v7, %s13710_s28  ;;  %450 = vrot.lane.b32.xlu1 %v11884_v6, %s13710_s28 }
 0x191   :  { %v411_v13 = vmax.f32 %v391_v9, 0.0  ;;  %v394_v14 = vadd.f32 %v9954_v12, %v9363_v28  ;;  %v385_v15 = vpop.f32.mrb[15].mxu0 }
 0x192   :  { %v409_v16 = vmax.f32 %v383_v11, 0.0  ;;  %v386_v17 = vadd.f32 %v9363_v28, %v385_v15  ;;  %v972_v11 = vlaneseq }
 0x193   :  { %v412_v18 = vmax.f32 %v394_v14, 0.0 }
 0x194   :  { %v410_v19 = vmax.f32 %v386_v17, 0.0 }
 0x195   :  { %v11892_v20 = vpack.c.bf16 %v412_v18, %v411_v13 }
 0x196   :  { %v11894_v21 = vpack.c.bf16 %v410_v19, %v409_v16 }
 0x197   :  { %454 = vrot.lane.b32.xlu1 %v11892_v20, %s13710_s28 }
 0x198   :  { %452 = vrot.lane.b32.xlu0 %v11894_v21, %s13710_s28 }
 0x1f2   :  { %v441_v22 = vpop.permute.xlu0 %440 }
 0x1f3   :  { %9959 = vmatprep.mubr.msk.bf16.mxu1 %vm468_vm2, %v441_v22  ;;  %v11946_v22 = vshrl.u32 %v972_v11, 7  ;;  %v10986_v11 = vld [vmem:[#allocation12 + $0x80] ss:$16 sps:$4 sm:$0xff]  }
 0x1f5   :  { %13711 = vst [vmem:[#allocation36_spill] sm:$0xff] %v11946_v22 }
 0x1f6   :  { %v443_v24 = vpop.permute.xlu0 %442 }
 0x1f7   :  { %9960 = vmatmul.mubr.msk.bf16.vlgmr.msra.gmra.mrb[0].mxu1 %vm468_vm2, %v443_v24  ;;  %v10964_v24 = vld [vmem:[#allocation12 + $0x4] ss:$16 sps:$4 sm:$0xff]  }
 0x1f8   :  { %9976 = vmatpush3.bf16.msra.mxu1 %v10954_v56  ;;  %1468 = vmatprep.subr.bf16.mxu0 %v10964_v24 }
 0x1f9   :  { %9977 = vmatprep.subr.bf16.mxu1 %v10955_v23 }
 0x1fa   :  { %v445_v26 = vpop.permute.xlu1 %444 }
 0x1fb   :  { %9963 = vmatprep.mubr.msk.bf16.mxu1 %vm468_vm2, %v445_v26  ;;  %v10965_v26 = vld [vmem:[#allocation12 + $0x8] ss:$16 sps:$4 sm:$0xff]  }
 0x1fc   :  { %9978 = vmatpush3.bf16.msra.mxu1 %v10955_v23  ;;  %v10962_v23 = vld [vmem:[#allocation12] ss:$16 sps:$4 sm:$0xff]  }
 0x1fd   :  { %9979 = vmatprep.subr.bf16.mxu1 %v10956_v25  ;;  %1469 = vmatpush1.bf16.msra.mxu0 %v10962_v23 }
 0x1fe   :  { %v447_v28 = vpop.permute.xlu1 %446 }
 0x1ff   :  { %9964 = vmatmul.mubr.msk.bf16.gmra.mrb[4].mxu1 %vm468_vm2, %v447_v28 }
 0x200   :  { %9980 = vmatpush3.bf16.msra.mxu1 %v10956_v25 }
 0x201   :  { %9981 = vmatprep.subr.bf16.mxu1 %v10957_v27 }
 0x202   :  { %v449_v30 = vpop.permute.xlu0 %448  ;;  %v451_v31 = vpop.permute.xlu1 %450 }
 0x203   :  { %9967 = vmatprep.mubr.msk.bf16.mxu1 %vm468_vm2, %v449_v30 }
 0x204   :  { %9982 = vmatpush3.bf16.msra.mxu1 %v10957_v27  ;;  %v10967_v27 = vld [vmem:[#allocation12 + $0xc] ss:$16 sps:$4 sm:$0xff]  }
 0x205   :  { %9999 = vmatprep.subr.bf16.mxu1 %v10958_v29 }
 0x207   :  { %9968 = vmatmul.mubr.msk.bf16.gmra.mrb[8].mxu1 %vm468_vm2, %v451_v31 }
 0x209   :  { %v455_v33 = vpop.permute.xlu1 %454 }
 0x20a   :  { %v453_v32 = vpop.permute.xlu0 %452 }
 0x20b   :  { %9971 = vmatprep.mubr.msk.bf16.mxu1 %vm468_vm2, %v453_v32  ;;  %v10968_v32 = vld [vmem:[#allocation12 + $0x20] ss:$16 sps:$4 sm:$0xff]  }
 0x20f   :  { %9972 = vmatmul.mubr.msk.bf16.gmra.mrb[12].mxu1 %vm468_vm2, %v455_v33  ;;  %v10973_v33 = vld [vmem:[#allocation12 + $0x2c] ss:$16 sps:$4 sm:$0xff]  }
 0x210   :  { %9983 = vmatprep.mubr.msk.bf16.mxu1 %vm638_vm3, %v11870_v42 }
 0x217   :  { %9984 = vmatmul.mubr.msk.bf16.vlgmr.msra.gmra.mrb[16].mxu1 %vm638_vm3, %v11868_v41 }
 0x218   :  { %9987 = vmatprep.mubr.msk.bf16.mxu1 %vm638_vm3, %v11878_v57  ;;  %10000 = vmatpush3.bf16.msra.mxu1 %v10958_v29  ;;  %v10970_v29 = vld [vmem:[#allocation12 + $0x24] ss:$16 sps:$4 sm:$0xff]  }
 0x219   :  { %10001 = vmatprep.subr.bf16.mxu1 %v10959_v34  ;;  %1470 = vmatprep.subr.bf16.mxu0 %v10970_v29  ;;  %v11000_v29 = vld [vmem:[#allocation12 + $0xc4] ss:$16 sps:$4 sm:$0xff]  }
 0x21a   :  { %1471 = vmatpush1.bf16.msra.mxu0 %v10968_v32  ;;  %v11003_v32 = vld [vmem:[#allocation12 + $0xcc] ss:$16 sps:$4 sm:$0xff]  }
 0x21c   :  { %10002 = vmatpush3.bf16.msra.mxu1 %v10959_v34 }
 0x21d   :  { %10003 = vmatprep.subr.bf16.mxu1 %v10960_v35 }
 0x21f   :  { %9988 = vmatmul.mubr.msk.bf16.gmra.mrb[20].mxu1 %vm638_vm3, %v11876_v55 }
 0x220   :  { %9991 = vmatprep.mubr.msk.bf16.mxu1 %vm638_vm3, %v11886_v7  ;;  %10004 = vmatpush3.bf16.msra.mxu1 %v10960_v35 }
 0x221   :  { %10005 = vmatprep.subr.bf16.mxu1 %v10961_v36 }
 0x224   :  { %10006 = vmatpush3.bf16.msra.mxu1 %v10961_v36  ;;  %v11951_v36 = vsub.s32 0, %v11946_v22 }
 0x225   :  { %1581 = vmatprep.subr.bf16.mxu1 %v10967_v27 }
 0x227   :  { %9992 = vmatmul.mubr.msk.bf16.gmra.mrb[24].mxu1 %vm638_vm3, %v11884_v6 }
 0x228   :  { %9995 = vmatprep.mubr.msk.bf16.mxu1 %vm638_vm3, %v11894_v21 }
 0x22f   :  { %9996 = vmatmul.mubr.msk.bf16.gmra.mrb[28].mxu1 %vm638_vm3, %v11892_v20 }
 0x2ca   :  { %v9961_v38 = vpop.f32.mrb[0].mxu1 }
 0x2cb   :  { %v536_v39 = vadd.f32 %v9961_v38, %v11924_v37  ;;  %v527_v40 = vpop.f32.mrb[1].mxu1  ;;  %v10971_v38 = vld [vmem:[#allocation12 + $0x28] ss:$16 sps:$4 sm:$0xff]  }
 0x2cc   :  { %v528_v43 = vadd.f32 %v11924_v37, %v527_v40  ;;  %v9962_v44 = vpop.f32.mrb[2].mxu1 }
 0x2cd   :  { %v539_v45 = vadd.f32 %v9962_v44, %v11924_v37  ;;  %v530_v46 = vpop.f32.mrb[3].mxu1  ;;  %v592_v48 = vmax.f32 %v536_v39, 0.0  ;;  %v10976_v39 = vld [vmem:[#allocation12 + $0x44] ss:$16 sps:$4 sm:$0xff]   ;;  %v11956_v44 = vld [vmem:[#allocation17 + $0x2] sm:$0x3] }
 0x2ce   :  { %v531_v47 = vadd.f32 %v11924_v37, %v530_v46  ;;  %v590_v50 = vmax.f32 %v528_v43, 0.0  ;;  %1472 = vmatprep.subr.bf16.mxu0 %v10976_v39 }
 0x2cf   :  { %v593_v49 = vmax.f32 %v539_v45, 0.0  ;;  %v10979_v45 = vld [vmem:[#allocation12 + $0x4c] ss:$16 sps:$4 sm:$0xff]  }
 0x2d0   :  { %v591_v51 = vmax.f32 %v531_v47, 0.0 }
 0x2d1   :  { %v607_v52 = vpack.c.bf16 %v593_v49, %v592_v48 }
 0x2d2   :  { %v9965_v53 = vpop.f32.mrb[4].mxu1  ;;  %v606_v54 = vpack.c.bf16 %v591_v51, %v590_v50  ;;  %v10974_v51 = vld [vmem:[#allocation12 + $0x40] ss:$16 sps:$4 sm:$0xff]  }
 0x2d3   :  { %v552_v56 = vadd.f32 %v9965_v53, %v11924_v37  ;;  %624 = vrot.lane.b32.xlu1 %v607_v52, %s13710_s28  ;;  %v543_v58 = vpop.f32.mrb[5].mxu1  ;;  %v11963_v53 = vrot.slane %v11956_v44, %v11951_v36  ;;  %1473 = vmatpush1.bf16.msra.mxu0 %v10974_v51 }
 0x2d4   :  { %v544_v59 = vadd.f32 %v11924_v37, %v543_v58  ;;  %v9966_v60 = vpop.f32.mrb[6].mxu1  ;;  %622 = vrot.lane.b32.xlu0 %v606_v54, %s13710_s28  ;;  %10007 = vmatprep.mubr.msk.bf16.mxu1 %vm638_vm3, %v606_v54  ;;  %v10977_v54 = vld [vmem:[#allocation12 + $0x48] ss:$16 sps:$4 sm:$0xff]  }
 0x2d5   :  { %v596_v61 = vmax.f32 %v552_v56, 0.0  ;;  %v555_v62 = vadd.f32 %v9966_v60, %v11924_v37  ;;  %v546_v63 = vpop.f32.mrb[7].mxu1  ;;  %10008 = vmatmul.mubr.msk.bf16.vlgmr.msra.gmra.mrb[32].mxu1 %vm638_vm3, %v607_v52 }
 0x2d6   :  { %v547_v0 = vadd.f32 %v11924_v37, %v546_v63  ;;  %v594_v2 = vmax.f32 %v544_v59, 0.0  ;;  %1582 = vmatpush1.bf16.msra.mxu1 %v10965_v26  ;;  %v10982_v59 = vld [vmem:[#allocation12 + $0x64] ss:$16 sps:$4 sm:$0xff]  }
 0x2d7   :  { %v597_v1 = vmax.f32 %v555_v62, 0.0  ;;  %1583 = vmatprep.subr.bf16.mxu1 %v10973_v33  ;;  %v10980_v62 = vld [vmem:[#allocation12 + $0x60] ss:$16 sps:$4 sm:$0xff]   ;;  %1474 = vmatprep.subr.bf16.mxu0 %v10982_v59  ;;  %v11012_v59 = vld [vmem:[#allocation12 + $0x104] ss:$16 sps:$4 sm:$0xff]  }
 0x2d8   :  { %v595_v3 = vmax.f32 %v547_v0, 0.0  ;;  %1475 = vmatpush1.bf16.msra.mxu0 %v10980_v62  ;;  %v11015_v62 = vld [vmem:[#allocation12 + $0x10c] ss:$16 sps:$4 sm:$0xff]  }
 0x2d9   :  { %v609_v4 = vpack.c.bf16 %v597_v1, %v596_v61  ;;  %v10983_v1 = vld [vmem:[#allocation12 + $0x68] ss:$16 sps:$4 sm:$0xff]  }
 0x2da   :  { %v9969_v5 = vpop.f32.mrb[8].mxu1  ;;  %v608_v8 = vpack.c.bf16 %v595_v3, %v594_v2  ;;  %1584 = vmatpush1.bf16.msra.mxu1 %v10971_v38  ;;  %v10988_v2 = vld [vmem:[#allocation12 + $0x84] ss:$16 sps:$4 sm:$0xff]   ;;  %v10998_v38 = vld [vmem:[#allocation12 + $0xc0] ss:$16 sps:$4 sm:$0xff]  }
 0x2db   :  { %v568_v9 = vadd.f32 %v9969_v5, %v11924_v37  ;;  %628 = vrot.lane.b32.xlu1 %v609_v4, %s13710_s28  ;;  %v559_v10 = vpop.f32.mrb[9].mxu1  ;;  %1585 = vmatprep.subr.bf16.mxu1 %v10979_v45  ;;  %v10991_v5 = vld [vmem:[#allocation12 + $0x8c] ss:$16 sps:$4 sm:$0xff]   ;;  %v11006_v45 = vld [vmem:[#allocation12 + $0xe4] ss:$16 sps:$4 sm:$0xff]  }
 0x2dc   :  { %v560_v12 = vadd.f32 %v11924_v37, %v559_v10  ;;  %626 = vrot.lane.b32.xlu0 %v608_v8, %s13710_s28  ;;  %v9970_v13 = vpop.f32.mrb[10].mxu1  ;;  %10011 = vmatprep.mubr.msk.bf16.mxu1 %vm638_vm3, %v608_v8 }
 0x2dd   :  { %v600_v14 = vmax.f32 %v568_v9, 0.0  ;;  %v571_v15 = vadd.f32 %v9970_v13, %v11924_v37  ;;  %v562_v16 = vpop.f32.mrb[11].mxu1  ;;  %10012 = vmatmul.mubr.msk.bf16.gmra.mrb[36].mxu1 %vm638_vm3, %v609_v4  ;;  %1476 = vmatprep.subr.bf16.mxu0 %v10988_v2 }
 0x2de   :  { %v598_v17 = vmax.f32 %v560_v12, 0.0  ;;  %v563_v18 = vadd.f32 %v11924_v37, %v562_v16  ;;  %1586 = vmatpush1.bf16.msra.mxu1 %v10977_v54  ;;  %1477 = vmatpush1.bf16.msra.mxu0 %v10986_v11 }
 0x2df   :  { %v601_v19 = vmax.f32 %v571_v15, 0.0  ;;  %v10994_v15 = vld [vmem:[#allocation12 + $0xa4] ss:$16 sps:$4 sm:$0xff]  }
 0x2e0   :  { %v599_v25 = vmax.f32 %v563_v18, 0.0  ;;  %v10997_v18 = vld [vmem:[#allocation12 + $0xac] ss:$16 sps:$4 sm:$0xff]   ;;  %1478 = vmatprep.subr.bf16.mxu0 %v10994_v15 }
 0x2e1   :  { %v611_v28 = vpack.c.bf16 %v601_v19, %v600_v14  ;;  %v10989_v14 = vld [vmem:[#allocation12 + $0x88] ss:$16 sps:$4 sm:$0xff]  }
 0x2e2   :  { %v9973_v30 = vpop.f32.mrb[12].mxu1  ;;  %v610_v31 = vpack.c.bf16 %v599_v25, %v598_v17  ;;  %v10992_v25 = vld [vmem:[#allocation12 + $0xa0] ss:$16 sps:$4 sm:$0xff]  }
 0x2e3   :  { %v584_v34 = vadd.f32 %v9973_v30, %v11924_v37  ;;  %632 = vrot.lane.b32.xlu1 %v611_v28, %s13710_s28  ;;  %v575_v35 = vpop.f32.mrb[13].mxu1  ;;  %1479 = vmatpush1.bf16.msra.mxu0 %v10992_v25 }
 0x2e4   :  { %v576_v40 = vadd.f32 %v11924_v37, %v575_v35  ;;  %630 = vrot.lane.b32.xlu0 %v610_v31, %s13710_s28  ;;  %v9974_v43 = vpop.f32.mrb[14].mxu1  ;;  %10015 = vmatprep.mubr.msk.bf16.mxu1 %vm638_vm3, %v610_v31 }
 0x2e5   :  { %v604_v46 = vmax.f32 %v584_v34, 0.0  ;;  %v587_v47 = vadd.f32 %v9974_v43, %v11924_v37  ;;  %v578_v48 = vpop.f32.mrb[15].mxu1  ;;  %10016 = vmatmul.mubr.msk.bf16.gmra.mrb[40].mxu1 %vm638_vm3, %v611_v28  ;;  %v10995_v28 = vld [vmem:[#allocation12 + $0xa8] ss:$16 sps:$4 sm:$0xff]   ;;  %1480 = vmatprep.subr.bf16.mxu0 %v11000_v29 }
 0x2e6   :  { %v602_v49 = vmax.f32 %v576_v40, 0.0  ;;  %v579_v50 = vadd.f32 %v11924_v37, %v578_v48  ;;  %v10985_v37 = vld [vmem:[#allocation12 + $0x6c] ss:$16 sps:$4 sm:$0xff]   ;;  %v11001_v43 = vld [vmem:[#allocation12 + $0xc8] ss:$16 sps:$4 sm:$0xff]  }
 0x2e7   :  { %v605_v52 = vmax.f32 %v587_v47, 0.0  ;;  %1587 = vmatprep.subr.bf16.mxu1 %v10985_v37  ;;  %v11009_v48 = vld [vmem:[#allocation12 + $0xec] ss:$16 sps:$4 sm:$0xff]   ;;  %1481 = vmatpush1.bf16.msra.mxu0 %v10998_v38 }
 0x2e8   :  { %v603_v56 = vmax.f32 %v579_v50, 0.0  ;;  %1588 = vmatpush1.bf16.msra.mxu1 %v10983_v1  ;;  %1482 = vmatprep.subr.bf16.mxu0 %v11006_v45  ;;  %v11010_v1 = vld [vmem:[#allocation12 + $0x100] ss:$16 sps:$4 sm:$0xff]  }
 0x2e9   :  { %v613_v58 = vpack.c.bf16 %v605_v52, %v604_v46  ;;  %1589 = vmatprep.subr.bf16.mxu1 %v10991_v5  ;;  %v11004_v52 = vld [vmem:[#allocation12 + $0xe0] ss:$16 sps:$4 sm:$0xff]   ;;  %v11018_v5 = vld [vmem:[#allocation12 + $0x124] ss:$16 sps:$4 sm:$0xff]  }
 0x2ea   :  { %v9985_v60 = vpop.f32.mrb[16].mxu1  ;;  %v612_v61 = vpack.c.bf16 %v603_v56, %v602_v49  ;;  %v11028_v45 = vld [vmem:[#allocation12 + $0x160] ss:$16 sps:$4 sm:$0xff]  }
 0x2eb   :  { %v986_v63 = vadd.f32 %v9985_v60, %v11963_v53  ;;  %636 = vrot.lane.b32.xlu1 %v613_v58, %s13710_s28  ;;  %v753_v0 = vpop.f32.mrb[17].mxu1  ;;  %1483 = vmatpush1.bf16.msra.mxu0 %v11004_v52  ;;  %v11042_v52 = vld [vmem:[#allocation12 + $0x1a4] ss:$16 sps:$4 sm:$0xff]  }
 0x2ec   :  { %v982_v3 = vadd.f32 %v11963_v53, %v753_v0  ;;  %v9986_v4 = vpop.f32.mrb[18].mxu1  ;;  %634 = vrot.lane.b32.xlu0 %v612_v61, %s13710_s28  ;;  %10019 = vmatprep.mubr.msk.bf16.mxu1 %vm638_vm3, %v612_v61 }
 0x2ed   :  { %v988_v8 = vadd.f32 %v9986_v4, %v11963_v53  ;;  %v756_v9 = vpop.f32.mrb[19].mxu1  ;;  %10020 = vmatmul.mubr.msk.bf16.gmra.mrb[44].mxu1 %vm638_vm3, %v613_v58  ;;  %v1018_v12 = vmax.f32 %v986_v63, 0.0  ;;  %v11007_v58 = vld [vmem:[#allocation12 + $0xe8] ss:$16 sps:$4 sm:$0xff]   ;;  %1484 = vmatprep.subr.bf16.mxu0 %v11012_v59  ;;  %v11048_v59 = vld [vmem:[#allocation12 + $0x1c4] ss:$16 sps:$4 sm:$0xff]  }
 0x2ee   :  { %v984_v10 = vadd.f32 %v11963_v53, %v756_v9  ;;  %v1014_v16 = vmax.f32 %v982_v3, 0.0  ;;  %1590 = vmatpush1.bf16.msra.mxu1 %v10989_v14  ;;  %v11013_v4 = vld [vmem:[#allocation12 + $0x108] ss:$16 sps:$4 sm:$0xff]   ;;  %v11016_v14 = vld [vmem:[#allocation12 + $0x120] ss:$16 sps:$4 sm:$0xff]  }
 0x2ef   :  { %v1020_v13 = vmax.f32 %v988_v8, 0.0  ;;  %1591 = vmatprep.subr.bf16.mxu1 %v10997_v18  ;;  %1485 = vmatpush1.bf16.msra.mxu0 %v11010_v1  ;;  %v11024_v18 = vld [vmem:[#allocation12 + $0x144] ss:$16 sps:$4 sm:$0xff]   ;;  %v11055_v1 = vld [vmem:[#allocation12 + $0x1e8] ss:$16 sps:$4 sm:$0xff]  }
 0x2f0   :  { %v1016_v17 = vmax.f32 %v984_v10, 0.0  ;;  %v11021_v10 = vld [vmem:[#allocation12 + $0x12c] ss:$16 sps:$4 sm:$0xff]   ;;  %1486 = vmatprep.subr.bf16.mxu0 %v11018_v5 }
 0x2f1   :  { %v11973_v19 = vpack.c.bf16 %v1020_v13, %v1018_v12 }
 0x2f2   :  { %v11975_v23 = vpack.c.bf16 %v1016_v17, %v1014_v16  ;;  %v9989_v24 = vpop.f32.mrb[20].mxu1  ;;  %1592 = vmatpush1.bf16.msra.mxu1 %v10995_v28  ;;  %v11019_v17 = vld [vmem:[#allocation12 + $0x128] ss:$16 sps:$4 sm:$0xff]  }
 0x2f3   :  { %v994_v26 = vadd.f32 %v9989_v24, %v11963_v53  ;;  %v769_v27 = vpop.f32.mrb[21].mxu1  ;;  %1593 = vmatprep.subr.bf16.mxu1 %v11003_v32  ;;  %1487 = vmatpush1.bf16.msra.mxu0 %v11016_v14 }
 0x2f4   :  { %v990_v30 = vadd.f32 %v11963_v53, %v769_v27  ;;  %v9990_v31 = vpop.f32.mrb[22].mxu1  ;;  %1488 = vmatprep.subr.bf16.mxu0 %v11024_v18  ;;  %v12034_v18 = vsub.s32 1, %v11946_v22 }
 0x2f5   :  { %v996_v33 = vadd.f32 %v9990_v31, %v11963_v53  ;;  %v772_v34 = vpop.f32.mrb[23].mxu1  ;;  %v1026_v39 = vmax.f32 %v994_v26, 0.0  ;;  %v11027_v26 = vld [vmem:[#allocation12 + $0x14c] ss:$16 sps:$4 sm:$0xff]  }
 0x2f6   :  { %v992_v35 = vadd.f32 %v11963_v53, %v772_v34  ;;  %v1022_v46 = vmax.f32 %v990_v30, 0.0  ;;  %1594 = vmatpush1.bf16.msra.mxu1 %v11001_v43  ;;  %v11022_v30 = vld [vmem:[#allocation12 + $0x140] ss:$16 sps:$4 sm:$0xff]   ;;  %v11030_v34 = vld [vmem:[#allocation12 + $0x164] ss:$16 sps:$4 sm:$0xff]   ;;  %13723 = vst [vmem:[#allocation48_spill] sm:$0xff] %v12034_v18 }
 0x2f7   :  { %v1028_v40 = vmax.f32 %v996_v33, 0.0  ;;  %1595 = vmatprep.subr.bf16.mxu1 %v11009_v48  ;;  %v11025_v33 = vld [vmem:[#allocation12 + $0x148] ss:$16 sps:$4 sm:$0xff]   ;;  %1489 = vmatpush1.bf16.msra.mxu0 %v11022_v30  ;;  %v11034_v48 = vld [vmem:[#allocation12 + $0x180] ss:$16 sps:$4 sm:$0xff]  }
 0x2f8   :  { %v1024_v47 = vmax.f32 %v992_v35, 0.0  ;;  %1490 = vmatprep.subr.bf16.mxu0 %v11030_v34 }
 0x2f9   :  { %v11981_v49 = vpack.c.bf16 %v1028_v40, %v1026_v39  ;;  %v11033_v39 = vld [vmem:[#allocation12 + $0x16c] ss:$16 sps:$4 sm:$0xff]  }
 0x2fa   :  { %v11983_v50 = vpack.c.bf16 %v1024_v47, %v1022_v46  ;;  %v9993_v51 = vpop.f32.mrb[24].mxu1  ;;  %1596 = vmatpush1.bf16.msra.mxu1 %v11007_v58  ;;  %v11036_v46 = vld [vmem:[#allocation12 + $0x184] ss:$16 sps:$4 sm:$0xff]   ;;  %v11039_v47 = vld [vmem:[#allocation12 + $0x18c] ss:$16 sps:$4 sm:$0xff]  }
 0x2fb   :  { %13712 = vst [vmem:[#allocation37_spill] sm:$0xff] %v11981_v49  ;;  %v1002_v54 = vadd.f32 %v9993_v51, %v11963_v53  ;;  %v785_v56 = vpop.f32.mrb[25].mxu1  ;;  %1597 = vmatprep.subr.bf16.mxu1 %v11015_v62  ;;  %1491 = vmatpush1.bf16.msra.mxu0 %v11028_v45  ;;  %v11037_v51 = vld [vmem:[#allocation12 + $0x188] ss:$16 sps:$4 sm:$0xff]  }
 0x2fc   :  { %v998_v60 = vadd.f32 %v11963_v53, %v785_v56  ;;  %v9994_v61 = vpop.f32.mrb[26].mxu1  ;;  %1492 = vmatprep.subr.bf16.mxu0 %v11036_v46  ;;  %v11040_v56 = vld [vmem:[#allocation12 + $0x1a0] ss:$16 sps:$4 sm:$0xff]   ;;  %v11043_v58 = vld [vmem:[#allocation12 + $0x1a8] ss:$16 sps:$4 sm:$0xff]  }
 0x2fd   :  { %v1004_v37 = vadd.f32 %v9994_v61, %v11963_v53  ;;  %v788_v63 = vpop.f32.mrb[27].mxu1  ;;  %v1034_v2 = vmax.f32 %v1002_v54, 0.0  ;;  %v11045_v54 = vld [vmem:[#allocation12 + $0x1ac] ss:$16 sps:$4 sm:$0xff]   ;;  %v11046_v61 = vld [vmem:[#allocation12 + $0x1c0] ss:$16 sps:$4 sm:$0xff]  }
 0x2fe   :  { %v1000_v0 = vadd.f32 %v11963_v53, %v788_v63  ;;  %v1030_v8 = vmax.f32 %v998_v60, 0.0  ;;  %1598 = vmatpush1.bf16.msra.mxu1 %v11013_v4  ;;  %v11051_v60 = vld [vmem:[#allocation12 + $0x1cc] ss:$16 sps:$4 sm:$0xff]   ;;  %v11049_v62 = vld [vmem:[#allocation12 + $0x1c8] ss:$16 sps:$4 sm:$0xff]  }
 0x2ff   :  { %v1036_v3 = vmax.f32 %v1004_v37, 0.0  ;;  %1599 = vmatprep.subr.bf16.mxu1 %v11021_v10  ;;  %1493 = vmatpush1.bf16.msra.mxu0 %v11034_v48  ;;  %v11054_v37 = vld [vmem:[#allocation12 + $0x1e4] ss:$16 sps:$4 sm:$0xff]   ;;  %v11057_v63 = vld [vmem:[#allocation12 + $0x1ec] ss:$16 sps:$4 sm:$0xff]  }
 0x300   :  { %v1032_v9 = vmax.f32 %v1000_v0, 0.0  ;;  %1494 = vmatprep.subr.bf16.mxu0 %v11042_v52  ;;  %v11052_v0 = vld [vmem:[#allocation12 + $0x1e0] ss:$16 sps:$4 sm:$0xff]  }
 0x301   :  { %v11989_v11 = vpack.c.bf16 %v1036_v3, %v1034_v2 }
 0x302   :  { %v11991_v12 = vpack.c.bf16 %v1032_v9, %v1030_v8  ;;  %v9997_v13 = vpop.f32.mrb[28].mxu1  ;;  %1600 = vmatpush1.bf16.msra.mxu1 %v11019_v17 }
 0x303   :  { %13713 = vst [vmem:[#allocation38_spill] sm:$0xff] %v11989_v11  ;;  %v1010_v15 = vadd.f32 %v9997_v13, %v11963_v53  ;;  %v801_v16 = vpop.f32.mrb[29].mxu1  ;;  %1601 = vmatprep.subr.bf16.mxu1 %v11027_v26  ;;  %1495 = vmatpush1.bf16.msra.mxu0 %v11040_v56 }
 0x304   :  { %13714 = vst [vmem:[#allocation39_spill] sm:$0xff] %v11991_v12  ;;  %v1006_v24 = vadd.f32 %v11963_v53, %v801_v16  ;;  %v9998_v25 = vpop.f32.mrb[30].mxu1  ;;  %1496 = vmatprep.subr.bf16.mxu0 %v11048_v59 }
 0x305   :  { %v1012_v27 = vadd.f32 %v9998_v25, %v11963_v53  ;;  %v804_v28 = vpop.f32.mrb[31].mxu1  ;;  %v1042_v31 = vmax.f32 %v1010_v15, 0.0 }
 0x306   :  { %v1008_v29 = vadd.f32 %v11963_v53, %v804_v28  ;;  %v1038_v35 = vmax.f32 %v1006_v24, 0.0  ;;  %1602 = vmatpush1.bf16.msra.mxu1 %v11025_v33  ;;  %v11031_v53 = vld [vmem:[#allocation12 + $0x168] ss:$16 sps:$4 sm:$0xff]  }
 0x307   :  { %v1044_v32 = vmax.f32 %v1012_v27, 0.0  ;;  %1603 = vmatprep.subr.bf16.mxu1 %v11033_v39  ;;  %1497 = vmatpush1.bf16.msra.mxu0 %v11046_v61 }
 0x308   :  { %v1040_v38 = vmax.f32 %v1008_v29, 0.0  ;;  %1498 = vmatprep.subr.bf16.mxu0 %v11054_v37 }
 0x309   :  { %v11997_v40 = vpack.c.bf16 %v1044_v32, %v1042_v31 }
 0x30a   :  { %v11999_v43 = vpack.c.bf16 %v1040_v38, %v1038_v35  ;;  %1604 = vmatpush1.bf16.msra.mxu1 %v11031_v53 }
 0x30b   :  { %13715 = vst [vmem:[#allocation40_spill] sm:$0xff] %v11997_v40  ;;  %1605 = vmatprep.subr.bf16.mxu1 %v11039_v47  ;;  %1499 = vmatpush1.bf16.msra.mxu0 %v11052_v0 }
 0x30c   :  { %13716 = vst [vmem:[#allocation41_spill] sm:$0xff] %v11999_v43 }
 0x30e   :  { %1606 = vmatpush1.bf16.msra.mxu1 %v11037_v51 }
 0x30f   :  { %1607 = vmatprep.subr.bf16.mxu1 %v11045_v54 }
 0x312   :  { %1608 = vmatpush1.bf16.msra.mxu1 %v11043_v58 }
 0x313   :  { %1609 = vmatprep.subr.bf16.mxu1 %v11051_v60 }
 0x316   :  { %1610 = vmatpush1.bf16.msra.mxu1 %v11049_v62 }
 0x317   :  { %1611 = vmatprep.subr.bf16.mxu1 %v11057_v63 }
 0x31a   :  { %1612 = vmatpush1.bf16.msra.mxu1 %v11055_v1 }
 0x345   :  { %v625_v2 = vpop.permute.xlu1 %624 }
 0x346   :  { %v12003_v3 = vsel %vm638_vm3, %v11868_v41, %v625_v2  ;;  %v623_v4 = vpop.permute.xlu0 %622 }
 0x347   :  { %v12007_v5 = vsel %vm638_vm3, %v11870_v42, %v623_v4 }
 0x34d   :  { %v629_v8 = vpop.permute.xlu1 %628 }
 0x34e   :  { %v12011_v9 = vsel %vm638_vm3, %v11876_v55, %v629_v8  ;;  %v627_v10 = vpop.permute.xlu0 %626 }
 0x34f   :  { %13717 = vst [vmem:[#allocation42_spill] sm:$0xff] %v12011_v9  ;;  %v12015_v13 = vsel %vm638_vm3, %v11878_v57, %v627_v10 }
 0x350   :  { %13718 = vst [vmem:[#allocation43_spill] sm:$0xff] %v12015_v13 }
 0x355   :  { %v633_v14 = vpop.permute.xlu1 %632 }
 0x356   :  { %v12019_v41 = vsel %vm638_vm3, %v11884_v6, %v633_v14  ;;  %v631_v15 = vpop.permute.xlu0 %630  ;;  %v12038_v6 = vrot.slane %v11956_v44, %v12034_v18 }
 0x357   :  { %13719 = vst [vmem:[#allocation44_spill] sm:$0xff] %v12019_v41  ;;  %v12023_v42 = vsel %vm638_vm3, %v11886_v7, %v631_v15 }
 0x358   :  { %13720 = vst [vmem:[#allocation45_spill] sm:$0xff] %v12023_v42 }
 0x35d   :  { %v637_v16 = vpop.permute.xlu1 %636 }
 0x35e   :  { %v12027_v55 = vsel %vm638_vm3, %v11892_v20, %v637_v16  ;;  %v635_v17 = vpop.permute.xlu0 %634 }
 0x35f   :  { %13721 = vst [vmem:[#allocation46_spill] sm:$0xff] %v12027_v55  ;;  %v12031_v57 = vsel %vm638_vm3, %v11894_v21, %v635_v17 }
 0x360   :  { %13722 = vst [vmem:[#allocation47_spill] sm:$0xff] %v12031_v57 }
 0x3a8   :  { %v10009_v24 = vpop.f32.mrb[32].mxu1 }
 0x3a9   :  { %v987_v7 = vadd.f32 %v10009_v24, %v12038_v6  ;;  %v907_v25 = vpop.f32.mrb[33].mxu1 }
 0x3aa   :  { %v983_v26 = vadd.f32 %v12038_v6, %v907_v25  ;;  %v10010_v20 = vpop.f32.mrb[34].mxu1 }
 0x3ab   :  { %v989_v27 = vadd.f32 %v10010_v20, %v12038_v6  ;;  %v910_v28 = vpop.f32.mrb[35].mxu1  ;;  %v1019_v29 = vmax.f32 %v987_v7, 0.0 }
 0x3ac   :  { %v985_v21 = vadd.f32 %v12038_v6, %v910_v28  ;;  %v1015_v31 = vmax.f32 %v983_v26, 0.0 }
 0x3ad   :  { %v1021_v30 = vmax.f32 %v989_v27, 0.0 }
 0x3ae   :  { %v1017_v32 = vmax.f32 %v985_v21, 0.0 }
 0x3af   :  { %v12044_v33 = vpack.c.bf16 %v1021_v30, %v1019_v29 }
 0x3b0   :  { %v12046_v44 = vpack.c.bf16 %v1017_v32, %v1015_v31  ;;  %v10013_v34 = vpop.f32.mrb[36].mxu1 }
 0x3b1   :  { %13724 = vst [vmem:[#allocation49_spill] sm:$0xff] %v12044_v33  ;;  %v995_v35 = vadd.f32 %v10013_v34, %v12038_v6  ;;  %v923_v38 = vpop.f32.mrb[37].mxu1  ;;  %v1126_v34 = vld [vmem:[#allocation17 + $0x4] sm:$0xf] }
 0x3b2   :  { %13725 = vst [vmem:[#allocation50_spill] sm:$0xff] %v12046_v44  ;;  %v991_v39 = vadd.f32 %v12038_v6, %v923_v38  ;;  %v10014_v45 = vpop.f32.mrb[38].mxu1  ;;  %1500 = vmatprep.mubr.bf16.mxu0 %v12046_v44  ;;  %1613 = vmatprep.mubr.bf16.mxu1 %v12046_v44  ;;  %v12111_v38 = vrot.slane %v1126_v34, %v11951_v36 }
 0x3b3   :  { %v997_v53 = vadd.f32 %v10014_v45, %v12038_v6  ;;  %v926_v46 = vpop.f32.mrb[39].mxu1  ;;  %1501 = vmatmul.mubr.bf16.vlgmr.msra.gmra.mrb[16].mxu0 %v11975_v23  ;;  %1614 = vmatmul.mubr.bf16.vlgmr.msra.gmra.mrb[48].mxu1 %v11975_v23  ;;  %v1027_v48 = vmax.f32 %v995_v35, 0.0  ;;  %v12108_v35 = vsub.s32 3, %v11946_v22  ;;  %v12117_v45 = vrot.slane %v1126_v34, %v12034_v18 }
 0x3b4   :  { %v993_v47 = vadd.f32 %v12038_v6, %v926_v46  ;;  %1510 = vmatprep.mubr.bf16.mxu0 %v12044_v33  ;;  %1623 = vmatprep.mubr.bf16.mxu1 %v12044_v33  ;;  %v1023_v52 = vmax.f32 %v991_v39, 0.0 }
 0x3b5   :  { %v1029_v51 = vmax.f32 %v997_v53, 0.0  ;;  %v12120_v53 = vrot.slane %v1126_v34, %v12108_v35 }
 0x3b6   :  { %v1025_v54 = vmax.f32 %v993_v47, 0.0 }
 0x3b7   :  { %v12058_v56 = vpack.c.bf16 %v1029_v51, %v1027_v48 }
 0x3b8   :  { %v12060_v58 = vpack.c.bf16 %v1025_v54, %v1023_v52  ;;  %v10017_v59 = vpop.f32.mrb[40].mxu1 }
 0x3b9   :  { %13726 = vst [vmem:[#allocation51_spill] sm:$0xff] %v12058_v56  ;;  %v1003_v60 = vadd.f32 %v10017_v59, %v12038_v6  ;;  %v939_v61 = vpop.f32.mrb[41].mxu1 }
 0x3ba   :  { %13727 = vst [vmem:[#allocation52_spill] sm:$0xff] %v12060_v58  ;;  %v999_v62 = vadd.f32 %v12038_v6, %v939_v61  ;;  %v10018_v37 = vpop.f32.mrb[42].mxu1 }
 0x3bb   :  { %1511 = vmatmul.mubr.bf16.gmra.mrb[20].mxu0 %v11973_v19  ;;  %1624 = vmatmul.mubr.bf16.gmra.mrb[52].mxu1 %v11973_v19  ;;  %v1035_v63 = vmax.f32 %v1003_v60, 0.0  ;;  %v1005_v0 = vadd.f32 %v10018_v37, %v12038_v6  ;;  %v942_v1 = vpop.f32.mrb[43].mxu1 }
 0x3bc   :  { %1520 = vmatprep.mubr.bf16.mxu0 %v12060_v58  ;;  %1633 = vmatprep.mubr.bf16.mxu1 %v12060_v58  ;;  %v1031_v2 = vmax.f32 %v999_v62, 0.0  ;;  %v1001_v4 = vadd.f32 %v12038_v6, %v942_v1 }
 0x3bd   :  { %v1037_v8 = vmax.f32 %v1005_v0, 0.0 }
 0x3be   :  { %v1033_v10 = vmax.f32 %v1001_v4, 0.0 }
 0x3bf   :  { %v12070_v14 = vpack.c.bf16 %v1037_v8, %v1035_v63 }
 0x3c0   :  { %v12072_v15 = vpack.c.bf16 %v1033_v10, %v1031_v2  ;;  %v10021_v16 = vpop.f32.mrb[44].mxu1 }
 0x3c1   :  { %13728 = vst [vmem:[#allocation53_spill] sm:$0xff] %v12070_v14  ;;  %v1011_v17 = vadd.f32 %v10021_v16, %v12038_v6  ;;  %v955_v24 = vpop.f32.mrb[45].mxu1 }
 0x3c2   :  { %13729 = vst [vmem:[#allocation54_spill] sm:$0xff] %v12072_v15  ;;  %v1007_v7 = vadd.f32 %v12038_v6, %v955_v24  ;;  %v10022_v25 = vpop.f32.mrb[46].mxu1 }
 0x3c3   :  { %1521 = vmatmul.mubr.bf16.gmra.mrb[24].mxu0 %v11983_v50  ;;  %1634 = vmatmul.mubr.bf16.gmra.mrb[56].mxu1 %v11983_v50  ;;  %v1043_v26 = vmax.f32 %v1011_v17, 0.0  ;;  %v1013_v20 = vadd.f32 %v10022_v25, %v12038_v6  ;;  %v958_v27 = vpop.f32.mrb[47].mxu1 }
 0x3c4   :  { %1530 = vmatprep.mubr.bf16.mxu0 %v12058_v56  ;;  %1643 = vmatprep.mubr.bf16.mxu1 %v12058_v56  ;;  %v1039_v28 = vmax.f32 %v1007_v7, 0.0  ;;  %v1009_v21 = vadd.f32 %v12038_v6, %v958_v27  ;;  %v12105_v6 = vsub.s32 2, %v11946_v22 }
 0x3c5   :  { %v1045_v29 = vmax.f32 %v1013_v20, 0.0 }
 0x3c6   :  { %v1041_v30 = vmax.f32 %v1009_v21, 0.0  ;;  %v12114_v39 = vrot.slane %v1126_v34, %v12105_v6 }
 0x3c7   :  { %v12082_v31 = vpack.c.bf16 %v1045_v29, %v1043_v26 }
 0x3c8   :  { %v12084_v32 = vpack.c.bf16 %v1041_v30, %v1039_v28 }
 0x3c9   :  { %13730 = vst [vmem:[#allocation55_spill] sm:$0xff] %v12082_v31 }
 0x3ca   :  { %13731 = vst [vmem:[#allocation56_spill] sm:$0xff] %v12084_v32 }
 0x3cb   :  { %1531 = vmatmul.mubr.bf16.gmra.mrb[28].mxu0 %v11981_v49  ;;  %1644 = vmatmul.mubr.bf16.gmra.mrb[60].mxu1 %v11981_v49 }
 0x3cc   :  { %1540 = vmatprep.mubr.bf16.mxu0 %v12072_v15  ;;  %1653 = vmatprep.mubr.bf16.mxu1 %v12072_v15 }
 0x3d3   :  { %1541 = vmatmul.mubr.bf16.gmra.mrb[32].mxu0 %v11991_v12  ;;  %1654 = vmatmul.mubr.bf16.gmra.mrb[64].mxu1 %v11991_v12 }
 0x3d4   :  { %1550 = vmatprep.mubr.bf16.mxu0 %v12070_v14  ;;  %1663 = vmatprep.mubr.bf16.mxu1 %v12070_v14 }
 0x3db   :  { %1551 = vmatmul.mubr.bf16.gmra.mrb[36].mxu0 %v11989_v11  ;;  %1664 = vmatmul.mubr.bf16.gmra.mrb[68].mxu1 %v11989_v11 }
 0x3dc   :  { %1560 = vmatprep.mubr.bf16.mxu0 %v12084_v32  ;;  %1673 = vmatprep.mubr.bf16.mxu1 %v12084_v32 }
 0x3e3   :  { %1561 = vmatmul.mubr.bf16.gmra.mrb[40].mxu0 %v11999_v43  ;;  %1674 = vmatmul.mubr.bf16.gmra.mrb[72].mxu1 %v11999_v43 }
 0x3e4   :  { %1570 = vmatprep.mubr.bf16.mxu0 %v12082_v31  ;;  %1683 = vmatprep.mubr.bf16.mxu1 %v12082_v31 }
 0x3eb   :  { %1571 = vmatmul.mubr.bf16.gmra.mrb[44].mxu0 %v11997_v40  ;;  %1684 = vmatmul.mubr.bf16.gmra.mrb[76].mxu1 %v11997_v40 }
 0x486   :  { %v1502_v46 = vpop.f32.mrb[16].mxu0  ;;  %v1615_v47 = vpop.f32.mrb[48].mxu1 }
 0x487   :  { %v1503_v48 = vadd.f32 %v1502_v46, %v12111_v38  ;;  %v1616_v51 = vadd.f32 %v1615_v47, %v12114_v39  ;;  %v1504_v52 = vpop.f32.mrb[17].mxu0  ;;  %v1617_v54 = vpop.f32.mrb[49].mxu1 }
 0x488   :  { %v1505_v59 = vadd.f32 %v1504_v52, %v12117_v45  ;;  %v1618_v60 = vadd.f32 %v1617_v54, %v12120_v53  ;;  %v1506_v61 = vpop.f32.mrb[18].mxu0  ;;  %v1619_v62 = vpop.f32.mrb[50].mxu1 }
 0x489   :  { %v1507_v37 = vadd.f32 %v1506_v61, %v12111_v38  ;;  %v1620_v63 = vadd.f32 %v1619_v62, %v12114_v39  ;;  %v1508_v0 = vpop.f32.mrb[19].mxu0  ;;  %v1621_v1 = vpop.f32.mrb[51].mxu1  ;;  %v1694_v8 = vmax.f32 %v1503_v48, 0.0  ;;  %v1696_v10 = vmax.f32 %v1616_v51, 0.0 }
 0x48a   :  { %v1509_v2 = vadd.f32 %v1508_v0, %v12117_v45  ;;  %v1622_v4 = vadd.f32 %v1621_v1, %v12120_v53  ;;  %v1695_v24 = vmax.f32 %v1505_v59, 0.0  ;;  %v1697_v7 = vmax.f32 %v1618_v60, 0.0 }
 0x48b   :  { %v1698_v16 = vmax.f32 %v1507_v37, 0.0  ;;  %v1700_v17 = vmax.f32 %v1620_v63, 0.0 }
 0x48c   :  { %v1699_v25 = vmax.f32 %v1509_v2, 0.0  ;;  %v1701_v26 = vmax.f32 %v1622_v4, 0.0 }
 0x48d   :  { %v12130_v20 = vpack.c.bf16 %v1698_v16, %v1694_v8  ;;  %v12132_v27 = vpack.c.bf16 %v1700_v17, %v1696_v10 }
 0x48e   :  { %v12134_v28 = vpack.c.bf16 %v1699_v25, %v1695_v24  ;;  %v12136_v21 = vpack.c.bf16 %v1701_v26, %v1697_v7  ;;  %v1512_v29 = vpop.f32.mrb[20].mxu0  ;;  %v1625_v30 = vpop.f32.mrb[52].mxu1 }
 0x48f   :  { %v1513_v34 = vadd.f32 %v1512_v29, %v12111_v38  ;;  %v1626_v46 = vadd.f32 %v1625_v30, %v12114_v39  ;;  %v1514_v47 = vpop.f32.mrb[21].mxu0  ;;  %v1627_v48 = vpop.f32.mrb[53].mxu1 }
 0x490   :  { %v1515_v51 = vadd.f32 %v1514_v47, %v12117_v45  ;;  %v1628_v52 = vadd.f32 %v1627_v48, %v12120_v53  ;;  %v1516_v54 = vpop.f32.mrb[22].mxu0  ;;  %v1629_v59 = vpop.f32.mrb[54].mxu1 }
 0x491   :  { %v1517_v60 = vadd.f32 %v1516_v54, %v12111_v38  ;;  %v1630_v61 = vadd.f32 %v1629_v59, %v12114_v39  ;;  %v1518_v62 = vpop.f32.mrb[23].mxu0  ;;  %v1631_v37 = vpop.f32.mrb[55].mxu1  ;;  %v1702_v1 = vmax.f32 %v1513_v34, 0.0  ;;  %v1704_v2 = vmax.f32 %v1626_v46, 0.0 }
 0x492   :  { %v1519_v63 = vadd.f32 %v1518_v62, %v12117_v45  ;;  %v1632_v0 = vadd.f32 %v1631_v37, %v12120_v53  ;;  %v1703_v10 = vmax.f32 %v1515_v51, 0.0  ;;  %v1705_v16 = vmax.f32 %v1628_v52, 0.0 }
 0x493   :  { %v1706_v4 = vmax.f32 %v1517_v60, 0.0  ;;  %v1708_v8 = vmax.f32 %v1630_v61, 0.0 }
 0x494   :  { %v1707_v17 = vmax.f32 %v1519_v63, 0.0  ;;  %v1709_v24 = vmax.f32 %v1632_v0, 0.0 }
 0x495   :  { %v12146_v7 = vpack.c.bf16 %v1706_v4, %v1702_v1  ;;  %v12148_v25 = vpack.c.bf16 %v1708_v8, %v1704_v2 }
 0x496   :  { %v12150_v26 = vpack.c.bf16 %v1707_v17, %v1703_v10  ;;  %v12152_v29 = vpack.c.bf16 %v1709_v24, %v1705_v16  ;;  %v1522_v30 = vpop.f32.mrb[24].mxu0  ;;  %v1635_v47 = vpop.f32.mrb[56].mxu1 }
 0x497   :  { %v1523_v48 = vadd.f32 %v1522_v30, %v12111_v38  ;;  %v1636_v34 = vadd.f32 %v1635_v47, %v12114_v39  ;;  %v1524_v46 = vpop.f32.mrb[25].mxu0  ;;  %v1637_v54 = vpop.f32.mrb[57].mxu1 }
 0x498   :  { %v1525_v51 = vadd.f32 %v1524_v46, %v12117_v45  ;;  %v1638_v52 = vadd.f32 %v1637_v54, %v12120_v53  ;;  %v1526_v59 = vpop.f32.mrb[26].mxu0  ;;  %v1639_v60 = vpop.f32.mrb[58].mxu1 }
 0x499   :  { %v1527_v61 = vadd.f32 %v1526_v59, %v12111_v38  ;;  %v1640_v62 = vadd.f32 %v1639_v60, %v12114_v39  ;;  %v1528_v37 = vpop.f32.mrb[27].mxu0  ;;  %v1641_v63 = vpop.f32.mrb[59].mxu1  ;;  %v1710_v2 = vmax.f32 %v1523_v48, 0.0  ;;  %v1712_v4 = vmax.f32 %v1636_v34, 0.0 }
 0x49a   :  { %v1529_v0 = vadd.f32 %v1528_v37, %v12117_v45  ;;  %v1642_v1 = vadd.f32 %v1641_v63, %v12120_v53  ;;  %v1711_v16 = vmax.f32 %v1525_v51, 0.0  ;;  %v1713_v17 = vmax.f32 %v1638_v52, 0.0 }
 0x49b   :  { %v1714_v8 = vmax.f32 %v1527_v61, 0.0  ;;  %v1716_v10 = vmax.f32 %v1640_v62, 0.0 }
 0x49c   :  { %v1715_v24 = vmax.f32 %v1529_v0, 0.0  ;;  %v1717_v30 = vmax.f32 %v1642_v1, 0.0 }
 0x49d   :  { %v12162_v47 = vpack.c.bf16 %v1714_v8, %v1710_v2  ;;  %v12164_v46 = vpack.c.bf16 %v1716_v10, %v1712_v4 }
 0x49e   :  { %v12166_v54 = vpack.c.bf16 %v1715_v24, %v1711_v16  ;;  %v12168_v59 = vpack.c.bf16 %v1717_v30, %v1713_v17  ;;  %v1532_v60 = vpop.f32.mrb[28].mxu0  ;;  %v1645_v37 = vpop.f32.mrb[60].mxu1 }
 0x49f   :  { %v1533_v63 = vadd.f32 %v1532_v60, %v12111_v38  ;;  %v1646_v48 = vadd.f32 %v1645_v37, %v12114_v39  ;;  %v1534_v34 = vpop.f32.mrb[29].mxu0  ;;  %v1647_v61 = vpop.f32.mrb[61].mxu1 }
 0x4a0   :  { %v1535_v51 = vadd.f32 %v1534_v34, %v12117_v45  ;;  %v1648_v52 = vadd.f32 %v1647_v61, %v12120_v53  ;;  %v1536_v62 = vpop.f32.mrb[30].mxu0  ;;  %v1649_v0 = vpop.f32.mrb[62].mxu1 }
 0x4a1   :  { %v1537_v1 = vadd.f32 %v1536_v62, %v12111_v38  ;;  %v1650_v2 = vadd.f32 %v1649_v0, %v12114_v39  ;;  %v1538_v4 = vpop.f32.mrb[31].mxu0  ;;  %v1651_v8 = vpop.f32.mrb[63].mxu1  ;;  %v1718_v17 = vmax.f32 %v1533_v63, 0.0  ;;  %v1720_v24 = vmax.f32 %v1646_v48, 0.0 }
 0x4a2   :  { %v1539_v10 = vadd.f32 %v1538_v4, %v12117_v45  ;;  %v1652_v16 = vadd.f32 %v1651_v8, %v12120_v53  ;;  %v1719_v37 = vmax.f32 %v1535_v51, 0.0  ;;  %v1721_v34 = vmax.f32 %v1648_v52, 0.0 }
 0x4a3   :  { %v1722_v30 = vmax.f32 %v1537_v1, 0.0  ;;  %v1724_v60 = vmax.f32 %v1650_v2, 0.0 }
 0x4a4   :  { %v1723_v31 = vmax.f32 %v1539_v10, 0.0  ;;  %v1725_v61 = vmax.f32 %v1652_v16, 0.0 }
 0x4a5   :  { %v12178_v32 = vpack.c.bf16 %v1722_v30, %v1718_v17  ;;  %v12180_v14 = vpack.c.bf16 %v1724_v60, %v1720_v24 }
 0x4a6   :  { %v12182_v62 = vpack.c.bf16 %v1723_v31, %v1719_v37  ;;  %v12184_v0 = vpack.c.bf16 %v1725_v61, %v1721_v34  ;;  %v1542_v15 = vpop.f32.mrb[32].mxu0  ;;  %v1655_v4 = vpop.f32.mrb[64].mxu1 }
 0x4a7   :  { %v1543_v8 = vadd.f32 %v1542_v15, %v12111_v38  ;;  %v1656_v63 = vadd.f32 %v1655_v4, %v12114_v39  ;;  %v1544_v48 = vpop.f32.mrb[33].mxu0  ;;  %v1657_v1 = vpop.f32.mrb[65].mxu1 }
 0x4a8   :  { %v1545_v51 = vadd.f32 %v1544_v48, %v12117_v45  ;;  %v1658_v52 = vadd.f32 %v1657_v1, %v12120_v53  ;;  %v1546_v2 = vpop.f32.mrb[34].mxu0  ;;  %v1659_v10 = vpop.f32.mrb[66].mxu1 }
 0x4a9   :  { %v1547_v16 = vadd.f32 %v1546_v2, %v12111_v38  ;;  %v1660_v31 = vadd.f32 %v1659_v10, %v12114_v39  ;;  %v1548_v17 = vpop.f32.mrb[35].mxu0  ;;  %v1661_v24 = vpop.f32.mrb[67].mxu1  ;;  %v1726_v60 = vmax.f32 %v1543_v8, 0.0  ;;  %v1728_v37 = vmax.f32 %v1656_v63, 0.0 }
 0x4aa   :  { %v1549_v30 = vadd.f32 %v1548_v17, %v12117_v45  ;;  %v1662_v15 = vadd.f32 %v1661_v24, %v12120_v53  ;;  %v1727_v4 = vmax.f32 %v1545_v51, 0.0  ;;  %v1729_v48 = vmax.f32 %v1658_v52, 0.0 }
 0x4ab   :  { %v1730_v34 = vmax.f32 %v1547_v16, 0.0  ;;  %v1732_v61 = vmax.f32 %v1660_v31, 0.0 }
 0x4ac   :  { %v1731_v56 = vmax.f32 %v1549_v30, 0.0  ;;  %v1733_v1 = vmax.f32 %v1662_v15, 0.0 }
 0x4ad   :  { %v12194_v58 = vpack.c.bf16 %v1730_v34, %v1726_v60  ;;  %v12196_v33 = vpack.c.bf16 %v1732_v61, %v1728_v37 }
 0x4ae   :  { %v12198_v2 = vpack.c.bf16 %v1731_v56, %v1727_v4  ;;  %v12200_v10 = vpack.c.bf16 %v1733_v1, %v1729_v48  ;;  %v1552_v44 = vpop.f32.mrb[36].mxu0  ;;  %v1665_v17 = vpop.f32.mrb[68].mxu1 }
 0x4af   :  { %v1553_v24 = vadd.f32 %v1552_v44, %v12111_v38  ;;  %v1666_v8 = vadd.f32 %v1665_v17, %v12114_v39  ;;  %v1554_v63 = vpop.f32.mrb[37].mxu0  ;;  %v1667_v16 = vpop.f32.mrb[69].mxu1 }
 0x4b0   :  { %v1555_v51 = vadd.f32 %v1554_v63, %v12117_v45  ;;  %v1668_v52 = vadd.f32 %v1667_v16, %v12120_v53  ;;  %v1556_v31 = vpop.f32.mrb[38].mxu0  ;;  %v1669_v30 = vpop.f32.mrb[70].mxu1 }
 0x4b1   :  { %v1557_v15 = vadd.f32 %v1556_v31, %v12111_v38  ;;  %v1670_v56 = vadd.f32 %v1669_v30, %v12114_v39  ;;  %v1558_v60 = vpop.f32.mrb[39].mxu0  ;;  %v1671_v37 = vpop.f32.mrb[71].mxu1  ;;  %v1734_v61 = vmax.f32 %v1553_v24, 0.0  ;;  %v1736_v4 = vmax.f32 %v1666_v8, 0.0 }
 0x4b2   :  { %v1559_v34 = vadd.f32 %v1558_v60, %v12117_v45  ;;  %v1672_v44 = vadd.f32 %v1671_v37, %v12120_v53  ;;  %v1735_v17 = vmax.f32 %v1555_v51, 0.0  ;;  %v1737_v63 = vmax.f32 %v1668_v52, 0.0 }
 0x4b3   :  { %v1738_v48 = vmax.f32 %v1557_v15, 0.0  ;;  %v1740_v1 = vmax.f32 %v1670_v56, 0.0 }
 0x4b4   :  { %v1739_v55 = vmax.f32 %v1559_v34, 0.0  ;;  %v1741_v16 = vmax.f32 %v1672_v44, 0.0 }
 0x4b5   :  { %v12210_v40 = vpack.c.bf16 %v1738_v48, %v1734_v61  ;;  %v12212_v57 = vpack.c.bf16 %v1740_v1, %v1736_v4 }
 0x4b6   :  { %v12214_v31 = vpack.c.bf16 %v1739_v55, %v1735_v17  ;;  %v12216_v30 = vpack.c.bf16 %v1741_v16, %v1737_v63  ;;  %v1562_v43 = vpop.f32.mrb[40].mxu0  ;;  %v1675_v60 = vpop.f32.mrb[72].mxu1 }
 0x4b7   :  { %v1563_v37 = vadd.f32 %v1562_v43, %v12111_v38  ;;  %v1676_v24 = vadd.f32 %v1675_v60, %v12114_v39  ;;  %v1564_v8 = vpop.f32.mrb[41].mxu0  ;;  %v1677_v15 = vpop.f32.mrb[73].mxu1 }
 0x4b8   :  { %v1565_v51 = vadd.f32 %v1564_v8, %v12117_v45  ;;  %v1678_v52 = vadd.f32 %v1677_v15, %v12120_v53  ;;  %v1566_v56 = vpop.f32.mrb[42].mxu0  ;;  %v1679_v34 = vpop.f32.mrb[74].mxu1 }
 0x4b9   :  { %v1567_v44 = vadd.f32 %v1566_v56, %v12111_v38  ;;  %v1680_v55 = vadd.f32 %v1679_v34, %v12114_v39  ;;  %v1568_v61 = vpop.f32.mrb[43].mxu0  ;;  %v1681_v4 = vpop.f32.mrb[75].mxu1  ;;  %v1742_v1 = vmax.f32 %v1563_v37, 0.0  ;;  %v1744_v17 = vmax.f32 %v1676_v24, 0.0 }
 0x4ba   :  { %v1569_v48 = vadd.f32 %v1568_v61, %v12117_v45  ;;  %v1682_v43 = vadd.f32 %v1681_v4, %v12120_v53  ;;  %v1743_v60 = vmax.f32 %v1565_v51, 0.0  ;;  %v1745_v8 = vmax.f32 %v1678_v52, 0.0 }
 0x4bb   :  { %v1746_v63 = vmax.f32 %v1567_v44, 0.0  ;;  %v1748_v16 = vmax.f32 %v1680_v55, 0.0 }
 0x4bc   :  { %v1747_v41 = vmax.f32 %v1569_v48, 0.0  ;;  %v1749_v15 = vmax.f32 %v1682_v43, 0.0 }
 0x4bd   :  { %v12226_v11 = vpack.c.bf16 %v1746_v63, %v1742_v1  ;;  %v12228_v42 = vpack.c.bf16 %v1748_v16, %v1744_v17 }
 0x4be   :  { %v12230_v56 = vpack.c.bf16 %v1747_v41, %v1743_v60  ;;  %v12232_v34 = vpack.c.bf16 %v1749_v15, %v1745_v8  ;;  %v1572_v12 = vpop.f32.mrb[44].mxu0  ;;  %v1685_v61 = vpop.f32.mrb[76].mxu1 }
 0x4bf   :  { %v1573_v4 = vadd.f32 %v1572_v12, %v12111_v38  ;;  %v1686_v37 = vadd.f32 %v1685_v61, %v12114_v39  ;;  %v1574_v24 = vpop.f32.mrb[45].mxu0  ;;  %v1687_v44 = vpop.f32.mrb[77].mxu1 }
 0x4c0   :  { %v1575_v51 = vadd.f32 %v1574_v24, %v12117_v45  ;;  %v1688_v52 = vadd.f32 %v1687_v44, %v12120_v53  ;;  %v1576_v55 = vpop.f32.mrb[46].mxu0  ;;  %v1689_v48 = vpop.f32.mrb[78].mxu1 }
 0x4c1   :  { %v1577_v43 = vadd.f32 %v1576_v55, %v12111_v38  ;;  %v1690_v41 = vadd.f32 %v1689_v48, %v12114_v39  ;;  %v1578_v1 = vpop.f32.mrb[47].mxu0  ;;  %v1691_v17 = vpop.f32.mrb[79].mxu1  ;;  %v1750_v16 = vmax.f32 %v1573_v4, 0.0  ;;  %v1752_v60 = vmax.f32 %v1686_v37, 0.0 }
 0x4c2   :  { %v1579_v63 = vadd.f32 %v1578_v1, %v12117_v45  ;;  %v1692_v12 = vadd.f32 %v1691_v17, %v12120_v53  ;;  %v1751_v61 = vmax.f32 %v1575_v51, 0.0  ;;  %v1753_v24 = vmax.f32 %v1688_v52, 0.0 }
 0x4c3   :  { %v1754_v8 = vmax.f32 %v1577_v43, 0.0  ;;  %v1756_v15 = vmax.f32 %v1690_v41, 0.0 }
 0x4c4   :  { %v1755_v9 = vmax.f32 %v1579_v63, 0.0  ;;  %v1757_v44 = vmax.f32 %v1692_v12, 0.0 }
 0x4c5   :  { %v12242_v49 = vpack.c.bf16 %v1754_v8, %v1750_v16  ;;  %v12244_v13 = vpack.c.bf16 %v1756_v15, %v1752_v60 }
 0x4c6   :  { %v12246_v38 = vpack.c.bf16 %v1755_v9, %v1751_v61  ;;  %v12248_v39 = vpack.c.bf16 %v1757_v44, %v1753_v24 }
 0x4c7   :  { %11553 = dma.done.wait [#allocation5], 32768 }
 0x4c8   :  { %11554 = vsyncadd [#allocation5], 4294934528  ;;  %2124 = vmatprep.mubr.bf16.mxu0 %v12134_v28  ;;  %2350 = vmatprep.mubr.bf16.mxu1 %v12134_v28  ;;  %v1795_v45 = vld [vmem:[#allocation2 + $0x8] sm:$0xff]  ;;  %v1797_v53 = vld [vmem:[#allocation2 + $0x18] sm:$0xff] }
 0x4c9   :  { %v1794_v4 = vld [vmem:[#allocation2] sm:$0xff]  ;;  %2092 = vmatprep.subr.bf16.mxu0 %v1795_v45  ;;  %2318 = vmatprep.subr.bf16.mxu1 %v1797_v53  ;;  %v1796_v37 = vld [vmem:[#allocation2 + $0x10] sm:$0xff]  ;;  %v1803_v51 = vld [vmem:[#allocation2 + $0x48] sm:$0xff] }
 0x4ca   :  { %v1805_v52 = vld [vmem:[#allocation2 + $0x58] sm:$0xff]  ;;  %2093 = vmatpush1.bf16.msra.mxu0 %v1794_v4  ;;  %2319 = vmatpush1.bf16.msra.mxu1 %v1796_v37  ;;  %v1802_v9 = vld [vmem:[#allocation2 + $0x40] sm:$0xff]  ;;  %v1804_v55 = vld [vmem:[#allocation2 + $0x50] sm:$0xff] }
 0x4cb   :  { %2094 = vmatprep.subr.bf16.mxu0 %v1803_v51  ;;  %2320 = vmatprep.subr.bf16.mxu1 %v1805_v52  ;;  %v1811_v48 = vld [vmem:[#allocation2 + $0x88] sm:$0xff]  ;;  %v1813_v43 = vld [vmem:[#allocation2 + $0x98] sm:$0xff]  ;;  %v1810_v41 = vld [vmem:[#allocation2 + $0x80] sm:$0xff] }
 0x4cc   :  { %v1812_v1 = vld [vmem:[#allocation2 + $0x90] sm:$0xff]  ;;  %v1819_v17 = vld [vmem:[#allocation2 + $0xc8] sm:$0xff]  ;;  %v1821_v63 = vld [vmem:[#allocation2 + $0xd8] sm:$0xff] }
 0x4cd   :  { %v1818_v12 = vld [vmem:[#allocation2 + $0xc0] sm:$0xff]  ;;  %v1820_v16 = vld [vmem:[#allocation2 + $0xd0] sm:$0xff]  ;;  %v1827_v60 = vld [vmem:[#allocation2 + $0x108] sm:$0xff] }
 0x4ce   :  { %2095 = vmatpush1.bf16.msra.mxu0 %v1802_v9  ;;  %2321 = vmatpush1.bf16.msra.mxu1 %v1804_v55  ;;  %v1829_v8 = vld [vmem:[#allocation2 + $0x118] sm:$0xff]  ;;  %v1826_v15 = vld [vmem:[#allocation2 + $0x100] sm:$0xff]  ;;  %v1828_v61 = vld [vmem:[#allocation2 + $0x110] sm:$0xff] }
 0x4cf   :  { %2096 = vmatprep.subr.bf16.mxu0 %v1811_v48  ;;  %2322 = vmatprep.subr.bf16.mxu1 %v1813_v43  ;;  %v1835_v24 = vld [vmem:[#allocation2 + $0x148] sm:$0xff]  ;;  %v1837_v44 = vld [vmem:[#allocation2 + $0x158] sm:$0xff]  ;;  %v1834_v45 = vld [vmem:[#allocation2 + $0x140] sm:$0xff] }
 0x4d0   :  { %v1836_v53 = vld [vmem:[#allocation2 + $0x150] sm:$0xff]  ;;  %v1843_v4 = vld [vmem:[#allocation2 + $0x188] sm:$0xff]  ;;  %v1845_v37 = vld [vmem:[#allocation2 + $0x198] sm:$0xff] }
 0x4d1   :  { %v1842_v51 = vld [vmem:[#allocation2 + $0x180] sm:$0xff]  ;;  %v1844_v52 = vld [vmem:[#allocation2 + $0x190] sm:$0xff]  ;;  %v1851_v9 = vld [vmem:[#allocation2 + $0x1c8] sm:$0xff] }
 0x4d2   :  { %2097 = vmatpush1.bf16.msra.mxu0 %v1810_v41  ;;  %2323 = vmatpush1.bf16.msra.mxu1 %v1812_v1  ;;  %v1853_v55 = vld [vmem:[#allocation2 + $0x1d8] sm:$0xff]  ;;  %v1850_v48 = vld [vmem:[#allocation2 + $0x1c0] sm:$0xff]  ;;  %v1852_v43 = vld [vmem:[#allocation2 + $0x1d0] sm:$0xff] }
 0x4d3   :  { %2098 = vmatprep.subr.bf16.mxu0 %v1819_v17  ;;  %2324 = vmatprep.subr.bf16.mxu1 %v1821_v63  ;;  %v1859_v41 = vld [vmem:[#allocation2 + $0x208] sm:$0xff]  ;;  %v1861_v1 = vld [vmem:[#allocation2 + $0x218] sm:$0xff]  ;;  %v1858_v17 = vld [vmem:[#allocation2 + $0x200] sm:$0xff] }
 0x4d4   :  { %v1860_v63 = vld [vmem:[#allocation2 + $0x210] sm:$0xff] }
 0x4d6   :  { %2099 = vmatpush1.bf16.msra.mxu0 %v1818_v12  ;;  %2325 = vmatpush1.bf16.msra.mxu1 %v1820_v16  ;;  %v1867_v12 = vld [vmem:[#allocation2 + $0x248] sm:$0xff]  ;;  %v1869_v16 = vld [vmem:[#allocation2 + $0x258] sm:$0xff] }
 0x4d7   :  { %2100 = vmatprep.subr.bf16.mxu0 %v1827_v60  ;;  %2326 = vmatprep.subr.bf16.mxu1 %v1829_v8  ;;  %v1866_v60 = vld [vmem:[#allocation2 + $0x240] sm:$0xff]  ;;  %v1868_v8 = vld [vmem:[#allocation2 + $0x250] sm:$0xff] }
 0x4da   :  { %2101 = vmatpush1.bf16.msra.mxu0 %v1826_v15  ;;  %2327 = vmatpush1.bf16.msra.mxu1 %v1828_v61  ;;  %v1875_v15 = vld [vmem:[#allocation2 + $0x288] sm:$0xff]  ;;  %v1877_v61 = vld [vmem:[#allocation2 + $0x298] sm:$0xff] }
 0x4db   :  { %2102 = vmatprep.subr.bf16.mxu0 %v1835_v24  ;;  %2328 = vmatprep.subr.bf16.mxu1 %v1837_v44  ;;  %v1874_v24 = vld [vmem:[#allocation2 + $0x280] sm:$0xff]  ;;  %v1876_v44 = vld [vmem:[#allocation2 + $0x290] sm:$0xff] }
 0x4de   :  { %2103 = vmatpush1.bf16.msra.mxu0 %v1834_v45  ;;  %2329 = vmatpush1.bf16.msra.mxu1 %v1836_v53  ;;  %v1883_v45 = vld [vmem:[#allocation2 + $0x2c8] sm:$0xff]  ;;  %v1885_v53 = vld [vmem:[#allocation2 + $0x2d8] sm:$0xff] }
 0x4df   :  { %2104 = vmatprep.subr.bf16.mxu0 %v1843_v4  ;;  %2330 = vmatprep.subr.bf16.mxu1 %v1845_v37  ;;  %v1882_v4 = vld [vmem:[#allocation2 + $0x2c0] sm:$0xff]  ;;  %v1884_v37 = vld [vmem:[#allocation2 + $0x2d0] sm:$0xff] }
 0x4e2   :  { %2105 = vmatpush1.bf16.msra.mxu0 %v1842_v51  ;;  %2331 = vmatpush1.bf16.msra.mxu1 %v1844_v52  ;;  %v1891_v51 = vld [vmem:[#allocation2 + $0x308] sm:$0xff]  ;;  %v1893_v52 = vld [vmem:[#allocation2 + $0x318] sm:$0xff] }
 0x4e3   :  { %2106 = vmatprep.subr.bf16.mxu0 %v1851_v9  ;;  %2332 = vmatprep.subr.bf16.mxu1 %v1853_v55  ;;  %v1890_v9 = vld [vmem:[#allocation2 + $0x300] sm:$0xff]  ;;  %v1892_v55 = vld [vmem:[#allocation2 + $0x310] sm:$0xff] }
 0x4e6   :  { %2107 = vmatpush1.bf16.msra.mxu0 %v1850_v48  ;;  %2333 = vmatpush1.bf16.msra.mxu1 %v1852_v43  ;;  %v1899_v48 = vld [vmem:[#allocation2 + $0x348] sm:$0xff]  ;;  %v1901_v43 = vld [vmem:[#allocation2 + $0x358] sm:$0xff] }
 0x4e7   :  { %2108 = vmatprep.subr.bf16.mxu0 %v1859_v41  ;;  %2334 = vmatprep.subr.bf16.mxu1 %v1861_v1  ;;  %v1898_v41 = vld [vmem:[#allocation2 + $0x340] sm:$0xff]  ;;  %v1900_v1 = vld [vmem:[#allocation2 + $0x350] sm:$0xff] }
 0x4ea   :  { %2109 = vmatpush1.bf16.msra.mxu0 %v1858_v17  ;;  %2335 = vmatpush1.bf16.msra.mxu1 %v1860_v63  ;;  %v1907_v17 = vld [vmem:[#allocation2 + $0x388] sm:$0xff]  ;;  %v1909_v63 = vld [vmem:[#allocation2 + $0x398] sm:$0xff] }
 0x4eb   :  { %2110 = vmatprep.subr.bf16.mxu0 %v1867_v12  ;;  %2336 = vmatprep.subr.bf16.mxu1 %v1869_v16  ;;  %v1906_v12 = vld [vmem:[#allocation2 + $0x380] sm:$0xff]  ;;  %v1908_v16 = vld [vmem:[#allocation2 + $0x390] sm:$0xff] }
 0x4ee   :  { %2111 = vmatpush1.bf16.msra.mxu0 %v1866_v60  ;;  %2337 = vmatpush1.bf16.msra.mxu1 %v1868_v8  ;;  %v1915_v60 = vld [vmem:[#allocation2 + $0x3c8] sm:$0xff]  ;;  %v1917_v8 = vld [vmem:[#allocation2 + $0x3d8] sm:$0xff] }
 0x4ef   :  { %2112 = vmatprep.subr.bf16.mxu0 %v1875_v15  ;;  %2338 = vmatprep.subr.bf16.mxu1 %v1877_v61  ;;  %v1914_v15 = vld [vmem:[#allocation2 + $0x3c0] sm:$0xff]  ;;  %v1916_v61 = vld [vmem:[#allocation2 + $0x3d0] sm:$0xff] }
 0x4f2   :  { %2113 = vmatpush1.bf16.msra.mxu0 %v1874_v24  ;;  %2339 = vmatpush1.bf16.msra.mxu1 %v1876_v44  ;;  %v1923_v24 = vld [vmem:[#allocation2 + $0x408] sm:$0xff]  ;;  %v1925_v44 = vld [vmem:[#allocation2 + $0x418] sm:$0xff] }
 0x4f3   :  { %2114 = vmatprep.subr.bf16.mxu0 %v1883_v45  ;;  %2340 = vmatprep.subr.bf16.mxu1 %v1885_v53  ;;  %v1922_v45 = vld [vmem:[#allocation2 + $0x400] sm:$0xff]  ;;  %v1924_v53 = vld [vmem:[#allocation2 + $0x410] sm:$0xff] }
 0x4f6   :  { %2115 = vmatpush1.bf16.msra.mxu0 %v1882_v4  ;;  %2341 = vmatpush1.bf16.msra.mxu1 %v1884_v37  ;;  %v1931_v4 = vld [vmem:[#allocation2 + $0x448] sm:$0xff]  ;;  %v1933_v37 = vld [vmem:[#allocation2 + $0x458] sm:$0xff] }
 0x4f7   :  { %2116 = vmatprep.subr.bf16.mxu0 %v1891_v51  ;;  %2342 = vmatprep.subr.bf16.mxu1 %v1893_v52  ;;  %v1930_v51 = vld [vmem:[#allocation2 + $0x440] sm:$0xff]  ;;  %v1932_v52 = vld [vmem:[#allocation2 + $0x450] sm:$0xff] }
 0x4fa   :  { %2117 = vmatpush1.bf16.msra.mxu0 %v1890_v9  ;;  %2343 = vmatpush1.bf16.msra.mxu1 %v1892_v55  ;;  %v1939_v9 = vld [vmem:[#allocation2 + $0x488] sm:$0xff]  ;;  %v1941_v55 = vld [vmem:[#allocation2 + $0x498] sm:$0xff] }
 0x4fb   :  { %2118 = vmatprep.subr.bf16.mxu0 %v1899_v48  ;;  %2344 = vmatprep.subr.bf16.mxu1 %v1901_v43  ;;  %v1938_v48 = vld [vmem:[#allocation2 + $0x480] sm:$0xff]  ;;  %v1940_v43 = vld [vmem:[#allocation2 + $0x490] sm:$0xff] }
 0x4fe   :  { %2119 = vmatpush1.bf16.msra.mxu0 %v1898_v41  ;;  %2345 = vmatpush1.bf16.msra.mxu1 %v1900_v1  ;;  %v1947_v41 = vld [vmem:[#allocation2 + $0x4c8] sm:$0xff]  ;;  %v1949_v1 = vld [vmem:[#allocation2 + $0x4d8] sm:$0xff] }
 0x4ff   :  { %2120 = vmatprep.subr.bf16.mxu0 %v1907_v17  ;;  %2346 = vmatprep.subr.bf16.mxu1 %v1909_v63  ;;  %v1946_v17 = vld [vmem:[#allocation2 + $0x4c0] sm:$0xff]  ;;  %v1948_v63 = vld [vmem:[#allocation2 + $0x4d0] sm:$0xff] }
 0x502   :  { %2121 = vmatpush1.bf16.msra.mxu0 %v1906_v12  ;;  %2347 = vmatpush1.bf16.msra.mxu1 %v1908_v16  ;;  %v1955_v12 = vld [vmem:[#allocation2 + $0x508] sm:$0xff]  ;;  %v1957_v16 = vld [vmem:[#allocation2 + $0x518] sm:$0xff] }
 0x503   :  { %2122 = vmatprep.subr.bf16.mxu0 %v1915_v60  ;;  %2348 = vmatprep.subr.bf16.mxu1 %v1917_v8  ;;  %v1954_v60 = vld [vmem:[#allocation2 + $0x500] sm:$0xff]  ;;  %v1956_v8 = vld [vmem:[#allocation2 + $0x510] sm:$0xff] }
 0x506   :  { %2123 = vmatpush1.bf16.msra.mxu0 %v1914_v15  ;;  %2349 = vmatpush1.bf16.msra.mxu1 %v1916_v61  ;;  %v1963_v15 = vld [vmem:[#allocation2 + $0x548] sm:$0xff]  ;;  %v1965_v61 = vld [vmem:[#allocation2 + $0x558] sm:$0xff] }
 0x507   :  { %2205 = vmatprep.subr.bf16.mxu0 %v1923_v24  ;;  %2431 = vmatprep.subr.bf16.mxu1 %v1925_v44  ;;  %v1962_v24 = vld [vmem:[#allocation2 + $0x540] sm:$0xff]  ;;  %v1964_v44 = vld [vmem:[#allocation2 + $0x550] sm:$0xff] }
 0x509   :  { %2125 = vmatmul.mubr.bf16.vlgmr.msra.gmra.mrb[48].mxu0 %v12130_v20  ;;  %2351 = vmatmul.mubr.bf16.vlgmr.msra.gmra.mrb[80].mxu1 %v12130_v20 }
 0x50a   :  { %2206 = vmatpush1.bf16.msra.mxu0 %v1922_v45  ;;  %2432 = vmatpush1.bf16.msra.mxu1 %v1924_v53  ;;  %v1971_v45 = vld [vmem:[#allocation2 + $0x588] sm:$0xff]  ;;  %v1973_v53 = vld [vmem:[#allocation2 + $0x598] sm:$0xff] }
 0x50b   :  { %2207 = vmatprep.subr.bf16.mxu0 %v1931_v4  ;;  %2433 = vmatprep.subr.bf16.mxu1 %v1933_v37  ;;  %v1970_v4 = vld [vmem:[#allocation2 + $0x580] sm:$0xff]  ;;  %v1972_v37 = vld [vmem:[#allocation2 + $0x590] sm:$0xff] }
 0x50c   :  { %2134 = vmatprep.mubr.bf16.mxu0 %v12150_v26  ;;  %2360 = vmatprep.mubr.bf16.mxu1 %v12150_v26 }
 0x50e   :  { %2208 = vmatpush1.bf16.msra.mxu0 %v1930_v51  ;;  %2434 = vmatpush1.bf16.msra.mxu1 %v1932_v52  ;;  %v1979_v51 = vld [vmem:[#allocation2 + $0x5c8] sm:$0xff]  ;;  %v1981_v52 = vld [vmem:[#allocation2 + $0x5d8] sm:$0xff] }
 0x50f   :  { %2209 = vmatprep.subr.bf16.mxu0 %v1939_v9  ;;  %2435 = vmatprep.subr.bf16.mxu1 %v1941_v55  ;;  %v1978_v9 = vld [vmem:[#allocation2 + $0x5c0] sm:$0xff]  ;;  %v1980_v55 = vld [vmem:[#allocation2 + $0x5d0] sm:$0xff] }
 0x511   :  { %2135 = vmatmul.mubr.bf16.gmra.mrb[52].mxu0 %v12146_v7  ;;  %2361 = vmatmul.mubr.bf16.gmra.mrb[84].mxu1 %v12146_v7 }
 0x512   :  { %2210 = vmatpush1.bf16.msra.mxu0 %v1938_v48  ;;  %2436 = vmatpush1.bf16.msra.mxu1 %v1940_v43  ;;  %v1987_v48 = vld [vmem:[#allocation2 + $0x608] sm:$0xff]  ;;  %v1989_v43 = vld [vmem:[#allocation2 + $0x618] sm:$0xff] }
 0x513   :  { %2211 = vmatprep.subr.bf16.mxu0 %v1947_v41  ;;  %2437 = vmatprep.subr.bf16.mxu1 %v1949_v1  ;;  %v1986_v41 = vld [vmem:[#allocation2 + $0x600] sm:$0xff]  ;;  %v1988_v1 = vld [vmem:[#allocation2 + $0x610] sm:$0xff] }
 0x514   :  { %2144 = vmatprep.mubr.bf16.mxu0 %v12166_v54  ;;  %2370 = vmatprep.mubr.bf16.mxu1 %v12166_v54 }
 0x516   :  { %2212 = vmatpush1.bf16.msra.mxu0 %v1946_v17  ;;  %2438 = vmatpush1.bf16.msra.mxu1 %v1948_v63  ;;  %v1995_v17 = vld [vmem:[#allocation2 + $0x648] sm:$0xff]  ;;  %v1997_v63 = vld [vmem:[#allocation2 + $0x658] sm:$0xff] }
 0x517   :  { %2213 = vmatprep.subr.bf16.mxu0 %v1955_v12  ;;  %2439 = vmatprep.subr.bf16.mxu1 %v1957_v16  ;;  %v1994_v12 = vld [vmem:[#allocation2 + $0x640] sm:$0xff]  ;;  %v1996_v16 = vld [vmem:[#allocation2 + $0x650] sm:$0xff] }
 0x519   :  { %2145 = vmatmul.mubr.bf16.gmra.mrb[56].mxu0 %v12162_v47  ;;  %2371 = vmatmul.mubr.bf16.gmra.mrb[88].mxu1 %v12162_v47 }
 0x51a   :  { %2214 = vmatpush1.bf16.msra.mxu0 %v1954_v60  ;;  %2440 = vmatpush1.bf16.msra.mxu1 %v1956_v8  ;;  %v2003_v60 = vld [vmem:[#allocation2 + $0x688] sm:$0xff]  ;;  %v2005_v8 = vld [vmem:[#allocation2 + $0x698] sm:$0xff] }
 0x51b   :  { %2215 = vmatprep.subr.bf16.mxu0 %v1963_v15  ;;  %2441 = vmatprep.subr.bf16.mxu1 %v1965_v61  ;;  %v2002_v15 = vld [vmem:[#allocation2 + $0x680] sm:$0xff]  ;;  %v2004_v61 = vld [vmem:[#allocation2 + $0x690] sm:$0xff] }
 0x51c   :  { %2154 = vmatprep.mubr.bf16.mxu0 %v12182_v62  ;;  %2380 = vmatprep.mubr.bf16.mxu1 %v12182_v62 }
 0x51e   :  { %2216 = vmatpush1.bf16.msra.mxu0 %v1962_v24  ;;  %2442 = vmatpush1.bf16.msra.mxu1 %v1964_v44  ;;  %v2011_v24 = vld [vmem:[#allocation2 + $0x6c8] sm:$0xff]  ;;  %v2013_v44 = vld [vmem:[#allocation2 + $0x6d8] sm:$0xff] }
 0x51f   :  { %2217 = vmatprep.subr.bf16.mxu0 %v1971_v45  ;;  %2443 = vmatprep.subr.bf16.mxu1 %v1973_v53  ;;  %v2010_v45 = vld [vmem:[#allocation2 + $0x6c0] sm:$0xff]  ;;  %v2012_v53 = vld [vmem:[#allocation2 + $0x6d0] sm:$0xff] }
 0x521   :  { %2155 = vmatmul.mubr.bf16.gmra.mrb[60].mxu0 %v12178_v32  ;;  %2381 = vmatmul.mubr.bf16.gmra.mrb[92].mxu1 %v12178_v32 }
 0x522   :  { %2218 = vmatpush1.bf16.msra.mxu0 %v1970_v4  ;;  %2444 = vmatpush1.bf16.msra.mxu1 %v1972_v37  ;;  %v2019_v4 = vld [vmem:[#allocation2 + $0x708] sm:$0xff]  ;;  %v2021_v37 = vld [vmem:[#allocation2 + $0x718] sm:$0xff] }
 0x523   :  { %2219 = vmatprep.subr.bf16.mxu0 %v1979_v51  ;;  %2445 = vmatprep.subr.bf16.mxu1 %v1981_v52  ;;  %v2018_v51 = vld [vmem:[#allocation2 + $0x700] sm:$0xff]  ;;  %v2020_v52 = vld [vmem:[#allocation2 + $0x710] sm:$0xff] }
 0x524   :  { %2164 = vmatprep.mubr.bf16.mxu0 %v12198_v2  ;;  %2390 = vmatprep.mubr.bf16.mxu1 %v12198_v2 }
 0x526   :  { %2220 = vmatpush1.bf16.msra.mxu0 %v1978_v9  ;;  %2446 = vmatpush1.bf16.msra.mxu1 %v1980_v55  ;;  %v2027_v9 = vld [vmem:[#allocation2 + $0x748] sm:$0xff]  ;;  %v2029_v55 = vld [vmem:[#allocation2 + $0x758] sm:$0xff] }
 0x527   :  { %2221 = vmatprep.subr.bf16.mxu0 %v1987_v48  ;;  %2447 = vmatprep.subr.bf16.mxu1 %v1989_v43  ;;  %v2026_v48 = vld [vmem:[#allocation2 + $0x740] sm:$0xff]  ;;  %v2028_v43 = vld [vmem:[#allocation2 + $0x750] sm:$0xff] }
 0x529   :  { %2165 = vmatmul.mubr.bf16.gmra.mrb[64].mxu0 %v12194_v58  ;;  %2391 = vmatmul.mubr.bf16.gmra.mrb[96].mxu1 %v12194_v58 }
 0x52a   :  { %2222 = vmatpush1.bf16.msra.mxu0 %v1986_v41  ;;  %2448 = vmatpush1.bf16.msra.mxu1 %v1988_v1  ;;  %v2035_v41 = vld [vmem:[#allocation2 + $0x788] sm:$0xff]  ;;  %v2037_v1 = vld [vmem:[#allocation2 + $0x798] sm:$0xff] }
 0x52b   :  { %2223 = vmatprep.subr.bf16.mxu0 %v1995_v17  ;;  %2449 = vmatprep.subr.bf16.mxu1 %v1997_v63  ;;  %v2034_v17 = vld [vmem:[#allocation2 + $0x780] sm:$0xff]  ;;  %v2036_v63 = vld [vmem:[#allocation2 + $0x790] sm:$0xff] }
 0x52c   :  { %2174 = vmatprep.mubr.bf16.mxu0 %v12214_v31  ;;  %2400 = vmatprep.mubr.bf16.mxu1 %v12214_v31 }
 0x52e   :  { %2224 = vmatpush1.bf16.msra.mxu0 %v1994_v12  ;;  %2450 = vmatpush1.bf16.msra.mxu1 %v1996_v16  ;;  %v2043_v12 = vld [vmem:[#allocation2 + $0x7c8] sm:$0xff]  ;;  %v2045_v16 = vld [vmem:[#allocation2 + $0x7d8] sm:$0xff] }
 0x52f   :  { %2225 = vmatprep.subr.bf16.mxu0 %v2003_v60  ;;  %2451 = vmatprep.subr.bf16.mxu1 %v2005_v8  ;;  %v2042_v60 = vld [vmem:[#allocation2 + $0x7c0] sm:$0xff]  ;;  %v2044_v8 = vld [vmem:[#allocation2 + $0x7d0] sm:$0xff] }
 0x531   :  { %2175 = vmatmul.mubr.bf16.gmra.mrb[68].mxu0 %v12210_v40  ;;  %2401 = vmatmul.mubr.bf16.gmra.mrb[100].mxu1 %v12210_v40 }
 0x532   :  { %2226 = vmatpush1.bf16.msra.mxu0 %v2002_v15  ;;  %2452 = vmatpush1.bf16.msra.mxu1 %v2004_v61  ;;  %v1799_v15 = vld [vmem:[#allocation2 + $0x28] sm:$0xff]  ;;  %v1801_v61 = vld [vmem:[#allocation2 + $0x38] sm:$0xff] }
 0x533   :  { %2227 = vmatprep.subr.bf16.mxu0 %v2011_v24  ;;  %2453 = vmatprep.subr.bf16.mxu1 %v2013_v44  ;;  %v1798_v24 = vld [vmem:[#allocation2 + $0x20] sm:$0xff]  ;;  %v1800_v44 = vld [vmem:[#allocation2 + $0x30] sm:$0xff] }
 0x534   :  { %2184 = vmatprep.mubr.bf16.mxu0 %v12230_v56  ;;  %2410 = vmatprep.mubr.bf16.mxu1 %v12230_v56 }
 0x536   :  { %2228 = vmatpush1.bf16.msra.mxu0 %v2010_v45  ;;  %2454 = vmatpush1.bf16.msra.mxu1 %v2012_v53  ;;  %v1807_v45 = vld [vmem:[#allocation2 + $0x68] sm:$0xff]  ;;  %v1809_v53 = vld [vmem:[#allocation2 + $0x78] sm:$0xff] }
 0x537   :  { %2229 = vmatprep.subr.bf16.mxu0 %v2019_v4  ;;  %2455 = vmatprep.subr.bf16.mxu1 %v2021_v37  ;;  %v1806_v4 = vld [vmem:[#allocation2 + $0x60] sm:$0xff]  ;;  %v1808_v37 = vld [vmem:[#allocation2 + $0x70] sm:$0xff] }
 0x539   :  { %2185 = vmatmul.mubr.bf16.gmra.mrb[72].mxu0 %v12226_v11  ;;  %2411 = vmatmul.mubr.bf16.gmra.mrb[104].mxu1 %v12226_v11 }
 0x53a   :  { %2230 = vmatpush1.bf16.msra.mxu0 %v2018_v51  ;;  %2456 = vmatpush1.bf16.msra.mxu1 %v2020_v52  ;;  %v1815_v51 = vld [vmem:[#allocation2 + $0xa8] sm:$0xff]  ;;  %v1817_v52 = vld [vmem:[#allocation2 + $0xb8] sm:$0xff] }
 0x53b   :  { %2231 = vmatprep.subr.bf16.mxu0 %v2027_v9  ;;  %2457 = vmatprep.subr.bf16.mxu1 %v2029_v55  ;;  %v1814_v9 = vld [vmem:[#allocation2 + $0xa0] sm:$0xff]  ;;  %v1816_v55 = vld [vmem:[#allocation2 + $0xb0] sm:$0xff] }
 0x53c   :  { %2194 = vmatprep.mubr.bf16.mxu0 %v12246_v38  ;;  %2420 = vmatprep.mubr.bf16.mxu1 %v12246_v38 }
 0x53e   :  { %2232 = vmatpush1.bf16.msra.mxu0 %v2026_v48  ;;  %2458 = vmatpush1.bf16.msra.mxu1 %v2028_v43  ;;  %v1823_v48 = vld [vmem:[#allocation2 + $0xe8] sm:$0xff]  ;;  %v1825_v43 = vld [vmem:[#allocation2 + $0xf8] sm:$0xff] }
 0x53f   :  { %2233 = vmatprep.subr.bf16.mxu0 %v2035_v41  ;;  %2459 = vmatprep.subr.bf16.mxu1 %v2037_v1  ;;  %v1822_v41 = vld [vmem:[#allocation2 + $0xe0] sm:$0xff]  ;;  %v1824_v1 = vld [vmem:[#allocation2 + $0xf0] sm:$0xff] }
 0x541   :  { %2195 = vmatmul.mubr.bf16.gmra.mrb[76].mxu0 %v12242_v49  ;;  %2421 = vmatmul.mubr.bf16.gmra.mrb[108].mxu1 %v12242_v49 }
 0x542   :  { %2234 = vmatpush1.bf16.msra.mxu0 %v2034_v17  ;;  %2460 = vmatpush1.bf16.msra.mxu1 %v2036_v63  ;;  %v1831_v17 = vld [vmem:[#allocation2 + $0x128] sm:$0xff]  ;;  %v1833_v63 = vld [vmem:[#allocation2 + $0x138] sm:$0xff] }
 0x543   :  { %2235 = vmatprep.subr.bf16.mxu0 %v2043_v12  ;;  %2461 = vmatprep.subr.bf16.mxu1 %v2045_v16  ;;  %v1830_v12 = vld [vmem:[#allocation2 + $0x120] sm:$0xff]  ;;  %v1832_v16 = vld [vmem:[#allocation2 + $0x130] sm:$0xff] }
 0x544   :  { %2237 = vmatprep.mubr.bf16.mxu0 %v12136_v21  ;;  %2463 = vmatprep.mubr.bf16.mxu1 %v12136_v21 }
 0x546   :  { %2236 = vmatpush1.bf16.msra.mxu0 %v2042_v60  ;;  %2462 = vmatpush1.bf16.msra.mxu1 %v2044_v8  ;;  %v1839_v60 = vld [vmem:[#allocation2 + $0x168] sm:$0xff]  ;;  %v1841_v8 = vld [vmem:[#allocation2 + $0x178] sm:$0xff] }
 0x547   :  { %2544 = vmatprep.subr.bf16.mxu0 %v1799_v15  ;;  %2770 = vmatprep.subr.bf16.mxu1 %v1801_v61  ;;  %v1838_v15 = vld [vmem:[#allocation2 + $0x160] sm:$0xff]  ;;  %v1840_v61 = vld [vmem:[#allocation2 + $0x170] sm:$0xff] }
 0x549   :  { %2238 = vmatmul.mubr.bf16.vlgmr.msra.gmra.mrb[48].mxu0 %v12132_v27  ;;  %2464 = vmatmul.mubr.bf16.vlgmr.msra.gmra.mrb[80].mxu1 %v12132_v27 }
 0x54a   :  { %2545 = vmatpush1.bf16.msra.mxu0 %v1798_v24  ;;  %2771 = vmatpush1.bf16.msra.mxu1 %v1800_v44  ;;  %v1847_v24 = vld [vmem:[#allocation2 + $0x1a8] sm:$0xff]  ;;  %v1849_v44 = vld [vmem:[#allocation2 + $0x1b8] sm:$0xff] }
 0x54b   :  { %2546 = vmatprep.subr.bf16.mxu0 %v1807_v45  ;;  %2772 = vmatprep.subr.bf16.mxu1 %v1809_v53  ;;  %v1846_v45 = vld [vmem:[#allocation2 + $0x1a0] sm:$0xff]  ;;  %v1848_v53 = vld [vmem:[#allocation2 + $0x1b0] sm:$0xff] }
 0x54c   :  { %2247 = vmatprep.mubr.bf16.mxu0 %v12152_v29  ;;  %2473 = vmatprep.mubr.bf16.mxu1 %v12152_v29 }
 0x54e   :  { %2547 = vmatpush1.bf16.msra.mxu0 %v1806_v4  ;;  %2773 = vmatpush1.bf16.msra.mxu1 %v1808_v37  ;;  %v1855_v4 = vld [vmem:[#allocation2 + $0x1e8] sm:$0xff]  ;;  %v1857_v37 = vld [vmem:[#allocation2 + $0x1f8] sm:$0xff] }
 0x54f   :  { %2548 = vmatprep.subr.bf16.mxu0 %v1815_v51  ;;  %2774 = vmatprep.subr.bf16.mxu1 %v1817_v52  ;;  %v1854_v51 = vld [vmem:[#allocation2 + $0x1e0] sm:$0xff]  ;;  %v1856_v52 = vld [vmem:[#allocation2 + $0x1f0] sm:$0xff] }
 0x551   :  { %2248 = vmatmul.mubr.bf16.gmra.mrb[52].mxu0 %v12148_v25  ;;  %2474 = vmatmul.mubr.bf16.gmra.mrb[84].mxu1 %v12148_v25 }
 0x552   :  { %2549 = vmatpush1.bf16.msra.mxu0 %v1814_v9  ;;  %2775 = vmatpush1.bf16.msra.mxu1 %v1816_v55  ;;  %v1863_v9 = vld [vmem:[#allocation2 + $0x228] sm:$0xff]  ;;  %v1865_v55 = vld [vmem:[#allocation2 + $0x238] sm:$0xff] }
 0x553   :  { %2550 = vmatprep.subr.bf16.mxu0 %v1823_v48  ;;  %2776 = vmatprep.subr.bf16.mxu1 %v1825_v43  ;;  %v1862_v48 = vld [vmem:[#allocation2 + $0x220] sm:$0xff]  ;;  %v1864_v43 = vld [vmem:[#allocation2 + $0x230] sm:$0xff] }
 0x554   :  { %2257 = vmatprep.mubr.bf16.mxu0 %v12168_v59  ;;  %2483 = vmatprep.mubr.bf16.mxu1 %v12168_v59 }
 0x556   :  { %2551 = vmatpush1.bf16.msra.mxu0 %v1822_v41  ;;  %2777 = vmatpush1.bf16.msra.mxu1 %v1824_v1  ;;  %v1871_v41 = vld [vmem:[#allocation2 + $0x268] sm:$0xff]  ;;  %v1873_v1 = vld [vmem:[#allocation2 + $0x278] sm:$0xff] }
 0x557   :  { %2552 = vmatprep.subr.bf16.mxu0 %v1831_v17  ;;  %2778 = vmatprep.subr.bf16.mxu1 %v1833_v63  ;;  %v1870_v17 = vld [vmem:[#allocation2 + $0x260] sm:$0xff]  ;;  %v1872_v63 = vld [vmem:[#allocation2 + $0x270] sm:$0xff] }
 0x559   :  { %2258 = vmatmul.mubr.bf16.gmra.mrb[56].mxu0 %v12164_v46  ;;  %2484 = vmatmul.mubr.bf16.gmra.mrb[88].mxu1 %v12164_v46 }
 0x55a   :  { %2553 = vmatpush1.bf16.msra.mxu0 %v1830_v12  ;;  %2779 = vmatpush1.bf16.msra.mxu1 %v1832_v16  ;;  %v1879_v12 = vld [vmem:[#allocation2 + $0x2a8] sm:$0xff]  ;;  %v1881_v16 = vld [vmem:[#allocation2 + $0x2b8] sm:$0xff] }
 0x55b   :  { %2554 = vmatprep.subr.bf16.mxu0 %v1839_v60  ;;  %2780 = vmatprep.subr.bf16.mxu1 %v1841_v8  ;;  %v1878_v60 = vld [vmem:[#allocation2 + $0x2a0] sm:$0xff]  ;;  %v1880_v8 = vld [vmem:[#allocation2 + $0x2b0] sm:$0xff] }
 0x55c   :  { %2267 = vmatprep.mubr.bf16.mxu0 %v12184_v0  ;;  %2493 = vmatprep.mubr.bf16.mxu1 %v12184_v0 }
 0x55e   :  { %2555 = vmatpush1.bf16.msra.mxu0 %v1838_v15  ;;  %2781 = vmatpush1.bf16.msra.mxu1 %v1840_v61  ;;  %v1887_v15 = vld [vmem:[#allocation2 + $0x2e8] sm:$0xff]  ;;  %v1889_v61 = vld [vmem:[#allocation2 + $0x2f8] sm:$0xff] }
 0x55f   :  { %2556 = vmatprep.subr.bf16.mxu0 %v1847_v24  ;;  %2782 = vmatprep.subr.bf16.mxu1 %v1849_v44  ;;  %v1886_v24 = vld [vmem:[#allocation2 + $0x2e0] sm:$0xff]  ;;  %v1888_v44 = vld [vmem:[#allocation2 + $0x2f0] sm:$0xff] }
 0x561   :  { %2268 = vmatmul.mubr.bf16.gmra.mrb[60].mxu0 %v12180_v14  ;;  %2494 = vmatmul.mubr.bf16.gmra.mrb[92].mxu1 %v12180_v14 }
 0x562   :  { %2557 = vmatpush1.bf16.msra.mxu0 %v1846_v45  ;;  %2783 = vmatpush1.bf16.msra.mxu1 %v1848_v53  ;;  %v1895_v45 = vld [vmem:[#allocation2 + $0x328] sm:$0xff]  ;;  %v1897_v53 = vld [vmem:[#allocation2 + $0x338] sm:$0xff] }
 0x563   :  { %2558 = vmatprep.subr.bf16.mxu0 %v1855_v4  ;;  %2784 = vmatprep.subr.bf16.mxu1 %v1857_v37  ;;  %v1894_v4 = vld [vmem:[#allocation2 + $0x320] sm:$0xff]  ;;  %v1896_v37 = vld [vmem:[#allocation2 + $0x330] sm:$0xff] }
 0x564   :  { %2277 = vmatprep.mubr.bf16.mxu0 %v12200_v10  ;;  %2503 = vmatprep.mubr.bf16.mxu1 %v12200_v10 }
 0x566   :  { %2559 = vmatpush1.bf16.msra.mxu0 %v1854_v51  ;;  %2785 = vmatpush1.bf16.msra.mxu1 %v1856_v52  ;;  %v1903_v51 = vld [vmem:[#allocation2 + $0x368] sm:$0xff]  ;;  %v1905_v52 = vld [vmem:[#allocation2 + $0x378] sm:$0xff] }
 0x567   :  { %2560 = vmatprep.subr.bf16.mxu0 %v1863_v9  ;;  %2786 = vmatprep.subr.bf16.mxu1 %v1865_v55  ;;  %v1902_v9 = vld [vmem:[#allocation2 + $0x360] sm:$0xff]  ;;  %v1904_v55 = vld [vmem:[#allocation2 + $0x370] sm:$0xff] }
 0x569   :  { %2278 = vmatmul.mubr.bf16.gmra.mrb[64].mxu0 %v12196_v33  ;;  %2504 = vmatmul.mubr.bf16.gmra.mrb[96].mxu1 %v12196_v33 }
 0x56a   :  { %2561 = vmatpush1.bf16.msra.mxu0 %v1862_v48  ;;  %2787 = vmatpush1.bf16.msra.mxu1 %v1864_v43  ;;  %v1911_v48 = vld [vmem:[#allocation2 + $0x3a8] sm:$0xff]  ;;  %v1913_v43 = vld [vmem:[#allocation2 + $0x3b8] sm:$0xff] }
 0x56b   :  { %2562 = vmatprep.subr.bf16.mxu0 %v1871_v41  ;;  %2788 = vmatprep.subr.bf16.mxu1 %v1873_v1  ;;  %v1910_v41 = vld [vmem:[#allocation2 + $0x3a0] sm:$0xff]  ;;  %v1912_v1 = vld [vmem:[#allocation2 + $0x3b0] sm:$0xff] }
 0x56c   :  { %2287 = vmatprep.mubr.bf16.mxu0 %v12216_v30  ;;  %2513 = vmatprep.mubr.bf16.mxu1 %v12216_v30 }
 0x56e   :  { %2563 = vmatpush1.bf16.msra.mxu0 %v1870_v17  ;;  %2789 = vmatpush1.bf16.msra.mxu1 %v1872_v63  ;;  %v1919_v17 = vld [vmem:[#allocation2 + $0x3e8] sm:$0xff]  ;;  %v1921_v63 = vld [vmem:[#allocation2 + $0x3f8] sm:$0xff] }
 0x56f   :  { %2564 = vmatprep.subr.bf16.mxu0 %v1879_v12  ;;  %2790 = vmatprep.subr.bf16.mxu1 %v1881_v16  ;;  %v1918_v12 = vld [vmem:[#allocation2 + $0x3e0] sm:$0xff]  ;;  %v1920_v16 = vld [vmem:[#allocation2 + $0x3f0] sm:$0xff] }
 0x571   :  { %2288 = vmatmul.mubr.bf16.gmra.mrb[68].mxu0 %v12212_v57  ;;  %2514 = vmatmul.mubr.bf16.gmra.mrb[100].mxu1 %v12212_v57 }
 0x572   :  { %2565 = vmatpush1.bf16.msra.mxu0 %v1878_v60  ;;  %2791 = vmatpush1.bf16.msra.mxu1 %v1880_v8  ;;  %v1927_v60 = vld [vmem:[#allocation2 + $0x428] sm:$0xff]  ;;  %v1929_v8 = vld [vmem:[#allocation2 + $0x438] sm:$0xff] }
 0x573   :  { %2566 = vmatprep.subr.bf16.mxu0 %v1887_v15  ;;  %2792 = vmatprep.subr.bf16.mxu1 %v1889_v61  ;;  %v1926_v15 = vld [vmem:[#allocation2 + $0x420] sm:$0xff]  ;;  %v1928_v61 = vld [vmem:[#allocation2 + $0x430] sm:$0xff] }
 0x574   :  { %2297 = vmatprep.mubr.bf16.mxu0 %v12232_v34  ;;  %2523 = vmatprep.mubr.bf16.mxu1 %v12232_v34 }
 0x576   :  { %2567 = vmatpush1.bf16.msra.mxu0 %v1886_v24  ;;  %2793 = vmatpush1.bf16.msra.mxu1 %v1888_v44  ;;  %v1935_v24 = vld [vmem:[#allocation2 + $0x468] sm:$0xff]  ;;  %v1937_v44 = vld [vmem:[#allocation2 + $0x478] sm:$0xff] }
 0x577   :  { %2568 = vmatprep.subr.bf16.mxu0 %v1895_v45  ;;  %2794 = vmatprep.subr.bf16.mxu1 %v1897_v53  ;;  %v1934_v45 = vld [vmem:[#allocation2 + $0x460] sm:$0xff]  ;;  %v1943_v53 = vld [vmem:[#allocation2 + $0x4a8] sm:$0xff] }
 0x579   :  { %2298 = vmatmul.mubr.bf16.gmra.mrb[72].mxu0 %v12228_v42  ;;  %2524 = vmatmul.mubr.bf16.gmra.mrb[104].mxu1 %v12228_v42 }
 0x57a   :  { %2569 = vmatpush1.bf16.msra.mxu0 %v1894_v4  ;;  %2795 = vmatpush1.bf16.msra.mxu1 %v1896_v37  ;;  %v1945_v4 = vld [vmem:[#allocation2 + $0x4b8] sm:$0xff]  ;;  %v1942_v37 = vld [vmem:[#allocation2 + $0x4a0] sm:$0xff] }
 0x57b   :  { %2570 = vmatprep.subr.bf16.mxu0 %v1903_v51  ;;  %2796 = vmatprep.subr.bf16.mxu1 %v1905_v52  ;;  %v1944_v51 = vld [vmem:[#allocation2 + $0x4b0] sm:$0xff]  ;;  %v1951_v52 = vld [vmem:[#allocation2 + $0x4e8] sm:$0xff] }
 0x57c   :  { %2307 = vmatprep.mubr.bf16.mxu0 %v12248_v39  ;;  %2533 = vmatprep.mubr.bf16.mxu1 %v12248_v39 }
 0x57e   :  { %2571 = vmatpush1.bf16.msra.mxu0 %v1902_v9  ;;  %2797 = vmatpush1.bf16.msra.mxu1 %v1904_v55  ;;  %v1950_v9 = vld [vmem:[#allocation2 + $0x4e0] sm:$0xff]  ;;  %v1959_v55 = vld [vmem:[#allocation2 + $0x528] sm:$0xff] }
 0x57f   :  { %2572 = vmatprep.subr.bf16.mxu0 %v1911_v48  ;;  %2798 = vmatprep.subr.bf16.mxu1 %v1913_v43  ;;  %v1961_v48 = vld [vmem:[#allocation2 + $0x538] sm:$0xff]  ;;  %v1958_v43 = vld [vmem:[#allocation2 + $0x520] sm:$0xff] }
 0x581   :  { %2308 = vmatmul.mubr.bf16.gmra.mrb[76].mxu0 %v12244_v13  ;;  %2534 = vmatmul.mubr.bf16.gmra.mrb[108].mxu1 %v12244_v13 }
 0x582   :  { %2573 = vmatpush1.bf16.msra.mxu0 %v1910_v41  ;;  %2799 = vmatpush1.bf16.msra.mxu1 %v1912_v1  ;;  %v1960_v41 = vld [vmem:[#allocation2 + $0x530] sm:$0xff]  ;;  %v1967_v1 = vld [vmem:[#allocation2 + $0x568] sm:$0xff] }
 0x583   :  { %2574 = vmatprep.subr.bf16.mxu0 %v1919_v17  ;;  %2800 = vmatprep.subr.bf16.mxu1 %v1921_v63  ;;  %v1966_v17 = vld [vmem:[#allocation2 + $0x560] sm:$0xff]  ;;  %v1975_v63 = vld [vmem:[#allocation2 + $0x5a8] sm:$0xff] }
 0x584   :  { %2576 = vmatprep.mubr.bf16.mxu0 %v12134_v28  ;;  %2802 = vmatprep.mubr.bf16.mxu1 %v12134_v28  ;;  %v1936_v28 = vld [vmem:[#allocation2 + $0x470] sm:$0xff] }
 0x586   :  { %2575 = vmatpush1.bf16.msra.mxu0 %v1918_v12  ;;  %2801 = vmatpush1.bf16.msra.mxu1 %v1920_v16  ;;  %v1977_v12 = vld [vmem:[#allocation2 + $0x5b8] sm:$0xff]  ;;  %v1974_v16 = vld [vmem:[#allocation2 + $0x5a0] sm:$0xff] }
 0x587   :  { %2657 = vmatprep.subr.bf16.mxu0 %v1927_v60  ;;  %2883 = vmatprep.subr.bf16.mxu1 %v1929_v8  ;;  %v1976_v60 = vld [vmem:[#allocation2 + $0x5b0] sm:$0xff]  ;;  %v1983_v8 = vld [vmem:[#allocation2 + $0x5e8] sm:$0xff] }
 0x589   :  { %2577 = vmatmul.mubr.bf16.vlgmr.msra.gmra.mrb[80].mxu0 %v12130_v20  ;;  %2803 = vmatmul.mubr.bf16.vlgmr.msra.gmra.mrb[112].mxu1 %v12130_v20  ;;  %v1953_v20 = vld [vmem:[#allocation2 + $0x4f8] sm:$0xff] }
 0x58a   :  { %2658 = vmatpush1.bf16.msra.mxu0 %v1926_v15  ;;  %2884 = vmatpush1.bf16.msra.mxu1 %v1928_v61  ;;  %v1982_v15 = vld [vmem:[#allocation2 + $0x5e0] sm:$0xff]  ;;  %v1991_v61 = vld [vmem:[#allocation2 + $0x628] sm:$0xff] }
 0x58b   :  { %2659 = vmatprep.subr.bf16.mxu0 %v1935_v24  ;;  %2885 = vmatprep.subr.bf16.mxu1 %v1937_v44  ;;  %v1993_v24 = vld [vmem:[#allocation2 + $0x638] sm:$0xff]  ;;  %v1990_v44 = vld [vmem:[#allocation2 + $0x620] sm:$0xff] }
 0x58c   :  { %2586 = vmatprep.mubr.bf16.mxu0 %v12150_v26  ;;  %2812 = vmatprep.mubr.bf16.mxu1 %v12150_v26  ;;  %v1952_v26 = vld [vmem:[#allocation2 + $0x4f0] sm:$0xff] }
 0x58e   :  { %2660 = vmatpush1.bf16.msra.mxu0 %v1934_v45  ;;  %2886 = vmatpush1.bf16.msra.mxu1 %v1936_v28  ;;  %v1992_v45 = vld [vmem:[#allocation2 + $0x630] sm:$0xff]  ;;  %v1999_v28 = vld [vmem:[#allocation2 + $0x668] sm:$0xff] }
 0x58f   :  { %2661 = vmatprep.subr.bf16.mxu0 %v1943_v53  ;;  %2887 = vmatprep.subr.bf16.mxu1 %v1945_v4  ;;  %v1998_v53 = vld [vmem:[#allocation2 + $0x660] sm:$0xff]  ;;  %v2007_v4 = vld [vmem:[#allocation2 + $0x6a8] sm:$0xff] }
 0x591   :  { %2587 = vmatmul.mubr.bf16.gmra.mrb[84].mxu0 %v12146_v7  ;;  %2813 = vmatmul.mubr.bf16.gmra.mrb[116].mxu1 %v12146_v7  ;;  %v1969_v7 = vld [vmem:[#allocation2 + $0x578] sm:$0xff] }
 0x592   :  { %2662 = vmatpush1.bf16.msra.mxu0 %v1942_v37  ;;  %2888 = vmatpush1.bf16.msra.mxu1 %v1944_v51  ;;  %v2009_v37 = vld [vmem:[#allocation2 + $0x6b8] sm:$0xff]  ;;  %v2006_v51 = vld [vmem:[#allocation2 + $0x6a0] sm:$0xff] }
 0x593   :  { %2663 = vmatprep.subr.bf16.mxu0 %v1951_v52  ;;  %2889 = vmatprep.subr.bf16.mxu1 %v1953_v20  ;;  %v2008_v52 = vld [vmem:[#allocation2 + $0x6b0] sm:$0xff]  ;;  %v2015_v20 = vld [vmem:[#allocation2 + $0x6e8] sm:$0xff] }
 0x594   :  { %2596 = vmatprep.mubr.bf16.mxu0 %v12166_v54  ;;  %2822 = vmatprep.mubr.bf16.mxu1 %v12166_v54  ;;  %v1968_v54 = vld [vmem:[#allocation2 + $0x570] sm:$0xff] }
 0x596   :  { %2664 = vmatpush1.bf16.msra.mxu0 %v1950_v9  ;;  %2890 = vmatpush1.bf16.msra.mxu1 %v1952_v26  ;;  %v2014_v9 = vld [vmem:[#allocation2 + $0x6e0] sm:$0xff]  ;;  %v2023_v26 = vld [vmem:[#allocation2 + $0x728] sm:$0xff] }
 0x597   :  { %2665 = vmatprep.subr.bf16.mxu0 %v1959_v55  ;;  %2891 = vmatprep.subr.bf16.mxu1 %v1961_v48  ;;  %v2025_v55 = vld [vmem:[#allocation2 + $0x738] sm:$0xff]  ;;  %v2022_v48 = vld [vmem:[#allocation2 + $0x720] sm:$0xff] }
 0x599   :  { %2597 = vmatmul.mubr.bf16.gmra.mrb[88].mxu0 %v12162_v47  ;;  %2823 = vmatmul.mubr.bf16.gmra.mrb[120].mxu1 %v12162_v47  ;;  %v1985_v47 = vld [vmem:[#allocation2 + $0x5f8] sm:$0xff] }
 0x59a   :  { %2666 = vmatpush1.bf16.msra.mxu0 %v1958_v43  ;;  %2892 = vmatpush1.bf16.msra.mxu1 %v1960_v41  ;;  %v2024_v43 = vld [vmem:[#allocation2 + $0x730] sm:$0xff]  ;;  %v2031_v41 = vld [vmem:[#allocation2 + $0x768] sm:$0xff] }
 0x59b   :  { %2667 = vmatprep.subr.bf16.mxu0 %v1967_v1  ;;  %2893 = vmatprep.subr.bf16.mxu1 %v1969_v7  ;;  %v2030_v1 = vld [vmem:[#allocation2 + $0x760] sm:$0xff]  ;;  %v2039_v7 = vld [vmem:[#allocation2 + $0x7a8] sm:$0xff] }
 0x59c   :  { %2606 = vmatprep.mubr.bf16.mxu0 %v12182_v62  ;;  %2832 = vmatprep.mubr.bf16.mxu1 %v12182_v62  ;;  %v1984_v62 = vld [vmem:[#allocation2 + $0x5f0] sm:$0xff] }
 0x59e   :  { %2668 = vmatpush1.bf16.msra.mxu0 %v1966_v17  ;;  %2894 = vmatpush1.bf16.msra.mxu1 %v1968_v54  ;;  %v2041_v17 = vld [vmem:[#allocation2 + $0x7b8] sm:$0xff]  ;;  %v2038_v54 = vld [vmem:[#allocation2 + $0x7a0] sm:$0xff] }
 0x59f   :  { %2669 = vmatprep.subr.bf16.mxu0 %v1975_v63  ;;  %2895 = vmatprep.subr.bf16.mxu1 %v1977_v12  ;;  %v2040_v63 = vld [vmem:[#allocation2 + $0x7b0] sm:$0xff]  ;;  %v2047_v12 = vld [vmem:[#allocation2 + $0x7e8] sm:$0xff] }
 0x5a1   :  { %2607 = vmatmul.mubr.bf16.gmra.mrb[92].mxu0 %v12178_v32  ;;  %2833 = vmatmul.mubr.bf16.gmra.mrb[124].mxu1 %v12178_v32  ;;  %v2001_v32 = vld [vmem:[#allocation2 + $0x678] sm:$0xff] }
 0x5a2   :  { %2670 = vmatpush1.bf16.msra.mxu0 %v1974_v16  ;;  %2896 = vmatpush1.bf16.msra.mxu1 %v1976_v60  ;;  %v2046_v16 = vld [vmem:[#allocation2 + $0x7e0] sm:$0xff] }
 0x5a3   :  { %2671 = vmatprep.subr.bf16.mxu0 %v1983_v8  ;;  %2897 = vmatprep.subr.bf16.mxu1 %v1985_v47 }
 0x5a4   :  { %2616 = vmatprep.mubr.bf16.mxu0 %v12198_v2  ;;  %2842 = vmatprep.mubr.bf16.mxu1 %v12198_v2  ;;  %v2000_v2 = vld [vmem:[#allocation2 + $0x670] sm:$0xff] }
 0x5a6   :  { %2672 = vmatpush1.bf16.msra.mxu0 %v1982_v15  ;;  %2898 = vmatpush1.bf16.msra.mxu1 %v1984_v62 }
 0x5a7   :  { %2673 = vmatprep.subr.bf16.mxu0 %v1991_v61  ;;  %2899 = vmatprep.subr.bf16.mxu1 %v1993_v24 }
 0x5a9   :  { %2617 = vmatmul.mubr.bf16.gmra.mrb[96].mxu0 %v12194_v58  ;;  %2843 = vmatmul.mubr.bf16.gmra.mrb[128].mxu1 %v12194_v58  ;;  %v2017_v58 = vld [vmem:[#allocation2 + $0x6f8] sm:$0xff] }
 0x5aa   :  { %2674 = vmatpush1.bf16.msra.mxu0 %v1990_v44  ;;  %2900 = vmatpush1.bf16.msra.mxu1 %v1992_v45 }
 0x5ab   :  { %2675 = vmatprep.subr.bf16.mxu0 %v1999_v28  ;;  %2901 = vmatprep.subr.bf16.mxu1 %v2001_v32 }
 0x5ac   :  { %2626 = vmatprep.mubr.bf16.mxu0 %v12214_v31  ;;  %2852 = vmatprep.mubr.bf16.mxu1 %v12214_v31  ;;  %v2016_v31 = vld [vmem:[#allocation2 + $0x6f0] sm:$0xff] }
 0x5ae   :  { %2676 = vmatpush1.bf16.msra.mxu0 %v1998_v53  ;;  %2902 = vmatpush1.bf16.msra.mxu1 %v2000_v2 }
 0x5af   :  { %2677 = vmatprep.subr.bf16.mxu0 %v2007_v4  ;;  %2903 = vmatprep.subr.bf16.mxu1 %v2009_v37 }
 0x5b1   :  { %2627 = vmatmul.mubr.bf16.gmra.mrb[100].mxu0 %v12210_v40  ;;  %2853 = vmatmul.mubr.bf16.gmra.mrb[132].mxu1 %v12210_v40  ;;  %v2033_v40 = vld [vmem:[#allocation2 + $0x778] sm:$0xff] }
 0x5b2   :  { %2678 = vmatpush1.bf16.msra.mxu0 %v2006_v51  ;;  %2904 = vmatpush1.bf16.msra.mxu1 %v2008_v52 }
 0x5b3   :  { %2679 = vmatprep.subr.bf16.mxu0 %v2015_v20  ;;  %2905 = vmatprep.subr.bf16.mxu1 %v2017_v58 }
 0x5b4   :  { %2636 = vmatprep.mubr.bf16.mxu0 %v12230_v56  ;;  %2862 = vmatprep.mubr.bf16.mxu1 %v12230_v56  ;;  %v2032_v56 = vld [vmem:[#allocation2 + $0x770] sm:$0xff] }
 0x5b6   :  { %2680 = vmatpush1.bf16.msra.mxu0 %v2014_v9  ;;  %2906 = vmatpush1.bf16.msra.mxu1 %v2016_v31 }
 0x5b7   :  { %2681 = vmatprep.subr.bf16.mxu0 %v2023_v26  ;;  %2907 = vmatprep.subr.bf16.mxu1 %v2025_v55 }
 0x5b9   :  { %2637 = vmatmul.mubr.bf16.gmra.mrb[104].mxu0 %v12226_v11  ;;  %2863 = vmatmul.mubr.bf16.gmra.mrb[136].mxu1 %v12226_v11  ;;  %v2049_v11 = vld [vmem:[#allocation2 + $0x7f8] sm:$0xff] }
 0x5ba   :  { %2682 = vmatpush1.bf16.msra.mxu0 %v2022_v48  ;;  %2908 = vmatpush1.bf16.msra.mxu1 %v2024_v43 }
 0x5bb   :  { %2683 = vmatprep.subr.bf16.mxu0 %v2031_v41  ;;  %2909 = vmatprep.subr.bf16.mxu1 %v2033_v40 }
 0x5bc   :  { %2646 = vmatprep.mubr.bf16.mxu0 %v12246_v38  ;;  %2872 = vmatprep.mubr.bf16.mxu1 %v12246_v38  ;;  %v2048_v38 = vld [vmem:[#allocation2 + $0x7f0] sm:$0xff] }
 0x5be   :  { %2684 = vmatpush1.bf16.msra.mxu0 %v2030_v1  ;;  %2910 = vmatpush1.bf16.msra.mxu1 %v2032_v56 }
 0x5bf   :  { %2685 = vmatprep.subr.bf16.mxu0 %v2039_v7  ;;  %2911 = vmatprep.subr.bf16.mxu1 %v2041_v17 }
 0x5c1   :  { %2647 = vmatmul.mubr.bf16.gmra.mrb[108].mxu0 %v12242_v49  ;;  %2873 = vmatmul.mubr.bf16.gmra.mrb[140].mxu1 %v12242_v49  ;;  %v12378_v49 = vld [vmem:[#allocation17 + $0x8] sm:$0xff] }
 0x5c2   :  { %2686 = vmatpush1.bf16.msra.mxu0 %v2038_v54  ;;  %2912 = vmatpush1.bf16.msra.mxu1 %v2040_v63 }
 0x5c3   :  { %2687 = vmatprep.subr.bf16.mxu0 %v2047_v12  ;;  %2913 = vmatprep.subr.bf16.mxu1 %v2049_v11 }
 0x5c4   :  { %2689 = vmatprep.mubr.bf16.mxu0 %v12136_v21  ;;  %2915 = vmatprep.mubr.bf16.mxu1 %v12136_v21 }
 0x5c6   :  { %2688 = vmatpush1.bf16.msra.mxu0 %v2046_v16  ;;  %2914 = vmatpush1.bf16.msra.mxu1 %v2048_v38 }
 0x5c9   :  { %2690 = vmatmul.mubr.bf16.vlgmr.msra.gmra.mrb[80].mxu0 %v12132_v27  ;;  %2916 = vmatmul.mubr.bf16.vlgmr.msra.gmra.mrb[112].mxu1 %v12132_v27 }
 0x5ca   :  { %2699 = vmatprep.mubr.bf16.mxu0 %v12152_v29  ;;  %2925 = vmatprep.mubr.bf16.mxu1 %v12152_v29 }
 0x5d1   :  { %2700 = vmatmul.mubr.bf16.gmra.mrb[84].mxu0 %v12148_v25  ;;  %2926 = vmatmul.mubr.bf16.gmra.mrb[116].mxu1 %v12148_v25 }
 0x5d2   :  { %2709 = vmatprep.mubr.bf16.mxu0 %v12168_v59  ;;  %2935 = vmatprep.mubr.bf16.mxu1 %v12168_v59 }
 0x5d9   :  { %2710 = vmatmul.mubr.bf16.gmra.mrb[88].mxu0 %v12164_v46  ;;  %2936 = vmatmul.mubr.bf16.gmra.mrb[120].mxu1 %v12164_v46 }
 0x5da   :  { %2719 = vmatprep.mubr.bf16.mxu0 %v12184_v0  ;;  %2945 = vmatprep.mubr.bf16.mxu1 %v12184_v0 }
 0x5e1   :  { %2720 = vmatmul.mubr.bf16.gmra.mrb[92].mxu0 %v12180_v14  ;;  %2946 = vmatmul.mubr.bf16.gmra.mrb[124].mxu1 %v12180_v14  ;;  %v12394_v14 = vrot.slane %v12378_v49, %v12108_v35 }
 0x5e2   :  { %2729 = vmatprep.mubr.bf16.mxu0 %v12200_v10  ;;  %2955 = vmatprep.mubr.bf16.mxu1 %v12200_v10 }
 0x5e9   :  { %2730 = vmatmul.mubr.bf16.gmra.mrb[96].mxu0 %v12196_v33  ;;  %2956 = vmatmul.mubr.bf16.gmra.mrb[128].mxu1 %v12196_v33  ;;  %v12386_v33 = vrot.slane %v12378_v49, %v12105_v6 }
 0x5ea   :  { %2739 = vmatprep.mubr.bf16.mxu0 %v12216_v30  ;;  %2965 = vmatprep.mubr.bf16.mxu1 %v12216_v30 }
 0x5f1   :  { %2740 = vmatmul.mubr.bf16.gmra.mrb[100].mxu0 %v12212_v57  ;;  %2966 = vmatmul.mubr.bf16.gmra.mrb[132].mxu1 %v12212_v57  ;;  %v12382_v57 = vrot.slane %v12378_v49, %v11951_v36 }
 0x5f2   :  { %2749 = vmatprep.mubr.bf16.mxu0 %v12232_v34  ;;  %2975 = vmatprep.mubr.bf16.mxu1 %v12232_v34 }
 0x5f9   :  { %2750 = vmatmul.mubr.bf16.gmra.mrb[104].mxu0 %v12228_v42  ;;  %2976 = vmatmul.mubr.bf16.gmra.mrb[136].mxu1 %v12228_v42  ;;  %v12390_v42 = vrot.slane %v12378_v49, %v12034_v18 }
 0x5fa   :  { %2759 = vmatprep.mubr.bf16.mxu0 %v12248_v39  ;;  %2985 = vmatprep.mubr.bf16.mxu1 %v12248_v39 }
 0x601   :  { %2760 = vmatmul.mubr.bf16.gmra.mrb[108].mxu0 %v12244_v13  ;;  %2986 = vmatmul.mubr.bf16.gmra.mrb[140].mxu1 %v12244_v13 }
 0x61c   :  { %v2239_v27 = vpop.f32.mrb[48].mxu0  ;;  %v2465_v13 = vpop.f32.mrb[80].mxu1 }
 0x61d   :  { %v10082_v21 = vadd.f32 %v2239_v27, %v12382_v57  ;;  %v10114_v25 = vadd.f32 %v2465_v13, %v12386_v33  ;;  %v2241_v29 = vpop.f32.mrb[49].mxu0  ;;  %v2467_v46 = vpop.f32.mrb[81].mxu1 }
 0x61e   :  { %v10083_v59 = vadd.f32 %v2241_v29, %v12390_v42  ;;  %v10115_v0 = vadd.f32 %v2467_v46, %v12394_v14  ;;  %v2243_v10 = vpop.f32.mrb[50].mxu0  ;;  %v2469_v30 = vpop.f32.mrb[82].mxu1 }
 0x61f   :  { %v10084_v34 = vadd.f32 %v2243_v10, %v12382_v57  ;;  %v10116_v39 = vadd.f32 %v2469_v30, %v12386_v33  ;;  %v2245_v60 = vpop.f32.mrb[51].mxu0  ;;  %v2471_v8 = vpop.f32.mrb[83].mxu1  ;;  %v2996_v62 = vmax.f32 %v10082_v21, 0.0  ;;  %v2998_v61 = vmax.f32 %v10114_v25, 0.0 }
 0x620   :  { %v10085_v47 = vadd.f32 %v2245_v60, %v12390_v42  ;;  %v10117_v15 = vadd.f32 %v2471_v8, %v12394_v14  ;;  %v2997_v45 = vmax.f32 %v10083_v59, 0.0  ;;  %v2999_v28 = vmax.f32 %v10115_v0, 0.0 }
 0x621   :  { %v3004_v24 = vmax.f32 %v10084_v34, 0.0  ;;  %v3006_v44 = vmax.f32 %v10116_v39, 0.0 }
 0x622   :  { %v3005_v32 = vmax.f32 %v10085_v47, 0.0  ;;  %v3007_v53 = vmax.f32 %v10117_v15, 0.0 }
 0x623   :  { %v3124_v2 = vadd.f32 %v3004_v24, %v2996_v62  ;;  %v3166_v4 = vadd.f32 %v3006_v44, %v2998_v61 }
 0x624   :  { %v3145_v37 = vadd.f32 %v3005_v32, %v2997_v45  ;;  %v3187_v51 = vadd.f32 %v3007_v53, %v2999_v28  ;;  %v2249_v52 = vpop.f32.mrb[52].mxu0  ;;  %v2475_v20 = vpop.f32.mrb[84].mxu1 }
 0x625   :  { %v10086_v58 = vadd.f32 %v2249_v52, %v12382_v57  ;;  %v10118_v9 = vadd.f32 %v2475_v20, %v12386_v33  ;;  %v2251_v31 = vpop.f32.mrb[53].mxu0  ;;  %v2477_v26 = vpop.f32.mrb[85].mxu1 }
 0x626   :  { %v10087_v55 = vadd.f32 %v2251_v31, %v12390_v42  ;;  %v10119_v48 = vadd.f32 %v2477_v26, %v12394_v14  ;;  %v2253_v43 = vpop.f32.mrb[54].mxu0  ;;  %v2479_v41 = vpop.f32.mrb[86].mxu1 }
 0x627   :  { %v3012_v40 = vmax.f32 %v10086_v58, 0.0  ;;  %v3014_v1 = vmax.f32 %v10118_v9, 0.0  ;;  %v10088_v56 = vadd.f32 %v2253_v43, %v12382_v57  ;;  %v10120_v7 = vadd.f32 %v2479_v41, %v12386_v33  ;;  %v2255_v17 = vpop.f32.mrb[55].mxu0  ;;  %v2481_v54 = vpop.f32.mrb[87].mxu1 }
 0x628   :  { %v3013_v63 = vmax.f32 %v10087_v55, 0.0  ;;  %v3015_v12 = vmax.f32 %v10119_v48, 0.0  ;;  %v10089_v11 = vadd.f32 %v2255_v17, %v12390_v42  ;;  %v10121_v16 = vadd.f32 %v2481_v54, %v12394_v14 }
 0x629   :  { %v3125_v38 = vadd.f32 %v3124_v2, %v3012_v40  ;;  %v3167_v27 = vadd.f32 %v3166_v4, %v3014_v1  ;;  %v3020_v13 = vmax.f32 %v10088_v56, 0.0  ;;  %v3022_v21 = vmax.f32 %v10120_v7, 0.0 }
 0x62a   :  { %v3146_v25 = vadd.f32 %v3145_v37, %v3013_v63  ;;  %v3188_v29 = vadd.f32 %v3187_v51, %v3015_v12  ;;  %v3021_v46 = vmax.f32 %v10089_v11, 0.0  ;;  %v3023_v59 = vmax.f32 %v10121_v16, 0.0 }
 0x62b   :  { %v3126_v0 = vadd.f32 %v3125_v38, %v3020_v13  ;;  %v3168_v10 = vadd.f32 %v3167_v27, %v3022_v21 }
 0x62c   :  { %v3147_v30 = vadd.f32 %v3146_v25, %v3021_v46  ;;  %v3189_v34 = vadd.f32 %v3188_v29, %v3023_v59  ;;  %v2259_v39 = vpop.f32.mrb[56].mxu0  ;;  %v2485_v60 = vpop.f32.mrb[88].mxu1 }
 0x62d   :  { %v10090_v8 = vadd.f32 %v2259_v39, %v12382_v57  ;;  %v10122_v47 = vadd.f32 %v2485_v60, %v12386_v33  ;;  %v2261_v15 = vpop.f32.mrb[57].mxu0  ;;  %v2487_v62 = vpop.f32.mrb[89].mxu1 }
 0x62e   :  { %v10091_v61 = vadd.f32 %v2261_v15, %v12390_v42  ;;  %v10123_v24 = vadd.f32 %v2487_v62, %v12394_v14  ;;  %v2263_v44 = vpop.f32.mrb[58].mxu0  ;;  %v2489_v45 = vpop.f32.mrb[90].mxu1 }
 0x62f   :  { %v3028_v28 = vmax.f32 %v10090_v8, 0.0  ;;  %v3030_v32 = vmax.f32 %v10122_v47, 0.0  ;;  %v10092_v53 = vadd.f32 %v2263_v44, %v12382_v57  ;;  %v10124_v2 = vadd.f32 %v2489_v45, %v12386_v33  ;;  %v2265_v4 = vpop.f32.mrb[59].mxu0  ;;  %v2491_v37 = vpop.f32.mrb[91].mxu1 }
 0x630   :  { %v3029_v51 = vmax.f32 %v10091_v61, 0.0  ;;  %v3031_v52 = vmax.f32 %v10123_v24, 0.0  ;;  %v10093_v20 = vadd.f32 %v2265_v4, %v12390_v42  ;;  %v10125_v58 = vadd.f32 %v2491_v37, %v12394_v14 }
 0x631   :  { %v3127_v9 = vadd.f32 %v3126_v0, %v3028_v28  ;;  %v3169_v31 = vadd.f32 %v3168_v10, %v3030_v32  ;;  %v3036_v26 = vmax.f32 %v10092_v53, 0.0  ;;  %v3038_v55 = vmax.f32 %v10124_v2, 0.0 }
 0x632   :  { %v3148_v48 = vadd.f32 %v3147_v30, %v3029_v51  ;;  %v3190_v43 = vadd.f32 %v3189_v34, %v3031_v52  ;;  %v3037_v41 = vmax.f32 %v10093_v20, 0.0  ;;  %v3039_v40 = vmax.f32 %v10125_v58, 0.0 }
 0x633   :  { %v3128_v1 = vadd.f32 %v3127_v9, %v3036_v26  ;;  %v3170_v56 = vadd.f32 %v3169_v31, %v3038_v55 }
 0x634   :  { %v3149_v7 = vadd.f32 %v3148_v48, %v3037_v41  ;;  %v3191_v17 = vadd.f32 %v3190_v43, %v3039_v40  ;;  %v2269_v54 = vpop.f32.mrb[60].mxu0  ;;  %v2495_v63 = vpop.f32.mrb[92].mxu1 }
 0x635   :  { %v10094_v12 = vadd.f32 %v2269_v54, %v12382_v57  ;;  %v10126_v11 = vadd.f32 %v2495_v63, %v12386_v33  ;;  %v2271_v16 = vpop.f32.mrb[61].mxu0  ;;  %v2497_v38 = vpop.f32.mrb[93].mxu1 }
 0x636   :  { %v10095_v27 = vadd.f32 %v2271_v16, %v12390_v42  ;;  %v10127_v13 = vadd.f32 %v2497_v38, %v12394_v14  ;;  %v2273_v21 = vpop.f32.mrb[62].mxu0  ;;  %v2499_v25 = vpop.f32.mrb[94].mxu1 }
 0x637   :  { %v3044_v29 = vmax.f32 %v10094_v12, 0.0  ;;  %v3046_v46 = vmax.f32 %v10126_v11, 0.0  ;;  %v10096_v59 = vadd.f32 %v2273_v21, %v12382_v57  ;;  %v10128_v0 = vadd.f32 %v2499_v25, %v12386_v33  ;;  %v2275_v10 = vpop.f32.mrb[63].mxu0  ;;  %v2501_v30 = vpop.f32.mrb[95].mxu1 }
 0x638   :  { %v3045_v34 = vmax.f32 %v10095_v27, 0.0  ;;  %v3047_v39 = vmax.f32 %v10127_v13, 0.0  ;;  %v10097_v60 = vadd.f32 %v2275_v10, %v12390_v42  ;;  %v10129_v8 = vadd.f32 %v2501_v30, %v12394_v14 }
 0x639   :  { %v3129_v47 = vadd.f32 %v3128_v1, %v3044_v29  ;;  %v3171_v15 = vadd.f32 %v3170_v56, %v3046_v46  ;;  %v3052_v62 = vmax.f32 %v10096_v59, 0.0  ;;  %v3054_v61 = vmax.f32 %v10128_v0, 0.0 }
 0x63a   :  { %v3150_v24 = vadd.f32 %v3149_v7, %v3045_v34  ;;  %v3192_v44 = vadd.f32 %v3191_v17, %v3047_v39  ;;  %v3053_v45 = vmax.f32 %v10097_v60, 0.0  ;;  %v3055_v28 = vmax.f32 %v10129_v8, 0.0 }
 0x63b   :  { %v3130_v32 = vadd.f32 %v3129_v47, %v3052_v62  ;;  %v3172_v53 = vadd.f32 %v3171_v15, %v3054_v61 }
 0x63c   :  { %v3151_v2 = vadd.f32 %v3150_v24, %v3053_v45  ;;  %v3193_v4 = vadd.f32 %v3192_v44, %v3055_v28  ;;  %v2279_v37 = vpop.f32.mrb[64].mxu0  ;;  %v2505_v51 = vpop.f32.mrb[96].mxu1 }
 0x63d   :  { %v10098_v52 = vadd.f32 %v2279_v37, %v12382_v57  ;;  %v10130_v20 = vadd.f32 %v2505_v51, %v12386_v33  ;;  %v2281_v58 = vpop.f32.mrb[65].mxu0  ;;  %v2507_v9 = vpop.f32.mrb[97].mxu1 }
 0x63e   :  { %v10099_v31 = vadd.f32 %v2281_v58, %v12390_v42  ;;  %v10131_v26 = vadd.f32 %v2507_v9, %v12394_v14  ;;  %v2283_v55 = vpop.f32.mrb[66].mxu0  ;;  %v2509_v48 = vpop.f32.mrb[98].mxu1 }
 0x63f   :  { %v3060_v43 = vmax.f32 %v10098_v52, 0.0  ;;  %v3062_v41 = vmax.f32 %v10130_v20, 0.0  ;;  %v10100_v40 = vadd.f32 %v2283_v55, %v12382_v57  ;;  %v10132_v1 = vadd.f32 %v2509_v48, %v12386_v33  ;;  %v2285_v56 = vpop.f32.mrb[67].mxu0  ;;  %v2511_v7 = vpop.f32.mrb[99].mxu1 }
 0x640   :  { %v3061_v17 = vmax.f32 %v10099_v31, 0.0  ;;  %v3063_v54 = vmax.f32 %v10131_v26, 0.0  ;;  %v10101_v63 = vadd.f32 %v2285_v56, %v12390_v42  ;;  %v10133_v12 = vadd.f32 %v2511_v7, %v12394_v14 }
 0x641   :  { %v3131_v11 = vadd.f32 %v3130_v32, %v3060_v43  ;;  %v3173_v16 = vadd.f32 %v3172_v53, %v3062_v41  ;;  %v3068_v38 = vmax.f32 %v10100_v40, 0.0  ;;  %v3070_v27 = vmax.f32 %v10132_v1, 0.0 }
 0x642   :  { %v3152_v13 = vadd.f32 %v3151_v2, %v3061_v17  ;;  %v3194_v21 = vadd.f32 %v3193_v4, %v3063_v54  ;;  %v3069_v25 = vmax.f32 %v10101_v63, 0.0  ;;  %v3071_v29 = vmax.f32 %v10133_v12, 0.0 }
 0x643   :  { %v3132_v46 = vadd.f32 %v3131_v11, %v3068_v38  ;;  %v3174_v59 = vadd.f32 %v3173_v16, %v3070_v27 }
 0x644   :  { %v3153_v0 = vadd.f32 %v3152_v13, %v3069_v25  ;;  %v3195_v10 = vadd.f32 %v3194_v21, %v3071_v29  ;;  %v2289_v30 = vpop.f32.mrb[68].mxu0  ;;  %v2515_v34 = vpop.f32.mrb[100].mxu1 }
 0x645   :  { %v10102_v39 = vadd.f32 %v2289_v30, %v12382_v57  ;;  %v10134_v60 = vadd.f32 %v2515_v34, %v12386_v33  ;;  %v2291_v8 = vpop.f32.mrb[69].mxu0  ;;  %v2517_v47 = vpop.f32.mrb[101].mxu1 }
 0x646   :  { %v10103_v15 = vadd.f32 %v2291_v8, %v12390_v42  ;;  %v10135_v62 = vadd.f32 %v2517_v47, %v12394_v14  ;;  %v2293_v61 = vpop.f32.mrb[70].mxu0  ;;  %v2519_v24 = vpop.f32.mrb[102].mxu1 }
 0x647   :  { %v3076_v44 = vmax.f32 %v10102_v39, 0.0  ;;  %v3078_v45 = vmax.f32 %v10134_v60, 0.0  ;;  %v10104_v28 = vadd.f32 %v2293_v61, %v12382_v57  ;;  %v10136_v32 = vadd.f32 %v2519_v24, %v12386_v33  ;;  %v2295_v53 = vpop.f32.mrb[71].mxu0  ;;  %v2521_v2 = vpop.f32.mrb[103].mxu1 }
 0x648   :  { %v3077_v4 = vmax.f32 %v10103_v15, 0.0  ;;  %v3079_v37 = vmax.f32 %v10135_v62, 0.0  ;;  %v10105_v51 = vadd.f32 %v2295_v53, %v12390_v42  ;;  %v10137_v52 = vadd.f32 %v2521_v2, %v12394_v14 }
 0x649   :  { %v3133_v20 = vadd.f32 %v3132_v46, %v3076_v44  ;;  %v3175_v58 = vadd.f32 %v3174_v59, %v3078_v45  ;;  %v3084_v9 = vmax.f32 %v10104_v28, 0.0  ;;  %v3086_v31 = vmax.f32 %v10136_v32, 0.0 }
 0x64a   :  { %v3154_v26 = vadd.f32 %v3153_v0, %v3077_v4  ;;  %v3196_v55 = vadd.f32 %v3195_v10, %v3079_v37  ;;  %v3085_v48 = vmax.f32 %v10105_v51, 0.0  ;;  %v3087_v43 = vmax.f32 %v10137_v52, 0.0 }
 0x64b   :  { %v3134_v41 = vadd.f32 %v3133_v20, %v3084_v9  ;;  %v3176_v40 = vadd.f32 %v3175_v58, %v3086_v31 }
 0x64c   :  { %v3155_v1 = vadd.f32 %v3154_v26, %v3085_v48  ;;  %v3197_v56 = vadd.f32 %v3196_v55, %v3087_v43  ;;  %v2299_v7 = vpop.f32.mrb[72].mxu0  ;;  %v2525_v17 = vpop.f32.mrb[104].mxu1 }
 0x64d   :  { %v10106_v54 = vadd.f32 %v2299_v7, %v12382_v57  ;;  %v10138_v63 = vadd.f32 %v2525_v17, %v12386_v33  ;;  %v2301_v12 = vpop.f32.mrb[73].mxu0  ;;  %v2527_v11 = vpop.f32.mrb[105].mxu1 }
 0x64e   :  { %v10107_v16 = vadd.f32 %v2301_v12, %v12390_v42  ;;  %v10139_v38 = vadd.f32 %v2527_v11, %v12394_v14  ;;  %v2303_v27 = vpop.f32.mrb[74].mxu0  ;;  %v2529_v13 = vpop.f32.mrb[106].mxu1 }
 0x64f   :  { %v3092_v21 = vmax.f32 %v10106_v54, 0.0  ;;  %v3094_v25 = vmax.f32 %v10138_v63, 0.0  ;;  %v10108_v29 = vadd.f32 %v2303_v27, %v12382_v57  ;;  %v10140_v46 = vadd.f32 %v2529_v13, %v12386_v33  ;;  %v2305_v59 = vpop.f32.mrb[75].mxu0  ;;  %v2531_v0 = vpop.f32.mrb[107].mxu1 }
 0x650   :  { %v3093_v10 = vmax.f32 %v10107_v16, 0.0  ;;  %v3095_v30 = vmax.f32 %v10139_v38, 0.0  ;;  %v10109_v34 = vadd.f32 %v2305_v59, %v12390_v42  ;;  %v10141_v39 = vadd.f32 %v2531_v0, %v12394_v14 }
 0x651   :  { %v3135_v60 = vadd.f32 %v3134_v41, %v3092_v21  ;;  %v3177_v8 = vadd.f32 %v3176_v40, %v3094_v25  ;;  %v3100_v47 = vmax.f32 %v10108_v29, 0.0  ;;  %v3102_v15 = vmax.f32 %v10140_v46, 0.0 }
 0x652   :  { %v3156_v62 = vadd.f32 %v3155_v1, %v3093_v10  ;;  %v3198_v61 = vadd.f32 %v3197_v56, %v3095_v30  ;;  %v3101_v24 = vmax.f32 %v10109_v34, 0.0  ;;  %v3103_v44 = vmax.f32 %v10141_v39, 0.0 }
 0x653   :  { %v3136_v45 = vadd.f32 %v3135_v60, %v3100_v47  ;;  %v3178_v28 = vadd.f32 %v3177_v8, %v3102_v15 }
 0x654   :  { %v3157_v32 = vadd.f32 %v3156_v62, %v3101_v24  ;;  %v3199_v53 = vadd.f32 %v3198_v61, %v3103_v44  ;;  %v2309_v2 = vpop.f32.mrb[76].mxu0  ;;  %v2535_v4 = vpop.f32.mrb[108].mxu1 }
 0x655   :  { %v10110_v37 = vadd.f32 %v2309_v2, %v12382_v57  ;;  %v10142_v51 = vadd.f32 %v2535_v4, %v12386_v33  ;;  %v2311_v52 = vpop.f32.mrb[77].mxu0  ;;  %v2537_v20 = vpop.f32.mrb[109].mxu1 }
 0x656   :  { %v10111_v58 = vadd.f32 %v2311_v52, %v12390_v42  ;;  %v10143_v9 = vadd.f32 %v2537_v20, %v12394_v14  ;;  %v2313_v31 = vpop.f32.mrb[78].mxu0  ;;  %v2539_v26 = vpop.f32.mrb[110].mxu1 }
 0x657   :  { %v3108_v55 = vmax.f32 %v10110_v37, 0.0  ;;  %v3110_v48 = vmax.f32 %v10142_v51, 0.0  ;;  %v10112_v43 = vadd.f32 %v2313_v31, %v12382_v57  ;;  %v10144_v41 = vadd.f32 %v2539_v26, %v12386_v33  ;;  %v2315_v40 = vpop.f32.mrb[79].mxu0  ;;  %v2541_v1 = vpop.f32.mrb[111].mxu1 }
 0x658   :  { %v3109_v56 = vmax.f32 %v10111_v58, 0.0  ;;  %v3111_v7 = vmax.f32 %v10143_v9, 0.0  ;;  %v10113_v17 = vadd.f32 %v2315_v40, %v12390_v42  ;;  %v10145_v54 = vadd.f32 %v2541_v1, %v12394_v14 }
 0x659   :  { %v3137_v63 = vadd.f32 %v3136_v45, %v3108_v55  ;;  %v3179_v12 = vadd.f32 %v3178_v28, %v3110_v48  ;;  %v3116_v11 = vmax.f32 %v10112_v43, 0.0  ;;  %v3118_v16 = vmax.f32 %v10144_v41, 0.0 }
 0x65a   :  { %v3158_v38 = vadd.f32 %v3157_v32, %v3109_v56  ;;  %v3200_v27 = vadd.f32 %v3199_v53, %v3111_v7  ;;  %v3117_v13 = vmax.f32 %v10113_v17, 0.0  ;;  %v3119_v21 = vmax.f32 %v10145_v54, 0.0 }
 0x65b   :  { %v3138_v25 = vadd.f32 %v3137_v63, %v3116_v11  ;;  %v3180_v57 = vadd.f32 %v3179_v12, %v3118_v16  ;;  %v13700_v9 = vsub.s32 4, %v11946_v22  ;;  %v13699_v31 = vsub.s32 6, %v11946_v22 }
 0x65c   :  { %v3159_v29 = vadd.f32 %v3158_v38, %v3117_v13  ;;  %v3201_v33 = vadd.f32 %v3200_v27, %v3119_v21  ;;  %v13698_v26 = vsub.s32 5, %v11946_v22  ;;  %v13697_v55 = vsub.s32 7, %v11946_v22 }
 0x65d   :  { %v3139_v46 = vrot.slane %v3138_v25, 4  ;;  %v3181_v59 = vrot.slane %v3180_v57, 4  ;;  %v12475_v48 = vrot.slane %v12378_v49, %v13700_v9  ;;  %v12480_v43 = vrot.slane %v12378_v49, %v13699_v31 }
 0x65e   :  { %v3160_v0 = vrot.slane %v3159_v29, 4  ;;  %v3202_v10 = vrot.slane %v3201_v33, 4  ;;  %v12485_v41 = vrot.slane %v12378_v49, %v13698_v26  ;;  %v12490_v40 = vrot.slane %v12378_v49, %v13697_v55 }
 0x65f   :  { %v3140_v30 = vadd.f32 %v3139_v46, %v3138_v25  ;;  %v3182_v42 = vadd.f32 %v3181_v59, %v3180_v57 }
 0x660   :  { %v3161_v34 = vadd.f32 %v3160_v0, %v3159_v29  ;;  %v3203_v14 = vadd.f32 %v3202_v10, %v3201_v33 }
 0x661   :  { %v3141_v39 = vrot.slane %v3140_v30, 2  ;;  %v3183_v60 = vrot.slane %v3182_v42, 2 }
 0x662   :  { %v3162_v8 = vrot.slane %v3161_v34, 2  ;;  %v3204_v47 = vrot.slane %v3203_v14, 2 }
 0x663   :  { %v3142_v15 = vadd.f32 %v3141_v39, %v3140_v30  ;;  %v3184_v62 = vadd.f32 %v3183_v60, %v3182_v42 }
 0x664   :  { %v3163_v61 = vadd.f32 %v3162_v8, %v3161_v34  ;;  %v3205_v24 = vadd.f32 %v3204_v47, %v3203_v14 }
 0x665   :  { %v3143_v44 = vrot.slane %v3142_v15, 1  ;;  %v3185_v45 = vrot.slane %v3184_v62, 1 }
 0x666   :  { %v3164_v28 = vrot.slane %v3163_v61, 1  ;;  %v3206_v32 = vrot.slane %v3205_v24, 1 }
 0x667   :  { %v3144_v53 = vadd.f32 %v3143_v44, %v3142_v15  ;;  %v3186_v2 = vadd.f32 %v3185_v45, %v3184_v62 }
 0x668   :  { %v3165_v4 = vadd.f32 %v3164_v28, %v3163_v61  ;;  %v3207_v37 = vadd.f32 %v3206_v32, %v3205_v24 }
 0x669   :  { %v12460_v51 = vmul.f32 0.0078125, %v3144_v53  ;;  %v12462_v52 = vmul.f32 0.0078125, %v3186_v2 }
 0x66a   :  { %v12464_v20 = vmul.f32 0.0078125, %v3165_v4  ;;  %v12466_v58 = vmul.f32 0.0078125, %v3207_v37 }
 0x69c   :  { %v2691_v1 = vpop.f32.mrb[80].mxu0  ;;  %v2917_v56 = vpop.f32.mrb[112].mxu1 }
 0x69d   :  { %v10146_v7 = vadd.f32 %v2691_v1, %v12475_v48  ;;  %v10178_v17 = vadd.f32 %v2917_v56, %v12480_v43  ;;  %v2693_v54 = vpop.f32.mrb[81].mxu0  ;;  %v2919_v63 = vpop.f32.mrb[113].mxu1 }
 0x69e   :  { %v10147_v12 = vadd.f32 %v2693_v54, %v12485_v41  ;;  %v10179_v11 = vadd.f32 %v2919_v63, %v12490_v40  ;;  %v2695_v16 = vpop.f32.mrb[82].mxu0  ;;  %v2921_v38 = vpop.f32.mrb[114].mxu1 }
 0x69f   :  { %v10148_v27 = vadd.f32 %v2695_v16, %v12475_v48  ;;  %v10180_v13 = vadd.f32 %v2921_v38, %v12480_v43  ;;  %v2697_v49 = vpop.f32.mrb[83].mxu0  ;;  %v2923_v21 = vpop.f32.mrb[115].mxu1  ;;  %v3000_v29 = vmax.f32 %v10146_v7, 0.0  ;;  %v3002_v33 = vmax.f32 %v10178_v17, 0.0 }
 0x6a0   :  { %v10149_v25 = vadd.f32 %v2697_v49, %v12485_v41  ;;  %v10181_v57 = vadd.f32 %v2923_v21, %v12490_v40  ;;  %v3001_v0 = vmax.f32 %v10147_v12, 0.0  ;;  %v3003_v10 = vmax.f32 %v10179_v11, 0.0 }
 0x6a1   :  { %v3008_v46 = vmax.f32 %v10148_v27, 0.0  ;;  %v3010_v59 = vmax.f32 %v10180_v13, 0.0 }
 0x6a2   :  { %v3009_v30 = vmax.f32 %v10149_v25, 0.0  ;;  %v3011_v42 = vmax.f32 %v10181_v57, 0.0 }
 0x6a3   :  { %v3208_v34 = vadd.f32 %v3008_v46, %v3000_v29  ;;  %v3250_v14 = vadd.f32 %v3010_v59, %v3002_v33 }
 0x6a4   :  { %v3229_v39 = vadd.f32 %v3009_v30, %v3001_v0  ;;  %v3271_v60 = vadd.f32 %v3011_v42, %v3003_v10  ;;  %v2701_v8 = vpop.f32.mrb[84].mxu0  ;;  %v2927_v47 = vpop.f32.mrb[116].mxu1 }
 0x6a5   :  { %v10150_v15 = vadd.f32 %v2701_v8, %v12475_v48  ;;  %v10182_v62 = vadd.f32 %v2927_v47, %v12480_v43  ;;  %v2703_v61 = vpop.f32.mrb[85].mxu0  ;;  %v2929_v24 = vpop.f32.mrb[117].mxu1 }
 0x6a6   :  { %v10151_v44 = vadd.f32 %v2703_v61, %v12485_v41  ;;  %v10183_v45 = vadd.f32 %v2929_v24, %v12490_v40  ;;  %v2705_v28 = vpop.f32.mrb[86].mxu0  ;;  %v2931_v32 = vpop.f32.mrb[118].mxu1 }
 0x6a7   :  { %v3016_v53 = vmax.f32 %v10150_v15, 0.0  ;;  %v3018_v2 = vmax.f32 %v10182_v62, 0.0  ;;  %v10152_v4 = vadd.f32 %v2705_v28, %v12475_v48  ;;  %v10184_v37 = vadd.f32 %v2931_v32, %v12480_v43  ;;  %v2707_v1 = vpop.f32.mrb[87].mxu0  ;;  %v2933_v56 = vpop.f32.mrb[119].mxu1 }
 0x6a8   :  { %v3017_v7 = vmax.f32 %v10151_v44, 0.0  ;;  %v3019_v17 = vmax.f32 %v10183_v45, 0.0  ;;  %v10153_v54 = vadd.f32 %v2707_v1, %v12485_v41  ;;  %v10185_v63 = vadd.f32 %v2933_v56, %v12490_v40 }
 0x6a9   :  { %v3209_v12 = vadd.f32 %v3208_v34, %v3016_v53  ;;  %v3251_v11 = vadd.f32 %v3250_v14, %v3018_v2  ;;  %v3024_v16 = vmax.f32 %v10152_v4, 0.0  ;;  %v3026_v38 = vmax.f32 %v10184_v37, 0.0 }
 0x6aa   :  { %v3230_v27 = vadd.f32 %v3229_v39, %v3017_v7  ;;  %v3272_v13 = vadd.f32 %v3271_v60, %v3019_v17  ;;  %v3025_v49 = vmax.f32 %v10153_v54, 0.0  ;;  %v3027_v21 = vmax.f32 %v10185_v63, 0.0 }
 0x6ab   :  { %v3210_v25 = vadd.f32 %v3209_v12, %v3024_v16  ;;  %v3252_v57 = vadd.f32 %v3251_v11, %v3026_v38 }
 0x6ac   :  { %v3231_v29 = vadd.f32 %v3230_v27, %v3025_v49  ;;  %v3273_v33 = vadd.f32 %v3272_v13, %v3027_v21  ;;  %v2711_v46 = vpop.f32.mrb[88].mxu0  ;;  %v2937_v59 = vpop.f32.mrb[120].mxu1 }
 0x6ad   :  { %v10154_v0 = vadd.f32 %v2711_v46, %v12475_v48  ;;  %v10186_v10 = vadd.f32 %v2937_v59, %v12480_v43  ;;  %v2713_v30 = vpop.f32.mrb[89].mxu0  ;;  %v2939_v42 = vpop.f32.mrb[121].mxu1 }
 0x6ae   :  { %v10155_v34 = vadd.f32 %v2713_v30, %v12485_v41  ;;  %v10187_v14 = vadd.f32 %v2939_v42, %v12490_v40  ;;  %v2715_v39 = vpop.f32.mrb[90].mxu0  ;;  %v2941_v60 = vpop.f32.mrb[122].mxu1 }
 0x6af   :  { %v3032_v8 = vmax.f32 %v10154_v0, 0.0  ;;  %v3034_v47 = vmax.f32 %v10186_v10, 0.0  ;;  %v10156_v15 = vadd.f32 %v2715_v39, %v12475_v48  ;;  %v10188_v62 = vadd.f32 %v2941_v60, %v12480_v43  ;;  %v2717_v61 = vpop.f32.mrb[91].mxu0  ;;  %v2943_v24 = vpop.f32.mrb[123].mxu1 }
 0x6b0   :  { %v3033_v44 = vmax.f32 %v10155_v34, 0.0  ;;  %v3035_v45 = vmax.f32 %v10187_v14, 0.0  ;;  %v10157_v28 = vadd.f32 %v2717_v61, %v12485_v41  ;;  %v10189_v32 = vadd.f32 %v2943_v24, %v12490_v40 }
 0x6b1   :  { %v3211_v53 = vadd.f32 %v3210_v25, %v3032_v8  ;;  %v3253_v2 = vadd.f32 %v3252_v57, %v3034_v47  ;;  %v3040_v4 = vmax.f32 %v10156_v15, 0.0  ;;  %v3042_v37 = vmax.f32 %v10188_v62, 0.0 }
 0x6b2   :  { %v3232_v1 = vadd.f32 %v3231_v29, %v3033_v44  ;;  %v3274_v56 = vadd.f32 %v3273_v33, %v3035_v45  ;;  %v3041_v7 = vmax.f32 %v10157_v28, 0.0  ;;  %v3043_v17 = vmax.f32 %v10189_v32, 0.0 }
 0x6b3   :  { %v3212_v54 = vadd.f32 %v3211_v53, %v3040_v4  ;;  %v3254_v63 = vadd.f32 %v3253_v2, %v3042_v37 }
 0x6b4   :  { %v3233_v12 = vadd.f32 %v3232_v1, %v3041_v7  ;;  %v3275_v11 = vadd.f32 %v3274_v56, %v3043_v17  ;;  %v2721_v16 = vpop.f32.mrb[92].mxu0  ;;  %v2947_v38 = vpop.f32.mrb[124].mxu1 }
 0x6b5   :  { %v10158_v27 = vadd.f32 %v2721_v16, %v12475_v48  ;;  %v10190_v13 = vadd.f32 %v2947_v38, %v12480_v43  ;;  %v2723_v49 = vpop.f32.mrb[93].mxu0  ;;  %v2949_v21 = vpop.f32.mrb[125].mxu1 }
 0x6b6   :  { %v10159_v25 = vadd.f32 %v2723_v49, %v12485_v41  ;;  %v10191_v57 = vadd.f32 %v2949_v21, %v12490_v40  ;;  %v2725_v29 = vpop.f32.mrb[94].mxu0  ;;  %v2951_v33 = vpop.f32.mrb[126].mxu1 }
 0x6b7   :  { %v3048_v46 = vmax.f32 %v10158_v27, 0.0  ;;  %v3050_v59 = vmax.f32 %v10190_v13, 0.0  ;;  %v10160_v0 = vadd.f32 %v2725_v29, %v12475_v48  ;;  %v10192_v10 = vadd.f32 %v2951_v33, %v12480_v43  ;;  %v2727_v30 = vpop.f32.mrb[95].mxu0  ;;  %v2953_v42 = vpop.f32.mrb[127].mxu1 }
 0x6b8   :  { %v3049_v34 = vmax.f32 %v10159_v25, 0.0  ;;  %v3051_v14 = vmax.f32 %v10191_v57, 0.0  ;;  %v10161_v39 = vadd.f32 %v2727_v30, %v12485_v41  ;;  %v10193_v60 = vadd.f32 %v2953_v42, %v12490_v40 }
 0x6b9   :  { %v3213_v8 = vadd.f32 %v3212_v54, %v3048_v46  ;;  %v3255_v47 = vadd.f32 %v3254_v63, %v3050_v59  ;;  %v3056_v15 = vmax.f32 %v10160_v0, 0.0  ;;  %v3058_v62 = vmax.f32 %v10192_v10, 0.0 }
 0x6ba   :  { %v3234_v61 = vadd.f32 %v3233_v12, %v3049_v34  ;;  %v3276_v24 = vadd.f32 %v3275_v11, %v3051_v14  ;;  %v3057_v44 = vmax.f32 %v10161_v39, 0.0  ;;  %v3059_v45 = vmax.f32 %v10193_v60, 0.0 }
 0x6bb   :  { %v3214_v28 = vadd.f32 %v3213_v8, %v3056_v15  ;;  %v3256_v32 = vadd.f32 %v3255_v47, %v3058_v62 }
 0x6bc   :  { %v3235_v53 = vadd.f32 %v3234_v61, %v3057_v44  ;;  %v3277_v2 = vadd.f32 %v3276_v24, %v3059_v45  ;;  %v2731_v4 = vpop.f32.mrb[96].mxu0  ;;  %v2957_v37 = vpop.f32.mrb[128].mxu1 }
 0x6bd   :  { %v10162_v1 = vadd.f32 %v2731_v4, %v12475_v48  ;;  %v10194_v56 = vadd.f32 %v2957_v37, %v12480_v43  ;;  %v2733_v7 = vpop.f32.mrb[97].mxu0  ;;  %v2959_v17 = vpop.f32.mrb[129].mxu1 }
 0x6be   :  { %v10163_v54 = vadd.f32 %v2733_v7, %v12485_v41  ;;  %v10195_v63 = vadd.f32 %v2959_v17, %v12490_v40  ;;  %v2735_v12 = vpop.f32.mrb[98].mxu0  ;;  %v2961_v11 = vpop.f32.mrb[130].mxu1 }
 0x6bf   :  { %v3064_v16 = vmax.f32 %v10162_v1, 0.0  ;;  %v3066_v38 = vmax.f32 %v10194_v56, 0.0  ;;  %v10164_v27 = vadd.f32 %v2735_v12, %v12475_v48  ;;  %v10196_v13 = vadd.f32 %v2961_v11, %v12480_v43  ;;  %v2737_v49 = vpop.f32.mrb[99].mxu0  ;;  %v2963_v21 = vpop.f32.mrb[131].mxu1 }
 0x6c0   :  { %v3065_v25 = vmax.f32 %v10163_v54, 0.0  ;;  %v3067_v57 = vmax.f32 %v10195_v63, 0.0  ;;  %v10165_v29 = vadd.f32 %v2737_v49, %v12485_v41  ;;  %v10197_v33 = vadd.f32 %v2963_v21, %v12490_v40 }
 0x6c1   :  { %v3215_v46 = vadd.f32 %v3214_v28, %v3064_v16  ;;  %v3257_v59 = vadd.f32 %v3256_v32, %v3066_v38  ;;  %v3072_v0 = vmax.f32 %v10164_v27, 0.0  ;;  %v3074_v10 = vmax.f32 %v10196_v13, 0.0 }
 0x6c2   :  { %v3236_v30 = vadd.f32 %v3235_v53, %v3065_v25  ;;  %v3278_v42 = vadd.f32 %v3277_v2, %v3067_v57  ;;  %v3073_v34 = vmax.f32 %v10165_v29, 0.0  ;;  %v3075_v14 = vmax.f32 %v10197_v33, 0.0 }
 0x6c3   :  { %v3216_v39 = vadd.f32 %v3215_v46, %v3072_v0  ;;  %v3258_v60 = vadd.f32 %v3257_v59, %v3074_v10 }
 0x6c4   :  { %v3237_v8 = vadd.f32 %v3236_v30, %v3073_v34  ;;  %v3279_v47 = vadd.f32 %v3278_v42, %v3075_v14  ;;  %v2741_v15 = vpop.f32.mrb[100].mxu0  ;;  %v2967_v62 = vpop.f32.mrb[132].mxu1 }
 0x6c5   :  { %v10166_v61 = vadd.f32 %v2741_v15, %v12475_v48  ;;  %v10198_v24 = vadd.f32 %v2967_v62, %v12480_v43  ;;  %v2743_v44 = vpop.f32.mrb[101].mxu0  ;;  %v2969_v45 = vpop.f32.mrb[133].mxu1 }
 0x6c6   :  { %v10167_v28 = vadd.f32 %v2743_v44, %v12485_v41  ;;  %v10199_v32 = vadd.f32 %v2969_v45, %v12490_v40  ;;  %v2745_v53 = vpop.f32.mrb[102].mxu0  ;;  %v2971_v2 = vpop.f32.mrb[134].mxu1 }
 0x6c7   :  { %v3080_v4 = vmax.f32 %v10166_v61, 0.0  ;;  %v3082_v37 = vmax.f32 %v10198_v24, 0.0  ;;  %v10168_v1 = vadd.f32 %v2745_v53, %v12475_v48  ;;  %v10200_v56 = vadd.f32 %v2971_v2, %v12480_v43  ;;  %v2747_v7 = vpop.f32.mrb[103].mxu0  ;;  %v2973_v17 = vpop.f32.mrb[135].mxu1 }
 0x6c8   :  { %v3081_v54 = vmax.f32 %v10167_v28, 0.0  ;;  %v3083_v63 = vmax.f32 %v10199_v32, 0.0  ;;  %v10169_v12 = vadd.f32 %v2747_v7, %v12485_v41  ;;  %v10201_v11 = vadd.f32 %v2973_v17, %v12490_v40 }
 0x6c9   :  { %v3217_v16 = vadd.f32 %v3216_v39, %v3080_v4  ;;  %v3259_v38 = vadd.f32 %v3258_v60, %v3082_v37  ;;  %v3088_v27 = vmax.f32 %v10168_v1, 0.0  ;;  %v3090_v13 = vmax.f32 %v10200_v56, 0.0 }
 0x6ca   :  { %v3238_v49 = vadd.f32 %v3237_v8, %v3081_v54  ;;  %v3280_v21 = vadd.f32 %v3279_v47, %v3083_v63  ;;  %v3089_v25 = vmax.f32 %v10169_v12, 0.0  ;;  %v3091_v57 = vmax.f32 %v10201_v11, 0.0 }
 0x6cb   :  { %v3218_v29 = vadd.f32 %v3217_v16, %v3088_v27  ;;  %v3260_v33 = vadd.f32 %v3259_v38, %v3090_v13 }
 0x6cc   :  { %v3239_v46 = vadd.f32 %v3238_v49, %v3089_v25  ;;  %v3281_v59 = vadd.f32 %v3280_v21, %v3091_v57  ;;  %v2751_v0 = vpop.f32.mrb[104].mxu0  ;;  %v2977_v10 = vpop.f32.mrb[136].mxu1 }
 0x6cd   :  { %v10170_v30 = vadd.f32 %v2751_v0, %v12475_v48  ;;  %v10202_v42 = vadd.f32 %v2977_v10, %v12480_v43  ;;  %v2753_v34 = vpop.f32.mrb[105].mxu0  ;;  %v2979_v14 = vpop.f32.mrb[137].mxu1 }
 0x6ce   :  { %v10171_v39 = vadd.f32 %v2753_v34, %v12485_v41  ;;  %v10203_v60 = vadd.f32 %v2979_v14, %v12490_v40  ;;  %v2755_v8 = vpop.f32.mrb[106].mxu0  ;;  %v2981_v47 = vpop.f32.mrb[138].mxu1 }
 0x6cf   :  { %v3096_v15 = vmax.f32 %v10170_v30, 0.0  ;;  %v3098_v62 = vmax.f32 %v10202_v42, 0.0  ;;  %v10172_v61 = vadd.f32 %v2755_v8, %v12475_v48  ;;  %v10204_v24 = vadd.f32 %v2981_v47, %v12480_v43  ;;  %v2757_v44 = vpop.f32.mrb[107].mxu0  ;;  %v2983_v45 = vpop.f32.mrb[139].mxu1 }
 0x6d0   :  { %v3097_v28 = vmax.f32 %v10171_v39, 0.0  ;;  %v3099_v32 = vmax.f32 %v10203_v60, 0.0  ;;  %v10173_v53 = vadd.f32 %v2757_v44, %v12485_v41  ;;  %v10205_v2 = vadd.f32 %v2983_v45, %v12490_v40 }
 0x6d1   :  { %v3219_v4 = vadd.f32 %v3218_v29, %v3096_v15  ;;  %v3261_v37 = vadd.f32 %v3260_v33, %v3098_v62  ;;  %v3104_v1 = vmax.f32 %v10172_v61, 0.0  ;;  %v3106_v56 = vmax.f32 %v10204_v24, 0.0 }
 0x6d2   :  { %v3240_v7 = vadd.f32 %v3239_v46, %v3097_v28  ;;  %v3282_v17 = vadd.f32 %v3281_v59, %v3099_v32  ;;  %v3105_v54 = vmax.f32 %v10173_v53, 0.0  ;;  %v3107_v63 = vmax.f32 %v10205_v2, 0.0 }
 0x6d3   :  { %v3220_v12 = vadd.f32 %v3219_v4, %v3104_v1  ;;  %v3262_v11 = vadd.f32 %v3261_v37, %v3106_v56 }
 0x6d4   :  { %v3241_v16 = vadd.f32 %v3240_v7, %v3105_v54  ;;  %v3283_v38 = vadd.f32 %v3282_v17, %v3107_v63  ;;  %v2761_v27 = vpop.f32.mrb[108].mxu0  ;;  %v2987_v13 = vpop.f32.mrb[140].mxu1 }
 0x6d5   :  { %v10174_v49 = vadd.f32 %v2761_v27, %v12475_v48  ;;  %v10206_v21 = vadd.f32 %v2987_v13, %v12480_v43  ;;  %v2763_v25 = vpop.f32.mrb[109].mxu0  ;;  %v2989_v57 = vpop.f32.mrb[141].mxu1 }
 0x6d6   :  { %v10175_v29 = vadd.f32 %v2763_v25, %v12485_v41  ;;  %v10207_v33 = vadd.f32 %v2989_v57, %v12490_v40  ;;  %v2765_v46 = vpop.f32.mrb[110].mxu0  ;;  %v2991_v59 = vpop.f32.mrb[142].mxu1 }
 0x6d7   :  { %v3112_v0 = vmax.f32 %v10174_v49, 0.0  ;;  %v3114_v10 = vmax.f32 %v10206_v21, 0.0  ;;  %v10176_v30 = vadd.f32 %v2765_v46, %v12475_v48  ;;  %v10208_v42 = vadd.f32 %v2991_v59, %v12480_v43  ;;  %v2767_v34 = vpop.f32.mrb[111].mxu0  ;;  %v2993_v14 = vpop.f32.mrb[143].mxu1 }
 0x6d8   :  { %v3113_v39 = vmax.f32 %v10175_v29, 0.0  ;;  %v3115_v60 = vmax.f32 %v10207_v33, 0.0  ;;  %v10177_v8 = vadd.f32 %v2767_v34, %v12485_v41  ;;  %v10209_v47 = vadd.f32 %v2993_v14, %v12490_v40 }
 0x6d9   :  { %v3221_v15 = vadd.f32 %v3220_v12, %v3112_v0  ;;  %v3263_v62 = vadd.f32 %v3262_v11, %v3114_v10  ;;  %v3120_v61 = vmax.f32 %v10176_v30, 0.0  ;;  %v3122_v24 = vmax.f32 %v10208_v42, 0.0 }
 0x6da   :  { %v3242_v44 = vadd.f32 %v3241_v16, %v3113_v39  ;;  %v3284_v45 = vadd.f32 %v3283_v38, %v3115_v60  ;;  %v3121_v28 = vmax.f32 %v10177_v8, 0.0  ;;  %v3123_v32 = vmax.f32 %v10209_v47, 0.0 }
 0x6db   :  { %v3222_v53 = vadd.f32 %v3221_v15, %v3120_v61  ;;  %v3264_v48 = vadd.f32 %v3263_v62, %v3122_v24 }
 0x6dc   :  { %v3243_v2 = vadd.f32 %v3242_v44, %v3121_v28  ;;  %v3285_v43 = vadd.f32 %v3284_v45, %v3123_v32 }
 0x6dd   :  { %v3223_v4 = vrot.slane %v3222_v53, 4  ;;  %v3265_v37 = vrot.slane %v3264_v48, 4 }
 0x6de   :  { %v3244_v1 = vrot.slane %v3243_v2, 4  ;;  %v3286_v56 = vrot.slane %v3285_v43, 4 }
 0x6df   :  { %v3224_v7 = vadd.f32 %v3223_v4, %v3222_v53  ;;  %v3266_v41 = vadd.f32 %v3265_v37, %v3264_v48 }
 0x6e0   :  { %v3245_v17 = vadd.f32 %v3244_v1, %v3243_v2  ;;  %v3287_v40 = vadd.f32 %v3286_v56, %v3285_v43 }
 0x6e1   :  { %v3225_v54 = vrot.slane %v3224_v7, 2  ;;  %v3267_v63 = vrot.slane %v3266_v41, 2 }
 0x6e2   :  { %v3246_v12 = vrot.slane %v3245_v17, 2  ;;  %v3288_v11 = vrot.slane %v3287_v40, 2 }
 0x6e3   :  { %v3226_v16 = vadd.f32 %v3225_v54, %v3224_v7  ;;  %v3268_v38 = vadd.f32 %v3267_v63, %v3266_v41 }
 0x6e4   :  { %v3247_v27 = vadd.f32 %v3246_v12, %v3245_v17  ;;  %v3289_v13 = vadd.f32 %v3288_v11, %v3287_v40 }
 0x6e5   :  { %v3227_v49 = vrot.slane %v3226_v16, 1  ;;  %v3269_v21 = vrot.slane %v3268_v38, 1 }
 0x6e6   :  { %v3248_v25 = vrot.slane %v3247_v27, 1  ;;  %v3290_v57 = vrot.slane %v3289_v13, 1 }
 0x6e7   :  { %v3228_v29 = vadd.f32 %v3227_v49, %v3226_v16  ;;  %v3270_v33 = vadd.f32 %v3269_v21, %v3268_v38 }
 0x6e8   :  { %v3249_v46 = vadd.f32 %v3248_v25, %v3247_v27  ;;  %v3291_v59 = vadd.f32 %v3290_v57, %v3289_v13 }
 0x6e9   :  { %v12556_v0 = vmul.f32 0.0078125, %v3228_v29  ;;  %v12558_v10 = vmul.f32 0.0078125, %v3270_v33 }
 0x6ea   :  { %v12560_v30 = vmul.f32 0.0078125, %v3249_v46  ;;  %v12562_v42 = vmul.f32 0.0078125, %v3291_v59 }
 0x6eb   :  { %11555 = dma.done.wait [#allocation5 + $0x1], 30720 }
 0x6ec   :  { %11556 = vsyncadd [#allocation5 + $0x1], 4294936576 }
 0x6ed   :  { %11557 = dma.done.wait [#allocation5 + $0x2], 81920 }
 0x6ee   :  { %11558 = vsyncadd [#allocation5 + $0x2], 4294885376  ;;  %v12566_v34 = vpack.c.bf16 %v12464_v20, %v12464_v20  ;;  %v3549_v14 = vld [vmem:[#allocation4 + $0x8] sm:$0xff]  ;;  %v3551_v39 = vld [vmem:[#allocation4 + $0x18] sm:$0xff]  ;;  %vm11593_vm4 = vmmov 0   ;;  %s11596_s18 = smov 122  }
 0x6ef   :  { %v3548_v60 = vld [vmem:[#allocation4] sm:$0xff]  ;;  %4196 = vmatprep.subr.bf16.mxu0 %v3549_v14  ;;  %4360 = vmatprep.subr.bf16.mxu1 %v3551_v39  ;;  %v3550_v8 = vld [vmem:[#allocation4 + $0x10] sm:$0xff]  ;;  %v3559_v47 = vld [vmem:[#allocation4 + $0x58] sm:$0xff]  ;;  %s11597_s9 = smov 12   ;;  %s11598_s5 = smov 124   ;;  %vm9280_vm5 = vcmask 24576  }
 0x6f0   :  { %4228 = vmatprep.mubr.bf16.mxu0 %v12566_v34  ;;  %4392 = vmatprep.mubr.bf16.mxu1 %v12566_v34  ;;  %v3561_v15 = vld [vmem:[#allocation4 + $0x68] sm:$0xff]  ;;  %v3558_v62 = vld [vmem:[#allocation4 + $0x50] sm:$0xff]  ;;  %v3560_v61 = vld [vmem:[#allocation4 + $0x60] sm:$0xff]  ;;  %s11599_s27 = smov 120   ;;  %s11600_s8 = smov 116  }
 0x6f1   :  { %4197 = vmatpush1.bf16.msra.mxu0 %v3548_v60  ;;  %4361 = vmatpush1.bf16.msra.mxu1 %v3550_v8  ;;  %v3569_v20 = vld [vmem:[#allocation4 + $0xa8] sm:$0xff]  ;;  %v3571_v24 = vld [vmem:[#allocation4 + $0xb8] sm:$0xff]  ;;  %v3568_v44 = vld [vmem:[#allocation4 + $0xa0] sm:$0xff]  ;;  %s11601_s4 = smov 112   ;;  %s11602_s19 = smov [#allocation18]  }
 0x6f2   :  { %4198 = vmatprep.subr.bf16.mxu0 %v3559_v47  ;;  %4362 = vmatprep.subr.bf16.mxu1 %v3561_v15  ;;  %v3570_v45 = vld [vmem:[#allocation4 + $0xb0] sm:$0xff]  ;;  %v3579_v28 = vld [vmem:[#allocation4 + $0xf8] sm:$0xff]  ;;  %v3581_v32 = vld [vmem:[#allocation4 + $0x108] sm:$0xff]  ;;  %s9311_s21 = sshll.u32 %s11602_s19, 4  ;;  %s9312_s21 = int_to_ptr.vmem [resolvable:$true] %s9311_s21 }
 0x6f3   :  { %v3578_v53 = vld [vmem:[#allocation4 + $0xf0] sm:$0xff]  ;;  %v3580_v48 = vld [vmem:[#allocation4 + $0x100] sm:$0xff]  ;;  %v3589_v2 = vld [vmem:[#allocation4 + $0x148] sm:$0xff]  ;;  %s11501_s2 = scalar_lea.vmem %s9312_s21, 16  ;;  %s11505_s30 = scalar_lea.vmem %s9312_s21, 32 }
 0x6f4   :  { %v3591_v43 = vld [vmem:[#allocation4 + $0x158] sm:$0xff]  ;;  %v3588_v4 = vld [vmem:[#allocation4 + $0x140] sm:$0xff]  ;;  %v3590_v37 = vld [vmem:[#allocation4 + $0x150] sm:$0xff]  ;;  %p11502_p0 = scmp.ne.s32.totalorder %s9312_s21, %s11501_s2  ;;  %p11506_p1 = scmp.lt.s32.totalorder %s9312_s21, %s9312_s21 }
 0x6f5   :  { %4199 = vmatpush1.bf16.msra.mxu0 %v3558_v62  ;;  %4363 = vmatpush1.bf16.msra.mxu1 %v3560_v61  ;;  %v3599_v1 = vld [vmem:[#allocation4 + $0x198] sm:$0xff]  ;;  %v3601_v56 = vld [vmem:[#allocation4 + $0x1a8] sm:$0xff]  ;;  %v3598_v7 = vld [vmem:[#allocation4 + $0x190] sm:$0xff]  ;;  %p11507_p2 = scmp.lt.s32.totalorder %s11505_s30, %s11501_s2 }
 0x6f6   :  { %4200 = vmatprep.subr.bf16.mxu0 %v3569_v20  ;;  %4364 = vmatprep.subr.bf16.mxu1 %v3571_v24  ;;  %v3600_v41 = vld [vmem:[#allocation4 + $0x1a0] sm:$0xff]  ;;  %v3609_v17 = vld [vmem:[#allocation4 + $0x1e8] sm:$0xff]  ;;  %v3611_v40 = vld [vmem:[#allocation4 + $0x1f8] sm:$0xff] }
 0x6f7   :  { %v3608_v54 = vld [vmem:[#allocation4 + $0x1e0] sm:$0xff]  ;;  %v3610_v63 = vld [vmem:[#allocation4 + $0x1f0] sm:$0xff]  ;;  %v3619_v12 = vld [vmem:[#allocation4 + $0x238] sm:$0xff]  ;;  %p11508_p3 = por %p11507_p2, %p11506_p1 }
 0x6f8   :  { %v3621_v11 = vld [vmem:[#allocation4 + $0x248] sm:$0xff]  ;;  %v3618_v16 = vld [vmem:[#allocation4 + $0x230] sm:$0xff]  ;;  %v3620_v38 = vld [vmem:[#allocation4 + $0x240] sm:$0xff] }
 0x6f9   :  { %4201 = vmatpush1.bf16.msra.mxu0 %v3568_v44  ;;  %4365 = vmatpush1.bf16.msra.mxu1 %v3570_v45  ;;  %v3629_v27 = vld [vmem:[#allocation4 + $0x288] sm:$0xff]  ;;  %v3631_v13 = vld [vmem:[#allocation4 + $0x298] sm:$0xff]  ;;  %v3628_v49 = vld [vmem:[#allocation4 + $0x280] sm:$0xff]  ;;  %p11509_p4 = pnand %p11508_p3, %p11502_p0 }
 0x6fa   :  { %4202 = vmatprep.subr.bf16.mxu0 %v3579_v28  ;;  %4366 = vmatprep.subr.bf16.mxu1 %v3581_v32  ;;  %v3630_v21 = vld [vmem:[#allocation4 + $0x290] sm:$0xff]  ;;  %v3639_v25 = vld [vmem:[#allocation4 + $0x2d8] sm:$0xff]  ;;  %v3641_v57 = vld [vmem:[#allocation4 + $0x2e8] sm:$0xff] }
 0x6fb   :  { %v3638_v29 = vld [vmem:[#allocation4 + $0x2d0] sm:$0xff]  ;;  %v3640_v33 = vld [vmem:[#allocation4 + $0x2e0] sm:$0xff]  ;;  %v3649_v46 = vld [vmem:[#allocation4 + $0x328] sm:$0xff] }
 0x6fc   :  { %v3651_v59 = vld [vmem:[#allocation4 + $0x338] sm:$0xff]  ;;  %v3648_v14 = vld [vmem:[#allocation4 + $0x320] sm:$0xff]  ;;  %v3650_v39 = vld [vmem:[#allocation4 + $0x330] sm:$0xff] }
 0x6fd   :  { %4203 = vmatpush1.bf16.msra.mxu0 %v3578_v53  ;;  %4367 = vmatpush1.bf16.msra.mxu1 %v3580_v48  ;;  %v3659_v60 = vld [vmem:[#allocation4 + $0x378] sm:$0xff]  ;;  %v3661_v8 = vld [vmem:[#allocation4 + $0x388] sm:$0xff]  ;;  %v3658_v47 = vld [vmem:[#allocation4 + $0x370] sm:$0xff] }
 0x6fe   :  { %4204 = vmatprep.subr.bf16.mxu0 %v3589_v2  ;;  %4368 = vmatprep.subr.bf16.mxu1 %v3591_v43  ;;  %v3660_v15 = vld [vmem:[#allocation4 + $0x380] sm:$0xff]  ;;  %v3669_v62 = vld [vmem:[#allocation4 + $0x3c8] sm:$0xff]  ;;  %v3671_v61 = vld [vmem:[#allocation4 + $0x3d8] sm:$0xff] }
 0x6ff   :  { %v3668_v20 = vld [vmem:[#allocation4 + $0x3c0] sm:$0xff]  ;;  %v3670_v24 = vld [vmem:[#allocation4 + $0x3d0] sm:$0xff]  ;;  %v3679_v44 = vld [vmem:[#allocation4 + $0x418] sm:$0xff] }
 0x700   :  { %v3681_v45 = vld [vmem:[#allocation4 + $0x428] sm:$0xff]  ;;  %v3678_v28 = vld [vmem:[#allocation4 + $0x410] sm:$0xff]  ;;  %v3680_v32 = vld [vmem:[#allocation4 + $0x420] sm:$0xff] }
 0x701   :  { %4205 = vmatpush1.bf16.msra.mxu0 %v3588_v4  ;;  %4369 = vmatpush1.bf16.msra.mxu1 %v3590_v37  ;;  %v3689_v53 = vld [vmem:[#allocation4 + $0x468] sm:$0xff]  ;;  %v3691_v48 = vld [vmem:[#allocation4 + $0x478] sm:$0xff]  ;;  %v3688_v2 = vld [vmem:[#allocation4 + $0x460] sm:$0xff] }
 0x702   :  { %4206 = vmatprep.subr.bf16.mxu0 %v3599_v1  ;;  %4370 = vmatprep.subr.bf16.mxu1 %v3601_v56  ;;  %v3690_v43 = vld [vmem:[#allocation4 + $0x470] sm:$0xff]  ;;  %v3699_v4 = vld [vmem:[#allocation4 + $0x4b8] sm:$0xff]  ;;  %v3701_v37 = vld [vmem:[#allocation4 + $0x4c8] sm:$0xff] }
 0x703   :  { %v3698_v1 = vld [vmem:[#allocation4 + $0x4b0] sm:$0xff]  ;;  %v3700_v56 = vld [vmem:[#allocation4 + $0x4c0] sm:$0xff]  ;;  %v3317_v55 = vld [vmem:[#allocation3 + $0x48] sm:$0xff] }
 0x704   :  { %v3327_v22 = vld [vmem:[#allocation3 + $0x98] sm:$0xff] }
 0x705   :  { %4207 = vmatpush1.bf16.msra.mxu0 %v3598_v7  ;;  %4371 = vmatpush1.bf16.msra.mxu1 %v3600_v41  ;;  %v3709_v7 = vld [vmem:[#allocation4 + $0x508] sm:$0xff]  ;;  %v3711_v41 = vld [vmem:[#allocation4 + $0x518] sm:$0xff] }
 0x706   :  { %4208 = vmatprep.subr.bf16.mxu0 %v3609_v17  ;;  %4372 = vmatprep.subr.bf16.mxu1 %v3611_v40  ;;  %v12572_v17 = vpack.c.bf16 %v12460_v51, %v12460_v51  ;;  %v3708_v40 = vld [vmem:[#allocation4 + $0x500] sm:$0xff] }
 0x707   :  { %v3720_v51 = vld [vmem:[#allocation4 + $0x560] sm:$0xff] }
 0x709   :  { %4209 = vmatpush1.bf16.msra.mxu0 %v3608_v54  ;;  %4373 = vmatpush1.bf16.msra.mxu1 %v3610_v63  ;;  %v3710_v54 = vld [vmem:[#allocation4 + $0x510] sm:$0xff]  ;;  %v3719_v63 = vld [vmem:[#allocation4 + $0x558] sm:$0xff] }
 0x70a   :  { %4210 = vmatprep.subr.bf16.mxu0 %v3619_v12  ;;  %4374 = vmatprep.subr.bf16.mxu1 %v3621_v11  ;;  %v3721_v12 = vld [vmem:[#allocation4 + $0x568] sm:$0xff]  ;;  %v12576_v11 = vpack.c.bf16 %v12466_v58, %v12466_v58  ;;  %v3730_v58 = vld [vmem:[#allocation4 + $0x5b0] sm:$0xff] }
 0x70d   :  { %4211 = vmatpush1.bf16.msra.mxu0 %v3618_v16  ;;  %4375 = vmatpush1.bf16.msra.mxu1 %v3620_v38  ;;  %v3718_v16 = vld [vmem:[#allocation4 + $0x550] sm:$0xff]  ;;  %v3729_v38 = vld [vmem:[#allocation4 + $0x5a8] sm:$0xff] }
 0x70e   :  { %4212 = vmatprep.subr.bf16.mxu0 %v3629_v27  ;;  %4376 = vmatprep.subr.bf16.mxu1 %v3631_v13  ;;  %v3731_v27 = vld [vmem:[#allocation4 + $0x5b8] sm:$0xff]  ;;  %v3728_v13 = vld [vmem:[#allocation4 + $0x5a0] sm:$0xff] }
 0x711   :  { %4213 = vmatpush1.bf16.msra.mxu0 %v3628_v49  ;;  %4377 = vmatpush1.bf16.msra.mxu1 %v3630_v21  ;;  %v3739_v49 = vld [vmem:[#allocation4 + $0x5f8] sm:$0xff]  ;;  %v3741_v21 = vld [vmem:[#allocation4 + $0x608] sm:$0xff] }
 0x712   :  { %4214 = vmatprep.subr.bf16.mxu0 %v3639_v25  ;;  %4378 = vmatprep.subr.bf16.mxu1 %v3641_v57  ;;  %v3738_v25 = vld [vmem:[#allocation4 + $0x5f0] sm:$0xff]  ;;  %v3740_v57 = vld [vmem:[#allocation4 + $0x600] sm:$0xff] }
 0x715   :  { %4215 = vmatpush1.bf16.msra.mxu0 %v3638_v29  ;;  %4379 = vmatpush1.bf16.msra.mxu1 %v3640_v33  ;;  %v3749_v29 = vld [vmem:[#allocation4 + $0x648] sm:$0xff]  ;;  %v3751_v33 = vld [vmem:[#allocation4 + $0x658] sm:$0xff] }
 0x716   :  { %4216 = vmatprep.subr.bf16.mxu0 %v3649_v46  ;;  %4380 = vmatprep.subr.bf16.mxu1 %v3651_v59  ;;  %v3748_v46 = vld [vmem:[#allocation4 + $0x640] sm:$0xff]  ;;  %v3750_v59 = vld [vmem:[#allocation4 + $0x650] sm:$0xff] }
 0x719   :  { %4217 = vmatpush1.bf16.msra.mxu0 %v3648_v14  ;;  %4381 = vmatpush1.bf16.msra.mxu1 %v3650_v39  ;;  %v3759_v14 = vld [vmem:[#allocation4 + $0x698] sm:$0xff]  ;;  %v3761_v39 = vld [vmem:[#allocation4 + $0x6a8] sm:$0xff] }
 0x71a   :  { %4218 = vmatprep.subr.bf16.mxu0 %v3659_v60  ;;  %4382 = vmatprep.subr.bf16.mxu1 %v3661_v8  ;;  %v3758_v60 = vld [vmem:[#allocation4 + $0x690] sm:$0xff]  ;;  %v3760_v8 = vld [vmem:[#allocation4 + $0x6a0] sm:$0xff] }
 0x71d   :  { %4219 = vmatpush1.bf16.msra.mxu0 %v3658_v47  ;;  %4383 = vmatpush1.bf16.msra.mxu1 %v3660_v15  ;;  %v3769_v47 = vld [vmem:[#allocation4 + $0x6e8] sm:$0xff]  ;;  %v3771_v15 = vld [vmem:[#allocation4 + $0x6f8] sm:$0xff] }
 0x71e   :  { %4220 = vmatprep.subr.bf16.mxu0 %v3669_v62  ;;  %4384 = vmatprep.subr.bf16.mxu1 %v3671_v61  ;;  %v3768_v62 = vld [vmem:[#allocation4 + $0x6e0] sm:$0xff]  ;;  %v3770_v61 = vld [vmem:[#allocation4 + $0x6f0] sm:$0xff] }
 0x721   :  { %4221 = vmatpush1.bf16.msra.mxu0 %v3668_v20  ;;  %4385 = vmatpush1.bf16.msra.mxu1 %v3670_v24  ;;  %v3779_v20 = vld [vmem:[#allocation4 + $0x738] sm:$0xff]  ;;  %v3781_v24 = vld [vmem:[#allocation4 + $0x748] sm:$0xff] }
 0x722   :  { %4222 = vmatprep.subr.bf16.mxu0 %v3679_v44  ;;  %4386 = vmatprep.subr.bf16.mxu1 %v3681_v45  ;;  %v3778_v44 = vld [vmem:[#allocation4 + $0x730] sm:$0xff]  ;;  %v3780_v45 = vld [vmem:[#allocation4 + $0x740] sm:$0xff] }
 0x725   :  { %4223 = vmatpush1.bf16.msra.mxu0 %v3678_v28  ;;  %4387 = vmatpush1.bf16.msra.mxu1 %v3680_v32  ;;  %v3789_v28 = vld [vmem:[#allocation4 + $0x788] sm:$0xff]  ;;  %v3791_v32 = vld [vmem:[#allocation4 + $0x798] sm:$0xff] }
 0x726   :  { %4224 = vmatprep.subr.bf16.mxu0 %v3689_v53  ;;  %4388 = vmatprep.subr.bf16.mxu1 %v3691_v48  ;;  %v3788_v53 = vld [vmem:[#allocation4 + $0x780] sm:$0xff]  ;;  %v3790_v48 = vld [vmem:[#allocation4 + $0x790] sm:$0xff] }
 0x729   :  { %4225 = vmatpush1.bf16.msra.mxu0 %v3688_v2  ;;  %4389 = vmatpush1.bf16.msra.mxu1 %v3690_v43  ;;  %v3799_v2 = vld [vmem:[#allocation4 + $0x7d8] sm:$0xff]  ;;  %v3801_v43 = vld [vmem:[#allocation4 + $0x7e8] sm:$0xff] }
 0x72a   :  { %4226 = vmatprep.subr.bf16.mxu0 %v3699_v4  ;;  %4390 = vmatprep.subr.bf16.mxu1 %v3701_v37  ;;  %v3798_v4 = vld [vmem:[#allocation4 + $0x7d0] sm:$0xff]  ;;  %v3800_v37 = vld [vmem:[#allocation4 + $0x7e0] sm:$0xff] }
 0x72d   :  { %4227 = vmatpush1.bf16.msra.mxu0 %v3698_v1  ;;  %4391 = vmatpush1.bf16.msra.mxu1 %v3700_v56  ;;  %v3809_v1 = vld [vmem:[#allocation4 + $0x828] sm:$0xff]  ;;  %v3811_v56 = vld [vmem:[#allocation4 + $0x838] sm:$0xff] }
 0x72e   :  { %4237 = vmatprep.subr.bf16.mxu0 %v3709_v7  ;;  %4401 = vmatprep.subr.bf16.mxu1 %v3711_v41  ;;  %v3808_v7 = vld [vmem:[#allocation4 + $0x820] sm:$0xff]  ;;  %v3810_v41 = vld [vmem:[#allocation4 + $0x830] sm:$0xff] }
 0x730   :  { %4229 = vmatmul.mubr.bf16.vlgmr.msra.gmra.mrb[112].mxu0 %v12572_v17  ;;  %4393 = vmatmul.mubr.bf16.vlgmr.msra.gmra.mrb[144].mxu1 %v12572_v17 }
 0x731   :  { %4238 = vmatpush1.bf16.msra.mxu0 %v3708_v40  ;;  %4402 = vmatpush1.bf16.msra.mxu1 %v3710_v54  ;;  %v3819_v40 = vld [vmem:[#allocation4 + $0x878] sm:$0xff]  ;;  %v3821_v54 = vld [vmem:[#allocation4 + $0x888] sm:$0xff] }
 0x732   :  { %4239 = vmatprep.subr.bf16.mxu0 %v3719_v63  ;;  %4403 = vmatprep.subr.bf16.mxu1 %v3721_v12  ;;  %v3818_v63 = vld [vmem:[#allocation4 + $0x870] sm:$0xff]  ;;  %v3820_v12 = vld [vmem:[#allocation4 + $0x880] sm:$0xff] }
 0x733   :  { %4269 = vmatprep.mubr.bf16.mxu0 %v12576_v11  ;;  %4433 = vmatprep.mubr.bf16.mxu1 %v12576_v11 }
 0x735   :  { %4240 = vmatpush1.bf16.msra.mxu0 %v3718_v16  ;;  %4404 = vmatpush1.bf16.msra.mxu1 %v3720_v51  ;;  %v3829_v16 = vld [vmem:[#allocation4 + $0x8c8] sm:$0xff]  ;;  %v3831_v51 = vld [vmem:[#allocation4 + $0x8d8] sm:$0xff] }
 0x736   :  { %4241 = vmatprep.subr.bf16.mxu0 %v3729_v38  ;;  %4405 = vmatprep.subr.bf16.mxu1 %v3731_v27  ;;  %v3828_v38 = vld [vmem:[#allocation4 + $0x8c0] sm:$0xff]  ;;  %v3830_v27 = vld [vmem:[#allocation4 + $0x8d0] sm:$0xff] }
 0x739   :  { %4242 = vmatpush1.bf16.msra.mxu0 %v3728_v13  ;;  %4406 = vmatpush1.bf16.msra.mxu1 %v3730_v58  ;;  %v3839_v13 = vld [vmem:[#allocation4 + $0x918] sm:$0xff]  ;;  %v3841_v58 = vld [vmem:[#allocation4 + $0x928] sm:$0xff] }
 0x73a   :  { %4243 = vmatprep.subr.bf16.mxu0 %v3739_v49  ;;  %4407 = vmatprep.subr.bf16.mxu1 %v3741_v21  ;;  %v3838_v49 = vld [vmem:[#allocation4 + $0x910] sm:$0xff]  ;;  %v3840_v21 = vld [vmem:[#allocation4 + $0x920] sm:$0xff] }
 0x73d   :  { %4244 = vmatpush1.bf16.msra.mxu0 %v3738_v25  ;;  %4408 = vmatpush1.bf16.msra.mxu1 %v3740_v57  ;;  %v3849_v25 = vld [vmem:[#allocation4 + $0x968] sm:$0xff]  ;;  %v3851_v57 = vld [vmem:[#allocation4 + $0x978] sm:$0xff] }
 0x73e   :  { %4245 = vmatprep.subr.bf16.mxu0 %v3749_v29  ;;  %4409 = vmatprep.subr.bf16.mxu1 %v3751_v33  ;;  %v3848_v29 = vld [vmem:[#allocation4 + $0x960] sm:$0xff]  ;;  %v3850_v33 = vld [vmem:[#allocation4 + $0x970] sm:$0xff] }
 0x741   :  { %4246 = vmatpush1.bf16.msra.mxu0 %v3748_v46  ;;  %4410 = vmatpush1.bf16.msra.mxu1 %v3750_v59  ;;  %v3859_v46 = vld [vmem:[#allocation4 + $0x9b8] sm:$0xff]  ;;  %v3861_v59 = vld [vmem:[#allocation4 + $0x9c8] sm:$0xff] }
 0x742   :  { %4247 = vmatprep.subr.bf16.mxu0 %v3759_v14  ;;  %4411 = vmatprep.subr.bf16.mxu1 %v3761_v39  ;;  %v3858_v14 = vld [vmem:[#allocation4 + $0x9b0] sm:$0xff]  ;;  %v3860_v39 = vld [vmem:[#allocation4 + $0x9c0] sm:$0xff] }
 0x745   :  { %4248 = vmatpush1.bf16.msra.mxu0 %v3758_v60  ;;  %4412 = vmatpush1.bf16.msra.mxu1 %v3760_v8  ;;  %v3869_v60 = vld [vmem:[#allocation4 + $0xa08] sm:$0xff]  ;;  %v3871_v8 = vld [vmem:[#allocation4 + $0xa18] sm:$0xff] }
 0x746   :  { %4249 = vmatprep.subr.bf16.mxu0 %v3769_v47  ;;  %4413 = vmatprep.subr.bf16.mxu1 %v3771_v15  ;;  %v12584_v47 = vpack.c.bf16 %v12462_v52, %v12462_v52  ;;  %v3868_v15 = vld [vmem:[#allocation4 + $0xa00] sm:$0xff] }
 0x747   :  { %v3880_v52 = vld [vmem:[#allocation4 + $0xa60] sm:$0xff] }
 0x749   :  { %4250 = vmatpush1.bf16.msra.mxu0 %v3768_v62  ;;  %4414 = vmatpush1.bf16.msra.mxu1 %v3770_v61  ;;  %v3870_v62 = vld [vmem:[#allocation4 + $0xa10] sm:$0xff]  ;;  %v3879_v61 = vld [vmem:[#allocation4 + $0xa58] sm:$0xff] }
 0x74a   :  { %4251 = vmatprep.subr.bf16.mxu0 %v3779_v20  ;;  %4415 = vmatprep.subr.bf16.mxu1 %v3781_v24  ;;  %v3881_v20 = vld [vmem:[#allocation4 + $0xa68] sm:$0xff]  ;;  %v12588_v24 = vpack.c.bf16 %v12560_v30, %v12560_v30  ;;  %v3890_v30 = vld [vmem:[#allocation4 + $0xab0] sm:$0xff] }
 0x74d   :  { %4252 = vmatpush1.bf16.msra.mxu0 %v3778_v44  ;;  %4416 = vmatpush1.bf16.msra.mxu1 %v3780_v45  ;;  %v3878_v44 = vld [vmem:[#allocation4 + $0xa50] sm:$0xff]  ;;  %v3889_v45 = vld [vmem:[#allocation4 + $0xaa8] sm:$0xff] }
 0x74e   :  { %4253 = vmatprep.subr.bf16.mxu0 %v3789_v28  ;;  %4417 = vmatprep.subr.bf16.mxu1 %v3791_v32  ;;  %v3891_v28 = vld [vmem:[#allocation4 + $0xab8] sm:$0xff]  ;;  %v3888_v32 = vld [vmem:[#allocation4 + $0xaa0] sm:$0xff] }
 0x751   :  { %4254 = vmatpush1.bf16.msra.mxu0 %v3788_v53  ;;  %4418 = vmatpush1.bf16.msra.mxu1 %v3790_v48  ;;  %v3899_v53 = vld [vmem:[#allocation4 + $0xaf8] sm:$0xff]  ;;  %v3901_v48 = vld [vmem:[#allocation4 + $0xb08] sm:$0xff] }
 0x752   :  { %4255 = vmatprep.subr.bf16.mxu0 %v3799_v2  ;;  %4419 = vmatprep.subr.bf16.mxu1 %v3801_v43  ;;  %v3898_v2 = vld [vmem:[#allocation4 + $0xaf0] sm:$0xff]  ;;  %v3900_v43 = vld [vmem:[#allocation4 + $0xb00] sm:$0xff] }
 0x755   :  { %4256 = vmatpush1.bf16.msra.mxu0 %v3798_v4  ;;  %4420 = vmatpush1.bf16.msra.mxu1 %v3800_v37  ;;  %v3909_v4 = vld [vmem:[#allocation4 + $0xb48] sm:$0xff]  ;;  %v3911_v37 = vld [vmem:[#allocation4 + $0xb58] sm:$0xff] }
 0x756   :  { %4257 = vmatprep.subr.bf16.mxu0 %v3809_v1  ;;  %4421 = vmatprep.subr.bf16.mxu1 %v3811_v56  ;;  %v3908_v1 = vld [vmem:[#allocation4 + $0xb40] sm:$0xff]  ;;  %v3910_v56 = vld [vmem:[#allocation4 + $0xb50] sm:$0xff] }
 0x759   :  { %4258 = vmatpush1.bf16.msra.mxu0 %v3808_v7  ;;  %4422 = vmatpush1.bf16.msra.mxu1 %v3810_v41  ;;  %v3919_v7 = vld [vmem:[#allocation4 + $0xb98] sm:$0xff]  ;;  %v3921_v41 = vld [vmem:[#allocation4 + $0xba8] sm:$0xff] }
 0x75a   :  { %4259 = vmatprep.subr.bf16.mxu0 %v3819_v40  ;;  %4423 = vmatprep.subr.bf16.mxu1 %v3821_v54  ;;  %v3918_v40 = vld [vmem:[#allocation4 + $0xb90] sm:$0xff]  ;;  %v3920_v54 = vld [vmem:[#allocation4 + $0xba0] sm:$0xff] }
 0x75d   :  { %4260 = vmatpush1.bf16.msra.mxu0 %v3818_v63  ;;  %4424 = vmatpush1.bf16.msra.mxu1 %v3820_v12  ;;  %v3929_v63 = vld [vmem:[#allocation4 + $0xbe8] sm:$0xff]  ;;  %v3931_v12 = vld [vmem:[#allocation4 + $0xbf8] sm:$0xff] }
 0x75e   :  { %4261 = vmatprep.subr.bf16.mxu0 %v3829_v16  ;;  %4425 = vmatprep.subr.bf16.mxu1 %v3831_v51  ;;  %v3928_v16 = vld [vmem:[#allocation4 + $0xbe0] sm:$0xff]  ;;  %v3930_v51 = vld [vmem:[#allocation4 + $0xbf0] sm:$0xff] }
 0x761   :  { %4262 = vmatpush1.bf16.msra.mxu0 %v3828_v38  ;;  %4426 = vmatpush1.bf16.msra.mxu1 %v3830_v27  ;;  %v3939_v38 = vld [vmem:[#allocation4 + $0xc38] sm:$0xff]  ;;  %v3941_v27 = vld [vmem:[#allocation4 + $0xc48] sm:$0xff] }
 0x762   :  { %4263 = vmatprep.subr.bf16.mxu0 %v3839_v13  ;;  %4427 = vmatprep.subr.bf16.mxu1 %v3841_v58  ;;  %v3938_v13 = vld [vmem:[#allocation4 + $0xc30] sm:$0xff]  ;;  %v3940_v58 = vld [vmem:[#allocation4 + $0xc40] sm:$0xff] }
 0x765   :  { %4264 = vmatpush1.bf16.msra.mxu0 %v3838_v49  ;;  %4428 = vmatpush1.bf16.msra.mxu1 %v3840_v21  ;;  %v3949_v49 = vld [vmem:[#allocation4 + $0xc88] sm:$0xff]  ;;  %v3951_v21 = vld [vmem:[#allocation4 + $0xc98] sm:$0xff] }
 0x766   :  { %4265 = vmatprep.subr.bf16.mxu0 %v3849_v25  ;;  %4429 = vmatprep.subr.bf16.mxu1 %v3851_v57  ;;  %v3948_v25 = vld [vmem:[#allocation4 + $0xc80] sm:$0xff]  ;;  %v3950_v57 = vld [vmem:[#allocation4 + $0xc90] sm:$0xff] }
 0x769   :  { %4266 = vmatpush1.bf16.msra.mxu0 %v3848_v29  ;;  %4430 = vmatpush1.bf16.msra.mxu1 %v3850_v33  ;;  %v3959_v29 = vld [vmem:[#allocation4 + $0xcd8] sm:$0xff]  ;;  %v3961_v33 = vld [vmem:[#allocation4 + $0xce8] sm:$0xff] }
 0x76a   :  { %4267 = vmatprep.subr.bf16.mxu0 %v3859_v46  ;;  %4431 = vmatprep.subr.bf16.mxu1 %v3861_v59  ;;  %v3958_v46 = vld [vmem:[#allocation4 + $0xcd0] sm:$0xff]  ;;  %v3960_v59 = vld [vmem:[#allocation4 + $0xce0] sm:$0xff] }
 0x76d   :  { %4268 = vmatpush1.bf16.msra.mxu0 %v3858_v14  ;;  %4432 = vmatpush1.bf16.msra.mxu1 %v3860_v39  ;;  %v3969_v14 = vld [vmem:[#allocation4 + $0xd28] sm:$0xff]  ;;  %v3971_v39 = vld [vmem:[#allocation4 + $0xd38] sm:$0xff] }
 0x76e   :  { %4278 = vmatprep.subr.bf16.mxu0 %v3869_v60  ;;  %4442 = vmatprep.subr.bf16.mxu1 %v3871_v8  ;;  %v3968_v60 = vld [vmem:[#allocation4 + $0xd20] sm:$0xff]  ;;  %v3970_v8 = vld [vmem:[#allocation4 + $0xd30] sm:$0xff] }
 0x770   :  { %4270 = vmatmul.mubr.bf16.vlgmr.msra.gmra.mrb[112].mxu0 %v12584_v47  ;;  %4434 = vmatmul.mubr.bf16.vlgmr.msra.gmra.mrb[144].mxu1 %v12584_v47 }
 0x771   :  { %4279 = vmatpush1.bf16.msra.mxu0 %v3868_v15  ;;  %4443 = vmatpush1.bf16.msra.mxu1 %v3870_v62  ;;  %v3979_v15 = vld [vmem:[#allocation4 + $0xd78] sm:$0xff]  ;;  %v3981_v62 = vld [vmem:[#allocation4 + $0xd88] sm:$0xff] }
 0x772   :  { %4280 = vmatprep.subr.bf16.mxu0 %v3879_v61  ;;  %4444 = vmatprep.subr.bf16.mxu1 %v3881_v20  ;;  %v3978_v61 = vld [vmem:[#allocation4 + $0xd70] sm:$0xff]  ;;  %v3980_v20 = vld [vmem:[#allocation4 + $0xd80] sm:$0xff] }
 0x773   :  { %4310 = vmatprep.mubr.bf16.mxu0 %v12588_v24  ;;  %4474 = vmatprep.mubr.bf16.mxu1 %v12588_v24 }
 0x775   :  { %4281 = vmatpush1.bf16.msra.mxu0 %v3878_v44  ;;  %4445 = vmatpush1.bf16.msra.mxu1 %v3880_v52  ;;  %v3989_v44 = vld [vmem:[#allocation4 + $0xdc8] sm:$0xff]  ;;  %v3991_v52 = vld [vmem:[#allocation4 + $0xdd8] sm:$0xff] }
 0x776   :  { %4282 = vmatprep.subr.bf16.mxu0 %v3889_v45  ;;  %4446 = vmatprep.subr.bf16.mxu1 %v3891_v28  ;;  %v3988_v45 = vld [vmem:[#allocation4 + $0xdc0] sm:$0xff]  ;;  %v3990_v28 = vld [vmem:[#allocation4 + $0xdd0] sm:$0xff] }
 0x779   :  { %4283 = vmatpush1.bf16.msra.mxu0 %v3888_v32  ;;  %4447 = vmatpush1.bf16.msra.mxu1 %v3890_v30  ;;  %v3999_v32 = vld [vmem:[#allocation4 + $0xe18] sm:$0xff]  ;;  %v4001_v30 = vld [vmem:[#allocation4 + $0xe28] sm:$0xff] }
 0x77a   :  { %4284 = vmatprep.subr.bf16.mxu0 %v3899_v53  ;;  %4448 = vmatprep.subr.bf16.mxu1 %v3901_v48  ;;  %v3998_v53 = vld [vmem:[#allocation4 + $0xe10] sm:$0xff]  ;;  %v4000_v48 = vld [vmem:[#allocation4 + $0xe20] sm:$0xff] }
 0x77d   :  { %4285 = vmatpush1.bf16.msra.mxu0 %v3898_v2  ;;  %4449 = vmatpush1.bf16.msra.mxu1 %v3900_v43  ;;  %v4009_v2 = vld [vmem:[#allocation4 + $0xe68] sm:$0xff]  ;;  %v4011_v43 = vld [vmem:[#allocation4 + $0xe78] sm:$0xff] }
 0x77e   :  { %4286 = vmatprep.subr.bf16.mxu0 %v3909_v4  ;;  %4450 = vmatprep.subr.bf16.mxu1 %v3911_v37  ;;  %v4008_v4 = vld [vmem:[#allocation4 + $0xe60] sm:$0xff]  ;;  %v4010_v37 = vld [vmem:[#allocation4 + $0xe70] sm:$0xff] }
 0x781   :  { %4287 = vmatpush1.bf16.msra.mxu0 %v3908_v1  ;;  %4451 = vmatpush1.bf16.msra.mxu1 %v3910_v56  ;;  %v4019_v1 = vld [vmem:[#allocation4 + $0xeb8] sm:$0xff]  ;;  %v4021_v56 = vld [vmem:[#allocation4 + $0xec8] sm:$0xff] }
 0x782   :  { %4288 = vmatprep.subr.bf16.mxu0 %v3919_v7  ;;  %4452 = vmatprep.subr.bf16.mxu1 %v3921_v41  ;;  %v4018_v7 = vld [vmem:[#allocation4 + $0xeb0] sm:$0xff]  ;;  %v4020_v41 = vld [vmem:[#allocation4 + $0xec0] sm:$0xff] }
 0x785   :  { %4289 = vmatpush1.bf16.msra.mxu0 %v3918_v40  ;;  %4453 = vmatpush1.bf16.msra.mxu1 %v3920_v54  ;;  %v4029_v40 = vld [vmem:[#allocation4 + $0xf08] sm:$0xff]  ;;  %v4031_v54 = vld [vmem:[#allocation4 + $0xf18] sm:$0xff] }
 0x786   :  { %4290 = vmatprep.subr.bf16.mxu0 %v3929_v63  ;;  %4454 = vmatprep.subr.bf16.mxu1 %v3931_v12  ;;  %v12596_v63 = vpack.c.bf16 %v12556_v0, %v12556_v0  ;;  %v4028_v12 = vld [vmem:[#allocation4 + $0xf00] sm:$0xff]  ;;  %v4038_v0 = vld [vmem:[#allocation4 + $0xf50] sm:$0xff] }
 0x789   :  { %4291 = vmatpush1.bf16.msra.mxu0 %v3928_v16  ;;  %4455 = vmatpush1.bf16.msra.mxu1 %v3930_v51  ;;  %v4030_v16 = vld [vmem:[#allocation4 + $0xf10] sm:$0xff]  ;;  %v4039_v51 = vld [vmem:[#allocation4 + $0xf58] sm:$0xff] }
 0x78a   :  { %4292 = vmatprep.subr.bf16.mxu0 %v3939_v38  ;;  %4456 = vmatprep.subr.bf16.mxu1 %v3941_v27  ;;  %v4041_v38 = vld [vmem:[#allocation4 + $0xf68] sm:$0xff]  ;;  %v12600_v27 = vpack.c.bf16 %v12562_v42, %v12562_v42  ;;  %v4048_v42 = vld [vmem:[#allocation4 + $0xfa0] sm:$0xff] }
 0x78d   :  { %4293 = vmatpush1.bf16.msra.mxu0 %v3938_v13  ;;  %4457 = vmatpush1.bf16.msra.mxu1 %v3940_v58  ;;  %v4040_v13 = vld [vmem:[#allocation4 + $0xf60] sm:$0xff]  ;;  %v4049_v58 = vld [vmem:[#allocation4 + $0xfa8] sm:$0xff] }
 0x78e   :  { %4294 = vmatprep.subr.bf16.mxu0 %v3949_v49  ;;  %4458 = vmatprep.subr.bf16.mxu1 %v3951_v21  ;;  %v4051_v49 = vld [vmem:[#allocation4 + $0xfb8] sm:$0xff]  ;;  %v4050_v21 = vld [vmem:[#allocation4 + $0xfb0] sm:$0xff] }
 0x791   :  { %4295 = vmatpush1.bf16.msra.mxu0 %v3948_v25  ;;  %4459 = vmatpush1.bf16.msra.mxu1 %v3950_v57  ;;  %v4059_v25 = vld [vmem:[#allocation4 + $0xff8] sm:$0xff]  ;;  %v4061_v57 = vld [vmem:[#allocation4 + $0x1008] sm:$0xff] }
 0x792   :  { %4296 = vmatprep.subr.bf16.mxu0 %v3959_v29  ;;  %4460 = vmatprep.subr.bf16.mxu1 %v3961_v33  ;;  %v4058_v29 = vld [vmem:[#allocation4 + $0xff0] sm:$0xff]  ;;  %v4060_v33 = vld [vmem:[#allocation4 + $0x1000] sm:$0xff] }
 0x795   :  { %4297 = vmatpush1.bf16.msra.mxu0 %v3958_v46  ;;  %4461 = vmatpush1.bf16.msra.mxu1 %v3960_v59  ;;  %v4069_v46 = vld [vmem:[#allocation4 + $0x1048] sm:$0xff]  ;;  %v4071_v59 = vld [vmem:[#allocation4 + $0x1058] sm:$0xff] }
 0x796   :  { %4298 = vmatprep.subr.bf16.mxu0 %v3969_v14  ;;  %4462 = vmatprep.subr.bf16.mxu1 %v3971_v39  ;;  %v4068_v14 = vld [vmem:[#allocation4 + $0x1040] sm:$0xff]  ;;  %v4070_v39 = vld [vmem:[#allocation4 + $0x1050] sm:$0xff] }
 0x799   :  { %4299 = vmatpush1.bf16.msra.mxu0 %v3968_v60  ;;  %4463 = vmatpush1.bf16.msra.mxu1 %v3970_v8  ;;  %v4079_v60 = vld [vmem:[#allocation4 + $0x1098] sm:$0xff]  ;;  %v4081_v8 = vld [vmem:[#allocation4 + $0x10a8] sm:$0xff] }
 0x79a   :  { %4300 = vmatprep.subr.bf16.mxu0 %v3979_v15  ;;  %4464 = vmatprep.subr.bf16.mxu1 %v3981_v62  ;;  %v4078_v15 = vld [vmem:[#allocation4 + $0x1090] sm:$0xff]  ;;  %v4080_v62 = vld [vmem:[#allocation4 + $0x10a0] sm:$0xff] }
 0x79d   :  { %4301 = vmatpush1.bf16.msra.mxu0 %v3978_v61  ;;  %4465 = vmatpush1.bf16.msra.mxu1 %v3980_v20  ;;  %v4089_v61 = vld [vmem:[#allocation4 + $0x10e8] sm:$0xff]  ;;  %v4091_v20 = vld [vmem:[#allocation4 + $0x10f8] sm:$0xff] }
 0x79e   :  { %4302 = vmatprep.subr.bf16.mxu0 %v3989_v44  ;;  %4466 = vmatprep.subr.bf16.mxu1 %v3991_v52  ;;  %v4088_v44 = vld [vmem:[#allocation4 + $0x10e0] sm:$0xff]  ;;  %v4090_v52 = vld [vmem:[#allocation4 + $0x10f0] sm:$0xff] }
 0x7a1   :  { %4303 = vmatpush1.bf16.msra.mxu0 %v3988_v45  ;;  %4467 = vmatpush1.bf16.msra.mxu1 %v3990_v28  ;;  %v4099_v45 = vld [vmem:[#allocation4 + $0x1138] sm:$0xff]  ;;  %v4101_v28 = vld [vmem:[#allocation4 + $0x1148] sm:$0xff] }
 0x7a2   :  { %4304 = vmatprep.subr.bf16.mxu0 %v3999_v32  ;;  %4468 = vmatprep.subr.bf16.mxu1 %v4001_v30  ;;  %v4098_v32 = vld [vmem:[#allocation4 + $0x1130] sm:$0xff]  ;;  %v4100_v30 = vld [vmem:[#allocation4 + $0x1140] sm:$0xff] }
 0x7a5   :  { %4305 = vmatpush1.bf16.msra.mxu0 %v3998_v53  ;;  %4469 = vmatpush1.bf16.msra.mxu1 %v4000_v48  ;;  %v4109_v53 = vld [vmem:[#allocation4 + $0x1188] sm:$0xff]  ;;  %v4111_v48 = vld [vmem:[#allocation4 + $0x1198] sm:$0xff] }
 0x7a6   :  { %4306 = vmatprep.subr.bf16.mxu0 %v4009_v2  ;;  %4470 = vmatprep.subr.bf16.mxu1 %v4011_v43  ;;  %v4108_v2 = vld [vmem:[#allocation4 + $0x1180] sm:$0xff]  ;;  %v4110_v43 = vld [vmem:[#allocation4 + $0x1190] sm:$0xff] }
 0x7a9   :  { %4307 = vmatpush1.bf16.msra.mxu0 %v4008_v4  ;;  %4471 = vmatpush1.bf16.msra.mxu1 %v4010_v37  ;;  %v4119_v4 = vld [vmem:[#allocation4 + $0x11d8] sm:$0xff]  ;;  %v4121_v37 = vld [vmem:[#allocation4 + $0x11e8] sm:$0xff] }
 0x7aa   :  { %4308 = vmatprep.subr.bf16.mxu0 %v4019_v1  ;;  %4472 = vmatprep.subr.bf16.mxu1 %v4021_v56  ;;  %v4118_v1 = vld [vmem:[#allocation4 + $0x11d0] sm:$0xff]  ;;  %v4120_v56 = vld [vmem:[#allocation4 + $0x11e0] sm:$0xff] }
 0x7ad   :  { %4309 = vmatpush1.bf16.msra.mxu0 %v4018_v7  ;;  %4473 = vmatpush1.bf16.msra.mxu1 %v4020_v41  ;;  %v4129_v7 = vld [vmem:[#allocation4 + $0x1228] sm:$0xff]  ;;  %v4131_v41 = vld [vmem:[#allocation4 + $0x1238] sm:$0xff] }
 0x7ae   :  { %4319 = vmatprep.subr.bf16.mxu0 %v4029_v40  ;;  %4483 = vmatprep.subr.bf16.mxu1 %v4031_v54  ;;  %v4128_v40 = vld [vmem:[#allocation4 + $0x1220] sm:$0xff]  ;;  %v4130_v54 = vld [vmem:[#allocation4 + $0x1230] sm:$0xff] }
 0x7b0   :  { %4311 = vmatmul.mubr.bf16.vlgmr.msra.gmra.mrb[112].mxu0 %v12596_v63  ;;  %4475 = vmatmul.mubr.bf16.vlgmr.msra.gmra.mrb[144].mxu1 %v12596_v63 }
 0x7b1   :  { %4320 = vmatpush1.bf16.msra.mxu0 %v4028_v12  ;;  %4484 = vmatpush1.bf16.msra.mxu1 %v4030_v16  ;;  %v4139_v12 = vld [vmem:[#allocation4 + $0x1278] sm:$0xff]  ;;  %v4141_v16 = vld [vmem:[#allocation4 + $0x1288] sm:$0xff] }
 0x7b2   :  { %4321 = vmatprep.subr.bf16.mxu0 %v4039_v51  ;;  %4485 = vmatprep.subr.bf16.mxu1 %v4041_v38  ;;  %v4138_v51 = vld [vmem:[#allocation4 + $0x1270] sm:$0xff]  ;;  %v4140_v38 = vld [vmem:[#allocation4 + $0x1280] sm:$0xff] }
 0x7b3   :  { %4351 = vmatprep.mubr.bf16.mxu0 %v12600_v27  ;;  %4515 = vmatprep.mubr.bf16.mxu1 %v12600_v27 }
 0x7b5   :  { %4322 = vmatpush1.bf16.msra.mxu0 %v4038_v0  ;;  %4486 = vmatpush1.bf16.msra.mxu1 %v4040_v13  ;;  %v4149_v0 = vld [vmem:[#allocation4 + $0x12c8] sm:$0xff]  ;;  %v4151_v13 = vld [vmem:[#allocation4 + $0x12d8] sm:$0xff] }
 0x7b6   :  { %4323 = vmatprep.subr.bf16.mxu0 %v4049_v58  ;;  %4487 = vmatprep.subr.bf16.mxu1 %v4051_v49  ;;  %v4148_v58 = vld [vmem:[#allocation4 + $0x12c0] sm:$0xff]  ;;  %v4150_v49 = vld [vmem:[#allocation4 + $0x12d0] sm:$0xff] }
 0x7b9   :  { %4324 = vmatpush1.bf16.msra.mxu0 %v4048_v42  ;;  %4488 = vmatpush1.bf16.msra.mxu1 %v4050_v21  ;;  %v4159_v42 = vld [vmem:[#allocation4 + $0x1318] sm:$0xff]  ;;  %v4161_v21 = vld [vmem:[#allocation4 + $0x1328] sm:$0xff] }
 0x7ba   :  { %4325 = vmatprep.subr.bf16.mxu0 %v4059_v25  ;;  %4489 = vmatprep.subr.bf16.mxu1 %v4061_v57  ;;  %v4158_v25 = vld [vmem:[#allocation4 + $0x1310] sm:$0xff]  ;;  %v4160_v57 = vld [vmem:[#allocation4 + $0x1320] sm:$0xff] }
 0x7bd   :  { %4326 = vmatpush1.bf16.msra.mxu0 %v4058_v29  ;;  %4490 = vmatpush1.bf16.msra.mxu1 %v4060_v33  ;;  %v4169_v29 = vld [vmem:[#allocation4 + $0x1368] sm:$0xff]  ;;  %v4171_v33 = vld [vmem:[#allocation4 + $0x1378] sm:$0xff] }
 0x7be   :  { %4327 = vmatprep.subr.bf16.mxu0 %v4069_v46  ;;  %4491 = vmatprep.subr.bf16.mxu1 %v4071_v59  ;;  %v4168_v46 = vld [vmem:[#allocation4 + $0x1360] sm:$0xff]  ;;  %v4170_v59 = vld [vmem:[#allocation4 + $0x1370] sm:$0xff] }
 0x7c1   :  { %4328 = vmatpush1.bf16.msra.mxu0 %v4068_v14  ;;  %4492 = vmatpush1.bf16.msra.mxu1 %v4070_v39  ;;  %v4179_v14 = vld [vmem:[#allocation4 + $0x13b8] sm:$0xff]  ;;  %v4181_v39 = vld [vmem:[#allocation4 + $0x13c8] sm:$0xff] }
 0x7c2   :  { %4329 = vmatprep.subr.bf16.mxu0 %v4079_v60  ;;  %4493 = vmatprep.subr.bf16.mxu1 %v4081_v8  ;;  %v4178_v60 = vld [vmem:[#allocation4 + $0x13b0] sm:$0xff]  ;;  %v4180_v8 = vld [vmem:[#allocation4 + $0x13c0] sm:$0xff] }
 0x7c5   :  { %4330 = vmatpush1.bf16.msra.mxu0 %v4078_v15  ;;  %4494 = vmatpush1.bf16.msra.mxu1 %v4080_v62  ;;  %v3553_v15 = vld [vmem:[#allocation4 + $0x28] sm:$0xff]  ;;  %v3555_v62 = vld [vmem:[#allocation4 + $0x38] sm:$0xff] }
 0x7c6   :  { %4331 = vmatprep.subr.bf16.mxu0 %v4089_v61  ;;  %4495 = vmatprep.subr.bf16.mxu1 %v4091_v20  ;;  %v12608_v61 = vpack.c.bf16 %v12558_v10, %v12558_v10  ;;  %v3552_v20 = vld [vmem:[#allocation4 + $0x20] sm:$0xff]  ;;  %v3573_v10 = vld [vmem:[#allocation4 + $0xc8] sm:$0xff] }
 0x7c9   :  { %4332 = vmatpush1.bf16.msra.mxu0 %v4088_v44  ;;  %4496 = vmatpush1.bf16.msra.mxu1 %v4090_v52  ;;  %v3554_v44 = vld [vmem:[#allocation4 + $0x30] sm:$0xff]  ;;  %v3563_v52 = vld [vmem:[#allocation4 + $0x78] sm:$0xff] }
 0x7ca   :  { %4333 = vmatprep.subr.bf16.mxu0 %v4099_v45  ;;  %4497 = vmatprep.subr.bf16.mxu1 %v4101_v28  ;;  %v3565_v45 = vld [vmem:[#allocation4 + $0x88] sm:$0xff]  ;;  %v3562_v28 = vld [vmem:[#allocation4 + $0x70] sm:$0xff] }
 0x7cd   :  { %4334 = vmatpush1.bf16.msra.mxu0 %v4098_v32  ;;  %4498 = vmatpush1.bf16.msra.mxu1 %v4100_v30  ;;  %v3564_v32 = vld [vmem:[#allocation4 + $0x80] sm:$0xff]  ;;  %v3575_v30 = vld [vmem:[#allocation4 + $0xd8] sm:$0xff] }
 0x7ce   :  { %4335 = vmatprep.subr.bf16.mxu0 %v4109_v53  ;;  %4499 = vmatprep.subr.bf16.mxu1 %v4111_v48  ;;  %v3572_v53 = vld [vmem:[#allocation4 + $0xc0] sm:$0xff]  ;;  %v3574_v48 = vld [vmem:[#allocation4 + $0xd0] sm:$0xff] }
 0x7d1   :  { %4336 = vmatpush1.bf16.msra.mxu0 %v4108_v2  ;;  %4500 = vmatpush1.bf16.msra.mxu1 %v4110_v43  ;;  %v3583_v2 = vld [vmem:[#allocation4 + $0x118] sm:$0xff]  ;;  %v3585_v43 = vld [vmem:[#allocation4 + $0x128] sm:$0xff] }
 0x7d2   :  { %4337 = vmatprep.subr.bf16.mxu0 %v4119_v4  ;;  %4501 = vmatprep.subr.bf16.mxu1 %v4121_v37  ;;  %v3582_v4 = vld [vmem:[#allocation4 + $0x110] sm:$0xff]  ;;  %v3584_v37 = vld [vmem:[#allocation4 + $0x120] sm:$0xff] }
 0x7d5   :  { %4338 = vmatpush1.bf16.msra.mxu0 %v4118_v1  ;;  %4502 = vmatpush1.bf16.msra.mxu1 %v4120_v56  ;;  %v3593_v1 = vld [vmem:[#allocation4 + $0x168] sm:$0xff]  ;;  %v3595_v56 = vld [vmem:[#allocation4 + $0x178] sm:$0xff] }
 0x7d6   :  { %4339 = vmatprep.subr.bf16.mxu0 %v4129_v7  ;;  %4503 = vmatprep.subr.bf16.mxu1 %v4131_v41  ;;  %v3592_v7 = vld [vmem:[#allocation4 + $0x160] sm:$0xff]  ;;  %v3594_v41 = vld [vmem:[#allocation4 + $0x170] sm:$0xff] }
 0x7d9   :  { %4340 = vmatpush1.bf16.msra.mxu0 %v4128_v40  ;;  %4504 = vmatpush1.bf16.msra.mxu1 %v4130_v54  ;;  %v3603_v40 = vld [vmem:[#allocation4 + $0x1b8] sm:$0xff]  ;;  %v3605_v54 = vld [vmem:[#allocation4 + $0x1c8] sm:$0xff] }
 0x7da   :  { %4341 = vmatprep.subr.bf16.mxu0 %v4139_v12  ;;  %4505 = vmatprep.subr.bf16.mxu1 %v4141_v16  ;;  %v3602_v12 = vld [vmem:[#allocation4 + $0x1b0] sm:$0xff]  ;;  %v3604_v16 = vld [vmem:[#allocation4 + $0x1c0] sm:$0xff] }
 0x7dd   :  { %4342 = vmatpush1.bf16.msra.mxu0 %v4138_v51  ;;  %4506 = vmatpush1.bf16.msra.mxu1 %v4140_v38  ;;  %v3613_v51 = vld [vmem:[#allocation4 + $0x208] sm:$0xff]  ;;  %v3615_v38 = vld [vmem:[#allocation4 + $0x218] sm:$0xff] }
 0x7de   :  { %4343 = vmatprep.subr.bf16.mxu0 %v4149_v0  ;;  %4507 = vmatprep.subr.bf16.mxu1 %v4151_v13  ;;  %v3612_v0 = vld [vmem:[#allocation4 + $0x200] sm:$0xff]  ;;  %v3614_v13 = vld [vmem:[#allocation4 + $0x210] sm:$0xff] }
 0x7e1   :  { %4344 = vmatpush1.bf16.msra.mxu0 %v4148_v58  ;;  %4508 = vmatpush1.bf16.msra.mxu1 %v4150_v49  ;;  %v3623_v58 = vld [vmem:[#allocation4 + $0x258] sm:$0xff]  ;;  %v3625_v49 = vld [vmem:[#allocation4 + $0x268] sm:$0xff] }
 0x7e2   :  { %4345 = vmatprep.subr.bf16.mxu0 %v4159_v42  ;;  %4509 = vmatprep.subr.bf16.mxu1 %v4161_v21  ;;  %v3622_v42 = vld [vmem:[#allocation4 + $0x250] sm:$0xff]  ;;  %v3624_v21 = vld [vmem:[#allocation4 + $0x260] sm:$0xff] }
 0x7e5   :  { %4346 = vmatpush1.bf16.msra.mxu0 %v4158_v25  ;;  %4510 = vmatpush1.bf16.msra.mxu1 %v4160_v57  ;;  %v3633_v25 = vld [vmem:[#allocation4 + $0x2a8] sm:$0xff]  ;;  %v3635_v57 = vld [vmem:[#allocation4 + $0x2b8] sm:$0xff] }
 0x7e6   :  { %4347 = vmatprep.subr.bf16.mxu0 %v4169_v29  ;;  %4511 = vmatprep.subr.bf16.mxu1 %v4171_v33  ;;  %v3632_v29 = vld [vmem:[#allocation4 + $0x2a0] sm:$0xff]  ;;  %v3634_v33 = vld [vmem:[#allocation4 + $0x2b0] sm:$0xff] }
 0x7e9   :  { %4348 = vmatpush1.bf16.msra.mxu0 %v4168_v46  ;;  %4512 = vmatpush1.bf16.msra.mxu1 %v4170_v59  ;;  %v3643_v46 = vld [vmem:[#allocation4 + $0x2f8] sm:$0xff]  ;;  %v3645_v59 = vld [vmem:[#allocation4 + $0x308] sm:$0xff] }
 0x7ea   :  { %4349 = vmatprep.subr.bf16.mxu0 %v4179_v14  ;;  %4513 = vmatprep.subr.bf16.mxu1 %v4181_v39  ;;  %v3642_v14 = vld [vmem:[#allocation4 + $0x2f0] sm:$0xff]  ;;  %v3644_v39 = vld [vmem:[#allocation4 + $0x300] sm:$0xff] }
 0x7ed   :  { %4350 = vmatpush1.bf16.msra.mxu0 %v4178_v60  ;;  %4514 = vmatpush1.bf16.msra.mxu1 %v4180_v8  ;;  %v3653_v60 = vld [vmem:[#allocation4 + $0x348] sm:$0xff]  ;;  %v3655_v8 = vld [vmem:[#allocation4 + $0x358] sm:$0xff] }
 0x7ee   :  { %4524 = vmatprep.subr.bf16.mxu0 %v3553_v15  ;;  %4688 = vmatprep.subr.bf16.mxu1 %v3555_v62  ;;  %v3652_v15 = vld [vmem:[#allocation4 + $0x340] sm:$0xff]  ;;  %v3654_v62 = vld [vmem:[#allocation4 + $0x350] sm:$0xff] }
 0x7f0   :  { %4352 = vmatmul.mubr.bf16.vlgmr.msra.gmra.mrb[112].mxu0 %v12608_v61  ;;  %4516 = vmatmul.mubr.bf16.vlgmr.msra.gmra.mrb[144].mxu1 %v12608_v61 }
 0x7f1   :  { %4525 = vmatpush1.bf16.msra.mxu0 %v3552_v20  ;;  %4689 = vmatpush1.bf16.msra.mxu1 %v3554_v44  ;;  %v3663_v20 = vld [vmem:[#allocation4 + $0x398] sm:$0xff]  ;;  %v3665_v44 = vld [vmem:[#allocation4 + $0x3a8] sm:$0xff] }
 0x7f2   :  { %4526 = vmatprep.subr.bf16.mxu0 %v3563_v52  ;;  %4690 = vmatprep.subr.bf16.mxu1 %v3565_v45  ;;  %v3662_v52 = vld [vmem:[#allocation4 + $0x390] sm:$0xff]  ;;  %v3664_v45 = vld [vmem:[#allocation4 + $0x3a0] sm:$0xff] }
 0x7f3   :  { %4556 = vmatprep.mubr.bf16.mxu0 %v12566_v34  ;;  %4720 = vmatprep.mubr.bf16.mxu1 %v12566_v34 }
 0x7f5   :  { %4527 = vmatpush1.bf16.msra.mxu0 %v3562_v28  ;;  %4691 = vmatpush1.bf16.msra.mxu1 %v3564_v32  ;;  %v3673_v28 = vld [vmem:[#allocation4 + $0x3e8] sm:$0xff]  ;;  %v3675_v32 = vld [vmem:[#allocation4 + $0x3f8] sm:$0xff] }
 0x7f6   :  { %4528 = vmatprep.subr.bf16.mxu0 %v3573_v10  ;;  %4692 = vmatprep.subr.bf16.mxu1 %v3575_v30  ;;  %v3672_v10 = vld [vmem:[#allocation4 + $0x3e0] sm:$0xff]  ;;  %v3674_v30 = vld [vmem:[#allocation4 + $0x3f0] sm:$0xff] }
 0x7f9   :  { %4529 = vmatpush1.bf16.msra.mxu0 %v3572_v53  ;;  %4693 = vmatpush1.bf16.msra.mxu1 %v3574_v48  ;;  %v3683_v53 = vld [vmem:[#allocation4 + $0x438] sm:$0xff]  ;;  %v3685_v48 = vld [vmem:[#allocation4 + $0x448] sm:$0xff] }
 0x7fa   :  { %4530 = vmatprep.subr.bf16.mxu0 %v3583_v2  ;;  %4694 = vmatprep.subr.bf16.mxu1 %v3585_v43  ;;  %v3682_v2 = vld [vmem:[#allocation4 + $0x430] sm:$0xff]  ;;  %v3684_v43 = vld [vmem:[#allocation4 + $0x440] sm:$0xff] }
 0x7fd   :  { %4531 = vmatpush1.bf16.msra.mxu0 %v3582_v4  ;;  %4695 = vmatpush1.bf16.msra.mxu1 %v3584_v37  ;;  %v3693_v4 = vld [vmem:[#allocation4 + $0x488] sm:$0xff]  ;;  %v3695_v37 = vld [vmem:[#allocation4 + $0x498] sm:$0xff] }
 0x7fe   :  { %4532 = vmatprep.subr.bf16.mxu0 %v3593_v1  ;;  %4696 = vmatprep.subr.bf16.mxu1 %v3595_v56  ;;  %v3692_v1 = vld [vmem:[#allocation4 + $0x480] sm:$0xff]  ;;  %v3694_v56 = vld [vmem:[#allocation4 + $0x490] sm:$0xff] }
 0x801   :  { %4533 = vmatpush1.bf16.msra.mxu0 %v3592_v7  ;;  %4697 = vmatpush1.bf16.msra.mxu1 %v3594_v41  ;;  %v3703_v7 = vld [vmem:[#allocation4 + $0x4d8] sm:$0xff]  ;;  %v3705_v41 = vld [vmem:[#allocation4 + $0x4e8] sm:$0xff] }
 0x802   :  { %4534 = vmatprep.subr.bf16.mxu0 %v3603_v40  ;;  %4698 = vmatprep.subr.bf16.mxu1 %v3605_v54  ;;  %v3702_v40 = vld [vmem:[#allocation4 + $0x4d0] sm:$0xff]  ;;  %v3704_v54 = vld [vmem:[#allocation4 + $0x4e0] sm:$0xff] }
 0x805   :  { %4535 = vmatpush1.bf16.msra.mxu0 %v3602_v12  ;;  %4699 = vmatpush1.bf16.msra.mxu1 %v3604_v16  ;;  %v3713_v12 = vld [vmem:[#allocation4 + $0x528] sm:$0xff]  ;;  %v3715_v16 = vld [vmem:[#allocation4 + $0x538] sm:$0xff] }
 0x806   :  { %4536 = vmatprep.subr.bf16.mxu0 %v3613_v51  ;;  %4700 = vmatprep.subr.bf16.mxu1 %v3615_v38  ;;  %v3712_v51 = vld [vmem:[#allocation4 + $0x520] sm:$0xff]  ;;  %v3714_v38 = vld [vmem:[#allocation4 + $0x530] sm:$0xff] }
 0x809   :  { %4537 = vmatpush1.bf16.msra.mxu0 %v3612_v0  ;;  %4701 = vmatpush1.bf16.msra.mxu1 %v3614_v13  ;;  %v3723_v0 = vld [vmem:[#allocation4 + $0x578] sm:$0xff]  ;;  %v3725_v13 = vld [vmem:[#allocation4 + $0x588] sm:$0xff] }
 0x80a   :  { %4538 = vmatprep.subr.bf16.mxu0 %v3623_v58  ;;  %4702 = vmatprep.subr.bf16.mxu1 %v3625_v49  ;;  %v3722_v58 = vld [vmem:[#allocation4 + $0x570] sm:$0xff]  ;;  %v3724_v49 = vld [vmem:[#allocation4 + $0x580] sm:$0xff] }
 0x80d   :  { %4539 = vmatpush1.bf16.msra.mxu0 %v3622_v42  ;;  %4703 = vmatpush1.bf16.msra.mxu1 %v3624_v21  ;;  %v3733_v42 = vld [vmem:[#allocation4 + $0x5c8] sm:$0xff]  ;;  %v3735_v21 = vld [vmem:[#allocation4 + $0x5d8] sm:$0xff] }
 0x80e   :  { %4540 = vmatprep.subr.bf16.mxu0 %v3633_v25  ;;  %4704 = vmatprep.subr.bf16.mxu1 %v3635_v57  ;;  %v3732_v25 = vld [vmem:[#allocation4 + $0x5c0] sm:$0xff]  ;;  %v3734_v57 = vld [vmem:[#allocation4 + $0x5d0] sm:$0xff] }
 0x811   :  { %4541 = vmatpush1.bf16.msra.mxu0 %v3632_v29  ;;  %4705 = vmatpush1.bf16.msra.mxu1 %v3634_v33  ;;  %v3743_v29 = vld [vmem:[#allocation4 + $0x618] sm:$0xff]  ;;  %v3745_v33 = vld [vmem:[#allocation4 + $0x628] sm:$0xff] }
 0x812   :  { %4542 = vmatprep.subr.bf16.mxu0 %v3643_v46  ;;  %4706 = vmatprep.subr.bf16.mxu1 %v3645_v59  ;;  %v3742_v46 = vld [vmem:[#allocation4 + $0x610] sm:$0xff]  ;;  %v3744_v59 = vld [vmem:[#allocation4 + $0x620] sm:$0xff] }
 0x815   :  { %4543 = vmatpush1.bf16.msra.mxu0 %v3642_v14  ;;  %4707 = vmatpush1.bf16.msra.mxu1 %v3644_v39  ;;  %v3753_v14 = vld [vmem:[#allocation4 + $0x668] sm:$0xff]  ;;  %v3755_v39 = vld [vmem:[#allocation4 + $0x678] sm:$0xff] }
 0x816   :  { %4544 = vmatprep.subr.bf16.mxu0 %v3653_v60  ;;  %4708 = vmatprep.subr.bf16.mxu1 %v3655_v8  ;;  %v3752_v60 = vld [vmem:[#allocation4 + $0x660] sm:$0xff]  ;;  %v3754_v8 = vld [vmem:[#allocation4 + $0x670] sm:$0xff] }
 0x819   :  { %4545 = vmatpush1.bf16.msra.mxu0 %v3652_v15  ;;  %4709 = vmatpush1.bf16.msra.mxu1 %v3654_v62  ;;  %v3763_v15 = vld [vmem:[#allocation4 + $0x6b8] sm:$0xff]  ;;  %v3765_v62 = vld [vmem:[#allocation4 + $0x6c8] sm:$0xff] }
 0x81a   :  { %4546 = vmatprep.subr.bf16.mxu0 %v3663_v20  ;;  %4710 = vmatprep.subr.bf16.mxu1 %v3665_v44  ;;  %v3762_v20 = vld [vmem:[#allocation4 + $0x6b0] sm:$0xff]  ;;  %v3764_v44 = vld [vmem:[#allocation4 + $0x6c0] sm:$0xff] }
 0x81d   :  { %4547 = vmatpush1.bf16.msra.mxu0 %v3662_v52  ;;  %4711 = vmatpush1.bf16.msra.mxu1 %v3664_v45  ;;  %v3773_v52 = vld [vmem:[#allocation4 + $0x708] sm:$0xff]  ;;  %v3775_v45 = vld [vmem:[#allocation4 + $0x718] sm:$0xff] }
 0x81e   :  { %4548 = vmatprep.subr.bf16.mxu0 %v3673_v28  ;;  %4712 = vmatprep.subr.bf16.mxu1 %v3675_v32  ;;  %v3772_v28 = vld [vmem:[#allocation4 + $0x700] sm:$0xff]  ;;  %v3774_v32 = vld [vmem:[#allocation4 + $0x710] sm:$0xff] }
 0x821   :  { %4549 = vmatpush1.bf16.msra.mxu0 %v3672_v10  ;;  %4713 = vmatpush1.bf16.msra.mxu1 %v3674_v30  ;;  %v3783_v10 = vld [vmem:[#allocation4 + $0x758] sm:$0xff]  ;;  %v3785_v30 = vld [vmem:[#allocation4 + $0x768] sm:$0xff] }
 0x822   :  { %4550 = vmatprep.subr.bf16.mxu0 %v3683_v53  ;;  %4714 = vmatprep.subr.bf16.mxu1 %v3685_v48  ;;  %v3782_v53 = vld [vmem:[#allocation4 + $0x750] sm:$0xff]  ;;  %v3784_v48 = vld [vmem:[#allocation4 + $0x760] sm:$0xff] }
 0x825   :  { %4551 = vmatpush1.bf16.msra.mxu0 %v3682_v2  ;;  %4715 = vmatpush1.bf16.msra.mxu1 %v3684_v43  ;;  %v3793_v2 = vld [vmem:[#allocation4 + $0x7a8] sm:$0xff]  ;;  %v3795_v43 = vld [vmem:[#allocation4 + $0x7b8] sm:$0xff] }
 0x826   :  { %4552 = vmatprep.subr.bf16.mxu0 %v3693_v4  ;;  %4716 = vmatprep.subr.bf16.mxu1 %v3695_v37  ;;  %v3792_v4 = vld [vmem:[#allocation4 + $0x7a0] sm:$0xff]  ;;  %v3794_v37 = vld [vmem:[#allocation4 + $0x7b0] sm:$0xff] }
 0x829   :  { %4553 = vmatpush1.bf16.msra.mxu0 %v3692_v1  ;;  %4717 = vmatpush1.bf16.msra.mxu1 %v3694_v56  ;;  %v3803_v1 = vld [vmem:[#allocation4 + $0x7f8] sm:$0xff]  ;;  %v3805_v56 = vld [vmem:[#allocation4 + $0x808] sm:$0xff] }
 0x82a   :  { %4554 = vmatprep.subr.bf16.mxu0 %v3703_v7  ;;  %4718 = vmatprep.subr.bf16.mxu1 %v3705_v41  ;;  %v3802_v7 = vld [vmem:[#allocation4 + $0x7f0] sm:$0xff]  ;;  %v3804_v41 = vld [vmem:[#allocation4 + $0x800] sm:$0xff] }
 0x82d   :  { %4555 = vmatpush1.bf16.msra.mxu0 %v3702_v40  ;;  %4719 = vmatpush1.bf16.msra.mxu1 %v3704_v54  ;;  %v3813_v40 = vld [vmem:[#allocation4 + $0x848] sm:$0xff]  ;;  %v3815_v54 = vld [vmem:[#allocation4 + $0x858] sm:$0xff] }
 0x82e   :  { %4565 = vmatprep.subr.bf16.mxu0 %v3713_v12  ;;  %4729 = vmatprep.subr.bf16.mxu1 %v3715_v16  ;;  %v3812_v12 = vld [vmem:[#allocation4 + $0x840] sm:$0xff]  ;;  %v3814_v16 = vld [vmem:[#allocation4 + $0x850] sm:$0xff] }
 0x830   :  { %4557 = vmatmul.mubr.bf16.vlgmr.msra.gmra.mrb[116].mxu0 %v12572_v17  ;;  %4721 = vmatmul.mubr.bf16.vlgmr.msra.gmra.mrb[148].mxu1 %v12572_v17 }
 0x831   :  { %4566 = vmatpush1.bf16.msra.mxu0 %v3712_v51  ;;  %4730 = vmatpush1.bf16.msra.mxu1 %v3714_v38  ;;  %v3823_v51 = vld [vmem:[#allocation4 + $0x898] sm:$0xff]  ;;  %v3825_v38 = vld [vmem:[#allocation4 + $0x8a8] sm:$0xff] }
 0x832   :  { %4567 = vmatprep.subr.bf16.mxu0 %v3723_v0  ;;  %4731 = vmatprep.subr.bf16.mxu1 %v3725_v13  ;;  %v3822_v0 = vld [vmem:[#allocation4 + $0x890] sm:$0xff]  ;;  %v3824_v13 = vld [vmem:[#allocation4 + $0x8a0] sm:$0xff] }
 0x833   :  { %4597 = vmatprep.mubr.bf16.mxu0 %v12576_v11  ;;  %4761 = vmatprep.mubr.bf16.mxu1 %v12576_v11 }
 0x835   :  { %4568 = vmatpush1.bf16.msra.mxu0 %v3722_v58  ;;  %4732 = vmatpush1.bf16.msra.mxu1 %v3724_v49  ;;  %v3833_v58 = vld [vmem:[#allocation4 + $0x8e8] sm:$0xff]  ;;  %v3835_v49 = vld [vmem:[#allocation4 + $0x8f8] sm:$0xff] }
 0x836   :  { %4569 = vmatprep.subr.bf16.mxu0 %v3733_v42  ;;  %4733 = vmatprep.subr.bf16.mxu1 %v3735_v21  ;;  %v3832_v42 = vld [vmem:[#allocation4 + $0x8e0] sm:$0xff]  ;;  %v3834_v21 = vld [vmem:[#allocation4 + $0x8f0] sm:$0xff] }
 0x839   :  { %4570 = vmatpush1.bf16.msra.mxu0 %v3732_v25  ;;  %4734 = vmatpush1.bf16.msra.mxu1 %v3734_v57  ;;  %v3843_v25 = vld [vmem:[#allocation4 + $0x938] sm:$0xff]  ;;  %v3845_v57 = vld [vmem:[#allocation4 + $0x948] sm:$0xff] }
 0x83a   :  { %4571 = vmatprep.subr.bf16.mxu0 %v3743_v29  ;;  %4735 = vmatprep.subr.bf16.mxu1 %v3745_v33  ;;  %v3842_v29 = vld [vmem:[#allocation4 + $0x930] sm:$0xff]  ;;  %v3844_v33 = vld [vmem:[#allocation4 + $0x940] sm:$0xff] }
 0x83d   :  { %4572 = vmatpush1.bf16.msra.mxu0 %v3742_v46  ;;  %4736 = vmatpush1.bf16.msra.mxu1 %v3744_v59  ;;  %v3853_v46 = vld [vmem:[#allocation4 + $0x988] sm:$0xff]  ;;  %v3855_v59 = vld [vmem:[#allocation4 + $0x998] sm:$0xff] }
 0x83e   :  { %4573 = vmatprep.subr.bf16.mxu0 %v3753_v14  ;;  %4737 = vmatprep.subr.bf16.mxu1 %v3755_v39  ;;  %v3852_v14 = vld [vmem:[#allocation4 + $0x980] sm:$0xff]  ;;  %v3854_v39 = vld [vmem:[#allocation4 + $0x990] sm:$0xff] }
 0x841   :  { %4574 = vmatpush1.bf16.msra.mxu0 %v3752_v60  ;;  %4738 = vmatpush1.bf16.msra.mxu1 %v3754_v8  ;;  %v3863_v60 = vld [vmem:[#allocation4 + $0x9d8] sm:$0xff]  ;;  %v3865_v8 = vld [vmem:[#allocation4 + $0x9e8] sm:$0xff] }
 0x842   :  { %4575 = vmatprep.subr.bf16.mxu0 %v3763_v15  ;;  %4739 = vmatprep.subr.bf16.mxu1 %v3765_v62  ;;  %v3862_v15 = vld [vmem:[#allocation4 + $0x9d0] sm:$0xff]  ;;  %v3864_v62 = vld [vmem:[#allocation4 + $0x9e0] sm:$0xff] }
 0x845   :  { %4576 = vmatpush1.bf16.msra.mxu0 %v3762_v20  ;;  %4740 = vmatpush1.bf16.msra.mxu1 %v3764_v44  ;;  %v3873_v20 = vld [vmem:[#allocation4 + $0xa28] sm:$0xff]  ;;  %v3875_v44 = vld [vmem:[#allocation4 + $0xa38] sm:$0xff] }
 0x846   :  { %4577 = vmatprep.subr.bf16.mxu0 %v3773_v52  ;;  %4741 = vmatprep.subr.bf16.mxu1 %v3775_v45  ;;  %v3872_v52 = vld [vmem:[#allocation4 + $0xa20] sm:$0xff]  ;;  %v3874_v45 = vld [vmem:[#allocation4 + $0xa30] sm:$0xff] }
 0x849   :  { %4578 = vmatpush1.bf16.msra.mxu0 %v3772_v28  ;;  %4742 = vmatpush1.bf16.msra.mxu1 %v3774_v32  ;;  %v3883_v28 = vld [vmem:[#allocation4 + $0xa78] sm:$0xff]  ;;  %v3885_v32 = vld [vmem:[#allocation4 + $0xa88] sm:$0xff] }
 0x84a   :  { %4579 = vmatprep.subr.bf16.mxu0 %v3783_v10  ;;  %4743 = vmatprep.subr.bf16.mxu1 %v3785_v30  ;;  %v3882_v10 = vld [vmem:[#allocation4 + $0xa70] sm:$0xff]  ;;  %v3884_v30 = vld [vmem:[#allocation4 + $0xa80] sm:$0xff] }
 0x84d   :  { %4580 = vmatpush1.bf16.msra.mxu0 %v3782_v53  ;;  %4744 = vmatpush1.bf16.msra.mxu1 %v3784_v48  ;;  %v3893_v53 = vld [vmem:[#allocation4 + $0xac8] sm:$0xff]  ;;  %v3895_v48 = vld [vmem:[#allocation4 + $0xad8] sm:$0xff] }
 0x84e   :  { %4581 = vmatprep.subr.bf16.mxu0 %v3793_v2  ;;  %4745 = vmatprep.subr.bf16.mxu1 %v3795_v43  ;;  %v3892_v2 = vld [vmem:[#allocation4 + $0xac0] sm:$0xff]  ;;  %v3894_v43 = vld [vmem:[#allocation4 + $0xad0] sm:$0xff] }
 0x851   :  { %4582 = vmatpush1.bf16.msra.mxu0 %v3792_v4  ;;  %4746 = vmatpush1.bf16.msra.mxu1 %v3794_v37  ;;  %v3903_v4 = vld [vmem:[#allocation4 + $0xb18] sm:$0xff]  ;;  %v3905_v37 = vld [vmem:[#allocation4 + $0xb28] sm:$0xff] }
 0x852   :  { %4583 = vmatprep.subr.bf16.mxu0 %v3803_v1  ;;  %4747 = vmatprep.subr.bf16.mxu1 %v3805_v56  ;;  %v3902_v1 = vld [vmem:[#allocation4 + $0xb10] sm:$0xff]  ;;  %v3904_v56 = vld [vmem:[#allocation4 + $0xb20] sm:$0xff] }
 0x855   :  { %4584 = vmatpush1.bf16.msra.mxu0 %v3802_v7  ;;  %4748 = vmatpush1.bf16.msra.mxu1 %v3804_v41  ;;  %v3913_v7 = vld [vmem:[#allocation4 + $0xb68] sm:$0xff]  ;;  %v3915_v41 = vld [vmem:[#allocation4 + $0xb78] sm:$0xff] }
 0x856   :  { %4585 = vmatprep.subr.bf16.mxu0 %v3813_v40  ;;  %4749 = vmatprep.subr.bf16.mxu1 %v3815_v54  ;;  %v3912_v40 = vld [vmem:[#allocation4 + $0xb60] sm:$0xff]  ;;  %v3914_v54 = vld [vmem:[#allocation4 + $0xb70] sm:$0xff] }
 0x859   :  { %4586 = vmatpush1.bf16.msra.mxu0 %v3812_v12  ;;  %4750 = vmatpush1.bf16.msra.mxu1 %v3814_v16  ;;  %v3923_v12 = vld [vmem:[#allocation4 + $0xbb8] sm:$0xff]  ;;  %v3925_v16 = vld [vmem:[#allocation4 + $0xbc8] sm:$0xff] }
 0x85a   :  { %4587 = vmatprep.subr.bf16.mxu0 %v3823_v51  ;;  %4751 = vmatprep.subr.bf16.mxu1 %v3825_v38  ;;  %v3922_v51 = vld [vmem:[#allocation4 + $0xbb0] sm:$0xff]  ;;  %v3924_v38 = vld [vmem:[#allocation4 + $0xbc0] sm:$0xff] }
 0x85d   :  { %4588 = vmatpush1.bf16.msra.mxu0 %v3822_v0  ;;  %4752 = vmatpush1.bf16.msra.mxu1 %v3824_v13  ;;  %v3933_v0 = vld [vmem:[#allocation4 + $0xc08] sm:$0xff]  ;;  %v3935_v13 = vld [vmem:[#allocation4 + $0xc18] sm:$0xff] }
 0x85e   :  { %4589 = vmatprep.subr.bf16.mxu0 %v3833_v58  ;;  %4753 = vmatprep.subr.bf16.mxu1 %v3835_v49  ;;  %v3932_v58 = vld [vmem:[#allocation4 + $0xc00] sm:$0xff]  ;;  %v3934_v49 = vld [vmem:[#allocation4 + $0xc10] sm:$0xff] }
 0x861   :  { %4590 = vmatpush1.bf16.msra.mxu0 %v3832_v42  ;;  %4754 = vmatpush1.bf16.msra.mxu1 %v3834_v21  ;;  %v3943_v42 = vld [vmem:[#allocation4 + $0xc58] sm:$0xff]  ;;  %v3945_v21 = vld [vmem:[#allocation4 + $0xc68] sm:$0xff] }
 0x862   :  { %4591 = vmatprep.subr.bf16.mxu0 %v3843_v25  ;;  %4755 = vmatprep.subr.bf16.mxu1 %v3845_v57  ;;  %v3942_v25 = vld [vmem:[#allocation4 + $0xc50] sm:$0xff]  ;;  %v3944_v57 = vld [vmem:[#allocation4 + $0xc60] sm:$0xff] }
 0x865   :  { %4592 = vmatpush1.bf16.msra.mxu0 %v3842_v29  ;;  %4756 = vmatpush1.bf16.msra.mxu1 %v3844_v33  ;;  %v3953_v29 = vld [vmem:[#allocation4 + $0xca8] sm:$0xff]  ;;  %v3955_v33 = vld [vmem:[#allocation4 + $0xcb8] sm:$0xff] }
 0x866   :  { %4593 = vmatprep.subr.bf16.mxu0 %v3853_v46  ;;  %4757 = vmatprep.subr.bf16.mxu1 %v3855_v59  ;;  %v3952_v46 = vld [vmem:[#allocation4 + $0xca0] sm:$0xff]  ;;  %v3954_v59 = vld [vmem:[#allocation4 + $0xcb0] sm:$0xff] }
 0x869   :  { %4594 = vmatpush1.bf16.msra.mxu0 %v3852_v14  ;;  %4758 = vmatpush1.bf16.msra.mxu1 %v3854_v39  ;;  %v3963_v14 = vld [vmem:[#allocation4 + $0xcf8] sm:$0xff]  ;;  %v3965_v39 = vld [vmem:[#allocation4 + $0xd08] sm:$0xff] }
 0x86a   :  { %4595 = vmatprep.subr.bf16.mxu0 %v3863_v60  ;;  %4759 = vmatprep.subr.bf16.mxu1 %v3865_v8  ;;  %v3962_v60 = vld [vmem:[#allocation4 + $0xcf0] sm:$0xff]  ;;  %v3964_v8 = vld [vmem:[#allocation4 + $0xd00] sm:$0xff] }
 0x86d   :  { %4596 = vmatpush1.bf16.msra.mxu0 %v3862_v15  ;;  %4760 = vmatpush1.bf16.msra.mxu1 %v3864_v62  ;;  %v3973_v15 = vld [vmem:[#allocation4 + $0xd48] sm:$0xff]  ;;  %v3975_v62 = vld [vmem:[#allocation4 + $0xd58] sm:$0xff] }
 0x86e   :  { %4606 = vmatprep.subr.bf16.mxu0 %v3873_v20  ;;  %4770 = vmatprep.subr.bf16.mxu1 %v3875_v44  ;;  %v3972_v20 = vld [vmem:[#allocation4 + $0xd40] sm:$0xff]  ;;  %v3974_v44 = vld [vmem:[#allocation4 + $0xd50] sm:$0xff] }
 0x870   :  { %4598 = vmatmul.mubr.bf16.vlgmr.msra.gmra.mrb[116].mxu0 %v12584_v47  ;;  %4762 = vmatmul.mubr.bf16.vlgmr.msra.gmra.mrb[148].mxu1 %v12584_v47 }
 0x871   :  { %4607 = vmatpush1.bf16.msra.mxu0 %v3872_v52  ;;  %4771 = vmatpush1.bf16.msra.mxu1 %v3874_v45  ;;  %v3983_v52 = vld [vmem:[#allocation4 + $0xd98] sm:$0xff]  ;;  %v3985_v45 = vld [vmem:[#allocation4 + $0xda8] sm:$0xff] }
 0x872   :  { %4608 = vmatprep.subr.bf16.mxu0 %v3883_v28  ;;  %4772 = vmatprep.subr.bf16.mxu1 %v3885_v32  ;;  %v3982_v28 = vld [vmem:[#allocation4 + $0xd90] sm:$0xff]  ;;  %v3984_v32 = vld [vmem:[#allocation4 + $0xda0] sm:$0xff] }
 0x873   :  { %4638 = vmatprep.mubr.bf16.mxu0 %v12588_v24  ;;  %4802 = vmatprep.mubr.bf16.mxu1 %v12588_v24 }
 0x875   :  { %4609 = vmatpush1.bf16.msra.mxu0 %v3882_v10  ;;  %4773 = vmatpush1.bf16.msra.mxu1 %v3884_v30  ;;  %v3993_v10 = vld [vmem:[#allocation4 + $0xde8] sm:$0xff]  ;;  %v3995_v30 = vld [vmem:[#allocation4 + $0xdf8] sm:$0xff] }
 0x876   :  { %4610 = vmatprep.subr.bf16.mxu0 %v3893_v53  ;;  %4774 = vmatprep.subr.bf16.mxu1 %v3895_v48  ;;  %v3992_v53 = vld [vmem:[#allocation4 + $0xde0] sm:$0xff]  ;;  %v3994_v48 = vld [vmem:[#allocation4 + $0xdf0] sm:$0xff] }
 0x879   :  { %4611 = vmatpush1.bf16.msra.mxu0 %v3892_v2  ;;  %4775 = vmatpush1.bf16.msra.mxu1 %v3894_v43  ;;  %v4003_v2 = vld [vmem:[#allocation4 + $0xe38] sm:$0xff]  ;;  %v4005_v43 = vld [vmem:[#allocation4 + $0xe48] sm:$0xff] }
 0x87a   :  { %4612 = vmatprep.subr.bf16.mxu0 %v3903_v4  ;;  %4776 = vmatprep.subr.bf16.mxu1 %v3905_v37  ;;  %v4002_v4 = vld [vmem:[#allocation4 + $0xe30] sm:$0xff]  ;;  %v4004_v37 = vld [vmem:[#allocation4 + $0xe40] sm:$0xff] }
 0x87d   :  { %4613 = vmatpush1.bf16.msra.mxu0 %v3902_v1  ;;  %4777 = vmatpush1.bf16.msra.mxu1 %v3904_v56  ;;  %v4013_v1 = vld [vmem:[#allocation4 + $0xe88] sm:$0xff]  ;;  %v4015_v56 = vld [vmem:[#allocation4 + $0xe98] sm:$0xff] }
 0x87e   :  { %4614 = vmatprep.subr.bf16.mxu0 %v3913_v7  ;;  %4778 = vmatprep.subr.bf16.mxu1 %v3915_v41  ;;  %v4012_v7 = vld [vmem:[#allocation4 + $0xe80] sm:$0xff]  ;;  %v4014_v41 = vld [vmem:[#allocation4 + $0xe90] sm:$0xff] }
 0x881   :  { %4615 = vmatpush1.bf16.msra.mxu0 %v3912_v40  ;;  %4779 = vmatpush1.bf16.msra.mxu1 %v3914_v54  ;;  %v4023_v40 = vld [vmem:[#allocation4 + $0xed8] sm:$0xff]  ;;  %v4025_v54 = vld [vmem:[#allocation4 + $0xee8] sm:$0xff] }
 0x882   :  { %4616 = vmatprep.subr.bf16.mxu0 %v3923_v12  ;;  %4780 = vmatprep.subr.bf16.mxu1 %v3925_v16  ;;  %v4022_v12 = vld [vmem:[#allocation4 + $0xed0] sm:$0xff]  ;;  %v4024_v16 = vld [vmem:[#allocation4 + $0xee0] sm:$0xff] }
 0x885   :  { %4617 = vmatpush1.bf16.msra.mxu0 %v3922_v51  ;;  %4781 = vmatpush1.bf16.msra.mxu1 %v3924_v38  ;;  %v4033_v51 = vld [vmem:[#allocation4 + $0xf28] sm:$0xff]  ;;  %v4035_v38 = vld [vmem:[#allocation4 + $0xf38] sm:$0xff] }
 0x886   :  { %4618 = vmatprep.subr.bf16.mxu0 %v3933_v0  ;;  %4782 = vmatprep.subr.bf16.mxu1 %v3935_v13  ;;  %v4032_v0 = vld [vmem:[#allocation4 + $0xf20] sm:$0xff]  ;;  %v4034_v13 = vld [vmem:[#allocation4 + $0xf30] sm:$0xff] }
 0x889   :  { %4619 = vmatpush1.bf16.msra.mxu0 %v3932_v58  ;;  %4783 = vmatpush1.bf16.msra.mxu1 %v3934_v49  ;;  %v4043_v58 = vld [vmem:[#allocation4 + $0xf78] sm:$0xff]  ;;  %v4045_v49 = vld [vmem:[#allocation4 + $0xf88] sm:$0xff] }
 0x88a   :  { %4620 = vmatprep.subr.bf16.mxu0 %v3943_v42  ;;  %4784 = vmatprep.subr.bf16.mxu1 %v3945_v21  ;;  %v4042_v42 = vld [vmem:[#allocation4 + $0xf70] sm:$0xff]  ;;  %v4044_v21 = vld [vmem:[#allocation4 + $0xf80] sm:$0xff] }
 0x88d   :  { %4621 = vmatpush1.bf16.msra.mxu0 %v3942_v25  ;;  %4785 = vmatpush1.bf16.msra.mxu1 %v3944_v57  ;;  %v4053_v25 = vld [vmem:[#allocation4 + $0xfc8] sm:$0xff]  ;;  %v4055_v57 = vld [vmem:[#allocation4 + $0xfd8] sm:$0xff] }
 0x88e   :  { %4622 = vmatprep.subr.bf16.mxu0 %v3953_v29  ;;  %4786 = vmatprep.subr.bf16.mxu1 %v3955_v33  ;;  %v4052_v29 = vld [vmem:[#allocation4 + $0xfc0] sm:$0xff]  ;;  %v4054_v33 = vld [vmem:[#allocation4 + $0xfd0] sm:$0xff] }
 0x891   :  { %4623 = vmatpush1.bf16.msra.mxu0 %v3952_v46  ;;  %4787 = vmatpush1.bf16.msra.mxu1 %v3954_v59  ;;  %v4063_v46 = vld [vmem:[#allocation4 + $0x1018] sm:$0xff]  ;;  %v4065_v59 = vld [vmem:[#allocation4 + $0x1028] sm:$0xff] }
 0x892   :  { %4624 = vmatprep.subr.bf16.mxu0 %v3963_v14  ;;  %4788 = vmatprep.subr.bf16.mxu1 %v3965_v39  ;;  %v4062_v14 = vld [vmem:[#allocation4 + $0x1010] sm:$0xff]  ;;  %v4064_v39 = vld [vmem:[#allocation4 + $0x1020] sm:$0xff] }
 0x895   :  { %4625 = vmatpush1.bf16.msra.mxu0 %v3962_v60  ;;  %4789 = vmatpush1.bf16.msra.mxu1 %v3964_v8  ;;  %v4073_v60 = vld [vmem:[#allocation4 + $0x1068] sm:$0xff]  ;;  %v4075_v8 = vld [vmem:[#allocation4 + $0x1078] sm:$0xff] }
 0x896   :  { %4626 = vmatprep.subr.bf16.mxu0 %v3973_v15  ;;  %4790 = vmatprep.subr.bf16.mxu1 %v3975_v62  ;;  %v4072_v15 = vld [vmem:[#allocation4 + $0x1060] sm:$0xff]  ;;  %v4074_v62 = vld [vmem:[#allocation4 + $0x1070] sm:$0xff] }
 0x899   :  { %4627 = vmatpush1.bf16.msra.mxu0 %v3972_v20  ;;  %4791 = vmatpush1.bf16.msra.mxu1 %v3974_v44  ;;  %v4083_v20 = vld [vmem:[#allocation4 + $0x10b8] sm:$0xff]  ;;  %v4085_v44 = vld [vmem:[#allocation4 + $0x10c8] sm:$0xff] }
 0x89a   :  { %4628 = vmatprep.subr.bf16.mxu0 %v3983_v52  ;;  %4792 = vmatprep.subr.bf16.mxu1 %v3985_v45  ;;  %v4082_v52 = vld [vmem:[#allocation4 + $0x10b0] sm:$0xff]  ;;  %v4084_v45 = vld [vmem:[#allocation4 + $0x10c0] sm:$0xff] }
 0x89d   :  { %4629 = vmatpush1.bf16.msra.mxu0 %v3982_v28  ;;  %4793 = vmatpush1.bf16.msra.mxu1 %v3984_v32 }
 0x89e   :  { %4630 = vmatprep.subr.bf16.mxu0 %v3993_v10  ;;  %4794 = vmatprep.subr.bf16.mxu1 %v3995_v30  ;;  %v4093_v10 = vld [vmem:[#allocation4 + $0x1108] sm:$0xff]  ;;  %v4095_v30 = vld [vmem:[#allocation4 + $0x1118] sm:$0xff] }
 0x8a1   :  { %4631 = vmatpush1.bf16.msra.mxu0 %v3992_v53  ;;  %4795 = vmatpush1.bf16.msra.mxu1 %v3994_v48 }
 0x8a2   :  { %4632 = vmatprep.subr.bf16.mxu0 %v4003_v2  ;;  %4796 = vmatprep.subr.bf16.mxu1 %v4005_v43 }
 0x8a5   :  { %4633 = vmatpush1.bf16.msra.mxu0 %v4002_v4  ;;  %4797 = vmatpush1.bf16.msra.mxu1 %v4004_v37 }
 0x8a6   :  { %4634 = vmatprep.subr.bf16.mxu0 %v4013_v1  ;;  %4798 = vmatprep.subr.bf16.mxu1 %v4015_v56  ;;  %v4092_v1 = vld [vmem:[#allocation4 + $0x1100] sm:$0xff]  ;;  %v4094_v56 = vld [vmem:[#allocation4 + $0x1110] sm:$0xff] }
 0x8a9   :  { %4635 = vmatpush1.bf16.msra.mxu0 %v4012_v7  ;;  %4799 = vmatpush1.bf16.msra.mxu1 %v4014_v41  ;;  %v4103_v7 = vld [vmem:[#allocation4 + $0x1158] sm:$0xff]  ;;  %v4105_v41 = vld [vmem:[#allocation4 + $0x1168] sm:$0xff] }
 0x8aa   :  { %4636 = vmatprep.subr.bf16.mxu0 %v4023_v40  ;;  %4800 = vmatprep.subr.bf16.mxu1 %v4025_v54  ;;  %v4102_v40 = vld [vmem:[#allocation4 + $0x1150] sm:$0xff]  ;;  %v4104_v54 = vld [vmem:[#allocation4 + $0x1160] sm:$0xff] }
 0x8ad   :  { %4637 = vmatpush1.bf16.msra.mxu0 %v4022_v12  ;;  %4801 = vmatpush1.bf16.msra.mxu1 %v4024_v16  ;;  %v4113_v12 = vld [vmem:[#allocation4 + $0x11a8] sm:$0xff]  ;;  %v4115_v16 = vld [vmem:[#allocation4 + $0x11b8] sm:$0xff] }
 0x8ae   :  { %4647 = vmatprep.subr.bf16.mxu0 %v4033_v51  ;;  %4811 = vmatprep.subr.bf16.mxu1 %v4035_v38  ;;  %v4112_v51 = vld [vmem:[#allocation4 + $0x11a0] sm:$0xff]  ;;  %v4114_v38 = vld [vmem:[#allocation4 + $0x11b0] sm:$0xff] }
 0x8b0   :  { %4639 = vmatmul.mubr.bf16.vlgmr.msra.gmra.mrb[116].mxu0 %v12596_v63  ;;  %4803 = vmatmul.mubr.bf16.vlgmr.msra.gmra.mrb[148].mxu1 %v12596_v63 }
 0x8b1   :  { %4648 = vmatpush1.bf16.msra.mxu0 %v4032_v0  ;;  %4812 = vmatpush1.bf16.msra.mxu1 %v4034_v13  ;;  %v4123_v0 = vld [vmem:[#allocation4 + $0x11f8] sm:$0xff]  ;;  %v4125_v13 = vld [vmem:[#allocation4 + $0x1208] sm:$0xff] }
 0x8b2   :  { %4649 = vmatprep.subr.bf16.mxu0 %v4043_v58  ;;  %4813 = vmatprep.subr.bf16.mxu1 %v4045_v49  ;;  %v4122_v58 = vld [vmem:[#allocation4 + $0x11f0] sm:$0xff]  ;;  %v4124_v49 = vld [vmem:[#allocation4 + $0x1200] sm:$0xff] }
 0x8b3   :  { %4679 = vmatprep.mubr.bf16.mxu0 %v12600_v27  ;;  %4843 = vmatprep.mubr.bf16.mxu1 %v12600_v27 }
 0x8b5   :  { %4650 = vmatpush1.bf16.msra.mxu0 %v4042_v42  ;;  %4814 = vmatpush1.bf16.msra.mxu1 %v4044_v21  ;;  %v4133_v42 = vld [vmem:[#allocation4 + $0x1248] sm:$0xff]  ;;  %v4135_v21 = vld [vmem:[#allocation4 + $0x1258] sm:$0xff] }
 0x8b6   :  { %4651 = vmatprep.subr.bf16.mxu0 %v4053_v25  ;;  %4815 = vmatprep.subr.bf16.mxu1 %v4055_v57  ;;  %v4132_v25 = vld [vmem:[#allocation4 + $0x1240] sm:$0xff]  ;;  %v4134_v57 = vld [vmem:[#allocation4 + $0x1250] sm:$0xff] }
 0x8b9   :  { %4652 = vmatpush1.bf16.msra.mxu0 %v4052_v29  ;;  %4816 = vmatpush1.bf16.msra.mxu1 %v4054_v33  ;;  %v4143_v29 = vld [vmem:[#allocation4 + $0x1298] sm:$0xff]  ;;  %v4145_v33 = vld [vmem:[#allocation4 + $0x12a8] sm:$0xff] }
 0x8ba   :  { %4653 = vmatprep.subr.bf16.mxu0 %v4063_v46  ;;  %4817 = vmatprep.subr.bf16.mxu1 %v4065_v59  ;;  %v4142_v46 = vld [vmem:[#allocation4 + $0x1290] sm:$0xff]  ;;  %v4144_v59 = vld [vmem:[#allocation4 + $0x12a0] sm:$0xff] }
 0x8bd   :  { %4654 = vmatpush1.bf16.msra.mxu0 %v4062_v14  ;;  %4818 = vmatpush1.bf16.msra.mxu1 %v4064_v39  ;;  %v4153_v14 = vld [vmem:[#allocation4 + $0x12e8] sm:$0xff]  ;;  %v4155_v39 = vld [vmem:[#allocation4 + $0x12f8] sm:$0xff] }
 0x8be   :  { %4655 = vmatprep.subr.bf16.mxu0 %v4073_v60  ;;  %4819 = vmatprep.subr.bf16.mxu1 %v4075_v8  ;;  %v4152_v60 = vld [vmem:[#allocation4 + $0x12e0] sm:$0xff]  ;;  %v4154_v8 = vld [vmem:[#allocation4 + $0x12f0] sm:$0xff] }
 0x8c1   :  { %4656 = vmatpush1.bf16.msra.mxu0 %v4072_v15  ;;  %4820 = vmatpush1.bf16.msra.mxu1 %v4074_v62  ;;  %v4163_v15 = vld [vmem:[#allocation4 + $0x1338] sm:$0xff]  ;;  %v4165_v62 = vld [vmem:[#allocation4 + $0x1348] sm:$0xff] }
 0x8c2   :  { %4657 = vmatprep.subr.bf16.mxu0 %v4083_v20  ;;  %4821 = vmatprep.subr.bf16.mxu1 %v4085_v44  ;;  %v4162_v20 = vld [vmem:[#allocation4 + $0x1330] sm:$0xff]  ;;  %v4164_v44 = vld [vmem:[#allocation4 + $0x1340] sm:$0xff] }
 0x8c3   :  { %v12626_v28 = vpop.f32.mrb[112].mxu0  ;;  %v12628_v32 = vpop.f32.mrb[144].mxu1 }
 0x8c4   :  { %v12630_v53 = vpop.f32.mrb[113].mxu0  ;;  %v12632_v48 = vpop.f32.mrb[145].mxu1 }
 0x8c5   :  { %v4357_v2 = vpop.f32.mrb[114].mxu0  ;;  %v4521_v43 = vpop.f32.mrb[146].mxu1  ;;  %4658 = vmatpush1.bf16.msra.mxu0 %v4082_v52  ;;  %4822 = vmatpush1.bf16.msra.mxu1 %v4084_v45  ;;  %v4173_v52 = vld [vmem:[#allocation4 + $0x1388] sm:$0xff]  ;;  %v4175_v45 = vld [vmem:[#allocation4 + $0x1398] sm:$0xff] }
 0x8c6   :  { %v4358_v4 = vpop.f32.mrb[115].mxu0  ;;  %v4522_v37 = vpop.f32.mrb[147].mxu1  ;;  %4659 = vmatprep.subr.bf16.mxu0 %v4093_v10  ;;  %4823 = vmatprep.subr.bf16.mxu1 %v4095_v30  ;;  %v4172_v10 = vld [vmem:[#allocation4 + $0x1380] sm:$0xff]  ;;  %v4174_v30 = vld [vmem:[#allocation4 + $0x1390] sm:$0xff]  ;;  %v4183_v2 = vld [vmem:[#allocation4 + $0x13d8] sm:$0xff] }
 0x8c7   :  { %v4185_v43 = vld [vmem:[#allocation4 + $0x13e8] sm:$0xff]  ;;  %v4182_v4 = vld [vmem:[#allocation4 + $0x13d0] sm:$0xff]  ;;  %v4184_v37 = vld [vmem:[#allocation4 + $0x13e0] sm:$0xff] }
 0x8c9   :  { %4660 = vmatpush1.bf16.msra.mxu0 %v4092_v1  ;;  %4824 = vmatpush1.bf16.msra.mxu1 %v4094_v56  ;;  %v3557_v1 = vld [vmem:[#allocation4 + $0x48] sm:$0xff] }
 0x8ca   :  { %4661 = vmatprep.subr.bf16.mxu0 %v4103_v7  ;;  %4825 = vmatprep.subr.bf16.mxu1 %v4105_v41  ;;  %v3309_v56 = vld [vmem:[#allocation3 + $0x8] sm:$0xff]  ;;  %v3556_v7 = vld [vmem:[#allocation4 + $0x40] sm:$0xff] }
 0x8cb   :  { %v3308_v41 = vld [vmem:[#allocation3] sm:$0xff] }
 0x8cd   :  { %4662 = vmatpush1.bf16.msra.mxu0 %v4102_v40  ;;  %4826 = vmatpush1.bf16.msra.mxu1 %v4104_v54  ;;  %v3567_v40 = vld [vmem:[#allocation4 + $0x98] sm:$0xff] }
 0x8ce   :  { %4663 = vmatprep.subr.bf16.mxu0 %v4113_v12  ;;  %4827 = vmatprep.subr.bf16.mxu1 %v4115_v16  ;;  %v3319_v54 = vld [vmem:[#allocation3 + $0x58] sm:$0xff]  ;;  %v3566_v12 = vld [vmem:[#allocation4 + $0x90] sm:$0xff] }
 0x8cf   :  { %v3318_v16 = vld [vmem:[#allocation3 + $0x50] sm:$0xff] }
 0x8d1   :  { %4664 = vmatpush1.bf16.msra.mxu0 %v4112_v51  ;;  %4828 = vmatpush1.bf16.msra.mxu1 %v4114_v38  ;;  %v3577_v51 = vld [vmem:[#allocation4 + $0xe8] sm:$0xff] }
 0x8d2   :  { %4665 = vmatprep.subr.bf16.mxu0 %v4123_v0  ;;  %4829 = vmatprep.subr.bf16.mxu1 %v4125_v13  ;;  %v3329_v38 = vld [vmem:[#allocation3 + $0xa8] sm:$0xff]  ;;  %v3576_v0 = vld [vmem:[#allocation4 + $0xe0] sm:$0xff] }
 0x8d3   :  { %v3328_v13 = vld [vmem:[#allocation3 + $0xa0] sm:$0xff] }
 0x8d5   :  { %4666 = vmatpush1.bf16.msra.mxu0 %v4122_v58  ;;  %4830 = vmatpush1.bf16.msra.mxu1 %v4124_v49  ;;  %v3587_v58 = vld [vmem:[#allocation4 + $0x138] sm:$0xff] }
 0x8d6   :  { %4667 = vmatprep.subr.bf16.mxu0 %v4133_v42  ;;  %4831 = vmatprep.subr.bf16.mxu1 %v4135_v21  ;;  %v3339_v49 = vld [vmem:[#allocation3 + $0xf8] sm:$0xff]  ;;  %v3586_v42 = vld [vmem:[#allocation4 + $0x130] sm:$0xff] }
 0x8d7   :  { %v3338_v21 = vld [vmem:[#allocation3 + $0xf0] sm:$0xff] }
 0x8d9   :  { %4668 = vmatpush1.bf16.msra.mxu0 %v4132_v25  ;;  %4832 = vmatpush1.bf16.msra.mxu1 %v4134_v57  ;;  %v3597_v25 = vld [vmem:[#allocation4 + $0x188] sm:$0xff] }
 0x8da   :  { %4669 = vmatprep.subr.bf16.mxu0 %v4143_v29  ;;  %4833 = vmatprep.subr.bf16.mxu1 %v4145_v33  ;;  %v3349_v57 = vld [vmem:[#allocation3 + $0x148] sm:$0xff]  ;;  %v3348_v29 = vld [vmem:[#allocation3 + $0x140] sm:$0xff]  ;;  %v3607_v33 = vld [vmem:[#allocation4 + $0x1d8] sm:$0xff] }
 0x8dd   :  { %4670 = vmatpush1.bf16.msra.mxu0 %v4142_v46  ;;  %4834 = vmatpush1.bf16.msra.mxu1 %v4144_v59  ;;  %v3359_v46 = vld [vmem:[#allocation3 + $0x198] sm:$0xff]  ;;  %v3606_v59 = vld [vmem:[#allocation4 + $0x1d0] sm:$0xff] }
 0x8de   :  { %4671 = vmatprep.subr.bf16.mxu0 %v4153_v14  ;;  %4835 = vmatprep.subr.bf16.mxu1 %v4155_v39  ;;  %v3358_v14 = vld [vmem:[#allocation3 + $0x190] sm:$0xff]  ;;  %v3617_v39 = vld [vmem:[#allocation4 + $0x228] sm:$0xff] }
 0x8e1   :  { %4672 = vmatpush1.bf16.msra.mxu0 %v4152_v60  ;;  %4836 = vmatpush1.bf16.msra.mxu1 %v4154_v8  ;;  %v3369_v60 = vld [vmem:[#allocation3 + $0x1e8] sm:$0xff]  ;;  %v3616_v8 = vld [vmem:[#allocation4 + $0x220] sm:$0xff] }
 0x8e2   :  { %4673 = vmatprep.subr.bf16.mxu0 %v4163_v15  ;;  %4837 = vmatprep.subr.bf16.mxu1 %v4165_v62  ;;  %v3368_v15 = vld [vmem:[#allocation3 + $0x1e0] sm:$0xff]  ;;  %v3627_v62 = vld [vmem:[#allocation4 + $0x278] sm:$0xff] }
 0x8e5   :  { %4674 = vmatpush1.bf16.msra.mxu0 %v4162_v20  ;;  %4838 = vmatpush1.bf16.msra.mxu1 %v4164_v44  ;;  %v3379_v20 = vld [vmem:[#allocation3 + $0x238] sm:$0xff]  ;;  %v3626_v44 = vld [vmem:[#allocation4 + $0x270] sm:$0xff] }
 0x8e6   :  { %4675 = vmatprep.subr.bf16.mxu0 %v4173_v52  ;;  %4839 = vmatprep.subr.bf16.mxu1 %v4175_v45  ;;  %v3378_v52 = vld [vmem:[#allocation3 + $0x230] sm:$0xff]  ;;  %v3637_v45 = vld [vmem:[#allocation4 + $0x2c8] sm:$0xff] }
 0x8e9   :  { %4676 = vmatpush1.bf16.msra.mxu0 %v4172_v10  ;;  %4840 = vmatpush1.bf16.msra.mxu1 %v4174_v30  ;;  %v3389_v10 = vld [vmem:[#allocation3 + $0x288] sm:$0xff]  ;;  %v3636_v30 = vld [vmem:[#allocation4 + $0x2c0] sm:$0xff] }
 0x8ea   :  { %4677 = vmatprep.subr.bf16.mxu0 %v4183_v2  ;;  %4841 = vmatprep.subr.bf16.mxu1 %v4185_v43  ;;  %v3388_v2 = vld [vmem:[#allocation3 + $0x280] sm:$0xff]  ;;  %v3647_v43 = vld [vmem:[#allocation4 + $0x318] sm:$0xff] }
 0x8ed   :  { %4678 = vmatpush1.bf16.msra.mxu0 %v4182_v4  ;;  %4842 = vmatpush1.bf16.msra.mxu1 %v4184_v37  ;;  %v3399_v4 = vld [vmem:[#allocation3 + $0x2d8] sm:$0xff]  ;;  %v3646_v37 = vld [vmem:[#allocation4 + $0x310] sm:$0xff] }
 0x8ee   :  { %4852 = vmatprep.subr.bf16.mxu0 %v3557_v1  ;;  %5056 = vmatprep.subr.bf16.mxu1 %v3309_v56  ;;  %v3398_v1 = vld [vmem:[#allocation3 + $0x2d0] sm:$0xff]  ;;  %v3657_v56 = vld [vmem:[#allocation4 + $0x368] sm:$0xff] }
 0x8f0   :  { %4680 = vmatmul.mubr.bf16.vlgmr.msra.gmra.mrb[116].mxu0 %v12608_v61  ;;  %4844 = vmatmul.mubr.bf16.vlgmr.msra.gmra.mrb[148].mxu1 %v12608_v61 }
 0x8f1   :  { %4853 = vmatpush1.bf16.msra.mxu0 %v3556_v7  ;;  %5057 = vmatpush1.bf16.msra.mxu1 %v3308_v41  ;;  %v3409_v7 = vld [vmem:[#allocation3 + $0x328] sm:$0xff]  ;;  %v3656_v41 = vld [vmem:[#allocation4 + $0x360] sm:$0xff] }
 0x8f2   :  { %4854 = vmatprep.subr.bf16.mxu0 %v3567_v40  ;;  %5058 = vmatprep.subr.bf16.mxu1 %v3319_v54  ;;  %v3408_v40 = vld [vmem:[#allocation3 + $0x320] sm:$0xff]  ;;  %v3667_v54 = vld [vmem:[#allocation4 + $0x3b8] sm:$0xff] }
 0x8f3   :  { %5088 = vmatprep.mubr.bf16.mxu1 %v11975_v23  ;;  %4884 = vmatprep.mubr.bf16.mxu0 %v12566_v34  ;;  %v3596_v34 = vld [vmem:[#allocation4 + $0x180] sm:$0xff] }
 0x8f5   :  { %4855 = vmatpush1.bf16.msra.mxu0 %v3566_v12  ;;  %5059 = vmatpush1.bf16.msra.mxu1 %v3318_v16  ;;  %v3419_v12 = vld [vmem:[#allocation3 + $0x378] sm:$0xff]  ;;  %v3666_v16 = vld [vmem:[#allocation4 + $0x3b0] sm:$0xff] }
 0x8f6   :  { %4856 = vmatprep.subr.bf16.mxu0 %v3577_v51  ;;  %5060 = vmatprep.subr.bf16.mxu1 %v3329_v38  ;;  %v3418_v51 = vld [vmem:[#allocation3 + $0x370] sm:$0xff]  ;;  %v3677_v38 = vld [vmem:[#allocation4 + $0x408] sm:$0xff] }
 0x8f9   :  { %4857 = vmatpush1.bf16.msra.mxu0 %v3576_v0  ;;  %5061 = vmatpush1.bf16.msra.mxu1 %v3328_v13  ;;  %v3429_v0 = vld [vmem:[#allocation3 + $0x3c8] sm:$0xff]  ;;  %v3676_v13 = vld [vmem:[#allocation4 + $0x400] sm:$0xff] }
 0x8fa   :  { %4858 = vmatprep.subr.bf16.mxu0 %v3587_v58  ;;  %5062 = vmatprep.subr.bf16.mxu1 %v3339_v49  ;;  %v3428_v58 = vld [vmem:[#allocation3 + $0x3c0] sm:$0xff]  ;;  %v3687_v49 = vld [vmem:[#allocation4 + $0x458] sm:$0xff] }
 0x8fd   :  { %4859 = vmatpush1.bf16.msra.mxu0 %v3586_v42  ;;  %5063 = vmatpush1.bf16.msra.mxu1 %v3338_v21  ;;  %v3439_v42 = vld [vmem:[#allocation3 + $0x418] sm:$0xff]  ;;  %v3686_v21 = vld [vmem:[#allocation4 + $0x450] sm:$0xff] }
 0x8fe   :  { %4860 = vmatprep.subr.bf16.mxu0 %v3597_v25  ;;  %5064 = vmatprep.subr.bf16.mxu1 %v3349_v57  ;;  %v3438_v25 = vld [vmem:[#allocation3 + $0x410] sm:$0xff]  ;;  %v3697_v57 = vld [vmem:[#allocation4 + $0x4a8] sm:$0xff] }
 0x901   :  { %4861 = vmatpush1.bf16.msra.mxu0 %v3596_v34  ;;  %5065 = vmatpush1.bf16.msra.mxu1 %v3348_v29  ;;  %v3449_v34 = vld [vmem:[#allocation3 + $0x468] sm:$0xff]  ;;  %v3696_v29 = vld [vmem:[#allocation4 + $0x4a0] sm:$0xff] }
 0x902   :  { %4862 = vmatprep.subr.bf16.mxu0 %v3607_v33  ;;  %5066 = vmatprep.subr.bf16.mxu1 %v3359_v46  ;;  %v3448_v33 = vld [vmem:[#allocation3 + $0x460] sm:$0xff]  ;;  %v3707_v46 = vld [vmem:[#allocation4 + $0x4f8] sm:$0xff] }
 0x905   :  { %4863 = vmatpush1.bf16.msra.mxu0 %v3606_v59  ;;  %5067 = vmatpush1.bf16.msra.mxu1 %v3358_v14  ;;  %v3459_v59 = vld [vmem:[#allocation3 + $0x4b8] sm:$0xff]  ;;  %v3706_v14 = vld [vmem:[#allocation4 + $0x4f0] sm:$0xff] }
 0x906   :  { %4864 = vmatprep.subr.bf16.mxu0 %v3617_v39  ;;  %5068 = vmatprep.subr.bf16.mxu1 %v3369_v60  ;;  %v3458_v39 = vld [vmem:[#allocation3 + $0x4b0] sm:$0xff]  ;;  %v3717_v60 = vld [vmem:[#allocation4 + $0x548] sm:$0xff] }
 0x909   :  { %4865 = vmatpush1.bf16.msra.mxu0 %v3616_v8  ;;  %5069 = vmatpush1.bf16.msra.mxu1 %v3368_v15  ;;  %v3469_v8 = vld [vmem:[#allocation3 + $0x508] sm:$0xff]  ;;  %v3716_v15 = vld [vmem:[#allocation4 + $0x540] sm:$0xff] }
 0x90a   :  { %4866 = vmatprep.subr.bf16.mxu0 %v3627_v62  ;;  %5070 = vmatprep.subr.bf16.mxu1 %v3379_v20  ;;  %v3727_v62 = vld [vmem:[#allocation4 + $0x598] sm:$0xff]  ;;  %v3468_v20 = vld [vmem:[#allocation3 + $0x500] sm:$0xff] }
 0x90d   :  { %4867 = vmatpush1.bf16.msra.mxu0 %v3626_v44  ;;  %5071 = vmatpush1.bf16.msra.mxu1 %v3378_v52  ;;  %v3479_v44 = vld [vmem:[#allocation3 + $0x558] sm:$0xff]  ;;  %v3726_v52 = vld [vmem:[#allocation4 + $0x590] sm:$0xff] }
 0x90e   :  { %4868 = vmatprep.subr.bf16.mxu0 %v3637_v45  ;;  %5072 = vmatprep.subr.bf16.mxu1 %v3389_v10  ;;  %v3737_v45 = vld [vmem:[#allocation4 + $0x5e8] sm:$0xff]  ;;  %v3478_v10 = vld [vmem:[#allocation3 + $0x550] sm:$0xff] }
 0x911   :  { %4869 = vmatpush1.bf16.msra.mxu0 %v3636_v30  ;;  %5073 = vmatpush1.bf16.msra.mxu1 %v3388_v2  ;;  %v3489_v30 = vld [vmem:[#allocation3 + $0x5a8] sm:$0xff]  ;;  %v3736_v2 = vld [vmem:[#allocation4 + $0x5e0] sm:$0xff] }
 0x912   :  { %4870 = vmatprep.subr.bf16.mxu0 %v3647_v43  ;;  %5074 = vmatprep.subr.bf16.mxu1 %v3399_v4  ;;  %v3747_v43 = vld [vmem:[#allocation4 + $0x638] sm:$0xff] }
 0x913   :  { %v3499_v4 = vld [vmem:[#allocation3 + $0x5f8] sm:$0xff] }
 0x915   :  { %4871 = vmatpush1.bf16.msra.mxu0 %v3646_v37  ;;  %5075 = vmatpush1.bf16.msra.mxu1 %v3398_v1  ;;  %v3746_v37 = vld [vmem:[#allocation4 + $0x630] sm:$0xff]  ;;  %v3757_v1 = vld [vmem:[#allocation4 + $0x688] sm:$0xff] }
 0x916   :  { %4872 = vmatprep.subr.bf16.mxu0 %v3657_v56  ;;  %5076 = vmatprep.subr.bf16.mxu1 %v3409_v7  ;;  %v3509_v56 = vld [vmem:[#allocation3 + $0x648] sm:$0xff]  ;;  %v3756_v7 = vld [vmem:[#allocation4 + $0x680] sm:$0xff] }
 0x919   :  { %4873 = vmatpush1.bf16.msra.mxu0 %v3656_v41  ;;  %5077 = vmatpush1.bf16.msra.mxu1 %v3408_v40  ;;  %v3767_v41 = vld [vmem:[#allocation4 + $0x6d8] sm:$0xff]  ;;  %v3508_v40 = vld [vmem:[#allocation3 + $0x640] sm:$0xff] }
 0x91a   :  { %4874 = vmatprep.subr.bf16.mxu0 %v3667_v54  ;;  %5078 = vmatprep.subr.bf16.mxu1 %v3419_v12  ;;  %v13732_v54 = vld [vmem:[#allocation43_spill] sm:$0xff] }
 0x91b   :  { %v3519_v12 = vld [vmem:[#allocation3 + $0x698] sm:$0xff] }
 0x91d   :  { %4875 = vmatpush1.bf16.msra.mxu0 %v3666_v16  ;;  %5079 = vmatpush1.bf16.msra.mxu1 %v3418_v51  ;;  %v13733_v16 = vld [vmem:[#allocation37_spill] sm:$0xff]  ;;  %v3766_v51 = vld [vmem:[#allocation4 + $0x6d0] sm:$0xff] }
 0x91e   :  { %4876 = vmatprep.subr.bf16.mxu0 %v3677_v38  ;;  %5080 = vmatprep.subr.bf16.mxu1 %v3429_v0  ;;  %v3777_v38 = vld [vmem:[#allocation4 + $0x728] sm:$0xff]  ;;  %v3518_v0 = vld [vmem:[#allocation3 + $0x690] sm:$0xff] }
 0x921   :  { %4877 = vmatpush1.bf16.msra.mxu0 %v3676_v13  ;;  %5081 = vmatpush1.bf16.msra.mxu1 %v3428_v58  ;;  %v3529_v13 = vld [vmem:[#allocation3 + $0x6e8] sm:$0xff]  ;;  %v3776_v58 = vld [vmem:[#allocation4 + $0x720] sm:$0xff] }
 0x922   :  { %4878 = vmatprep.subr.bf16.mxu0 %v3687_v49  ;;  %5082 = vmatprep.subr.bf16.mxu1 %v3439_v42  ;;  %v3787_v49 = vld [vmem:[#allocation4 + $0x778] sm:$0xff]  ;;  %v3528_v42 = vld [vmem:[#allocation3 + $0x6e0] sm:$0xff] }
 0x925   :  { %4879 = vmatpush1.bf16.msra.mxu0 %v3686_v21  ;;  %5083 = vmatpush1.bf16.msra.mxu1 %v3438_v25  ;;  %v13734_v21 = vld [vmem:[#allocation42_spill] sm:$0xff]  ;;  %v3539_v25 = vld [vmem:[#allocation3 + $0x738] sm:$0xff] }
 0x926   :  { %4880 = vmatprep.subr.bf16.mxu0 %v3697_v57  ;;  %5084 = vmatprep.subr.bf16.mxu1 %v3449_v34  ;;  %v13735_v57 = vld [vmem:[#allocation39_spill] sm:$0xff] }
 0x927   :  { %v3786_v34 = vld [vmem:[#allocation4 + $0x770] sm:$0xff] }
 0x929   :  { %4881 = vmatpush1.bf16.msra.mxu0 %v3696_v29  ;;  %5085 = vmatpush1.bf16.msra.mxu1 %v3448_v33  ;;  %v3797_v29 = vld [vmem:[#allocation4 + $0x7c8] sm:$0xff]  ;;  %v3538_v33 = vld [vmem:[#allocation3 + $0x730] sm:$0xff] }
 0x92a   :  { %4882 = vmatprep.subr.bf16.mxu0 %v3707_v46  ;;  %5086 = vmatprep.subr.bf16.mxu1 %v3459_v59  ;;  %v3311_v46 = vld [vmem:[#allocation3 + $0x18] sm:$0xff]  ;;  %v3796_v59 = vld [vmem:[#allocation4 + $0x7c0] sm:$0xff] }
 0x92d   :  { %4883 = vmatpush1.bf16.msra.mxu0 %v3706_v14  ;;  %5087 = vmatpush1.bf16.msra.mxu1 %v3458_v39  ;;  %v3807_v14 = vld [vmem:[#allocation4 + $0x818] sm:$0xff]  ;;  %v13736_v39 = vld [vmem:[#allocation45_spill] sm:$0xff] }
 0x92e   :  { %4893 = vmatprep.subr.bf16.mxu0 %v3717_v60  ;;  %5169 = vmatprep.subr.bf16.mxu1 %v3469_v8  ;;  %v13737_v60 = vld [vmem:[#allocation38_spill] sm:$0xff] }
 0x92f   :  { %v3806_v8 = vld [vmem:[#allocation4 + $0x810] sm:$0xff] }
 0x930   :  { %5089 = vmatmul.mubr.bf16.vlgmr.msra.gmra.mrb[152].mxu1 %v12007_v5  ;;  %4885 = vmatmul.mubr.bf16.vlgmr.msra.gmra.mrb[120].mxu0 %v12572_v17  ;;  %v3488_v17 = vld [vmem:[#allocation3 + $0x5a0] sm:$0xff] }
 0x931   :  { %4894 = vmatpush1.bf16.msra.mxu0 %v3716_v15  ;;  %5098 = vmatprep.mubr.bf16.mxu1 %v11973_v19  ;;  %v3817_v15 = vld [vmem:[#allocation4 + $0x868] sm:$0xff] }
 0x932   :  { %4895 = vmatprep.subr.bf16.mxu0 %v3727_v62  ;;  %5170 = vmatpush1.bf16.msra.mxu1 %v3468_v20  ;;  %v3816_v62 = vld [vmem:[#allocation4 + $0x860] sm:$0xff]  ;;  %v3827_v20 = vld [vmem:[#allocation4 + $0x8b8] sm:$0xff] }
 0x933   :  { %5171 = vmatprep.subr.bf16.mxu1 %v3479_v44  ;;  %4925 = vmatprep.mubr.bf16.mxu0 %v12576_v11  ;;  %v3498_v11 = vld [vmem:[#allocation3 + $0x5f0] sm:$0xff]  ;;  %v13738_v44 = vld [vmem:[#allocation44_spill] sm:$0xff] }
 0x935   :  { %4896 = vmatpush1.bf16.msra.mxu0 %v3726_v52  ;;  %v13739_v52 = vld [vmem:[#allocation41_spill] sm:$0xff] }
 0x936   :  { %4897 = vmatprep.subr.bf16.mxu0 %v3737_v45  ;;  %5172 = vmatpush1.bf16.msra.mxu1 %v3478_v10  ;;  %v3826_v45 = vld [vmem:[#allocation4 + $0x8b0] sm:$0xff]  ;;  %v3837_v10 = vld [vmem:[#allocation4 + $0x908] sm:$0xff] }
 0x937   :  { %5173 = vmatprep.subr.bf16.mxu1 %v3489_v30  ;;  %v3836_v30 = vld [vmem:[#allocation4 + $0x900] sm:$0xff] }
 0x938   :  { %5099 = vmatmul.mubr.bf16.gmra.mrb[156].mxu1 %v12003_v3 }
 0x939   :  { %4898 = vmatpush1.bf16.msra.mxu0 %v3736_v2  ;;  %5108 = vmatprep.mubr.bf16.mxu1 %v11983_v50  ;;  %v3847_v2 = vld [vmem:[#allocation4 + $0x958] sm:$0xff] }
 0x93a   :  { %4899 = vmatprep.subr.bf16.mxu0 %v3747_v43  ;;  %5174 = vmatpush1.bf16.msra.mxu1 %v3488_v17  ;;  %v13740_v43 = vld [vmem:[#allocation47_spill] sm:$0xff]  ;;  %v13741_v17 = vld [vmem:[#allocation40_spill] sm:$0xff] }
 0x93b   :  { %5175 = vmatprep.subr.bf16.mxu1 %v3499_v4  ;;  %v3846_v4 = vld [vmem:[#allocation4 + $0x950] sm:$0xff] }
 0x93d   :  { %4900 = vmatpush1.bf16.msra.mxu0 %v3746_v37  ;;  %v3857_v37 = vld [vmem:[#allocation4 + $0x9a8] sm:$0xff] }
 0x93e   :  { %4901 = vmatprep.subr.bf16.mxu0 %v3757_v1  ;;  %5176 = vmatpush1.bf16.msra.mxu1 %v3498_v11  ;;  %v3856_v1 = vld [vmem:[#allocation4 + $0x9a0] sm:$0xff]  ;;  %v3867_v11 = vld [vmem:[#allocation4 + $0x9f8] sm:$0xff] }
 0x93f   :  { %5177 = vmatprep.subr.bf16.mxu1 %v3509_v56  ;;  %v13742_v56 = vld [vmem:[#allocation46_spill] sm:$0xff] }
 0x940   :  { %5109 = vmatmul.mubr.bf16.gmra.mrb[160].mxu1 %v13732_v54 }
 0x941   :  { %4902 = vmatpush1.bf16.msra.mxu0 %v3756_v7  ;;  %5118 = vmatprep.mubr.bf16.mxu1 %v13733_v16  ;;  %v13701_v7 = vmov 0  }
 0x942   :  { %4903 = vmatprep.subr.bf16.mxu0 %v3767_v41  ;;  %5178 = vmatpush1.bf16.msra.mxu1 %v3508_v40  ;;  %v3866_v41 = vld [vmem:[#allocation4 + $0x9f0] sm:$0xff]  ;;  %v3877_v40 = vld [vmem:[#allocation4 + $0xa48] sm:$0xff] }
 0x943   :  { %5179 = vmatprep.subr.bf16.mxu1 %v3519_v12  ;;  %v3876_v12 = vld [vmem:[#allocation4 + $0xa40] sm:$0xff] }
 0x945   :  { %4904 = vmatpush1.bf16.msra.mxu0 %v3766_v51  ;;  %v3310_v51 = vld [vmem:[#allocation3 + $0x10] sm:$0xff] }
 0x946   :  { %4905 = vmatprep.subr.bf16.mxu0 %v3777_v38  ;;  %5180 = vmatpush1.bf16.msra.mxu1 %v3518_v0  ;;  %v3887_v38 = vld [vmem:[#allocation4 + $0xa98] sm:$0xff]  ;;  %v3321_v0 = vld [vmem:[#allocation3 + $0x68] sm:$0xff] }
 0x947   :  { %5181 = vmatprep.subr.bf16.mxu1 %v3529_v13  ;;  %v13743_v13 = vld [vmem:[#allocation50_spill] sm:$0xff] }
 0x948   :  { %5119 = vmatmul.mubr.bf16.gmra.mrb[164].mxu1 %v13734_v21 }
 0x949   :  { %4906 = vmatpush1.bf16.msra.mxu0 %v3776_v58  ;;  %5128 = vmatprep.mubr.bf16.mxu1 %v13735_v57  ;;  %v3886_v58 = vld [vmem:[#allocation4 + $0xa90] sm:$0xff] }
 0x94a   :  { %4907 = vmatprep.subr.bf16.mxu0 %v3787_v49  ;;  %5182 = vmatpush1.bf16.msra.mxu1 %v3528_v42  ;;  %v3320_v49 = vld [vmem:[#allocation3 + $0x60] sm:$0xff]  ;;  %v3897_v42 = vld [vmem:[#allocation4 + $0xae8] sm:$0xff] }
 0x94b   :  { %5183 = vmatprep.subr.bf16.mxu1 %v3539_v25  ;;  %v3331_v25 = vld [vmem:[#allocation3 + $0xb8] sm:$0xff] }
 0x94d   :  { %4908 = vmatpush1.bf16.msra.mxu0 %v3786_v34  ;;  %v3896_v34 = vld [vmem:[#allocation4 + $0xae0] sm:$0xff] }
 0x94e   :  { %4909 = vmatprep.subr.bf16.mxu0 %v3797_v29  ;;  %5184 = vmatpush1.bf16.msra.mxu1 %v3538_v33  ;;  %v3330_v29 = vld [vmem:[#allocation3 + $0xb0] sm:$0xff]  ;;  %v3907_v33 = vld [vmem:[#allocation4 + $0xb38] sm:$0xff] }
 0x94f   :  { %5282 = vmatprep.subr.bf16.mxu1 %v3311_v46  ;;  %v13744_v46 = vld [vmem:[#allocation49_spill] sm:$0xff] }
 0x950   :  { %5129 = vmatmul.mubr.bf16.gmra.mrb[168].mxu1 %v13736_v39 }
 0x951   :  { %4910 = vmatpush1.bf16.msra.mxu0 %v3796_v59  ;;  %5138 = vmatprep.mubr.bf16.mxu1 %v13737_v60  ;;  %v3906_v59 = vld [vmem:[#allocation4 + $0xb30] sm:$0xff] }
 0x952   :  { %4911 = vmatprep.subr.bf16.mxu0 %v3807_v14  ;;  %v3340_v14 = vld [vmem:[#allocation3 + $0x100] sm:$0xff] }
 0x955   :  { %4912 = vmatpush1.bf16.msra.mxu0 %v3806_v8  ;;  %v3917_v8 = vld [vmem:[#allocation4 + $0xb88] sm:$0xff] }
 0x956   :  { %4913 = vmatprep.subr.bf16.mxu0 %v3817_v15  ;;  %v3916_v15 = vld [vmem:[#allocation4 + $0xb80] sm:$0xff] }
 0x958   :  { %5139 = vmatmul.mubr.bf16.gmra.mrb[172].mxu1 %v13738_v44 }
 0x959   :  { %4914 = vmatpush1.bf16.msra.mxu0 %v3816_v62  ;;  %5148 = vmatprep.mubr.bf16.mxu1 %v13739_v52  ;;  %v3350_v62 = vld [vmem:[#allocation3 + $0x150] sm:$0xff] }
 0x95a   :  { %4915 = vmatprep.subr.bf16.mxu0 %v3827_v20  ;;  %v3927_v20 = vld [vmem:[#allocation4 + $0xbd8] sm:$0xff] }
 0x95d   :  { %4916 = vmatpush1.bf16.msra.mxu0 %v3826_v45  ;;  %v3361_v45 = vld [vmem:[#allocation3 + $0x1a8] sm:$0xff] }
 0x95e   :  { %4917 = vmatprep.subr.bf16.mxu0 %v3837_v10  ;;  %v13745_v10 = vld [vmem:[#allocation52_spill] sm:$0xff] }
 0x960   :  { %5149 = vmatmul.mubr.bf16.gmra.mrb[176].mxu1 %v13740_v43 }
 0x961   :  { %4918 = vmatpush1.bf16.msra.mxu0 %v3836_v30  ;;  %5158 = vmatprep.mubr.bf16.mxu1 %v13741_v17  ;;  %v3926_v30 = vld [vmem:[#allocation4 + $0xbd0] sm:$0xff] }
 0x962   :  { %4919 = vmatprep.subr.bf16.mxu0 %v3847_v2  ;;  %v3360_v2 = vld [vmem:[#allocation3 + $0x1a0] sm:$0xff] }
 0x965   :  { %4920 = vmatpush1.bf16.msra.mxu0 %v3846_v4  ;;  %v3937_v4 = vld [vmem:[#allocation4 + $0xc28] sm:$0xff] }
 0x966   :  { %4921 = vmatprep.subr.bf16.mxu0 %v3857_v37  ;;  %v3371_v37 = vld [vmem:[#allocation3 + $0x1f8] sm:$0xff] }
 0x968   :  { %5159 = vmatmul.mubr.bf16.gmra.mrb[180].mxu1 %v13742_v56 }
 0x969   :  { %4922 = vmatpush1.bf16.msra.mxu0 %v3856_v1  ;;  %5201 = vmatprep.mubr.bf16.mxu1 %v13701_v7  ;;  %v3936_v1 = vld [vmem:[#allocation4 + $0xc20] sm:$0xff] }
 0x96a   :  { %4923 = vmatprep.subr.bf16.mxu0 %v3867_v11  ;;  %v3370_v11 = vld [vmem:[#allocation3 + $0x1f0] sm:$0xff] }
 0x96d   :  { %4924 = vmatpush1.bf16.msra.mxu0 %v3866_v41  ;;  %v3947_v41 = vld [vmem:[#allocation4 + $0xc78] sm:$0xff] }
 0x96e   :  { %4934 = vmatprep.subr.bf16.mxu0 %v3877_v40  ;;  %v3381_v40 = vld [vmem:[#allocation3 + $0x248] sm:$0xff] }
 0x970   :  { %5202 = vmatmul.mubr.bf16.vlgmr.msra.gmra.mrb[152].mxu1 %v13743_v13  ;;  %4926 = vmatmul.mubr.bf16.vlgmr.msra.gmra.mrb[120].mxu0 %v12584_v47  ;;  %v3341_v47 = vld [vmem:[#allocation3 + $0x108] sm:$0xff] }
 0x971   :  { %4935 = vmatpush1.bf16.msra.mxu0 %v3876_v12  ;;  %5283 = vmatpush1.bf16.msra.mxu1 %v3310_v51  ;;  %v13746_v12 = vld [vmem:[#allocation51_spill] sm:$0xff] }
 0x972   :  { %4936 = vmatprep.subr.bf16.mxu0 %v3887_v38  ;;  %5284 = vmatprep.subr.bf16.mxu1 %v3321_v0  ;;  %v3946_v51 = vld [vmem:[#allocation4 + $0xc70] sm:$0xff]  ;;  %v3380_v38 = vld [vmem:[#allocation3 + $0x240] sm:$0xff]  ;;  %v3957_v0 = vld [vmem:[#allocation4 + $0xcc8] sm:$0xff] }
 0x973   :  { %5211 = vmatprep.mubr.bf16.mxu1 %v13701_v7  ;;  %4966 = vmatprep.mubr.bf16.mxu0 %v12588_v24  ;;  %v3351_v24 = vld [vmem:[#allocation3 + $0x158] sm:$0xff] }
 0x975   :  { %4937 = vmatpush1.bf16.msra.mxu0 %v3886_v58  ;;  %5285 = vmatpush1.bf16.msra.mxu1 %v3320_v49  ;;  %v3391_v58 = vld [vmem:[#allocation3 + $0x298] sm:$0xff]  ;;  %v3956_v49 = vld [vmem:[#allocation4 + $0xcc0] sm:$0xff] }
 0x976   :  { %4938 = vmatprep.subr.bf16.mxu0 %v3897_v42  ;;  %5286 = vmatprep.subr.bf16.mxu1 %v3331_v25  ;;  %v3390_v42 = vld [vmem:[#allocation3 + $0x290] sm:$0xff]  ;;  %v3967_v25 = vld [vmem:[#allocation4 + $0xd18] sm:$0xff] }
 0x978   :  { %5212 = vmatmul.mubr.bf16.gmra.mrb[156].mxu1 %v13744_v46 }
 0x979   :  { %4939 = vmatpush1.bf16.msra.mxu0 %v3896_v34  ;;  %5287 = vmatpush1.bf16.msra.mxu1 %v3330_v29  ;;  %v3401_v34 = vld [vmem:[#allocation3 + $0x2e8] sm:$0xff] }
 0x97a   :  { %4940 = vmatprep.subr.bf16.mxu0 %v3907_v33  ;;  %5288 = vmatprep.subr.bf16.mxu1 %v3341_v47  ;;  %v13747_v29 = vld [vmem:[#allocation54_spill] sm:$0xff]  ;;  %v3400_v47 = vld [vmem:[#allocation3 + $0x2e0] sm:$0xff] }
 0x97b   :  { %5221 = vmatprep.mubr.bf16.mxu1 %v13701_v7  ;;  %v3966_v33 = vld [vmem:[#allocation4 + $0xd10] sm:$0xff] }
 0x97d   :  { %4941 = vmatpush1.bf16.msra.mxu0 %v3906_v59  ;;  %5289 = vmatpush1.bf16.msra.mxu1 %v3340_v14  ;;  %v3977_v59 = vld [vmem:[#allocation4 + $0xd68] sm:$0xff]  ;;  %v3411_v14 = vld [vmem:[#allocation3 + $0x338] sm:$0xff] }
 0x97e   :  { %4942 = vmatprep.subr.bf16.mxu0 %v3917_v8  ;;  %5290 = vmatprep.subr.bf16.mxu1 %v3351_v24  ;;  %v3976_v8 = vld [vmem:[#allocation4 + $0xd60] sm:$0xff]  ;;  %v3410_v24 = vld [vmem:[#allocation3 + $0x330] sm:$0xff] }
 0x980   :  { %5222 = vmatmul.mubr.bf16.gmra.mrb[160].mxu1 %v13745_v10 }
 0x981   :  { %4943 = vmatpush1.bf16.msra.mxu0 %v3916_v15  ;;  %5291 = vmatpush1.bf16.msra.mxu1 %v3350_v62  ;;  %v3987_v15 = vld [vmem:[#allocation4 + $0xdb8] sm:$0xff]  ;;  %v3421_v62 = vld [vmem:[#allocation3 + $0x388] sm:$0xff] }
 0x982   :  { %4944 = vmatprep.subr.bf16.mxu0 %v3927_v20  ;;  %5292 = vmatprep.subr.bf16.mxu1 %v3361_v45  ;;  %v13748_v20 = vld [vmem:[#allocation53_spill] sm:$0xff]  ;;  %v3986_v45 = vld [vmem:[#allocation4 + $0xdb0] sm:$0xff] }
 0x983   :  { %5231 = vmatprep.mubr.bf16.mxu1 %v13701_v7 }
 0x985   :  { %4945 = vmatpush1.bf16.msra.mxu0 %v3926_v30  ;;  %5293 = vmatpush1.bf16.msra.mxu1 %v3360_v2  ;;  %v3420_v30 = vld [vmem:[#allocation3 + $0x380] sm:$0xff]  ;;  %v3997_v2 = vld [vmem:[#allocation4 + $0xe08] sm:$0xff] }
 0x986   :  { %4946 = vmatprep.subr.bf16.mxu0 %v3937_v4  ;;  %5294 = vmatprep.subr.bf16.mxu1 %v3371_v37  ;;  %v3431_v4 = vld [vmem:[#allocation3 + $0x3d8] sm:$0xff]  ;;  %v3996_v37 = vld [vmem:[#allocation4 + $0xe00] sm:$0xff] }
 0x988   :  { %5232 = vmatmul.mubr.bf16.gmra.mrb[164].mxu1 %v13746_v12 }
 0x989   :  { %4947 = vmatpush1.bf16.msra.mxu0 %v3936_v1  ;;  %5295 = vmatpush1.bf16.msra.mxu1 %v3370_v11  ;;  %v3430_v1 = vld [vmem:[#allocation3 + $0x3d0] sm:$0xff]  ;;  %v4007_v11 = vld [vmem:[#allocation4 + $0xe58] sm:$0xff] }
 0x98a   :  { %4948 = vmatprep.subr.bf16.mxu0 %v3947_v41  ;;  %5296 = vmatprep.subr.bf16.mxu1 %v3381_v40  ;;  %v3441_v41 = vld [vmem:[#allocation3 + $0x428] sm:$0xff]  ;;  %v13749_v40 = vld [vmem:[#allocation56_spill] sm:$0xff] }
 0x98b   :  { %5241 = vmatprep.mubr.bf16.mxu1 %v13701_v7 }
 0x98d   :  { %4949 = vmatpush1.bf16.msra.mxu0 %v3946_v51  ;;  %5297 = vmatpush1.bf16.msra.mxu1 %v3380_v38  ;;  %v4006_v51 = vld [vmem:[#allocation4 + $0xe50] sm:$0xff]  ;;  %v3440_v38 = vld [vmem:[#allocation3 + $0x420] sm:$0xff] }
 0x98e   :  { %4950 = vmatprep.subr.bf16.mxu0 %v3957_v0  ;;  %5298 = vmatprep.subr.bf16.mxu1 %v3391_v58  ;;  %v4017_v0 = vld [vmem:[#allocation4 + $0xea8] sm:$0xff]  ;;  %v3451_v58 = vld [vmem:[#allocation3 + $0x478] sm:$0xff] }
 0x990   :  { %5242 = vmatmul.mubr.bf16.gmra.mrb[168].mxu1 %v13747_v29 }
 0x991   :  { %4951 = vmatpush1.bf16.msra.mxu0 %v3956_v49  ;;  %5299 = vmatpush1.bf16.msra.mxu1 %v3390_v42  ;;  %v4016_v49 = vld [vmem:[#allocation4 + $0xea0] sm:$0xff]  ;;  %v3450_v42 = vld [vmem:[#allocation3 + $0x470] sm:$0xff] }
 0x992   :  { %4952 = vmatprep.subr.bf16.mxu0 %v3967_v25  ;;  %5300 = vmatprep.subr.bf16.mxu1 %v3401_v34  ;;  %v4027_v25 = vld [vmem:[#allocation4 + $0xef8] sm:$0xff]  ;;  %v3461_v34 = vld [vmem:[#allocation3 + $0x4c8] sm:$0xff] }
 0x993   :  { %5251 = vmatprep.mubr.bf16.mxu1 %v13701_v7 }
 0x995   :  { %4953 = vmatpush1.bf16.msra.mxu0 %v3966_v33  ;;  %5301 = vmatpush1.bf16.msra.mxu1 %v3400_v47  ;;  %v13750_v33 = vld [vmem:[#allocation55_spill] sm:$0xff] }
 0x996   :  { %4954 = vmatprep.subr.bf16.mxu0 %v3977_v59  ;;  %5302 = vmatprep.subr.bf16.mxu1 %v3411_v14  ;;  %v4026_v47 = vld [vmem:[#allocation4 + $0xef0] sm:$0xff]  ;;  %v3460_v59 = vld [vmem:[#allocation3 + $0x4c0] sm:$0xff]  ;;  %v4037_v14 = vld [vmem:[#allocation4 + $0xf48] sm:$0xff] }
 0x998   :  { %5252 = vmatmul.mubr.bf16.gmra.mrb[172].mxu1 %v13748_v20 }
 0x999   :  { %4955 = vmatpush1.bf16.msra.mxu0 %v3976_v8  ;;  %5303 = vmatpush1.bf16.msra.mxu1 %v3410_v24  ;;  %v3471_v8 = vld [vmem:[#allocation3 + $0x518] sm:$0xff]  ;;  %v4036_v24 = vld [vmem:[#allocation4 + $0xf40] sm:$0xff] }
 0x99a   :  { %4956 = vmatprep.subr.bf16.mxu0 %v3987_v15  ;;  %5304 = vmatprep.subr.bf16.mxu1 %v3421_v62  ;;  %v4047_v15 = vld [vmem:[#allocation4 + $0xf98] sm:$0xff]  ;;  %v3470_v62 = vld [vmem:[#allocation3 + $0x510] sm:$0xff] }
 0x99b   :  { %5261 = vmatprep.mubr.bf16.mxu1 %v13701_v7 }
 0x99d   :  { %4957 = vmatpush1.bf16.msra.mxu0 %v3986_v45  ;;  %5305 = vmatpush1.bf16.msra.mxu1 %v3420_v30  ;;  %v3481_v45 = vld [vmem:[#allocation3 + $0x568] sm:$0xff]  ;;  %v4046_v30 = vld [vmem:[#allocation4 + $0xf90] sm:$0xff] }
 0x99e   :  { %4958 = vmatprep.subr.bf16.mxu0 %v3997_v2  ;;  %5306 = vmatprep.subr.bf16.mxu1 %v3431_v4  ;;  %v4057_v2 = vld [vmem:[#allocation4 + $0xfe8] sm:$0xff]  ;;  %v3480_v4 = vld [vmem:[#allocation3 + $0x560] sm:$0xff] }
 0x9a0   :  { %5262 = vmatmul.mubr.bf16.gmra.mrb[176].mxu1 %v13749_v40 }
 0x9a1   :  { %4959 = vmatpush1.bf16.msra.mxu0 %v3996_v37  ;;  %5307 = vmatpush1.bf16.msra.mxu1 %v3430_v1  ;;  %v3491_v37 = vld [vmem:[#allocation3 + $0x5b8] sm:$0xff]  ;;  %v4056_v1 = vld [vmem:[#allocation4 + $0xfe0] sm:$0xff] }
 0x9a2   :  { %4960 = vmatprep.subr.bf16.mxu0 %v4007_v11  ;;  %5308 = vmatprep.subr.bf16.mxu1 %v3441_v41  ;;  %v4067_v11 = vld [vmem:[#allocation4 + $0x1038] sm:$0xff]  ;;  %v3501_v41 = vld [vmem:[#allocation3 + $0x608] sm:$0xff] }
 0x9a3   :  { %5271 = vmatprep.mubr.bf16.mxu1 %v13701_v7 }
 0x9a5   :  { %4961 = vmatpush1.bf16.msra.mxu0 %v4006_v51  ;;  %5309 = vmatpush1.bf16.msra.mxu1 %v3440_v38  ;;  %v4066_v51 = vld [vmem:[#allocation4 + $0x1030] sm:$0xff]  ;;  %v4077_v38 = vld [vmem:[#allocation4 + $0x1088] sm:$0xff] }
 0x9a6   :  { %4962 = vmatprep.subr.bf16.mxu0 %v4017_v0  ;;  %5310 = vmatprep.subr.bf16.mxu1 %v3451_v58  ;;  %v3511_v0 = vld [vmem:[#allocation3 + $0x658] sm:$0xff]  ;;  %v4076_v58 = vld [vmem:[#allocation4 + $0x1080] sm:$0xff] }
 0x9a8   :  { %5272 = vmatmul.mubr.bf16.gmra.mrb[180].mxu1 %v13750_v33 }
 0x9a9   :  { %4963 = vmatpush1.bf16.msra.mxu0 %v4016_v49  ;;  %5311 = vmatpush1.bf16.msra.mxu1 %v3450_v42  ;;  %v4087_v49 = vld [vmem:[#allocation4 + $0x10d8] sm:$0xff]  ;;  %v3510_v42 = vld [vmem:[#allocation3 + $0x650] sm:$0xff] }
 0x9aa   :  { %4964 = vmatprep.subr.bf16.mxu0 %v4027_v25  ;;  %5312 = vmatprep.subr.bf16.mxu1 %v3461_v34  ;;  %v3521_v25 = vld [vmem:[#allocation3 + $0x6a8] sm:$0xff]  ;;  %v4086_v34 = vld [vmem:[#allocation4 + $0x10d0] sm:$0xff] }
 0x9ab   :  { %5314 = vmatprep.mubr.bf16.mxu1 %v11975_v23 }
 0x9ad   :  { %4965 = vmatpush1.bf16.msra.mxu0 %v4026_v47  ;;  %5313 = vmatpush1.bf16.msra.mxu1 %v3460_v59 }
 0x9ae   :  { %4975 = vmatprep.subr.bf16.mxu0 %v4037_v14  ;;  %5395 = vmatprep.subr.bf16.mxu1 %v3471_v8  ;;  %v4097_v14 = vld [vmem:[#allocation4 + $0x1128] sm:$0xff]  ;;  %v3520_v8 = vld [vmem:[#allocation3 + $0x6a0] sm:$0xff] }
 0x9b0   :  { %5315 = vmatmul.mubr.bf16.vlgmr.msra.gmra.mrb[184].mxu1 %v12007_v5  ;;  %4967 = vmatmul.mubr.bf16.vlgmr.msra.gmra.mrb[120].mxu0 %v12596_v63  ;;  %v3490_v63 = vld [vmem:[#allocation3 + $0x5b0] sm:$0xff] }
 0x9b1   :  { %4976 = vmatpush1.bf16.msra.mxu0 %v4036_v24  ;;  %5324 = vmatprep.mubr.bf16.mxu1 %v11973_v19 }
 0x9b2   :  { %4977 = vmatprep.subr.bf16.mxu0 %v4047_v15  ;;  %5396 = vmatpush1.bf16.msra.mxu1 %v3470_v62  ;;  %v3531_v62 = vld [vmem:[#allocation3 + $0x6f8] sm:$0xff] }
 0x9b3   :  { %5397 = vmatprep.subr.bf16.mxu1 %v3481_v45  ;;  %5007 = vmatprep.mubr.bf16.mxu0 %v12600_v27  ;;  %v3500_v27 = vld [vmem:[#allocation3 + $0x600] sm:$0xff] }
 0x9b5   :  { %4978 = vmatpush1.bf16.msra.mxu0 %v4046_v30 }
 0x9b6   :  { %4979 = vmatprep.subr.bf16.mxu0 %v4057_v2  ;;  %5398 = vmatpush1.bf16.msra.mxu1 %v3480_v4 }
 0x9b7   :  { %5399 = vmatprep.subr.bf16.mxu1 %v3491_v37  ;;  %v4096_v37 = vld [vmem:[#allocation4 + $0x1120] sm:$0xff] }
 0x9b8   :  { %5325 = vmatmul.mubr.bf16.gmra.mrb[188].mxu1 %v12003_v3 }
 0x9b9   :  { %4980 = vmatpush1.bf16.msra.mxu0 %v4056_v1  ;;  %5334 = vmatprep.mubr.bf16.mxu1 %v11983_v50  ;;  %v4107_v1 = vld [vmem:[#allocation4 + $0x1178] sm:$0xff] }
 0x9ba   :  { %4981 = vmatprep.subr.bf16.mxu0 %v4067_v11  ;;  %5400 = vmatpush1.bf16.msra.mxu1 %v3490_v63  ;;  %v3530_v11 = vld [vmem:[#allocation3 + $0x6f0] sm:$0xff]  ;;  %v3541_v63 = vld [vmem:[#allocation3 + $0x748] sm:$0xff] }
 0x9bb   :  { %5401 = vmatprep.subr.bf16.mxu1 %v3501_v41  ;;  %v4106_v41 = vld [vmem:[#allocation4 + $0x1170] sm:$0xff] }
 0x9bd   :  { %4982 = vmatpush1.bf16.msra.mxu0 %v4066_v51  ;;  %v4117_v51 = vld [vmem:[#allocation4 + $0x11c8] sm:$0xff] }
 0x9be   :  { %4983 = vmatprep.subr.bf16.mxu0 %v4077_v38  ;;  %5402 = vmatpush1.bf16.msra.mxu1 %v3500_v27  ;;  %v3540_v38 = vld [vmem:[#allocation3 + $0x740] sm:$0xff]  ;;  %v3315_v27 = vld [vmem:[#allocation3 + $0x38] sm:$0xff] }
 0x9bf   :  { %5403 = vmatprep.subr.bf16.mxu1 %v3511_v0  ;;  %v4116_v0 = vld [vmem:[#allocation4 + $0x11c0] sm:$0xff] }
 0x9c0   :  { %5335 = vmatmul.mubr.bf16.gmra.mrb[192].mxu1 %v13732_v54 }
 0x9c1   :  { %4984 = vmatpush1.bf16.msra.mxu0 %v4076_v58  ;;  %5344 = vmatprep.mubr.bf16.mxu1 %v13733_v16  ;;  %v4127_v58 = vld [vmem:[#allocation4 + $0x1218] sm:$0xff] }
 0x9c2   :  { %4985 = vmatprep.subr.bf16.mxu0 %v4087_v49  ;;  %5404 = vmatpush1.bf16.msra.mxu1 %v3510_v42  ;;  %v4126_v49 = vld [vmem:[#allocation4 + $0x1210] sm:$0xff]  ;;  %v4137_v42 = vld [vmem:[#allocation4 + $0x1268] sm:$0xff] }
 0x9c3   :  { %v12682_v47 = vpop.f32.mrb[116].mxu0  ;;  %v12684_v59 = vpop.f32.mrb[148].mxu1  ;;  %5405 = vmatprep.subr.bf16.mxu1 %v3521_v25  ;;  %v4136_v25 = vld [vmem:[#allocation4 + $0x1260] sm:$0xff] }
 0x9c4   :  { %13751 = vst [vmem:[#allocation43_spill] sm:$0xff] %v12682_v47  ;;  %13752 = vst [vmem:[#allocation37_spill] sm:$0xff] %v12684_v59  ;;  %v12686_v24 = vpop.f32.mrb[117].mxu0  ;;  %v12688_v15 = vpop.f32.mrb[149].mxu1 }
 0x9c5   :  { %13753 = vst [vmem:[#allocation42_spill] sm:$0xff] %v12686_v24  ;;  %13754 = vst [vmem:[#allocation39_spill] sm:$0xff] %v12688_v15  ;;  %v4685_v45 = vpop.f32.mrb[118].mxu0  ;;  %v4849_v30 = vpop.f32.mrb[150].mxu1  ;;  %4986 = vmatpush1.bf16.msra.mxu0 %v4086_v34  ;;  %v4147_v34 = vld [vmem:[#allocation4 + $0x12b8] sm:$0xff] }
 0x9c6   :  { %v4686_v2 = vpop.f32.mrb[119].mxu0  ;;  %v4850_v4 = vpop.f32.mrb[151].mxu1  ;;  %4987 = vmatprep.subr.bf16.mxu0 %v4097_v14  ;;  %5406 = vmatpush1.bf16.msra.mxu1 %v3520_v8  ;;  %v4146_v14 = vld [vmem:[#allocation4 + $0x12b0] sm:$0xff]  ;;  %v4157_v8 = vld [vmem:[#allocation4 + $0x1308] sm:$0xff]  ;;  %v4167_v45 = vld [vmem:[#allocation4 + $0x1358] sm:$0xff] }
 0x9c7   :  { %5407 = vmatprep.subr.bf16.mxu1 %v3531_v62  ;;  %v4156_v62 = vld [vmem:[#allocation4 + $0x1300] sm:$0xff]  ;;  %v4166_v30 = vld [vmem:[#allocation4 + $0x1350] sm:$0xff]  ;;  %v4177_v2 = vld [vmem:[#allocation4 + $0x13a8] sm:$0xff] }
 0x9c8   :  { %5345 = vmatmul.mubr.bf16.gmra.mrb[196].mxu1 %v13734_v21  ;;  %v4176_v4 = vld [vmem:[#allocation4 + $0x13a0] sm:$0xff] }
 0x9c9   :  { %4988 = vmatpush1.bf16.msra.mxu0 %v4096_v37  ;;  %5354 = vmatprep.mubr.bf16.mxu1 %v13735_v57  ;;  %v4187_v37 = vld [vmem:[#allocation4 + $0x13f8] sm:$0xff] }
 0x9ca   :  { %4989 = vmatprep.subr.bf16.mxu0 %v4107_v1  ;;  %5408 = vmatpush1.bf16.msra.mxu1 %v3530_v11  ;;  %v4186_v1 = vld [vmem:[#allocation4 + $0x13f0] sm:$0xff]  ;;  %v3313_v11 = vld [vmem:[#allocation3 + $0x28] sm:$0xff] }
 0x9cb   :  { %5409 = vmatprep.subr.bf16.mxu1 %v3541_v63  ;;  %v3312_v63 = vld [vmem:[#allocation3 + $0x20] sm:$0xff] }
 0x9cd   :  { %4990 = vmatpush1.bf16.msra.mxu0 %v4106_v41  ;;  %v3314_v41 = vld [vmem:[#allocation3 + $0x30] sm:$0xff] }
 0x9ce   :  { %4991 = vmatprep.subr.bf16.mxu0 %v4117_v51  ;;  %5410 = vmatpush1.bf16.msra.mxu1 %v3540_v38  ;;  %v3323_v51 = vld [vmem:[#allocation3 + $0x78] sm:$0xff]  ;;  %v3325_v38 = vld [vmem:[#allocation3 + $0x88] sm:$0xff] }
 0x9cf   :  { %5734 = vmatprep.subr.bf16.mxu1 %v3315_v27  ;;  %v3322_v27 = vld [vmem:[#allocation3 + $0x70] sm:$0xff] }
 0x9d0   :  { %5355 = vmatmul.mubr.bf16.gmra.mrb[200].mxu1 %v13736_v39 }
 0x9d1   :  { %4992 = vmatpush1.bf16.msra.mxu0 %v4116_v0  ;;  %5364 = vmatprep.mubr.bf16.mxu1 %v13737_v60  ;;  %v3324_v0 = vld [vmem:[#allocation3 + $0x80] sm:$0xff] }
 0x9d2   :  { %4993 = vmatprep.subr.bf16.mxu0 %v4127_v58  ;;  %v3333_v58 = vld [vmem:[#allocation3 + $0xc8] sm:$0xff] }
 0x9d5   :  { %4994 = vmatpush1.bf16.msra.mxu0 %v4126_v49  ;;  %v3335_v49 = vld [vmem:[#allocation3 + $0xd8] sm:$0xff] }
 0x9d6   :  { %4995 = vmatprep.subr.bf16.mxu0 %v4137_v42  ;;  %v3332_v42 = vld [vmem:[#allocation3 + $0xc0] sm:$0xff] }
 0x9d8   :  { %5365 = vmatmul.mubr.bf16.gmra.mrb[204].mxu1 %v13738_v44 }
 0x9d9   :  { %4996 = vmatpush1.bf16.msra.mxu0 %v4136_v25  ;;  %5374 = vmatprep.mubr.bf16.mxu1 %v13739_v52  ;;  %v3343_v25 = vld [vmem:[#allocation3 + $0x118] sm:$0xff] }
 0x9da   :  { %4997 = vmatprep.subr.bf16.mxu0 %v4147_v34  ;;  %v3345_v34 = vld [vmem:[#allocation3 + $0x128] sm:$0xff] }
 0x9dd   :  { %4998 = vmatpush1.bf16.msra.mxu0 %v4146_v14  ;;  %v3342_v14 = vld [vmem:[#allocation3 + $0x110] sm:$0xff] }
 0x9de   :  { %4999 = vmatprep.subr.bf16.mxu0 %v4157_v8  ;;  %v3344_v8 = vld [vmem:[#allocation3 + $0x120] sm:$0xff] }
 0x9e0   :  { %5375 = vmatmul.mubr.bf16.gmra.mrb[208].mxu1 %v13740_v43 }
 0x9e1   :  { %5000 = vmatpush1.bf16.msra.mxu0 %v4156_v62  ;;  %5384 = vmatprep.mubr.bf16.mxu1 %v13741_v17  ;;  %v3353_v62 = vld [vmem:[#allocation3 + $0x168] sm:$0xff] }
 0x9e2   :  { %5001 = vmatprep.subr.bf16.mxu0 %v4167_v45  ;;  %v3355_v45 = vld [vmem:[#allocation3 + $0x178] sm:$0xff] }
 0x9e5   :  { %5002 = vmatpush1.bf16.msra.mxu0 %v4166_v30  ;;  %v3352_v30 = vld [vmem:[#allocation3 + $0x160] sm:$0xff] }
 0x9e6   :  { %5003 = vmatprep.subr.bf16.mxu0 %v4177_v2  ;;  %v3354_v2 = vld [vmem:[#allocation3 + $0x170] sm:$0xff] }
 0x9e8   :  { %5385 = vmatmul.mubr.bf16.gmra.mrb[212].mxu1 %v13742_v56 }
 0x9e9   :  { %5004 = vmatpush1.bf16.msra.mxu0 %v4176_v4  ;;  %5427 = vmatprep.mubr.bf16.mxu1 %v13701_v7  ;;  %v3363_v4 = vld [vmem:[#allocation3 + $0x1b8] sm:$0xff] }
 0x9ea   :  { %5005 = vmatprep.subr.bf16.mxu0 %v4187_v37  ;;  %v3365_v37 = vld [vmem:[#allocation3 + $0x1c8] sm:$0xff] }
 0x9ed   :  { %5006 = vmatpush1.bf16.msra.mxu0 %v4186_v1  ;;  %v3362_v1 = vld [vmem:[#allocation3 + $0x1b0] sm:$0xff] }
 0x9ee   :  { %5508 = vmatprep.subr.bf16.mxu0 %v3313_v11  ;;  %v3364_v11 = vld [vmem:[#allocation3 + $0x1c0] sm:$0xff] }
 0x9f0   :  { %5008 = vmatmul.mubr.bf16.vlgmr.msra.gmra.mrb[120].mxu0 %v12608_v61  ;;  %5428 = vmatmul.mubr.bf16.vlgmr.msra.gmra.mrb[184].mxu1 %v13743_v13  ;;  %v3334_v61 = vld [vmem:[#allocation3 + $0xd0] sm:$0xff] }
 0x9f1   :  { %5509 = vmatpush1.bf16.msra.mxu0 %v3312_v63  ;;  %5735 = vmatpush1.bf16.msra.mxu1 %v3314_v41  ;;  %v3373_v63 = vld [vmem:[#allocation3 + $0x208] sm:$0xff]  ;;  %v3375_v41 = vld [vmem:[#allocation3 + $0x218] sm:$0xff] }
 0x9f2   :  { %5510 = vmatprep.subr.bf16.mxu0 %v3323_v51  ;;  %5736 = vmatprep.subr.bf16.mxu1 %v3325_v38  ;;  %v3372_v51 = vld [vmem:[#allocation3 + $0x200] sm:$0xff]  ;;  %v3374_v38 = vld [vmem:[#allocation3 + $0x210] sm:$0xff] }
 0x9f3   :  { %5437 = vmatprep.mubr.bf16.mxu1 %v13701_v7  ;;  %5540 = vmatprep.mubr.bf16.mxu0 %v11975_v23 }
 0x9f5   :  { %5511 = vmatpush1.bf16.msra.mxu0 %v3322_v27  ;;  %5737 = vmatpush1.bf16.msra.mxu1 %v3324_v0  ;;  %v3383_v27 = vld [vmem:[#allocation3 + $0x258] sm:$0xff]  ;;  %v3385_v0 = vld [vmem:[#allocation3 + $0x268] sm:$0xff] }
 0x9f6   :  { %5512 = vmatprep.subr.bf16.mxu0 %v3333_v58  ;;  %5738 = vmatprep.subr.bf16.mxu1 %v3335_v49  ;;  %v3382_v58 = vld [vmem:[#allocation3 + $0x250] sm:$0xff]  ;;  %v3384_v49 = vld [vmem:[#allocation3 + $0x260] sm:$0xff] }
 0x9f8   :  { %5438 = vmatmul.mubr.bf16.gmra.mrb[188].mxu1 %v13744_v46 }
 0x9f9   :  { %5513 = vmatpush1.bf16.msra.mxu0 %v3332_v42  ;;  %5739 = vmatpush1.bf16.msra.mxu1 %v3334_v61  ;;  %v3393_v42 = vld [vmem:[#allocation3 + $0x2a8] sm:$0xff]  ;;  %v3395_v61 = vld [vmem:[#allocation3 + $0x2b8] sm:$0xff] }
 0x9fa   :  { %5514 = vmatprep.subr.bf16.mxu0 %v3343_v25  ;;  %5740 = vmatprep.subr.bf16.mxu1 %v3345_v34  ;;  %v3392_v25 = vld [vmem:[#allocation3 + $0x2a0] sm:$0xff]  ;;  %v3394_v34 = vld [vmem:[#allocation3 + $0x2b0] sm:$0xff] }
 0x9fb   :  { %5447 = vmatprep.mubr.bf16.mxu1 %v13701_v7 }
 0x9fd   :  { %5515 = vmatpush1.bf16.msra.mxu0 %v3342_v14  ;;  %5741 = vmatpush1.bf16.msra.mxu1 %v3344_v8  ;;  %v3403_v14 = vld [vmem:[#allocation3 + $0x2f8] sm:$0xff]  ;;  %v3405_v8 = vld [vmem:[#allocation3 + $0x308] sm:$0xff] }
 0x9fe   :  { %5516 = vmatprep.subr.bf16.mxu0 %v3353_v62  ;;  %5742 = vmatprep.subr.bf16.mxu1 %v3355_v45  ;;  %v3402_v62 = vld [vmem:[#allocation3 + $0x2f0] sm:$0xff]  ;;  %v3404_v45 = vld [vmem:[#allocation3 + $0x300] sm:$0xff] }
 0xa00   :  { %5448 = vmatmul.mubr.bf16.gmra.mrb[192].mxu1 %v13745_v10 }
 0xa01   :  { %5517 = vmatpush1.bf16.msra.mxu0 %v3352_v30  ;;  %5743 = vmatpush1.bf16.msra.mxu1 %v3354_v2  ;;  %v3413_v30 = vld [vmem:[#allocation3 + $0x348] sm:$0xff]  ;;  %v3415_v2 = vld [vmem:[#allocation3 + $0x358] sm:$0xff] }
 0xa02   :  { %5518 = vmatprep.subr.bf16.mxu0 %v3363_v4  ;;  %5744 = vmatprep.subr.bf16.mxu1 %v3365_v37  ;;  %v3412_v4 = vld [vmem:[#allocation3 + $0x340] sm:$0xff]  ;;  %v3414_v37 = vld [vmem:[#allocation3 + $0x350] sm:$0xff] }
 0xa03   :  { %5457 = vmatprep.mubr.bf16.mxu1 %v13701_v7 }
 0xa05   :  { %5519 = vmatpush1.bf16.msra.mxu0 %v3362_v1  ;;  %5745 = vmatpush1.bf16.msra.mxu1 %v3364_v11  ;;  %v3423_v1 = vld [vmem:[#allocation3 + $0x398] sm:$0xff]  ;;  %v3425_v11 = vld [vmem:[#allocation3 + $0x3a8] sm:$0xff] }
 0xa06   :  { %5520 = vmatprep.subr.bf16.mxu0 %v3373_v63  ;;  %5746 = vmatprep.subr.bf16.mxu1 %v3375_v41  ;;  %v3422_v63 = vld [vmem:[#allocation3 + $0x390] sm:$0xff]  ;;  %v3424_v41 = vld [vmem:[#allocation3 + $0x3a0] sm:$0xff] }
 0xa08   :  { %5458 = vmatmul.mubr.bf16.gmra.mrb[196].mxu1 %v13746_v12 }
 0xa09   :  { %5521 = vmatpush1.bf16.msra.mxu0 %v3372_v51  ;;  %5747 = vmatpush1.bf16.msra.mxu1 %v3374_v38  ;;  %v3433_v51 = vld [vmem:[#allocation3 + $0x3e8] sm:$0xff]  ;;  %v3435_v38 = vld [vmem:[#allocation3 + $0x3f8] sm:$0xff] }
 0xa0a   :  { %5522 = vmatprep.subr.bf16.mxu0 %v3383_v27  ;;  %5748 = vmatprep.subr.bf16.mxu1 %v3385_v0  ;;  %v3432_v27 = vld [vmem:[#allocation3 + $0x3e0] sm:$0xff]  ;;  %v3434_v0 = vld [vmem:[#allocation3 + $0x3f0] sm:$0xff] }
 0xa0b   :  { %5467 = vmatprep.mubr.bf16.mxu1 %v13701_v7 }
 0xa0d   :  { %5523 = vmatpush1.bf16.msra.mxu0 %v3382_v58  ;;  %5749 = vmatpush1.bf16.msra.mxu1 %v3384_v49  ;;  %v3443_v58 = vld [vmem:[#allocation3 + $0x438] sm:$0xff]  ;;  %v3445_v49 = vld [vmem:[#allocation3 + $0x448] sm:$0xff] }
 0xa0e   :  { %5524 = vmatprep.subr.bf16.mxu0 %v3393_v42  ;;  %5750 = vmatprep.subr.bf16.mxu1 %v3395_v61  ;;  %v3442_v42 = vld [vmem:[#allocation3 + $0x430] sm:$0xff]  ;;  %v3444_v61 = vld [vmem:[#allocation3 + $0x440] sm:$0xff] }
 0xa10   :  { %5468 = vmatmul.mubr.bf16.gmra.mrb[200].mxu1 %v13747_v29 }
 0xa11   :  { %5525 = vmatpush1.bf16.msra.mxu0 %v3392_v25  ;;  %5751 = vmatpush1.bf16.msra.mxu1 %v3394_v34  ;;  %v3453_v25 = vld [vmem:[#allocation3 + $0x488] sm:$0xff]  ;;  %v3455_v34 = vld [vmem:[#allocation3 + $0x498] sm:$0xff] }
 0xa12   :  { %5526 = vmatprep.subr.bf16.mxu0 %v3403_v14  ;;  %5752 = vmatprep.subr.bf16.mxu1 %v3405_v8  ;;  %v3452_v14 = vld [vmem:[#allocation3 + $0x480] sm:$0xff]  ;;  %v3454_v8 = vld [vmem:[#allocation3 + $0x490] sm:$0xff] }
 0xa13   :  { %5477 = vmatprep.mubr.bf16.mxu1 %v13701_v7 }
 0xa15   :  { %5527 = vmatpush1.bf16.msra.mxu0 %v3402_v62  ;;  %5753 = vmatpush1.bf16.msra.mxu1 %v3404_v45  ;;  %v3463_v62 = vld [vmem:[#allocation3 + $0x4d8] sm:$0xff]  ;;  %v3465_v45 = vld [vmem:[#allocation3 + $0x4e8] sm:$0xff] }
 0xa16   :  { %5528 = vmatprep.subr.bf16.mxu0 %v3413_v30  ;;  %5754 = vmatprep.subr.bf16.mxu1 %v3415_v2  ;;  %v3462_v30 = vld [vmem:[#allocation3 + $0x4d0] sm:$0xff]  ;;  %v3464_v2 = vld [vmem:[#allocation3 + $0x4e0] sm:$0xff] }
 0xa18   :  { %5478 = vmatmul.mubr.bf16.gmra.mrb[204].mxu1 %v13748_v20 }
 0xa19   :  { %5529 = vmatpush1.bf16.msra.mxu0 %v3412_v4  ;;  %5755 = vmatpush1.bf16.msra.mxu1 %v3414_v37  ;;  %v3473_v4 = vld [vmem:[#allocation3 + $0x528] sm:$0xff]  ;;  %v3475_v37 = vld [vmem:[#allocation3 + $0x538] sm:$0xff] }
 0xa1a   :  { %5530 = vmatprep.subr.bf16.mxu0 %v3423_v1  ;;  %5756 = vmatprep.subr.bf16.mxu1 %v3425_v11  ;;  %v3472_v1 = vld [vmem:[#allocation3 + $0x520] sm:$0xff]  ;;  %v3483_v11 = vld [vmem:[#allocation3 + $0x578] sm:$0xff] }
 0xa1b   :  { %5487 = vmatprep.mubr.bf16.mxu1 %v13701_v7 }
 0xa1d   :  { %5531 = vmatpush1.bf16.msra.mxu0 %v3422_v63  ;;  %5757 = vmatpush1.bf16.msra.mxu1 %v3424_v41  ;;  %v3474_v63 = vld [vmem:[#allocation3 + $0x530] sm:$0xff]  ;;  %v3485_v41 = vld [vmem:[#allocation3 + $0x588] sm:$0xff] }
 0xa1e   :  { %5532 = vmatprep.subr.bf16.mxu0 %v3433_v51  ;;  %5758 = vmatprep.subr.bf16.mxu1 %v3435_v38  ;;  %v3482_v51 = vld [vmem:[#allocation3 + $0x570] sm:$0xff]  ;;  %v3493_v38 = vld [vmem:[#allocation3 + $0x5c8] sm:$0xff] }
 0xa20   :  { %5488 = vmatmul.mubr.bf16.gmra.mrb[208].mxu1 %v13749_v40 }
 0xa21   :  { %5533 = vmatpush1.bf16.msra.mxu0 %v3432_v27  ;;  %5759 = vmatpush1.bf16.msra.mxu1 %v3434_v0  ;;  %v3484_v27 = vld [vmem:[#allocation3 + $0x580] sm:$0xff] }
 0xa22   :  { %5534 = vmatprep.subr.bf16.mxu0 %v3443_v58  ;;  %5760 = vmatprep.subr.bf16.mxu1 %v3445_v49  ;;  %v3492_v0 = vld [vmem:[#allocation3 + $0x5c0] sm:$0xff]  ;;  %v3495_v58 = vld [vmem:[#allocation3 + $0x5d8] sm:$0xff] }
 0xa23   :  { %5497 = vmatprep.mubr.bf16.mxu1 %v13701_v7  ;;  %v3503_v49 = vld [vmem:[#allocation3 + $0x618] sm:$0xff] }
 0xa25   :  { %5535 = vmatpush1.bf16.msra.mxu0 %v3442_v42  ;;  %5761 = vmatpush1.bf16.msra.mxu1 %v3444_v61  ;;  %v3494_v42 = vld [vmem:[#allocation3 + $0x5d0] sm:$0xff]  ;;  %v3505_v61 = vld [vmem:[#allocation3 + $0x628] sm:$0xff] }
 0xa26   :  { %5536 = vmatprep.subr.bf16.mxu0 %v3453_v25  ;;  %5762 = vmatprep.subr.bf16.mxu1 %v3455_v34  ;;  %v3502_v25 = vld [vmem:[#allocation3 + $0x610] sm:$0xff]  ;;  %v3513_v34 = vld [vmem:[#allocation3 + $0x668] sm:$0xff] }
 0xa28   :  { %5498 = vmatmul.mubr.bf16.gmra.mrb[212].mxu1 %v13750_v33 }
 0xa29   :  { %5537 = vmatpush1.bf16.msra.mxu0 %v3452_v14  ;;  %5763 = vmatpush1.bf16.msra.mxu1 %v3454_v8  ;;  %v3504_v14 = vld [vmem:[#allocation3 + $0x620] sm:$0xff] }
 0xa2a   :  { %5538 = vmatprep.subr.bf16.mxu0 %v3463_v62  ;;  %5764 = vmatprep.subr.bf16.mxu1 %v3465_v45  ;;  %v12726_v8 = vld [vmem:[#allocation17 + $0x10] sm:$0xff]  ;;  %v3515_v45 = vld [vmem:[#allocation3 + $0x678] sm:$0xff] }
 0xa2b   :  { %5766 = vmatprep.mubr.bf16.mxu1 %v11975_v23  ;;  %v3512_v62 = vld [vmem:[#allocation3 + $0x660] sm:$0xff] }
 0xa2d   :  { %5539 = vmatpush1.bf16.msra.mxu0 %v3462_v30  ;;  %5765 = vmatpush1.bf16.msra.mxu1 %v3464_v2  ;;  %v3523_v30 = vld [vmem:[#allocation3 + $0x6b8] sm:$0xff]  ;;  %v3514_v2 = vld [vmem:[#allocation3 + $0x670] sm:$0xff] }
 0xa2e   :  { %5621 = vmatprep.subr.bf16.mxu0 %v3473_v4  ;;  %5847 = vmatprep.subr.bf16.mxu1 %v3475_v37  ;;  %v3525_v4 = vld [vmem:[#allocation3 + $0x6c8] sm:$0xff]  ;;  %v12734_v37 = vrot.slane %v12626_v28, %v11951_v36 }
 0xa30   :  { %5541 = vmatmul.mubr.bf16.vlgmr.msra.gmra.mrb[124].mxu0 %v12007_v5  ;;  %5767 = vmatmul.mubr.bf16.vlgmr.msra.gmra.mrb[216].mxu1 %v12007_v5 }
 0xa31   :  { %5622 = vmatpush1.bf16.msra.mxu0 %v3472_v1  ;;  %5550 = vmatprep.mubr.bf16.mxu0 %v11973_v19  ;;  %v12738_v1 = vrot.slane %v12726_v8, %v11951_v36 }
 0xa32   :  { %5776 = vmatprep.mubr.bf16.mxu1 %v11973_v19  ;;  %5623 = vmatprep.subr.bf16.mxu0 %v3483_v11  ;;  %v12742_v11 = vrot.slane %v12630_v53, %v11951_v36 }
 0xa33   :  { %5848 = vmatpush1.bf16.msra.mxu1 %v3474_v63 }
 0xa34   :  { %5849 = vmatprep.subr.bf16.mxu1 %v3485_v41  ;;  %v12746_v41 = vrot.slane %v12726_v8, %v12034_v18  ;;  %v11058_v18 = vld [vmem:[#allocation14] ss:$8 sps:$4 sm:$0xff]  }
 0xa35   :  { %5624 = vmatpush1.bf16.msra.mxu0 %v3482_v51  ;;  %v3522_v51 = vld [vmem:[#allocation3 + $0x6b0] sm:$0xff] }
 0xa36   :  { %5625 = vmatprep.subr.bf16.mxu0 %v3493_v38 }
 0xa37   :  { %5850 = vmatpush1.bf16.msra.mxu1 %v3484_v27  ;;  %v3533_v27 = vld [vmem:[#allocation3 + $0x708] sm:$0xff] }
 0xa38   :  { %5551 = vmatmul.mubr.bf16.gmra.mrb[128].mxu0 %v12003_v3  ;;  %5777 = vmatmul.mubr.bf16.gmra.mrb[220].mxu1 %v12003_v3 }
 0xa39   :  { %5560 = vmatprep.mubr.bf16.mxu0 %v11983_v50  ;;  %5786 = vmatprep.mubr.bf16.mxu1 %v11983_v50 }
 0xa3a   :  { %5626 = vmatpush1.bf16.msra.mxu0 %v3492_v0  ;;  %5851 = vmatprep.subr.bf16.mxu1 %v3495_v58  ;;  %v3524_v0 = vld [vmem:[#allocation3 + $0x6c0] sm:$0xff] }
 0xa3b   :  { %5627 = vmatprep.subr.bf16.mxu0 %v3503_v49  ;;  %5852 = vmatpush1.bf16.msra.mxu1 %v3494_v42 }
 0xa3c   :  { %5853 = vmatprep.subr.bf16.mxu1 %v3505_v61 }
 0xa3e   :  { %5628 = vmatpush1.bf16.msra.mxu0 %v3502_v25 }
 0xa3f   :  { %5629 = vmatprep.subr.bf16.mxu0 %v3513_v34  ;;  %5854 = vmatpush1.bf16.msra.mxu1 %v3504_v14  ;;  %v3532_v14 = vld [vmem:[#allocation3 + $0x700] sm:$0xff] }
 0xa40   :  { %5561 = vmatmul.mubr.bf16.gmra.mrb[132].mxu0 %v13732_v54  ;;  %5787 = vmatmul.mubr.bf16.gmra.mrb[224].mxu1 %v13732_v54 }
 0xa41   :  { %5570 = vmatprep.mubr.bf16.mxu0 %v13733_v16  ;;  %5796 = vmatprep.mubr.bf16.mxu1 %v13733_v16 }
 0xa42   :  { %5630 = vmatpush1.bf16.msra.mxu0 %v3512_v62  ;;  %5855 = vmatprep.subr.bf16.mxu1 %v3515_v45  ;;  %v3535_v62 = vld [vmem:[#allocation3 + $0x718] sm:$0xff] }
 0xa43   :  { %v5203_v63 = vpop.f32.mrb[152].mxu1  ;;  %5631 = vmatprep.subr.bf16.mxu0 %v3523_v30  ;;  %5856 = vmatpush1.bf16.msra.mxu1 %v3514_v2  ;;  %v3543_v30 = vld [vmem:[#allocation3 + $0x758] sm:$0xff]  ;;  %v3534_v2 = vld [vmem:[#allocation3 + $0x710] sm:$0xff] }
 0xa44   :  { %v10210_v28 = vadd.f32 %v5203_v63, %v12734_v37  ;;  %v5205_v38 = vpop.f32.mrb[153].mxu1  ;;  %5857 = vmatprep.subr.bf16.mxu1 %v3525_v4  ;;  %v3545_v63 = vld [vmem:[#allocation3 + $0x768] sm:$0xff] }
 0xa45   :  { %v10211_v58 = vadd.f32 %v5205_v38, %v12742_v11  ;;  %v5207_v49 = vpop.f32.mrb[154].mxu1 }
 0xa46   :  { %v6240_v53 = vadd.f32 %v10210_v28, %v12738_v1  ;;  %v10212_v42 = vadd.f32 %v5207_v49, %v12734_v37  ;;  %v5209_v61 = vpop.f32.mrb[155].mxu1  ;;  %5632 = vmatpush1.bf16.msra.mxu0 %v3522_v51 }
 0xa47   :  { %v6241_v25 = vadd.f32 %v10211_v58, %v12746_v41  ;;  %v10213_v34 = vadd.f32 %v5209_v61, %v12742_v11  ;;  %5633 = vmatprep.subr.bf16.mxu0 %v3533_v27  ;;  %5858 = vmatpush1.bf16.msra.mxu1 %v3524_v0  ;;  %v3542_v58 = vld [vmem:[#allocation3 + $0x750] sm:$0xff] }
 0xa48   :  { %v6250_v45 = vadd.f32 %v10212_v42, %v12738_v1  ;;  %5571 = vmatmul.mubr.bf16.gmra.mrb[136].mxu0 %v13734_v21  ;;  %5797 = vmatmul.mubr.bf16.gmra.mrb[228].mxu1 %v13734_v21  ;;  %v6400_v51 = vmax.f32 %v6240_v53, 0.0 }
 0xa49   :  { %v6251_v4 = vadd.f32 %v10213_v34, %v12746_v41  ;;  %5580 = vmatprep.mubr.bf16.mxu0 %v13735_v57  ;;  %5806 = vmatprep.mubr.bf16.mxu1 %v13735_v57  ;;  %v6401_v38 = vmax.f32 %v6241_v25, 0.0  ;;  %v3544_v34 = vld [vmem:[#allocation3 + $0x760] sm:$0xff] }
 0xa4a   :  { %v6410_v28 = vmax.f32 %v6250_v45, 0.0  ;;  %5634 = vmatpush1.bf16.msra.mxu0 %v3532_v14  ;;  %5859 = vmatprep.subr.bf16.mxu1 %v3535_v62 }
 0xa4b   :  { %v6411_v27 = vmax.f32 %v6251_v4, 0.0  ;;  %v5213_v0 = vpop.f32.mrb[156].mxu1  ;;  %5635 = vmatprep.subr.bf16.mxu0 %v3543_v30  ;;  %5860 = vmatpush1.bf16.msra.mxu1 %v3534_v2  ;;  %v11060_v30 = vld [vmem:[#allocation14 + $0x4] ss:$8 sps:$4 sm:$0xff]  }
 0xa4c   :  { %v12760_v49 = vpack.c.bf16 %v6410_v28, %v6400_v51  ;;  %v10214_v42 = vadd.f32 %v5213_v0, %v12734_v37  ;;  %v5215_v61 = vpop.f32.mrb[157].mxu1  ;;  %5861 = vmatprep.subr.bf16.mxu1 %v3545_v63 }
 0xa4d   :  { %v10215_v26 = vadd.f32 %v5215_v61, %v12742_v11  ;;  %v5217_v53 = vpop.f32.mrb[158].mxu1  ;;  %v12764_v45 = vpack.c.bf16 %v6411_v27, %v6401_v38 }
 0xa4e   :  { %v6260_v25 = vadd.f32 %v10214_v42, %v12738_v1  ;;  %v10216_v14 = vadd.f32 %v5217_v53, %v12734_v37  ;;  %v5219_v62 = vpop.f32.mrb[159].mxu1  ;;  %5636 = vmatpush1.bf16.msra.mxu0 %v3542_v58 }
 0xa4f   :  { %v6261_v2 = vadd.f32 %v10215_v26, %v12746_v41  ;;  %v10217_v4 = vadd.f32 %v5219_v62, %v12742_v11  ;;  %5862 = vmatpush1.bf16.msra.mxu1 %v3544_v34  ;;  %5960 = vmatprep.subr.bf16.mxu0 %v3317_v55 }
 0xa50   :  { %v6270_v63 = vadd.f32 %v10216_v14, %v12738_v1  ;;  %5581 = vmatmul.mubr.bf16.gmra.mrb[140].mxu0 %v13736_v39  ;;  %5807 = vmatmul.mubr.bf16.gmra.mrb[232].mxu1 %v13736_v39  ;;  %v6420_v28 = vmax.f32 %v6260_v25, 0.0 }
 0xa51   :  { %v6271_v51 = vadd.f32 %v10217_v4, %v12746_v41  ;;  %5590 = vmatprep.mubr.bf16.mxu0 %v13737_v60  ;;  %5816 = vmatprep.mubr.bf16.mxu1 %v13737_v60  ;;  %v6421_v26 = vmax.f32 %v6261_v2, 0.0 }
 0xa52   :  { %v6430_v38 = vmax.f32 %v6270_v63, 0.0  ;;  %7132 = vmatprep.subr.bf16.mxu1 %v11060_v30 }
 0xa53   :  { %v6431_v27 = vmax.f32 %v6271_v51, 0.0  ;;  %v5223_v0 = vpop.f32.mrb[160].mxu1 }
 0xa54   :  { %v10218_v55 = vadd.f32 %v5223_v0, %v12734_v37  ;;  %v5225_v58 = vpop.f32.mrb[161].mxu1  ;;  %v12777_v42 = vpack.c.bf16 %v6430_v38, %v6420_v28 }
 0xa55   :  { %v10219_v61 = vadd.f32 %v5225_v58, %v12742_v11  ;;  %v5227_v34 = vpop.f32.mrb[162].mxu1  ;;  %v12780_v53 = vpack.c.bf16 %v6431_v27, %v6421_v26 }
 0xa56   :  { %v6280_v14 = vadd.f32 %v10218_v55, %v12738_v1  ;;  %v10220_v62 = vadd.f32 %v5227_v34, %v12734_v37  ;;  %v5229_v25 = vpop.f32.mrb[163].mxu1 }
 0xa57   :  { %v6281_v30 = vadd.f32 %v10219_v61, %v12746_v41  ;;  %v10221_v2 = vadd.f32 %v5229_v25, %v12742_v11 }
 0xa58   :  { %v6290_v4 = vadd.f32 %v10220_v62, %v12738_v1  ;;  %5591 = vmatmul.mubr.bf16.gmra.mrb[144].mxu0 %v13738_v44  ;;  %5817 = vmatmul.mubr.bf16.gmra.mrb[236].mxu1 %v13738_v44  ;;  %v6440_v51 = vmax.f32 %v6280_v14, 0.0 }
 0xa59   :  { %v6291_v63 = vadd.f32 %v10221_v2, %v12746_v41  ;;  %5600 = vmatprep.mubr.bf16.mxu0 %v13739_v52  ;;  %5826 = vmatprep.mubr.bf16.mxu1 %v13739_v52  ;;  %v6441_v38 = vmax.f32 %v6281_v30, 0.0 }
 0xa5a   :  { %v6450_v28 = vmax.f32 %v6290_v4, 0.0 }
 0xa5b   :  { %v6451_v26 = vmax.f32 %v6291_v63, 0.0  ;;  %v5233_v27 = vpop.f32.mrb[164].mxu1 }
 0xa5c   :  { %v10222_v0 = vadd.f32 %v5233_v27, %v12734_v37  ;;  %v5235_v55 = vpop.f32.mrb[165].mxu1  ;;  %v12793_v58 = vpack.c.bf16 %v6450_v28, %v6440_v51 }
 0xa5d   :  { %v10223_v61 = vadd.f32 %v5235_v55, %v12742_v11  ;;  %v5237_v34 = vpop.f32.mrb[166].mxu1  ;;  %v12796_v62 = vpack.c.bf16 %v6451_v26, %v6441_v38 }
 0xa5e   :  { %v6300_v25 = vadd.f32 %v10222_v0, %v12738_v1  ;;  %v10224_v2 = vadd.f32 %v5237_v34, %v12734_v37  ;;  %v5239_v31 = vpop.f32.mrb[167].mxu1 }
 0xa5f   :  { %v6301_v14 = vadd.f32 %v10223_v61, %v12746_v41  ;;  %v10225_v30 = vadd.f32 %v5239_v31, %v12742_v11 }
 0xa60   :  { %v6310_v4 = vadd.f32 %v10224_v2, %v12738_v1  ;;  %5601 = vmatmul.mubr.bf16.gmra.mrb[148].mxu0 %v13740_v43  ;;  %5827 = vmatmul.mubr.bf16.gmra.mrb[240].mxu1 %v13740_v43  ;;  %v6460_v51 = vmax.f32 %v6300_v25, 0.0 }
 0xa61   :  { %v6311_v63 = vadd.f32 %v10225_v30, %v12746_v41  ;;  %5610 = vmatprep.mubr.bf16.mxu0 %v13741_v17  ;;  %5836 = vmatprep.mubr.bf16.mxu1 %v13741_v17  ;;  %v6461_v38 = vmax.f32 %v6301_v14, 0.0 }
 0xa62   :  { %v6470_v28 = vmax.f32 %v6310_v4, 0.0 }
 0xa63   :  { %v6471_v26 = vmax.f32 %v6311_v63, 0.0  ;;  %v5243_v27 = vpop.f32.mrb[168].mxu1 }
 0xa64   :  { %v10226_v0 = vadd.f32 %v5243_v27, %v12734_v37  ;;  %v5245_v31 = vpop.f32.mrb[169].mxu1  ;;  %v12809_v55 = vpack.c.bf16 %v6470_v28, %v6460_v51  ;;  %v13755_v51 = vmov 0  }
 0xa65   :  { %v10227_v61 = vadd.f32 %v5245_v31, %v12742_v11  ;;  %v5247_v34 = vpop.f32.mrb[170].mxu1  ;;  %v12812_v2 = vpack.c.bf16 %v6471_v26, %v6461_v38 }
 0xa66   :  { %v6320_v30 = vadd.f32 %v10226_v0, %v12738_v1  ;;  %v10228_v9 = vadd.f32 %v5247_v34, %v12734_v37  ;;  %v5249_v7 = vpop.f32.mrb[171].mxu1 }
 0xa67   :  { %v6321_v25 = vadd.f32 %v10227_v61, %v12746_v41  ;;  %v10229_v14 = vadd.f32 %v5249_v7, %v12742_v11 }
 0xa68   :  { %v6330_v4 = vadd.f32 %v10228_v9, %v12738_v1  ;;  %5611 = vmatmul.mubr.bf16.gmra.mrb[152].mxu0 %v13742_v56  ;;  %5837 = vmatmul.mubr.bf16.gmra.mrb[244].mxu1 %v13742_v56  ;;  %v6480_v28 = vmax.f32 %v6320_v30, 0.0  ;;  %v3356_v56 = vld [vmem:[#allocation3 + $0x180] sm:$0xff] }
 0xa69   :  { %v6331_v63 = vadd.f32 %v10229_v14, %v12746_v41  ;;  %5653 = vmatprep.mubr.bf16.mxu0 %v13755_v51  ;;  %5879 = vmatprep.mubr.bf16.mxu1 %v13755_v51  ;;  %v6481_v26 = vmax.f32 %v6321_v25, 0.0  ;;  %v11063_v25 = vld [vmem:[#allocation14 + $0x14] ss:$8 sps:$4 sm:$0xff]  }
 0xa6a   :  { %v6490_v38 = vmax.f32 %v6330_v4, 0.0  ;;  %v3316_v4 = vld [vmem:[#allocation3 + $0x40] sm:$0xff] }
 0xa6b   :  { %v6491_v27 = vmax.f32 %v6331_v63, 0.0  ;;  %v5253_v0 = vpop.f32.mrb[172].mxu1 }
 0xa6c   :  { %v10230_v31 = vadd.f32 %v5253_v0, %v12734_v37  ;;  %v5255_v7 = vpop.f32.mrb[173].mxu1  ;;  %v12825_v61 = vpack.c.bf16 %v6490_v38, %v6480_v28 }
 0xa6d   :  { %v10231_v9 = vadd.f32 %v5255_v7, %v12742_v11  ;;  %v5257_v34 = vpop.f32.mrb[174].mxu1  ;;  %v12828_v15 = vpack.c.bf16 %v6491_v27, %v6481_v26  ;;  %v11061_v26 = vld [vmem:[#allocation14 + $0x10] ss:$8 sps:$4 sm:$0xff]   ;;  %v3326_v7 = vld [vmem:[#allocation3 + $0x90] sm:$0xff] }
 0xa6e   :  { %v6340_v14 = vadd.f32 %v10230_v31, %v12738_v1  ;;  %v10232_v24 = vadd.f32 %v5257_v34, %v12734_v37  ;;  %v5259_v30 = vpop.f32.mrb[175].mxu1 }
 0xa6f   :  { %v6341_v63 = vadd.f32 %v10231_v9, %v12746_v41  ;;  %v10233_v0 = vadd.f32 %v5259_v30, %v12742_v11  ;;  %v11066_v9 = vld [vmem:[#allocation14 + $0x24] ss:$8 sps:$4 sm:$0xff]  }
 0xa70   :  { %v6350_v28 = vadd.f32 %v10232_v24, %v12738_v1  ;;  %5654 = vmatmul.mubr.bf16.vlgmr.msra.gmra.mrb[124].mxu0 %v13743_v13  ;;  %5880 = vmatmul.mubr.bf16.vlgmr.msra.gmra.mrb[216].mxu1 %v13743_v13  ;;  %v6500_v27 = vmax.f32 %v6340_v14, 0.0  ;;  %v3337_v24 = vld [vmem:[#allocation3 + $0xe8] sm:$0xff]  ;;  %v3336_v13 = vld [vmem:[#allocation3 + $0xe0] sm:$0xff] }
 0xa71   :  { %v6351_v38 = vadd.f32 %v10233_v0, %v12746_v41  ;;  %5961 = vmatpush1.bf16.msra.mxu0 %v3316_v4  ;;  %7133 = vmatpush1.bf16.msra.mxu1 %v11058_v18  ;;  %v6501_v34 = vmax.f32 %v6341_v63, 0.0 }
 0xa72   :  { %v6510_v31 = vmax.f32 %v6350_v28, 0.0  ;;  %5962 = vmatprep.subr.bf16.mxu0 %v3327_v22  ;;  %7134 = vmatprep.subr.bf16.mxu1 %v11063_v25  ;;  %v11064_v22 = vld [vmem:[#allocation14 + $0x20] ss:$8 sps:$4 sm:$0xff]  }
 0xa73   :  { %v6511_v30 = vmax.f32 %v6351_v38, 0.0  ;;  %v5263_v59 = vpop.f32.mrb[176].mxu1  ;;  %5663 = vmatprep.mubr.bf16.mxu0 %v13755_v51  ;;  %5889 = vmatprep.mubr.bf16.mxu1 %v13755_v51 }
 0xa74   :  { %v10234_v47 = vadd.f32 %v5263_v59, %v12734_v37  ;;  %v5265_v0 = vpop.f32.mrb[177].mxu1  ;;  %v12841_v4 = vpack.c.bf16 %v6510_v31, %v6500_v27  ;;  %v11069_v59 = vld [vmem:[#allocation14 + $0x34] ss:$8 sps:$4 sm:$0xff]  }
 0xa75   :  { %v10235_v18 = vadd.f32 %v5265_v0, %v12742_v11  ;;  %v5267_v14 = vpop.f32.mrb[178].mxu1  ;;  %5963 = vmatpush1.bf16.msra.mxu0 %v3326_v7  ;;  %7135 = vmatpush1.bf16.msra.mxu1 %v11061_v26  ;;  %v12844_v25 = vpack.c.bf16 %v6511_v30, %v6501_v34  ;;  %v3347_v0 = vld [vmem:[#allocation3 + $0x138] sm:$0xff]  ;;  %v11067_v26 = vld [vmem:[#allocation14 + $0x30] ss:$8 sps:$4 sm:$0xff]   ;;  %v3346_v30 = vld [vmem:[#allocation3 + $0x130] sm:$0xff] }
 0xa76   :  { %v6360_v63 = vadd.f32 %v10234_v47, %v12738_v1  ;;  %v10236_v28 = vadd.f32 %v5267_v14, %v12734_v37  ;;  %v5269_v38 = vpop.f32.mrb[179].mxu1  ;;  %5964 = vmatprep.subr.bf16.mxu0 %v3337_v24  ;;  %7136 = vmatprep.subr.bf16.mxu1 %v11066_v9  ;;  %v11072_v24 = vld [vmem:[#allocation14 + $0x44] ss:$8 sps:$4 sm:$0xff]  }
 0xa77   :  { %v6361_v27 = vadd.f32 %v10235_v18, %v12746_v41  ;;  %v10237_v31 = vadd.f32 %v5269_v38, %v12742_v11 }
 0xa78   :  { %v6370_v7 = vadd.f32 %v10236_v28, %v12738_v1  ;;  %5664 = vmatmul.mubr.bf16.gmra.mrb[128].mxu0 %v13744_v46  ;;  %5890 = vmatmul.mubr.bf16.gmra.mrb[220].mxu1 %v13744_v46  ;;  %v6520_v34 = vmax.f32 %v6360_v63, 0.0  ;;  %v3357_v28 = vld [vmem:[#allocation3 + $0x188] sm:$0xff] }
 0xa79   :  { %v6371_v47 = vadd.f32 %v10237_v31, %v12746_v41  ;;  %5965 = vmatpush1.bf16.msra.mxu0 %v3336_v13  ;;  %7137 = vmatpush1.bf16.msra.mxu1 %v11064_v22  ;;  %v6521_v18 = vmax.f32 %v6361_v27, 0.0 }
 0xa7a   :  { %v6530_v9 = vmax.f32 %v6370_v7, 0.0  ;;  %5966 = vmatprep.subr.bf16.mxu0 %v3347_v0  ;;  %7138 = vmatprep.subr.bf16.mxu1 %v11069_v59  ;;  %v11070_v59 = vld [vmem:[#allocation14 + $0x40] ss:$8 sps:$4 sm:$0xff]  }
 0xa7b   :  { %v6531_v14 = vmax.f32 %v6371_v47, 0.0  ;;  %v5273_v38 = vpop.f32.mrb[180].mxu1  ;;  %5673 = vmatprep.mubr.bf16.mxu0 %v13755_v51  ;;  %5899 = vmatprep.mubr.bf16.mxu1 %v13755_v51 }
 0xa7c   :  { %v10238_v46 = vadd.f32 %v5273_v38, %v12734_v37  ;;  %v5275_v31 = vpop.f32.mrb[181].mxu1  ;;  %v12857_v13 = vpack.c.bf16 %v6530_v9, %v6520_v34  ;;  %v11075_v38 = vld [vmem:[#allocation14 + $0x54] ss:$8 sps:$4 sm:$0xff]  }
 0xa7d   :  { %v10239_v22 = vadd.f32 %v5275_v31, %v12742_v11  ;;  %v5277_v63 = vpop.f32.mrb[182].mxu1  ;;  %5967 = vmatpush1.bf16.msra.mxu0 %v3346_v30  ;;  %7139 = vmatpush1.bf16.msra.mxu1 %v11067_v26  ;;  %v12860_v0 = vpack.c.bf16 %v6531_v14, %v6521_v18  ;;  %v3367_v31 = vld [vmem:[#allocation3 + $0x1d8] sm:$0xff]  ;;  %v3366_v18 = vld [vmem:[#allocation3 + $0x1d0] sm:$0xff] }
 0xa7e   :  { %v6380_v27 = vadd.f32 %v10238_v46, %v12738_v1  ;;  %v10240_v7 = vadd.f32 %v5277_v63, %v12734_v37  ;;  %v5279_v47 = vpop.f32.mrb[183].mxu1  ;;  %5968 = vmatprep.subr.bf16.mxu0 %v3357_v28  ;;  %7140 = vmatprep.subr.bf16.mxu1 %v11072_v24  ;;  %v11073_v37 = vld [vmem:[#allocation14 + $0x50] ss:$8 sps:$4 sm:$0xff]   ;;  %v11078_v14 = vld [vmem:[#allocation14 + $0x64] ss:$8 sps:$4 sm:$0xff]  }
 0xa7f   :  { %v6381_v34 = vadd.f32 %v10239_v22, %v12746_v41  ;;  %v10241_v9 = vadd.f32 %v5279_v47, %v12742_v11  ;;  %v3376_v63 = vld [vmem:[#allocation3 + $0x220] sm:$0xff]  ;;  %v3386_v47 = vld [vmem:[#allocation3 + $0x270] sm:$0xff] }
 0xa80   :  { %v6390_v30 = vadd.f32 %v10240_v7, %v12738_v1  ;;  %5674 = vmatmul.mubr.bf16.gmra.mrb[132].mxu0 %v13745_v10  ;;  %5900 = vmatmul.mubr.bf16.gmra.mrb[224].mxu1 %v13745_v10  ;;  %v6540_v26 = vmax.f32 %v6380_v27, 0.0  ;;  %v3377_v1 = vld [vmem:[#allocation3 + $0x228] sm:$0xff]  ;;  %v3387_v27 = vld [vmem:[#allocation3 + $0x278] sm:$0xff] }
 0xa81   :  { %v6391_v46 = vadd.f32 %v10241_v9, %v12746_v41  ;;  %5969 = vmatpush1.bf16.msra.mxu0 %v3356_v56  ;;  %7141 = vmatpush1.bf16.msra.mxu1 %v11070_v59  ;;  %v6541_v28 = vmax.f32 %v6381_v34, 0.0  ;;  %v11076_v56 = vld [vmem:[#allocation14 + $0x60] ss:$8 sps:$4 sm:$0xff]   ;;  %v11081_v59 = vld [vmem:[#allocation14 + $0x74] ss:$8 sps:$4 sm:$0xff]  }
 0xa82   :  { %v6550_v24 = vmax.f32 %v6390_v30, 0.0  ;;  %5970 = vmatprep.subr.bf16.mxu0 %v3367_v31  ;;  %7142 = vmatprep.subr.bf16.mxu1 %v11075_v38  ;;  %v11079_v7 = vld [vmem:[#allocation14 + $0x70] ss:$8 sps:$4 sm:$0xff]   ;;  %v11084_v38 = vld [vmem:[#allocation14 + $0x84] ss:$8 sps:$4 sm:$0xff]  }
 0xa83   :  { %v6551_v11 = vmax.f32 %v6391_v46, 0.0  ;;  %5683 = vmatprep.mubr.bf16.mxu0 %v13755_v51  ;;  %5909 = vmatprep.mubr.bf16.mxu1 %v13755_v51  ;;  %v3397_v34 = vld [vmem:[#allocation3 + $0x2c8] sm:$0xff]  ;;  %v11082_v9 = vld [vmem:[#allocation14 + $0x80] ss:$8 sps:$4 sm:$0xff]   ;;  %v3396_v31 = vld [vmem:[#allocation3 + $0x2c0] sm:$0xff] }
 0xa84   :  { %v12872_v22 = vpack.c.bf16 %v6550_v24, %v6540_v26  ;;  %v11087_v30 = vld [vmem:[#allocation14 + $0x94] ss:$8 sps:$4 sm:$0xff]   ;;  %v3407_v46 = vld [vmem:[#allocation3 + $0x318] sm:$0xff] }
 0xa85   :  { %5971 = vmatpush1.bf16.msra.mxu0 %v3366_v18  ;;  %7143 = vmatpush1.bf16.msra.mxu1 %v11073_v37  ;;  %v12874_v41 = vpack.c.bf16 %v6551_v11, %v6541_v28  ;;  %v11085_v37 = vld [vmem:[#allocation14 + $0x90] ss:$8 sps:$4 sm:$0xff]   ;;  %v3406_v26 = vld [vmem:[#allocation3 + $0x310] sm:$0xff]  ;;  %v11090_v24 = vld [vmem:[#allocation14 + $0xa4] ss:$8 sps:$4 sm:$0xff]  }
 0xa86   :  { %5972 = vmatprep.subr.bf16.mxu0 %v3377_v1  ;;  %7144 = vmatprep.subr.bf16.mxu1 %v11078_v14  ;;  %v3417_v18 = vld [vmem:[#allocation3 + $0x368] sm:$0xff]  ;;  %v11088_v14 = vld [vmem:[#allocation14 + $0xa0] ss:$8 sps:$4 sm:$0xff]   ;;  %v3416_v28 = vld [vmem:[#allocation3 + $0x360] sm:$0xff] }
 0xa87   :  { %v11093_v11 = vld [vmem:[#allocation14 + $0xb4] ss:$8 sps:$4 sm:$0xff]   ;;  %v3427_v1 = vld [vmem:[#allocation3 + $0x3b8] sm:$0xff] }
 0xa88   :  { %5684 = vmatmul.mubr.bf16.gmra.mrb[136].mxu0 %v13746_v12  ;;  %5910 = vmatmul.mubr.bf16.gmra.mrb[228].mxu1 %v13746_v12 }
 0xa89   :  { %5973 = vmatpush1.bf16.msra.mxu0 %v3376_v63  ;;  %7145 = vmatpush1.bf16.msra.mxu1 %v11076_v56  ;;  %v11091_v56 = vld [vmem:[#allocation14 + $0xb0] ss:$8 sps:$4 sm:$0xff]   ;;  %v3426_v63 = vld [vmem:[#allocation3 + $0x3b0] sm:$0xff] }
 0xa8a   :  { %5974 = vmatprep.subr.bf16.mxu0 %v3387_v27  ;;  %7146 = vmatprep.subr.bf16.mxu1 %v11081_v59  ;;  %v11096_v59 = vld [vmem:[#allocation14 + $0xc4] ss:$8 sps:$4 sm:$0xff]   ;;  %v3437_v27 = vld [vmem:[#allocation3 + $0x408] sm:$0xff] }
 0xa8b   :  { %5693 = vmatprep.mubr.bf16.mxu0 %v13755_v51  ;;  %5919 = vmatprep.mubr.bf16.mxu1 %v13755_v51 }
 0xa8d   :  { %5975 = vmatpush1.bf16.msra.mxu0 %v3386_v47  ;;  %7147 = vmatpush1.bf16.msra.mxu1 %v11079_v7  ;;  %v11094_v7 = vld [vmem:[#allocation14 + $0xc0] ss:$8 sps:$4 sm:$0xff]   ;;  %v3436_v47 = vld [vmem:[#allocation3 + $0x400] sm:$0xff] }
 0xa8e   :  { %5976 = vmatprep.subr.bf16.mxu0 %v3397_v34  ;;  %7148 = vmatprep.subr.bf16.mxu1 %v11084_v38  ;;  %v11099_v38 = vld [vmem:[#allocation14 + $0xd4] ss:$8 sps:$4 sm:$0xff]   ;;  %v3447_v34 = vld [vmem:[#allocation3 + $0x458] sm:$0xff] }
 0xa90   :  { %5694 = vmatmul.mubr.bf16.gmra.mrb[140].mxu0 %v13747_v29  ;;  %5920 = vmatmul.mubr.bf16.gmra.mrb[232].mxu1 %v13747_v29 }
 0xa91   :  { %5977 = vmatpush1.bf16.msra.mxu0 %v3396_v31  ;;  %7149 = vmatpush1.bf16.msra.mxu1 %v11082_v9  ;;  %v11097_v9 = vld [vmem:[#allocation14 + $0xd0] ss:$8 sps:$4 sm:$0xff]   ;;  %v3446_v31 = vld [vmem:[#allocation3 + $0x450] sm:$0xff] }
 0xa92   :  { %5978 = vmatprep.subr.bf16.mxu0 %v3407_v46  ;;  %7150 = vmatprep.subr.bf16.mxu1 %v11087_v30  ;;  %v11102_v30 = vld [vmem:[#allocation14 + $0xe4] ss:$8 sps:$4 sm:$0xff]   ;;  %v3457_v46 = vld [vmem:[#allocation3 + $0x4a8] sm:$0xff] }
 0xa93   :  { %5703 = vmatprep.mubr.bf16.mxu0 %v13755_v51  ;;  %5929 = vmatprep.mubr.bf16.mxu1 %v13755_v51 }
 0xa95   :  { %5979 = vmatpush1.bf16.msra.mxu0 %v3406_v26  ;;  %7151 = vmatpush1.bf16.msra.mxu1 %v11085_v37  ;;  %v11100_v37 = vld [vmem:[#allocation14 + $0xe0] ss:$8 sps:$4 sm:$0xff]   ;;  %v3456_v26 = vld [vmem:[#allocation3 + $0x4a0] sm:$0xff] }
 0xa96   :  { %5980 = vmatprep.subr.bf16.mxu0 %v3417_v18  ;;  %7152 = vmatprep.subr.bf16.mxu1 %v11090_v24  ;;  %v3467_v24 = vld [vmem:[#allocation3 + $0x4f8] sm:$0xff]  ;;  %v11105_v18 = vld [vmem:[#allocation14 + $0xf4] ss:$8 sps:$4 sm:$0xff]  }
 0xa98   :  { %5704 = vmatmul.mubr.bf16.gmra.mrb[144].mxu0 %v13748_v20  ;;  %5930 = vmatmul.mubr.bf16.gmra.mrb[236].mxu1 %v13748_v20 }
 0xa99   :  { %5981 = vmatpush1.bf16.msra.mxu0 %v3416_v28  ;;  %7153 = vmatpush1.bf16.msra.mxu1 %v11088_v14  ;;  %v11103_v14 = vld [vmem:[#allocation14 + $0xf0] ss:$8 sps:$4 sm:$0xff]   ;;  %v3466_v28 = vld [vmem:[#allocation3 + $0x4f0] sm:$0xff] }
 0xa9a   :  { %5982 = vmatprep.subr.bf16.mxu0 %v3427_v1  ;;  %7154 = vmatprep.subr.bf16.mxu1 %v11093_v11  ;;  %v11108_v11 = vld [vmem:[#allocation14 + $0x104] ss:$8 sps:$4 sm:$0xff]   ;;  %v3477_v1 = vld [vmem:[#allocation3 + $0x548] sm:$0xff] }
 0xa9b   :  { %5713 = vmatprep.mubr.bf16.mxu0 %v13755_v51  ;;  %5939 = vmatprep.mubr.bf16.mxu1 %v13755_v51 }
 0xa9d   :  { %5983 = vmatpush1.bf16.msra.mxu0 %v3426_v63  ;;  %7155 = vmatpush1.bf16.msra.mxu1 %v11091_v56  ;;  %v11106_v56 = vld [vmem:[#allocation14 + $0x100] ss:$8 sps:$4 sm:$0xff]   ;;  %v3476_v63 = vld [vmem:[#allocation3 + $0x540] sm:$0xff] }
 0xa9e   :  { %5984 = vmatprep.subr.bf16.mxu0 %v3437_v27  ;;  %7156 = vmatprep.subr.bf16.mxu1 %v11096_v59  ;;  %v11111_v59 = vld [vmem:[#allocation14 + $0x114] ss:$8 sps:$4 sm:$0xff]   ;;  %v3487_v27 = vld [vmem:[#allocation3 + $0x598] sm:$0xff] }
 0xaa0   :  { %5714 = vmatmul.mubr.bf16.gmra.mrb[148].mxu0 %v13749_v40  ;;  %5940 = vmatmul.mubr.bf16.gmra.mrb[240].mxu1 %v13749_v40 }
 0xaa1   :  { %5985 = vmatpush1.bf16.msra.mxu0 %v3436_v47  ;;  %7157 = vmatpush1.bf16.msra.mxu1 %v11094_v7  ;;  %v11114_v7 = vld [vmem:[#allocation14 + $0x124] ss:$8 sps:$4 sm:$0xff]   ;;  %v3497_v47 = vld [vmem:[#allocation3 + $0x5e8] sm:$0xff] }
 0xaa2   :  { %5986 = vmatprep.subr.bf16.mxu0 %v3447_v34  ;;  %7158 = vmatprep.subr.bf16.mxu1 %v11099_v38  ;;  %v11112_v38 = vld [vmem:[#allocation14 + $0x120] ss:$8 sps:$4 sm:$0xff]   ;;  %v11120_v34 = vld [vmem:[#allocation14 + $0x144] ss:$8 sps:$4 sm:$0xff]  }
 0xaa3   :  { %5723 = vmatprep.mubr.bf16.mxu0 %v13755_v51  ;;  %5949 = vmatprep.mubr.bf16.mxu1 %v13755_v51 }
 0xaa5   :  { %5987 = vmatpush1.bf16.msra.mxu0 %v3446_v31  ;;  %7159 = vmatpush1.bf16.msra.mxu1 %v11097_v9  ;;  %v3506_v9 = vld [vmem:[#allocation3 + $0x630] sm:$0xff]  ;;  %v3517_v31 = vld [vmem:[#allocation3 + $0x688] sm:$0xff] }
 0xaa6   :  { %5988 = vmatprep.subr.bf16.mxu0 %v3457_v46  ;;  %7160 = vmatprep.subr.bf16.mxu1 %v11102_v30  ;;  %v11118_v30 = vld [vmem:[#allocation14 + $0x140] ss:$8 sps:$4 sm:$0xff]   ;;  %v12914_v46 = vrot.slane %v12726_v8, %v12105_v6 }
 0xaa8   :  { %5724 = vmatmul.mubr.bf16.gmra.mrb[152].mxu0 %v13750_v33  ;;  %5950 = vmatmul.mubr.bf16.gmra.mrb[244].mxu1 %v13750_v33 }
 0xaa9   :  { %5989 = vmatpush1.bf16.msra.mxu0 %v3456_v26  ;;  %7161 = vmatpush1.bf16.msra.mxu1 %v11100_v37  ;;  %v11121_v37 = vld [vmem:[#allocation14 + $0x150] ss:$8 sps:$4 sm:$0xff]   ;;  %v3526_v26 = vld [vmem:[#allocation3 + $0x6d0] sm:$0xff] }
 0xaaa   :  { %7164 = vmatprep.mubr.bf16.mxu1 %v12764_v45  ;;  %5990 = vmatprep.subr.bf16.mxu0 %v3467_v24  ;;  %v11109_v45 = vld [vmem:[#allocation14 + $0x110] ss:$8 sps:$4 sm:$0xff]  }
 0xaab   :  { %7162 = vmatprep.subr.bf16.mxu1 %v11105_v18  ;;  %5992 = vmatprep.mubr.bf16.mxu0 %v11975_v23  ;;  %v3486_v23 = vld [vmem:[#allocation3 + $0x590] sm:$0xff] }
 0xaad   :  { %5991 = vmatpush1.bf16.msra.mxu0 %v3466_v28  ;;  %7163 = vmatpush1.bf16.msra.mxu1 %v11103_v14  ;;  %v3537_v14 = vld [vmem:[#allocation3 + $0x728] sm:$0xff] }
 0xaae   :  { %6073 = vmatprep.subr.bf16.mxu0 %v3477_v1  ;;  %7245 = vmatprep.subr.bf16.mxu1 %v11108_v11 }
 0xab0   :  { %5993 = vmatmul.mubr.bf16.vlgmr.msra.gmra.mrb[156].mxu0 %v12007_v5  ;;  %7165 = vmatmul.mubr.bf16.vlgmr.msra.gmra.mrb[248].mxu1 %v12760_v49  ;;  %v11117_v5 = vld [vmem:[#allocation14 + $0x134] ss:$8 sps:$4 sm:$0xff]   ;;  %v3496_v49 = vld [vmem:[#allocation3 + $0x5e0] sm:$0xff] }
 0xab1   :  { %6074 = vmatpush1.bf16.msra.mxu0 %v3476_v63  ;;  %7174 = vmatprep.mubr.bf16.mxu1 %v12780_v53  ;;  %v3507_v53 = vld [vmem:[#allocation3 + $0x638] sm:$0xff] }
 0xab2   :  { %7246 = vmatpush1.bf16.msra.mxu1 %v11106_v56  ;;  %6002 = vmatprep.mubr.bf16.mxu0 %v11973_v19  ;;  %v11115_v19 = vld [vmem:[#allocation14 + $0x130] ss:$8 sps:$4 sm:$0xff]   ;;  %v11124_v63 = vld [vmem:[#allocation14 + $0x160] ss:$8 sps:$4 sm:$0xff]  }
 0xab3   :  { %7247 = vmatprep.subr.bf16.mxu1 %v11111_v59  ;;  %6075 = vmatprep.subr.bf16.mxu0 %v3487_v27 }
 0xab5   :  { %6076 = vmatpush1.bf16.msra.mxu0 %v3486_v23  ;;  %v3536_v23 = vld [vmem:[#allocation3 + $0x720] sm:$0xff] }
 0xab6   :  { %7248 = vmatpush1.bf16.msra.mxu1 %v11109_v45  ;;  %6077 = vmatprep.subr.bf16.mxu0 %v3497_v47  ;;  %v11129_v45 = vld [vmem:[#allocation14 + $0x174] ss:$8 sps:$4 sm:$0xff]   ;;  %v3547_v47 = vld [vmem:[#allocation3 + $0x778] sm:$0xff] }
 0xab7   :  { %7249 = vmatprep.subr.bf16.mxu1 %v11114_v7 }
 0xab8   :  { %6003 = vmatmul.mubr.bf16.gmra.mrb[160].mxu0 %v12003_v3  ;;  %7175 = vmatmul.mubr.bf16.gmra.mrb[252].mxu1 %v12777_v42  ;;  %v11123_v3 = vld [vmem:[#allocation14 + $0x154] ss:$8 sps:$4 sm:$0xff]   ;;  %v3516_v42 = vld [vmem:[#allocation3 + $0x680] sm:$0xff] }
 0xab9   :  { %7184 = vmatprep.mubr.bf16.mxu1 %v12796_v62  ;;  %6012 = vmatprep.mubr.bf16.mxu0 %v11983_v50  ;;  %v3527_v50 = vld [vmem:[#allocation3 + $0x6d8] sm:$0xff]  ;;  %v12910_v62 = vrot.slane %v12628_v32, %v11951_v36 }
 0xaba   :  { %7250 = vmatpush1.bf16.msra.mxu1 %v11112_v38  ;;  %6078 = vmatpush1.bf16.msra.mxu0 %v3496_v49  ;;  %v11126_v32 = vld [vmem:[#allocation14 + $0x164] ss:$8 sps:$4 sm:$0xff]  }
 0xabb   :  { %7251 = vmatprep.subr.bf16.mxu1 %v11117_v5  ;;  %6079 = vmatprep.subr.bf16.mxu0 %v3507_v53  ;;  %v11127_v53 = vld [vmem:[#allocation14 + $0x170] ss:$8 sps:$4 sm:$0xff]  }
 0xabe   :  { %7252 = vmatpush1.bf16.msra.mxu1 %v11115_v19  ;;  %6080 = vmatpush1.bf16.msra.mxu0 %v3506_v9  ;;  %v11132_v19 = vld [vmem:[#allocation14 + $0x184] ss:$8 sps:$4 sm:$0xff]  }
 0xabf   :  { %7253 = vmatprep.subr.bf16.mxu1 %v11120_v34  ;;  %6081 = vmatprep.subr.bf16.mxu0 %v3517_v31 }
 0xac0   :  { %6013 = vmatmul.mubr.bf16.gmra.mrb[164].mxu0 %v13732_v54  ;;  %7185 = vmatmul.mubr.bf16.gmra.mrb[0].mxu1 %v12793_v58  ;;  %v12918_v54 = vrot.slane %v12632_v48, %v11951_v36 }
 0xac1   :  { %7194 = vmatprep.mubr.bf16.mxu1 %v12812_v2  ;;  %6022 = vmatprep.mubr.bf16.mxu0 %v13733_v16  ;;  %v12924_v16 = vrot.slane %v12726_v8, %v12108_v35 }
 0xac2   :  { %7254 = vmatpush1.bf16.msra.mxu1 %v11118_v30  ;;  %6082 = vmatpush1.bf16.msra.mxu0 %v3516_v42 }
 0xac3   :  { %v12920_v58 = vpop.f32.mrb[120].mxu0  ;;  %v5429_v2 = vpop.f32.mrb[184].mxu1  ;;  %7255 = vmatprep.subr.bf16.mxu1 %v11123_v3  ;;  %6083 = vmatprep.subr.bf16.mxu0 %v3527_v50 }
 0xac4   :  { %v10242_v6 = vadd.f32 %v5429_v2, %v12910_v62  ;;  %v12927_v24 = vpop.f32.mrb[121].mxu0  ;;  %v5431_v18 = vpop.f32.mrb[185].mxu1 }
 0xac5   :  { %v10243_v48 = vadd.f32 %v5431_v18, %v12918_v54  ;;  %v5013_v28 = vpop.f32.mrb[122].mxu0  ;;  %v5433_v11 = vpop.f32.mrb[186].mxu1 }
 0xac6   :  { %v6242_v1 = vadd.f32 %v10242_v6, %v12914_v46  ;;  %v10244_v56 = vadd.f32 %v5433_v11, %v12910_v62  ;;  %7256 = vmatpush1.bf16.msra.mxu1 %v11121_v37  ;;  %v5014_v35 = vpop.f32.mrb[123].mxu0  ;;  %v5435_v8 = vpop.f32.mrb[187].mxu1  ;;  %6084 = vmatpush1.bf16.msra.mxu0 %v3526_v26  ;;  %v11130_v26 = vld [vmem:[#allocation14 + $0x180] ss:$8 sps:$4 sm:$0xff]  }
 0xac7   :  { %v6243_v59 = vadd.f32 %v10243_v48, %v12924_v16  ;;  %v10245_v27 = vadd.f32 %v5435_v8, %v12918_v54  ;;  %7257 = vmatprep.subr.bf16.mxu1 %v11126_v32  ;;  %6085 = vmatprep.subr.bf16.mxu0 %v3537_v14  ;;  %v11135_v14 = vld [vmem:[#allocation14 + $0x194] ss:$8 sps:$4 sm:$0xff]  }
 0xac8   :  { %v6252_v7 = vadd.f32 %v10244_v56, %v12914_v46  ;;  %6023 = vmatmul.mubr.bf16.gmra.mrb[168].mxu0 %v13734_v21  ;;  %7195 = vmatmul.mubr.bf16.gmra.mrb[4].mxu1 %v12809_v55  ;;  %v6402_v5 = vmax.f32 %v6242_v1, 0.0  ;;  %v3546_v21 = vld [vmem:[#allocation3 + $0x770] sm:$0xff]  ;;  %v11156_v55 = vld [vmem:[#allocation14 + $0x284] ss:$8 sps:$4 sm:$0xff]   ;;  %v11133_v56 = vld [vmem:[#allocation14 + $0x190] ss:$8 sps:$4 sm:$0xff]  }
 0xac9   :  { %v6253_v38 = vadd.f32 %v10245_v27, %v12924_v16  ;;  %7204 = vmatprep.mubr.bf16.mxu1 %v12828_v15  ;;  %6032 = vmatprep.mubr.bf16.mxu0 %v13735_v57  ;;  %v6403_v34 = vmax.f32 %v6243_v59, 0.0  ;;  %v11138_v59 = vld [vmem:[#allocation14 + $0x1a4] ss:$8 sps:$4 sm:$0xff]  }
 0xaca   :  { %v6412_v49 = vmax.f32 %v6252_v7, 0.0  ;;  %7258 = vmatpush1.bf16.msra.mxu1 %v11124_v63  ;;  %6086 = vmatpush1.bf16.msra.mxu0 %v3536_v23 }
 0xacb   :  { %v6413_v9 = vmax.f32 %v6253_v38, 0.0  ;;  %v5439_v31 = vpop.f32.mrb[188].mxu1  ;;  %7259 = vmatprep.subr.bf16.mxu1 %v11129_v45  ;;  %6087 = vmatprep.subr.bf16.mxu0 %v3547_v47  ;;  %v11136_v38 = vld [vmem:[#allocation14 + $0x1a0] ss:$8 sps:$4 sm:$0xff]  }
 0xacc   :  { %v12940_v30 = vpack.c.bf16 %v6412_v49, %v6402_v5  ;;  %v10246_v3 = vadd.f32 %v5439_v31, %v12910_v62  ;;  %v5441_v15 = vpop.f32.mrb[189].mxu1 }
 0xacd   :  { %v10247_v57 = vadd.f32 %v5441_v15, %v12918_v54  ;;  %v5443_v42 = vpop.f32.mrb[190].mxu1  ;;  %v12944_v50 = vpack.c.bf16 %v6413_v9, %v6403_v34 }
 0xace   :  { %v6262_v37 = vadd.f32 %v10246_v3, %v12914_v46  ;;  %v10248_v2 = vadd.f32 %v5443_v42, %v12910_v62  ;;  %7260 = vmatpush1.bf16.msra.mxu1 %v11127_v53  ;;  %v5445_v32 = vpop.f32.mrb[191].mxu1  ;;  %6088 = vmatpush1.bf16.msra.mxu0 %v3546_v21  ;;  %v11141_v53 = vld [vmem:[#allocation14 + $0x1b4] ss:$8 sps:$4 sm:$0xff]   ;;  %v11139_v21 = vld [vmem:[#allocation14 + $0x1b0] ss:$8 sps:$4 sm:$0xff]  }
 0xacf   :  { %v6263_v6 = vadd.f32 %v10247_v57, %v12924_v16  ;;  %v10249_v18 = vadd.f32 %v5445_v32, %v12918_v54  ;;  %7261 = vmatprep.subr.bf16.mxu1 %v11132_v19  ;;  %8012 = vmatprep.subr.bf16.mxu0 %v11156_v55  ;;  %v11144_v57 = vld [vmem:[#allocation14 + $0x1c4] ss:$8 sps:$4 sm:$0xff]  }
 0xad0   :  { %v6272_v48 = vadd.f32 %v10248_v2, %v12914_v46  ;;  %6033 = vmatmul.mubr.bf16.gmra.mrb[172].mxu0 %v13736_v39  ;;  %7205 = vmatmul.mubr.bf16.gmra.mrb[8].mxu1 %v12825_v61  ;;  %v6422_v11 = vmax.f32 %v6262_v37, 0.0 }
 0xad1   :  { %v6273_v28 = vadd.f32 %v10249_v18, %v12924_v16  ;;  %7214 = vmatprep.mubr.bf16.mxu1 %v12844_v25  ;;  %6042 = vmatprep.mubr.bf16.mxu0 %v13737_v60  ;;  %v6423_v35 = vmax.f32 %v6263_v6, 0.0  ;;  %v11142_v6 = vld [vmem:[#allocation14 + $0x1c0] ss:$8 sps:$4 sm:$0xff]  }
 0xad2   :  { %v6432_v1 = vmax.f32 %v6272_v48, 0.0  ;;  %7262 = vmatpush1.bf16.msra.mxu1 %v11130_v26  ;;  %v11147_v48 = vld [vmem:[#allocation14 + $0x1d4] ss:$8 sps:$4 sm:$0xff]  }
 0xad3   :  { %v6433_v8 = vmax.f32 %v6273_v28, 0.0  ;;  %v5449_v63 = vpop.f32.mrb[192].mxu1  ;;  %7263 = vmatprep.subr.bf16.mxu1 %v11135_v14 }
 0xad4   :  { %v10250_v27 = vadd.f32 %v5449_v63, %v12910_v62  ;;  %v5451_v39 = vpop.f32.mrb[193].mxu1  ;;  %v12957_v45 = vpack.c.bf16 %v6432_v1, %v6422_v11 }
 0xad5   :  { %v10251_v61 = vadd.f32 %v5451_v39, %v12918_v54  ;;  %v5453_v23 = vpop.f32.mrb[194].mxu1  ;;  %v12960_v25 = vpack.c.bf16 %v6433_v8, %v6423_v35  ;;  %v11145_v35 = vld [vmem:[#allocation14 + $0x1d0] ss:$8 sps:$4 sm:$0xff]  }
 0xad6   :  { %v6282_v60 = vadd.f32 %v10250_v27, %v12914_v46  ;;  %v10252_v7 = vadd.f32 %v5453_v23, %v12910_v62  ;;  %7264 = vmatpush1.bf16.msra.mxu1 %v11133_v56  ;;  %v5455_v47 = vpop.f32.mrb[195].mxu1  ;;  %v11150_v27 = vld [vmem:[#allocation14 + $0x1e4] ss:$8 sps:$4 sm:$0xff]  }
 0xad7   :  { %v6283_v5 = vadd.f32 %v10251_v61, %v12924_v16  ;;  %v10253_v49 = vadd.f32 %v5455_v47, %v12918_v54  ;;  %7265 = vmatprep.subr.bf16.mxu1 %v11138_v59  ;;  %v11148_v47 = vld [vmem:[#allocation14 + $0x1e0] ss:$8 sps:$4 sm:$0xff]  }
 0xad8   :  { %v6292_v19 = vadd.f32 %v10252_v7, %v12914_v46  ;;  %6043 = vmatmul.mubr.bf16.gmra.mrb[176].mxu0 %v13738_v44  ;;  %7215 = vmatmul.mubr.bf16.gmra.mrb[12].mxu1 %v12841_v4  ;;  %v6442_v9 = vmax.f32 %v6282_v60, 0.0 }
 0xad9   :  { %v6293_v34 = vadd.f32 %v10253_v49, %v12924_v16  ;;  %7224 = vmatprep.mubr.bf16.mxu1 %v12860_v0  ;;  %6052 = vmatprep.mubr.bf16.mxu0 %v13739_v52  ;;  %v6443_v55 = vmax.f32 %v6283_v5, 0.0  ;;  %v11153_v49 = vld [vmem:[#allocation14 + $0x1f4] ss:$8 sps:$4 sm:$0xff]  }
 0xada   :  { %v6452_v31 = vmax.f32 %v6292_v19, 0.0  ;;  %7266 = vmatpush1.bf16.msra.mxu1 %v11136_v38  ;;  %v13756_v19 = vld [vmem:[#allocation46_spill] sm:$0xff] }
 0xadb   :  { %v6453_v3 = vmax.f32 %v6293_v34, 0.0  ;;  %v5459_v15 = vpop.f32.mrb[196].mxu1  ;;  %7267 = vmatprep.subr.bf16.mxu1 %v11141_v53 }
 0xadc   :  { %v10254_v42 = vadd.f32 %v5459_v15, %v12910_v62  ;;  %v5461_v44 = vpop.f32.mrb[197].mxu1  ;;  %v12973_v37 = vpack.c.bf16 %v6452_v31, %v6442_v9 }
 0xadd   :  { %v10255_v4 = vadd.f32 %v5461_v44, %v12918_v54  ;;  %v5463_v2 = vpop.f32.mrb[198].mxu1  ;;  %v12976_v0 = vpack.c.bf16 %v6453_v3, %v6443_v55 }
 0xade   :  { %v6302_v52 = vadd.f32 %v10254_v42, %v12914_v46  ;;  %v10256_v32 = vadd.f32 %v5463_v2, %v12910_v62  ;;  %7268 = vmatpush1.bf16.msra.mxu1 %v11139_v21  ;;  %v5465_v26 = vpop.f32.mrb[199].mxu1  ;;  %v11151_v21 = vld [vmem:[#allocation14 + $0x1f0] ss:$8 sps:$4 sm:$0xff]  }
 0xadf   :  { %v6303_v18 = vadd.f32 %v10255_v4, %v12924_v16  ;;  %v10257_v14 = vadd.f32 %v5465_v26, %v12918_v54  ;;  %7269 = vmatprep.subr.bf16.mxu1 %v11144_v57  ;;  %v11180_v57 = vld [vmem:[#allocation14 + $0x204] ss:$8 sps:$4 sm:$0xff]  }
 0xae0   :  { %v6312_v28 = vadd.f32 %v10256_v32, %v12914_v46  ;;  %6053 = vmatmul.mubr.bf16.gmra.mrb[180].mxu0 %v13740_v43  ;;  %7225 = vmatmul.mubr.bf16.gmra.mrb[16].mxu1 %v12857_v13  ;;  %v6462_v1 = vmax.f32 %v6302_v52, 0.0 }
 0xae1   :  { %v6313_v11 = vadd.f32 %v10257_v14, %v12924_v16  ;;  %7234 = vmatprep.mubr.bf16.mxu1 %v12874_v41  ;;  %6062 = vmatprep.mubr.bf16.mxu0 %v13741_v17  ;;  %v6463_v8 = vmax.f32 %v6303_v18, 0.0 }
 0xae2   :  { %v6472_v56 = vmax.f32 %v6312_v28, 0.0  ;;  %7270 = vmatpush1.bf16.msra.mxu1 %v11142_v6  ;;  %v11154_v6 = vld [vmem:[#allocation14 + $0x280] ss:$8 sps:$4 sm:$0xff]  }
 0xae3   :  { %v6473_v63 = vmax.f32 %v6313_v11, 0.0  ;;  %v5469_v59 = vpop.f32.mrb[200].mxu1  ;;  %7271 = vmatprep.subr.bf16.mxu1 %v11147_v48  ;;  %v11159_v48 = vld [vmem:[#allocation14 + $0x294] ss:$8 sps:$4 sm:$0xff]   ;;  %v11178_v28 = vld [vmem:[#allocation14 + $0x200] ss:$8 sps:$4 sm:$0xff]  }
 0xae4   :  { %v10258_v39 = vadd.f32 %v5469_v59, %v12910_v62  ;;  %v5471_v43 = vpop.f32.mrb[201].mxu1  ;;  %v12989_v61 = vpack.c.bf16 %v6472_v56, %v6462_v1  ;;  %v13757_v1 = vld [vmem:[#allocation50_spill] sm:$0xff] }
 0xae5   :  { %v10259_v13 = vadd.f32 %v5471_v43, %v12918_v54  ;;  %v5473_v23 = vpop.f32.mrb[202].mxu1  ;;  %v12992_v41 = vpack.c.bf16 %v6473_v63, %v6463_v8  ;;  %v11186_v56 = vld [vmem:[#allocation14 + $0x214] ss:$8 sps:$4 sm:$0xff]   ;;  %v11157_v59 = vld [vmem:[#allocation14 + $0x290] ss:$8 sps:$4 sm:$0xff]  }
 0xae6   :  { %v6322_v17 = vadd.f32 %v10258_v39, %v12914_v46  ;;  %v10260_v60 = vadd.f32 %v5473_v23, %v12910_v62  ;;  %7272 = vmatpush1.bf16.msra.mxu1 %v11145_v35  ;;  %v5475_v7 = vpop.f32.mrb[203].mxu1  ;;  %v11184_v23 = vld [vmem:[#allocation14 + $0x210] ss:$8 sps:$4 sm:$0xff]  }
 0xae7   :  { %v6323_v38 = vadd.f32 %v10259_v13, %v12924_v16  ;;  %v10261_v5 = vadd.f32 %v5475_v7, %v12918_v54  ;;  %7273 = vmatprep.subr.bf16.mxu1 %v11150_v27  ;;  %v11162_v27 = vld [vmem:[#allocation14 + $0x2a4] ss:$8 sps:$4 sm:$0xff]  }
 0xae8   :  { %v6332_v53 = vadd.f32 %v10260_v60, %v12914_v46  ;;  %6063 = vmatmul.mubr.bf16.gmra.mrb[184].mxu0 %v13756_v19  ;;  %7235 = vmatmul.mubr.bf16.gmra.mrb[20].mxu1 %v12872_v22  ;;  %v6482_v9 = vmax.f32 %v6322_v17, 0.0  ;;  %v11160_v19 = vld [vmem:[#allocation14 + $0x2a0] ss:$8 sps:$4 sm:$0xff]  }
 0xae9   :  { %v6333_v34 = vadd.f32 %v10261_v5, %v12924_v16  ;;  %7277 = vmatprep.mubr.bf16.mxu1 %v12944_v50  ;;  %6105 = vmatprep.mubr.bf16.mxu0 %v13755_v51  ;;  %v6483_v55 = vmax.f32 %v6323_v38, 0.0 }
 0xaea   :  { %v6492_v31 = vmax.f32 %v6332_v53, 0.0  ;;  %7274 = vmatpush1.bf16.msra.mxu1 %v11148_v47 }
 0xaeb   :  { %v6493_v3 = vmax.f32 %v6333_v34, 0.0  ;;  %v5479_v15 = vpop.f32.mrb[204].mxu1  ;;  %7275 = vmatprep.subr.bf16.mxu1 %v11153_v49 }
 0xaec   :  { %v10262_v42 = vadd.f32 %v5479_v15, %v12910_v62  ;;  %v5481_v44 = vpop.f32.mrb[205].mxu1  ;;  %v13005_v4 = vpack.c.bf16 %v6492_v31, %v6482_v9  ;;  %v11165_v31 = vld [vmem:[#allocation14 + $0x2b4] ss:$8 sps:$4 sm:$0xff]  }
 0xaed   :  { %v10263_v22 = vadd.f32 %v5481_v44, %v12918_v54  ;;  %v5483_v2 = vpop.f32.mrb[206].mxu1  ;;  %v13008_v50 = vpack.c.bf16 %v6493_v3, %v6483_v55  ;;  %v13758_v3 = vld [vmem:[#allocation49_spill] sm:$0xff] }
 0xaee   :  { %v6342_v52 = vadd.f32 %v10262_v42, %v12914_v46  ;;  %v10264_v32 = vadd.f32 %v5483_v2, %v12910_v62  ;;  %7276 = vmatpush1.bf16.msra.mxu1 %v11151_v21  ;;  %v5485_v26 = vpop.f32.mrb[207].mxu1  ;;  %v11190_v21 = vld [vmem:[#allocation14 + $0x220] ss:$8 sps:$4 sm:$0xff]   ;;  %v11198_v15 = vld [vmem:[#allocation14 + $0x234] ss:$8 sps:$4 sm:$0xff]  }
 0xaef   :  { %v6343_v18 = vadd.f32 %v10263_v22, %v12924_v16  ;;  %v10265_v14 = vadd.f32 %v5485_v26, %v12918_v54  ;;  %7358 = vmatprep.subr.bf16.mxu1 %v11180_v57  ;;  %v11163_v22 = vld [vmem:[#allocation14 + $0x2b0] ss:$8 sps:$4 sm:$0xff]   ;;  %v11168_v2 = vld [vmem:[#allocation14 + $0x2c4] ss:$8 sps:$4 sm:$0xff]  }
 0xaf0   :  { %v6352_v11 = vadd.f32 %v10264_v32, %v12914_v46  ;;  %6106 = vmatmul.mubr.bf16.vlgmr.msra.gmra.mrb[156].mxu0 %v13757_v1  ;;  %v6502_v8 = vmax.f32 %v6342_v52, 0.0 }
 0xaf1   :  { %v6353_v35 = vadd.f32 %v10265_v14, %v12924_v16  ;;  %7278 = vmatmul.mubr.bf16.vlgmr.msra.gmra.mrb[248].mxu1 %v12940_v30  ;;  %6115 = vmatprep.mubr.bf16.mxu0 %v13755_v51  ;;  %v6503_v39 = vmax.f32 %v6343_v18, 0.0  ;;  %v11192_v30 = vld [vmem:[#allocation14 + $0x224] ss:$8 sps:$4 sm:$0xff]  }
 0xaf2   :  { %v6512_v63 = vmax.f32 %v6352_v11, 0.0  ;;  %7287 = vmatprep.mubr.bf16.mxu1 %v12960_v25  ;;  %8013 = vmatpush1.bf16.msra.mxu0 %v11154_v6  ;;  %v11196_v6 = vld [vmem:[#allocation14 + $0x230] ss:$8 sps:$4 sm:$0xff]  }
 0xaf3   :  { %v6513_v43 = vmax.f32 %v6353_v35, 0.0  ;;  %v5489_v13 = vpop.f32.mrb[208].mxu1  ;;  %8014 = vmatprep.subr.bf16.mxu0 %v11159_v48  ;;  %7359 = vmatpush1.bf16.msra.mxu1 %v11178_v28 }
 0xaf4   :  { %v10266_v17 = vadd.f32 %v5489_v13, %v12910_v62  ;;  %v5491_v60 = vpop.f32.mrb[209].mxu1  ;;  %v13021_v7 = vpack.c.bf16 %v6512_v63, %v6502_v8  ;;  %7360 = vmatprep.subr.bf16.mxu1 %v11186_v56  ;;  %v11166_v8 = vld [vmem:[#allocation14 + $0x2c0] ss:$8 sps:$4 sm:$0xff]   ;;  %v11210_v13 = vld [vmem:[#allocation14 + $0x254] ss:$8 sps:$4 sm:$0xff]  }
 0xaf5   :  { %v10267_v47 = vadd.f32 %v5491_v60, %v12918_v54  ;;  %v5493_v38 = vpop.f32.mrb[210].mxu1  ;;  %v13024_v25 = vpack.c.bf16 %v6513_v43, %v6503_v39  ;;  %v11202_v39 = vld [vmem:[#allocation14 + $0x240] ss:$8 sps:$4 sm:$0xff]  }
 0xaf6   :  { %v6362_v5 = vadd.f32 %v10266_v17, %v12914_v46  ;;  %v10268_v49 = vadd.f32 %v5493_v38, %v12910_v62  ;;  %v5495_v53 = vpop.f32.mrb[211].mxu1  ;;  %8015 = vmatpush1.bf16.msra.mxu0 %v11157_v59 }
 0xaf7   :  { %v6363_v34 = vadd.f32 %v10267_v47, %v12924_v16  ;;  %v10269_v9 = vadd.f32 %v5495_v53, %v12918_v54  ;;  %8016 = vmatprep.subr.bf16.mxu0 %v11162_v27  ;;  %7361 = vmatpush1.bf16.msra.mxu1 %v11184_v23  ;;  %v11171_v27 = vld [vmem:[#allocation14 + $0x2d4] ss:$8 sps:$4 sm:$0xff]   ;;  %v11175_v53 = vld [vmem:[#allocation14 + $0x2f0] ss:$8 sps:$4 sm:$0xff]  }
 0xaf8   :  { %v6372_v55 = vadd.f32 %v10268_v49, %v12914_v46  ;;  %6116 = vmatmul.mubr.bf16.gmra.mrb[160].mxu0 %v13758_v3  ;;  %7362 = vmatprep.subr.bf16.mxu1 %v11192_v30  ;;  %v6522_v42 = vmax.f32 %v6362_v5, 0.0  ;;  %v11177_v5 = vld [vmem:[#allocation14 + $0x2f4] ss:$8 sps:$4 sm:$0xff]   ;;  %v11214_v49 = vld [vmem:[#allocation14 + $0x260] ss:$8 sps:$4 sm:$0xff]  }
 0xaf9   :  { %v6373_v57 = vadd.f32 %v10269_v9, %v12924_v16  ;;  %7288 = vmatmul.mubr.bf16.gmra.mrb[252].mxu1 %v12957_v45  ;;  %6125 = vmatprep.mubr.bf16.mxu0 %v13755_v51  ;;  %v6523_v52 = vmax.f32 %v6363_v34, 0.0  ;;  %v11204_v45 = vld [vmem:[#allocation14 + $0x244] ss:$8 sps:$4 sm:$0xff]   ;;  %v11220_v34 = vld [vmem:[#allocation14 + $0x270] ss:$8 sps:$4 sm:$0xff]  }
 0xafa   :  { %v6532_v44 = vmax.f32 %v6372_v55, 0.0  ;;  %7297 = vmatprep.mubr.bf16.mxu1 %v12976_v0  ;;  %8017 = vmatpush1.bf16.msra.mxu0 %v11160_v19  ;;  %v11183_v19 = vld [vmem:[#allocation14 + $0x304] ss:$8 sps:$4 sm:$0xff]   ;;  %v11181_v9 = vld [vmem:[#allocation14 + $0x300] ss:$8 sps:$4 sm:$0xff]  }
 0xafb   :  { %v6533_v32 = vmax.f32 %v6373_v57, 0.0  ;;  %v5499_v26 = vpop.f32.mrb[212].mxu1  ;;  %8018 = vmatprep.subr.bf16.mxu0 %v11165_v31  ;;  %7363 = vmatpush1.bf16.msra.mxu1 %v11190_v21  ;;  %v11189_v31 = vld [vmem:[#allocation14 + $0x314] ss:$8 sps:$4 sm:$0xff]   ;;  %v11217_v3 = vld [vmem:[#allocation14 + $0x360] ss:$8 sps:$4 sm:$0xff]  }
 0xafc   :  { %v10270_v18 = vadd.f32 %v5499_v26, %v12910_v62  ;;  %v5501_v14 = vpop.f32.mrb[213].mxu1  ;;  %v13037_v48 = vpack.c.bf16 %v6532_v44, %v6522_v42  ;;  %7364 = vmatprep.subr.bf16.mxu1 %v11198_v15  ;;  %v11201_v21 = vld [vmem:[#allocation14 + $0x334] ss:$8 sps:$4 sm:$0xff]   ;;  %v11223_v57 = vld [vmem:[#allocation14 + $0x370] ss:$8 sps:$4 sm:$0xff]  }
 0xafd   :  { %v10271_v28 = vadd.f32 %v5501_v14, %v12918_v54  ;;  %v5503_v11 = vpop.f32.mrb[214].mxu1  ;;  %v13040_v0 = vpack.c.bf16 %v6533_v32, %v6523_v52  ;;  %v11213_v55 = vld [vmem:[#allocation14 + $0x354] ss:$8 sps:$4 sm:$0xff]  }
 0xafe   :  { %v6382_v1 = vadd.f32 %v10270_v18, %v12914_v46  ;;  %v10272_v56 = vadd.f32 %v5503_v11, %v12910_v62  ;;  %v5505_v35 = vpop.f32.mrb[215].mxu1  ;;  %8019 = vmatpush1.bf16.msra.mxu0 %v11163_v22  ;;  %v11225_v15 = vld [vmem:[#allocation14 + $0x374] ss:$8 sps:$4 sm:$0xff]  }
 0xaff   :  { %v6383_v63 = vadd.f32 %v10271_v28, %v12924_v16  ;;  %v10273_v59 = vadd.f32 %v5505_v35, %v12918_v54  ;;  %8020 = vmatprep.subr.bf16.mxu0 %v11168_v2  ;;  %7365 = vmatpush1.bf16.msra.mxu1 %v11196_v6  ;;  %v11169_v54 = vld [vmem:[#allocation14 + $0x2d0] ss:$8 sps:$4 sm:$0xff]   ;;  %v13759_v42 = vld [vmem:[#allocation43_spill] sm:$0xff] }
 0xb00   :  { %v6392_v43 = vadd.f32 %v10272_v56, %v12914_v46  ;;  %6126 = vmatmul.mubr.bf16.gmra.mrb[164].mxu0 %v13745_v10  ;;  %7366 = vmatprep.subr.bf16.mxu1 %v11204_v45  ;;  %v6542_v62 = vmax.f32 %v6382_v1, 0.0  ;;  %v11174_v46 = vld [vmem:[#allocation14 + $0x2e4] ss:$8 sps:$4 sm:$0xff]   ;;  %v11208_v10 = vld [vmem:[#allocation14 + $0x250] ss:$8 sps:$4 sm:$0xff]   ;;  %v13074_v44 = vrot.slane %v13759_v42, %v11951_v36 }
 0xb01   :  { %v6393_v23 = vadd.f32 %v10273_v59, %v12924_v16  ;;  %7298 = vmatmul.mubr.bf16.gmra.mrb[0].mxu1 %v12973_v37  ;;  %6135 = vmatprep.mubr.bf16.mxu0 %v13755_v51  ;;  %v6543_v60 = vmax.f32 %v6383_v63, 0.0  ;;  %v11216_v16 = vld [vmem:[#allocation14 + $0x264] ss:$8 sps:$4 sm:$0xff]   ;;  %v11172_v37 = vld [vmem:[#allocation14 + $0x2e0] ss:$8 sps:$4 sm:$0xff]   ;;  %v11346_v52 = vld [vmem:[#allocation17 + $0x10] sm:$0xff] }
 0xb02   :  { %v6552_v17 = vmax.f32 %v6392_v43, 0.0  ;;  %7307 = vmatprep.mubr.bf16.mxu1 %v12992_v41  ;;  %8021 = vmatpush1.bf16.msra.mxu0 %v11166_v8  ;;  %v11222_v41 = vld [vmem:[#allocation14 + $0x274] ss:$8 sps:$4 sm:$0xff]  }
 0xb03   :  { %v6553_v30 = vmax.f32 %v6393_v23, 0.0  ;;  %8022 = vmatprep.subr.bf16.mxu0 %v11171_v27  ;;  %7367 = vmatpush1.bf16.msra.mxu1 %v11202_v39  ;;  %v13760_v22 = vld [vmem:[#allocation37_spill] sm:$0xff]  ;;  %v13764_v14 = vld [vmem:[#allocation42_spill] sm:$0xff]  ;;  %v13765_v45 = vld [vmem:[#allocation39_spill] sm:$0xff] }
 0xb04   :  { %v13052_v47 = vpack.c.bf16 %v6552_v17, %v6542_v62  ;;  %7368 = vmatprep.subr.bf16.mxu1 %v11210_v13  ;;  %v13078_v2 = vrot.slane %v13760_v22, %v11951_v36  ;;  %v13094_v28 = vrot.slane %v13765_v45, %v11951_v36 }
 0xb05   :  { %v6633_v38 = vpack.c.bf16 %v6553_v30, %v6543_v60 }
 0xb06   :  { %8023 = vmatpush1.bf16.msra.mxu0 %v11169_v54 }
 0xb07   :  { %8024 = vmatprep.subr.bf16.mxu0 %v11174_v46  ;;  %7369 = vmatpush1.bf16.msra.mxu1 %v11208_v10 }
 0xb08   :  { %6136 = vmatmul.mubr.bf16.gmra.mrb[168].mxu0 %v13746_v12  ;;  %7370 = vmatprep.subr.bf16.mxu1 %v11216_v16  ;;  %v11187_v12 = vld [vmem:[#allocation14 + $0x310] ss:$8 sps:$4 sm:$0xff]  }
 0xb09   :  { %7308 = vmatmul.mubr.bf16.gmra.mrb[4].mxu1 %v12989_v61  ;;  %6145 = vmatprep.mubr.bf16.mxu0 %v13755_v51  ;;  %v11195_v61 = vld [vmem:[#allocation14 + $0x324] ss:$8 sps:$4 sm:$0xff]  }
 0xb0a   :  { %7317 = vmatprep.mubr.bf16.mxu1 %v13008_v50  ;;  %8025 = vmatpush1.bf16.msra.mxu0 %v11172_v37  ;;  %v11193_v50 = vld [vmem:[#allocation14 + $0x320] ss:$8 sps:$4 sm:$0xff]  }
 0xb0b   :  { %8026 = vmatprep.subr.bf16.mxu0 %v11177_v5  ;;  %7371 = vmatpush1.bf16.msra.mxu1 %v11214_v49 }
 0xb0c   :  { %7372 = vmatprep.subr.bf16.mxu1 %v11222_v41 }
 0xb0e   :  { %8027 = vmatpush1.bf16.msra.mxu0 %v11175_v53 }
 0xb0f   :  { %8028 = vmatprep.subr.bf16.mxu0 %v11183_v19  ;;  %7373 = vmatpush1.bf16.msra.mxu1 %v11220_v34 }
 0xb10   :  { %6146 = vmatmul.mubr.bf16.gmra.mrb[172].mxu0 %v13747_v29  ;;  %v11199_v29 = vld [vmem:[#allocation14 + $0x330] ss:$8 sps:$4 sm:$0xff]  }
 0xb11   :  { %7318 = vmatmul.mubr.bf16.gmra.mrb[8].mxu1 %v13005_v4  ;;  %6155 = vmatprep.mubr.bf16.mxu0 %v13755_v51  ;;  %v11207_v4 = vld [vmem:[#allocation14 + $0x344] ss:$8 sps:$4 sm:$0xff]  }
 0xb12   :  { %7327 = vmatprep.mubr.bf16.mxu1 %v13024_v25  ;;  %8029 = vmatpush1.bf16.msra.mxu0 %v11181_v9  ;;  %v11205_v25 = vld [vmem:[#allocation14 + $0x340] ss:$8 sps:$4 sm:$0xff]  }
 0xb13   :  { %8030 = vmatprep.subr.bf16.mxu0 %v11189_v31 }
 0xb16   :  { %8031 = vmatpush1.bf16.msra.mxu0 %v11187_v12 }
 0xb17   :  { %8032 = vmatprep.subr.bf16.mxu0 %v11195_v61 }
 0xb18   :  { %6156 = vmatmul.mubr.bf16.gmra.mrb[176].mxu0 %v13748_v20  ;;  %v11211_v20 = vld [vmem:[#allocation14 + $0x350] ss:$8 sps:$4 sm:$0xff]  }
 0xb19   :  { %7328 = vmatmul.mubr.bf16.gmra.mrb[12].mxu1 %v13021_v7  ;;  %6165 = vmatprep.mubr.bf16.mxu0 %v13755_v51  ;;  %v11219_v7 = vld [vmem:[#allocation14 + $0x364] ss:$8 sps:$4 sm:$0xff]  }
 0xb1a   :  { %7337 = vmatprep.mubr.bf16.mxu1 %v13040_v0  ;;  %8033 = vmatpush1.bf16.msra.mxu0 %v11193_v50 }
 0xb1b   :  { %8034 = vmatprep.subr.bf16.mxu0 %v11201_v21 }
 0xb1e   :  { %8035 = vmatpush1.bf16.msra.mxu0 %v11199_v29 }
 0xb1f   :  { %8036 = vmatprep.subr.bf16.mxu0 %v11207_v4 }
 0xb20   :  { %6166 = vmatmul.mubr.bf16.gmra.mrb[180].mxu0 %v13749_v40  ;;  %v11228_v40 = vld [vmem:[#allocation14 + $0x384] ss:$8 sps:$4 sm:$0xff]  }
 0xb21   :  { %7338 = vmatmul.mubr.bf16.gmra.mrb[16].mxu1 %v13037_v48  ;;  %6175 = vmatprep.mubr.bf16.mxu0 %v13755_v51  ;;  %v13090_v48 = vrot.slane %v13764_v14, %v11951_v36 }
 0xb22   :  { %7347 = vmatprep.mubr.bf16.mxu1 %v6633_v38  ;;  %8037 = vmatpush1.bf16.msra.mxu0 %v11205_v25 }
 0xb23   :  { %8038 = vmatprep.subr.bf16.mxu0 %v11213_v55 }
 0xb26   :  { %8039 = vmatpush1.bf16.msra.mxu0 %v11211_v20 }
 0xb27   :  { %8040 = vmatprep.subr.bf16.mxu0 %v11219_v7 }
 0xb28   :  { %6176 = vmatmul.mubr.bf16.gmra.mrb[184].mxu0 %v13750_v33  ;;  %v13761_v33 = vld [vmem:[#allocation36_spill] sm:$0xff] }
 0xb29   :  { %7348 = vmatmul.mubr.bf16.gmra.mrb[20].mxu1 %v13052_v47  ;;  %v13762_v32 = vsub.s32 4, %v13761_v33  ;;  %v13763_v6 = vsub.s32 6, %v13761_v33  ;;  %v13766_v1 = vsub.s32 5, %v13761_v33  ;;  %v13767_v35 = vsub.s32 7, %v13761_v33 }
 0xb2a   :  { %8041 = vmatpush1.bf16.msra.mxu0 %v11217_v3  ;;  %7390 = vmatprep.mubr.bf16.mxu1 %v13755_v51 }
 0xb2b   :  { %8042 = vmatprep.subr.bf16.mxu0 %v11225_v15  ;;  %v13082_v26 = vrot.slane %v11346_v52, %v13762_v32  ;;  %v13086_v18 = vrot.slane %v11346_v52, %v13763_v6  ;;  %v13098_v56 = vrot.slane %v11346_v52, %v13766_v1  ;;  %v13102_v8 = vrot.slane %v11346_v52, %v13767_v35  ;;  %v11226_v32 = vld [vmem:[#allocation14 + $0x380] ss:$8 sps:$4 sm:$0xff]   ;;  %v11231_v35 = vld [vmem:[#allocation14 + $0x394] ss:$8 sps:$4 sm:$0xff]  }
 0xb2e   :  { %8043 = vmatpush1.bf16.msra.mxu0 %v11223_v57 }
 0xb2f   :  { %8125 = vmatprep.subr.bf16.mxu0 %v11228_v40 }
 0xb43   :  { %v5655_v11 = vpop.f32.mrb[124].mxu0  ;;  %v5881_v0 = vpop.f32.mrb[216].mxu1 }
 0xb44   :  { %v10274_v63 = vadd.f32 %v5655_v11, %v13074_v44  ;;  %v10306_v59 = vadd.f32 %v5881_v0, %v13078_v2  ;;  %v5657_v27 = vpop.f32.mrb[125].mxu0  ;;  %v5883_v39 = vpop.f32.mrb[217].mxu1 }
 0xb45   :  { %v10275_v43 = vadd.f32 %v5657_v27, %v13090_v48  ;;  %v10307_v13 = vadd.f32 %v5883_v39, %v13094_v28  ;;  %v5659_v23 = vpop.f32.mrb[126].mxu0  ;;  %v5885_v62 = vpop.f32.mrb[218].mxu1 }
 0xb46   :  { %v6244_v17 = vadd.f32 %v10274_v63, %v13082_v26  ;;  %v6246_v54 = vadd.f32 %v10306_v59, %v13086_v18  ;;  %v10276_v60 = vadd.f32 %v5659_v23, %v13074_v44  ;;  %v10308_v30 = vadd.f32 %v5885_v62, %v13078_v2  ;;  %v5661_v46 = vpop.f32.mrb[127].mxu0  ;;  %v5887_v10 = vpop.f32.mrb[219].mxu1 }
 0xb47   :  { %v6245_v47 = vadd.f32 %v10275_v43, %v13098_v56  ;;  %v6247_v16 = vadd.f32 %v10307_v13, %v13102_v8  ;;  %v10277_v38 = vadd.f32 %v5661_v46, %v13090_v48  ;;  %v10309_v37 = vadd.f32 %v5887_v10, %v13094_v28 }
 0xb48   :  { %v6254_v5 = vadd.f32 %v10276_v60, %v13082_v26  ;;  %v6256_v49 = vadd.f32 %v10308_v30, %v13086_v18  ;;  %v6404_v19 = vmax.f32 %v6244_v17, 0.0  ;;  %v6406_v34 = vmax.f32 %v6246_v54, 0.0  ;;  %v11229_v17 = vld [vmem:[#allocation14 + $0x390] ss:$8 sps:$4 sm:$0xff]  }
 0xb49   :  { %v6255_v41 = vadd.f32 %v10277_v38, %v13098_v56  ;;  %v6257_v53 = vadd.f32 %v10309_v37, %v13102_v8  ;;  %v6405_v12 = vmax.f32 %v6245_v47, 0.0  ;;  %v6407_v61 = vmax.f32 %v6247_v16, 0.0 }
 0xb4a   :  { %v6414_v9 = vmax.f32 %v6254_v5, 0.0  ;;  %v6416_v31 = vmax.f32 %v6256_v49, 0.0 }
 0xb4b   :  { %v6415_v50 = vmax.f32 %v6255_v41, 0.0  ;;  %v6417_v21 = vmax.f32 %v6257_v53, 0.0  ;;  %v5665_v29 = vpop.f32.mrb[128].mxu0  ;;  %v5891_v4 = vpop.f32.mrb[220].mxu1 }
 0xb4c   :  { %v6564_v25 = vpack.c.bf16 %v6414_v9, %v6404_v19  ;;  %v10278_v55 = vadd.f32 %v5665_v29, %v13074_v44  ;;  %v10310_v20 = vadd.f32 %v5891_v4, %v13078_v2  ;;  %v5667_v7 = vpop.f32.mrb[129].mxu0  ;;  %v5893_v3 = vpop.f32.mrb[221].mxu1  ;;  %v6566_v15 = vpack.c.bf16 %v6416_v31, %v6406_v34  ;;  %v11234_v29 = vld [vmem:[#allocation14 + $0x3a4] ss:$8 sps:$4 sm:$0xff]  }
 0xb4d   :  { %v6565_v57 = vpack.c.bf16 %v6415_v50, %v6405_v12  ;;  %v13122_v40 = vpack.c.bf16 %v6417_v21, %v6407_v61  ;;  %v10279_v42 = vadd.f32 %v5667_v7, %v13090_v48  ;;  %v10311_v22 = vadd.f32 %v5893_v3, %v13094_v28  ;;  %v5669_v52 = vpop.f32.mrb[130].mxu0  ;;  %v5895_v33 = vpop.f32.mrb[222].mxu1 }
 0xb4e   :  { %v6264_v6 = vadd.f32 %v10278_v55, %v13082_v26  ;;  %v6266_v14 = vadd.f32 %v10310_v20, %v13086_v18  ;;  %v10280_v45 = vadd.f32 %v5669_v52, %v13074_v44  ;;  %v10312_v11 = vadd.f32 %v5895_v33, %v13078_v2  ;;  %v5671_v0 = vpop.f32.mrb[131].mxu0  ;;  %v5897_v1 = vpop.f32.mrb[223].mxu1  ;;  %7391 = vmatmul.mubr.bf16.vlgmr.msra.gmra.mrb[248].mxu1 %v6564_v25 }
 0xb4f   :  { %v6265_v63 = vadd.f32 %v10279_v42, %v13098_v56  ;;  %v6267_v59 = vadd.f32 %v10311_v22, %v13102_v8  ;;  %v10281_v27 = vadd.f32 %v5671_v0, %v13090_v48  ;;  %v10313_v39 = vadd.f32 %v5897_v1, %v13094_v28  ;;  %8044 = vmatprep.mubr.bf16.mxu0 %v6566_v15 }
 0xb50   :  { %v6274_v43 = vadd.f32 %v10280_v45, %v13082_v26  ;;  %v6276_v13 = vadd.f32 %v10312_v11, %v13086_v18  ;;  %8045 = vmatmul.mubr.bf16.vlgmr.msra.gmra.mrb[188].mxu0 %v6565_v57  ;;  %7400 = vmatprep.mubr.bf16.mxu1 %v13755_v51  ;;  %v6424_v54 = vmax.f32 %v6264_v6, 0.0  ;;  %v6426_v60 = vmax.f32 %v6266_v14, 0.0  ;;  %v11232_v57 = vld [vmem:[#allocation14 + $0x3a0] ss:$8 sps:$4 sm:$0xff]  }
 0xb51   :  { %v6275_v23 = vadd.f32 %v10281_v27, %v13098_v56  ;;  %v6277_v62 = vadd.f32 %v10313_v39, %v13102_v8  ;;  %8126 = vmatpush1.bf16.msra.mxu0 %v11226_v32  ;;  %v6425_v10 = vmax.f32 %v6265_v63, 0.0  ;;  %v6427_v47 = vmax.f32 %v6267_v59, 0.0  ;;  %v11237_v32 = vld [vmem:[#allocation14 + $0x3b4] ss:$8 sps:$4 sm:$0xff]  }
 0xb52   :  { %v6434_v30 = vmax.f32 %v6274_v43, 0.0  ;;  %v6436_v46 = vmax.f32 %v6276_v13, 0.0  ;;  %8127 = vmatprep.subr.bf16.mxu0 %v11231_v35 }
 0xb53   :  { %v6435_v16 = vmax.f32 %v6275_v23, 0.0  ;;  %v6437_v38 = vmax.f32 %v6277_v62, 0.0  ;;  %v5675_v37 = vpop.f32.mrb[132].mxu0  ;;  %v5901_v5 = vpop.f32.mrb[224].mxu1 }
 0xb54   :  { %v10282_v49 = vadd.f32 %v5675_v37, %v13074_v44  ;;  %v10314_v41 = vadd.f32 %v5901_v5, %v13078_v2  ;;  %v5677_v53 = vpop.f32.mrb[133].mxu0  ;;  %v5903_v19 = vpop.f32.mrb[225].mxu1  ;;  %v6574_v34 = vpack.c.bf16 %v6434_v30, %v6424_v54  ;;  %v6576_v9 = vpack.c.bf16 %v6436_v46, %v6426_v60  ;;  %v11235_v5 = vld [vmem:[#allocation14 + $0x3b0] ss:$8 sps:$4 sm:$0xff]  }
 0xb55   :  { %v10283_v31 = vadd.f32 %v5677_v53, %v13090_v48  ;;  %v10315_v12 = vadd.f32 %v5903_v19, %v13094_v28  ;;  %v5679_v61 = vpop.f32.mrb[134].mxu0  ;;  %v5905_v50 = vpop.f32.mrb[226].mxu1  ;;  %v6575_v21 = vpack.c.bf16 %v6435_v16, %v6425_v10  ;;  %8128 = vmatpush1.bf16.msra.mxu0 %v11229_v17  ;;  %v13143_v4 = vpack.c.bf16 %v6437_v38, %v6427_v47 }
 0xb56   :  { %v6284_v25 = vadd.f32 %v10282_v49, %v13082_v26  ;;  %v6286_v55 = vadd.f32 %v10314_v41, %v13086_v18  ;;  %v10284_v20 = vadd.f32 %v5679_v61, %v13074_v44  ;;  %v10316_v7 = vadd.f32 %v5905_v50, %v13078_v2  ;;  %v5681_v3 = vpop.f32.mrb[135].mxu0  ;;  %v5907_v15 = vpop.f32.mrb[227].mxu1  ;;  %7401 = vmatmul.mubr.bf16.gmra.mrb[252].mxu1 %v6574_v34 }
 0xb57   :  { %v6285_v42 = vadd.f32 %v10283_v31, %v13098_v56  ;;  %v6287_v22 = vadd.f32 %v10315_v12, %v13102_v8  ;;  %v10285_v52 = vadd.f32 %v5681_v3, %v13090_v48  ;;  %v10317_v33 = vadd.f32 %v5907_v15, %v13094_v28  ;;  %8054 = vmatprep.mubr.bf16.mxu0 %v6576_v9  ;;  %v11240_v12 = vld [vmem:[#allocation14 + $0x3c4] ss:$8 sps:$4 sm:$0xff]   ;;  %v11238_v3 = vld [vmem:[#allocation14 + $0x3c0] ss:$8 sps:$4 sm:$0xff]  }
 0xb58   :  { %v6294_v6 = vadd.f32 %v10284_v20, %v13082_v26  ;;  %v6296_v14 = vadd.f32 %v10316_v7, %v13086_v18  ;;  %8055 = vmatmul.mubr.bf16.gmra.mrb[192].mxu0 %v6575_v21  ;;  %7410 = vmatprep.mubr.bf16.mxu1 %v13755_v51  ;;  %v6444_v0 = vmax.f32 %v6284_v25, 0.0  ;;  %v6446_v1 = vmax.f32 %v6286_v55, 0.0 }
 0xb59   :  { %v6295_v45 = vadd.f32 %v10285_v52, %v13098_v56  ;;  %v6297_v11 = vadd.f32 %v10317_v33, %v13102_v8  ;;  %8129 = vmatprep.subr.bf16.mxu0 %v11234_v29  ;;  %v6445_v59 = vmax.f32 %v6285_v42, 0.0  ;;  %v6447_v27 = vmax.f32 %v6287_v22, 0.0 }
 0xb5a   :  { %v6454_v35 = vmax.f32 %v6294_v6, 0.0  ;;  %v6456_v63 = vmax.f32 %v6296_v14, 0.0  ;;  %8130 = vmatpush1.bf16.msra.mxu0 %v11232_v57 }
 0xb5b   :  { %v6455_v39 = vmax.f32 %v6295_v45, 0.0  ;;  %v6457_v43 = vmax.f32 %v6297_v11, 0.0  ;;  %v5685_v13 = vpop.f32.mrb[136].mxu0  ;;  %v5911_v23 = vpop.f32.mrb[228].mxu1  ;;  %8131 = vmatprep.subr.bf16.mxu0 %v11237_v32 }
 0xb5c   :  { %v10286_v62 = vadd.f32 %v5685_v13, %v13074_v44  ;;  %v10318_v17 = vadd.f32 %v5911_v23, %v13078_v2  ;;  %v5687_v54 = vpop.f32.mrb[137].mxu0  ;;  %v5913_v60 = vpop.f32.mrb[229].mxu1  ;;  %v6584_v30 = vpack.c.bf16 %v6454_v35, %v6444_v0  ;;  %v6586_v46 = vpack.c.bf16 %v6456_v63, %v6446_v1 }
 0xb5d   :  { %v10287_v10 = vadd.f32 %v5687_v54, %v13090_v48  ;;  %v10319_v47 = vadd.f32 %v5913_v60, %v13094_v28  ;;  %v5689_v16 = vpop.f32.mrb[138].mxu0  ;;  %v5915_v38 = vpop.f32.mrb[230].mxu1  ;;  %v6585_v37 = vpack.c.bf16 %v6455_v39, %v6445_v59  ;;  %v13162_v49 = vpack.c.bf16 %v6457_v43, %v6447_v27 }
 0xb5e   :  { %v6304_v41 = vadd.f32 %v10286_v62, %v13082_v26  ;;  %v6306_v53 = vadd.f32 %v10318_v17, %v13086_v18  ;;  %v10288_v19 = vadd.f32 %v5689_v16, %v13074_v44  ;;  %v10320_v34 = vadd.f32 %v5915_v38, %v13078_v2  ;;  %v5691_v9 = vpop.f32.mrb[139].mxu0  ;;  %v5917_v31 = vpop.f32.mrb[231].mxu1  ;;  %7411 = vmatmul.mubr.bf16.gmra.mrb[0].mxu1 %v6584_v30  ;;  %v11243_v62 = vld [vmem:[#allocation14 + $0x3d4] ss:$8 sps:$4 sm:$0xff]   ;;  %v11241_v16 = vld [vmem:[#allocation14 + $0x3d0] ss:$8 sps:$4 sm:$0xff]  }
 0xb5f   :  { %v6305_v61 = vadd.f32 %v10287_v10, %v13098_v56  ;;  %v6307_v50 = vadd.f32 %v10319_v47, %v13102_v8  ;;  %v10289_v21 = vadd.f32 %v5691_v9, %v13090_v48  ;;  %v10321_v29 = vadd.f32 %v5917_v31, %v13094_v28  ;;  %8064 = vmatprep.mubr.bf16.mxu0 %v6586_v46 }
 0xb60   :  { %v6314_v25 = vadd.f32 %v10288_v19, %v13082_v26  ;;  %v6316_v55 = vadd.f32 %v10320_v34, %v13086_v18  ;;  %8065 = vmatmul.mubr.bf16.gmra.mrb[196].mxu0 %v6585_v37  ;;  %7420 = vmatprep.mubr.bf16.mxu1 %v13755_v51  ;;  %v6464_v15 = vmax.f32 %v6304_v41, 0.0  ;;  %v6466_v57 = vmax.f32 %v6306_v53, 0.0  ;;  %v11246_v53 = vld [vmem:[#allocation14 + $0x3e4] ss:$8 sps:$4 sm:$0xff]  }
 0xb61   :  { %v6315_v20 = vadd.f32 %v10289_v21, %v13098_v56  ;;  %v6317_v7 = vadd.f32 %v10321_v29, %v13102_v8  ;;  %8132 = vmatpush1.bf16.msra.mxu0 %v11235_v5  ;;  %v6465_v52 = vmax.f32 %v6305_v61, 0.0  ;;  %v6467_v33 = vmax.f32 %v6307_v50, 0.0 }
 0xb62   :  { %v6474_v42 = vmax.f32 %v6314_v25, 0.0  ;;  %v6476_v22 = vmax.f32 %v6316_v55, 0.0  ;;  %8133 = vmatprep.subr.bf16.mxu0 %v11240_v12 }
 0xb63   :  { %v6475_v32 = vmax.f32 %v6315_v20, 0.0  ;;  %v6477_v6 = vmax.f32 %v6317_v7, 0.0  ;;  %v5695_v14 = vpop.f32.mrb[140].mxu0  ;;  %v5921_v45 = vpop.f32.mrb[232].mxu1 }
 0xb64   :  { %v10290_v11 = vadd.f32 %v5695_v14, %v13074_v44  ;;  %v10322_v0 = vadd.f32 %v5921_v45, %v13078_v2  ;;  %v5697_v1 = vpop.f32.mrb[141].mxu0  ;;  %v5923_v35 = vpop.f32.mrb[233].mxu1  ;;  %v6594_v63 = vpack.c.bf16 %v6474_v42, %v6464_v15  ;;  %v6596_v59 = vpack.c.bf16 %v6476_v22, %v6466_v57 }
 0xb65   :  { %v10291_v27 = vadd.f32 %v5697_v1, %v13090_v48  ;;  %v10323_v39 = vadd.f32 %v5923_v35, %v13094_v28  ;;  %v5699_v43 = vpop.f32.mrb[142].mxu0  ;;  %v5925_v13 = vpop.f32.mrb[234].mxu1  ;;  %v6595_v23 = vpack.c.bf16 %v6475_v32, %v6465_v52  ;;  %8134 = vmatpush1.bf16.msra.mxu0 %v11238_v3  ;;  %v13181_v17 = vpack.c.bf16 %v6477_v6, %v6467_v33 }
 0xb66   :  { %v6324_v54 = vadd.f32 %v10290_v11, %v13082_v26  ;;  %v6326_v60 = vadd.f32 %v10322_v0, %v13086_v18  ;;  %v10292_v30 = vadd.f32 %v5699_v43, %v13074_v44  ;;  %v10324_v46 = vadd.f32 %v5925_v13, %v13078_v2  ;;  %v5701_v10 = vpop.f32.mrb[143].mxu0  ;;  %v5927_v47 = vpop.f32.mrb[235].mxu1  ;;  %7421 = vmatmul.mubr.bf16.gmra.mrb[4].mxu1 %v6594_v63  ;;  %v11244_v0 = vld [vmem:[#allocation14 + $0x3e0] ss:$8 sps:$4 sm:$0xff]   ;;  %v11249_v13 = vld [vmem:[#allocation14 + $0x3f4] ss:$8 sps:$4 sm:$0xff]  }
 0xb67   :  { %v6325_v38 = vadd.f32 %v10291_v27, %v13098_v56  ;;  %v6327_v37 = vadd.f32 %v10323_v39, %v13102_v8  ;;  %v10293_v5 = vadd.f32 %v5701_v10, %v13090_v48  ;;  %v10325_v41 = vadd.f32 %v5927_v47, %v13094_v28  ;;  %8074 = vmatprep.mubr.bf16.mxu0 %v6596_v59 }
 0xb68   :  { %v6334_v19 = vadd.f32 %v10292_v30, %v13082_v26  ;;  %v6336_v34 = vadd.f32 %v10324_v46, %v13086_v18  ;;  %8075 = vmatmul.mubr.bf16.gmra.mrb[200].mxu0 %v6595_v23  ;;  %7430 = vmatprep.mubr.bf16.mxu1 %v13755_v51  ;;  %v6484_v12 = vmax.f32 %v6324_v54, 0.0  ;;  %v6486_v61 = vmax.f32 %v6326_v60, 0.0 }
 0xb69   :  { %v6335_v9 = vadd.f32 %v10293_v5, %v13098_v56  ;;  %v6337_v31 = vadd.f32 %v10325_v41, %v13102_v8  ;;  %8135 = vmatprep.subr.bf16.mxu0 %v11243_v62  ;;  %v6485_v29 = vmax.f32 %v6325_v38, 0.0  ;;  %v6487_v25 = vmax.f32 %v6327_v37, 0.0 }
 0xb6a   :  { %v6494_v50 = vmax.f32 %v6334_v19, 0.0  ;;  %v6496_v21 = vmax.f32 %v6336_v34, 0.0  ;;  %8136 = vmatpush1.bf16.msra.mxu0 %v11241_v16  ;;  %v11247_v16 = vld [vmem:[#allocation14 + $0x3f0] ss:$8 sps:$4 sm:$0xff]  }
 0xb6b   :  { %v6495_v55 = vmax.f32 %v6335_v9, 0.0  ;;  %v6497_v20 = vmax.f32 %v6337_v31, 0.0  ;;  %v5705_v7 = vpop.f32.mrb[144].mxu0  ;;  %v5931_v3 = vpop.f32.mrb[236].mxu1  ;;  %8137 = vmatprep.subr.bf16.mxu0 %v11246_v53 }
 0xb6c   :  { %v10294_v15 = vadd.f32 %v5705_v7, %v13074_v44  ;;  %v10326_v57 = vadd.f32 %v5931_v3, %v13078_v2  ;;  %v5707_v42 = vpop.f32.mrb[145].mxu0  ;;  %v5933_v22 = vpop.f32.mrb[237].mxu1  ;;  %v6604_v52 = vpack.c.bf16 %v6494_v50, %v6484_v12  ;;  %v6606_v33 = vpack.c.bf16 %v6496_v21, %v6486_v61 }
 0xb6d   :  { %v10295_v32 = vadd.f32 %v5707_v42, %v13090_v48  ;;  %v10327_v6 = vadd.f32 %v5933_v22, %v13094_v28  ;;  %v5709_v14 = vpop.f32.mrb[146].mxu0  ;;  %v5935_v45 = vpop.f32.mrb[238].mxu1  ;;  %v6605_v11 = vpack.c.bf16 %v6495_v55, %v6485_v29  ;;  %v13200_v1 = vpack.c.bf16 %v6497_v20, %v6487_v25  ;;  %v11252_v42 = vld [vmem:[#allocation14 + $0x404] ss:$8 sps:$4 sm:$0xff]  }
 0xb6e   :  { %v6344_v35 = vadd.f32 %v10294_v15, %v13082_v26  ;;  %v6346_v63 = vadd.f32 %v10326_v57, %v13086_v18  ;;  %v10296_v59 = vadd.f32 %v5709_v14, %v13074_v44  ;;  %v10328_v27 = vadd.f32 %v5935_v45, %v13078_v2  ;;  %v5711_v39 = vpop.f32.mrb[147].mxu0  ;;  %v5937_v43 = vpop.f32.mrb[239].mxu1  ;;  %7431 = vmatmul.mubr.bf16.gmra.mrb[8].mxu1 %v6604_v52 }
 0xb6f   :  { %v6345_v23 = vadd.f32 %v10295_v32, %v13098_v56  ;;  %v6347_v62 = vadd.f32 %v10327_v6, %v13102_v8  ;;  %v10297_v54 = vadd.f32 %v5711_v39, %v13090_v48  ;;  %v10329_v60 = vadd.f32 %v5937_v43, %v13094_v28  ;;  %8084 = vmatprep.mubr.bf16.mxu0 %v6606_v33 }
 0xb70   :  { %v6354_v30 = vadd.f32 %v10296_v59, %v13082_v26  ;;  %v6356_v46 = vadd.f32 %v10328_v27, %v13086_v18  ;;  %8085 = vmatmul.mubr.bf16.gmra.mrb[204].mxu0 %v6605_v11  ;;  %7440 = vmatprep.mubr.bf16.mxu1 %v13755_v51  ;;  %v6504_v38 = vmax.f32 %v6344_v35, 0.0  ;;  %v6506_v37 = vmax.f32 %v6346_v63, 0.0  ;;  %v11250_v11 = vld [vmem:[#allocation14 + $0x400] ss:$8 sps:$4 sm:$0xff]   ;;  %v11255_v27 = vld [vmem:[#allocation14 + $0x414] ss:$8 sps:$4 sm:$0xff]  }
 0xb71   :  { %v6355_v10 = vadd.f32 %v10297_v54, %v13098_v56  ;;  %v6357_v47 = vadd.f32 %v10329_v60, %v13102_v8  ;;  %8138 = vmatpush1.bf16.msra.mxu0 %v11244_v0  ;;  %v6505_v53 = vmax.f32 %v6345_v23, 0.0  ;;  %v6507_v19 = vmax.f32 %v6347_v62, 0.0 }
 0xb72   :  { %v6514_v5 = vmax.f32 %v6354_v30, 0.0  ;;  %v6516_v41 = vmax.f32 %v6356_v46, 0.0  ;;  %8139 = vmatprep.subr.bf16.mxu0 %v11249_v13 }
 0xb73   :  { %v6515_v34 = vmax.f32 %v6355_v10, 0.0  ;;  %v6517_v9 = vmax.f32 %v6357_v47, 0.0  ;;  %v5715_v31 = vpop.f32.mrb[148].mxu0  ;;  %v5941_v12 = vpop.f32.mrb[240].mxu1 }
 0xb74   :  { %v10298_v61 = vadd.f32 %v5715_v31, %v13074_v44  ;;  %v10330_v50 = vadd.f32 %v5941_v12, %v13078_v2  ;;  %v5717_v21 = vpop.f32.mrb[149].mxu0  ;;  %v5943_v29 = vpop.f32.mrb[241].mxu1  ;;  %v6614_v25 = vpack.c.bf16 %v6514_v5, %v6504_v38  ;;  %v6616_v55 = vpack.c.bf16 %v6516_v41, %v6506_v37 }
 0xb75   :  { %v10299_v20 = vadd.f32 %v5717_v21, %v13090_v48  ;;  %v10331_v7 = vadd.f32 %v5943_v29, %v13094_v28  ;;  %v5719_v3 = vpop.f32.mrb[150].mxu0  ;;  %v5945_v15 = vpop.f32.mrb[242].mxu1  ;;  %v6615_v57 = vpack.c.bf16 %v6515_v34, %v6505_v53  ;;  %8140 = vmatpush1.bf16.msra.mxu0 %v11247_v16  ;;  %v13219_v22 = vpack.c.bf16 %v6517_v9, %v6507_v19  ;;  %v11253_v29 = vld [vmem:[#allocation14 + $0x410] ss:$8 sps:$4 sm:$0xff]  }
 0xb76   :  { %v6364_v52 = vadd.f32 %v10298_v61, %v13082_v26  ;;  %v6366_v33 = vadd.f32 %v10330_v50, %v13086_v18  ;;  %v10300_v32 = vadd.f32 %v5719_v3, %v13074_v44  ;;  %v10332_v6 = vadd.f32 %v5945_v15, %v13078_v2  ;;  %v5721_v14 = vpop.f32.mrb[151].mxu0  ;;  %v5947_v45 = vpop.f32.mrb[243].mxu1  ;;  %7441 = vmatmul.mubr.bf16.gmra.mrb[12].mxu1 %v6614_v25 }
 0xb77   :  { %v6365_v0 = vadd.f32 %v10299_v20, %v13098_v56  ;;  %v6367_v35 = vadd.f32 %v10331_v7, %v13102_v8  ;;  %v10301_v63 = vadd.f32 %v5721_v14, %v13090_v48  ;;  %v10333_v59 = vadd.f32 %v5947_v45, %v13094_v28  ;;  %8094 = vmatprep.mubr.bf16.mxu0 %v6616_v55 }
 0xb78   :  { %v6374_v39 = vadd.f32 %v10300_v32, %v13082_v26  ;;  %v6376_v43 = vadd.f32 %v10332_v6, %v13086_v18  ;;  %8095 = vmatmul.mubr.bf16.gmra.mrb[208].mxu0 %v6615_v57  ;;  %7450 = vmatprep.mubr.bf16.mxu1 %v13755_v51  ;;  %v6524_v62 = vmax.f32 %v6364_v52, 0.0  ;;  %v6526_v54 = vmax.f32 %v6366_v33, 0.0 }
 0xb79   :  { %v6375_v13 = vadd.f32 %v10301_v63, %v13098_v56  ;;  %v6377_v23 = vadd.f32 %v10333_v59, %v13102_v8  ;;  %8141 = vmatprep.subr.bf16.mxu0 %v11252_v42  ;;  %v6525_v46 = vmax.f32 %v6365_v0, 0.0  ;;  %v6527_v10 = vmax.f32 %v6367_v35, 0.0  ;;  %v11258_v42 = vld [vmem:[#allocation14 + $0x424] ss:$8 sps:$4 sm:$0xff]  }
 0xb7a   :  { %v6534_v60 = vmax.f32 %v6374_v39, 0.0  ;;  %v6536_v30 = vmax.f32 %v6376_v43, 0.0  ;;  %8142 = vmatpush1.bf16.msra.mxu0 %v11250_v11  ;;  %v11256_v11 = vld [vmem:[#allocation14 + $0x420] ss:$8 sps:$4 sm:$0xff]   ;;  %v11261_v39 = vld [vmem:[#allocation14 + $0x434] ss:$8 sps:$4 sm:$0xff]  }
 0xb7b   :  { %v6535_v47 = vmax.f32 %v6375_v13, 0.0  ;;  %v6537_v16 = vmax.f32 %v6377_v23, 0.0  ;;  %v5725_v38 = vpop.f32.mrb[152].mxu0  ;;  %v5951_v37 = vpop.f32.mrb[244].mxu1  ;;  %8143 = vmatprep.subr.bf16.mxu0 %v11255_v27  ;;  %v11259_v23 = vld [vmem:[#allocation14 + $0x430] ss:$8 sps:$4 sm:$0xff]  }
 0xb7c   :  { %v10302_v5 = vadd.f32 %v5725_v38, %v13074_v44  ;;  %v10334_v41 = vadd.f32 %v5951_v37, %v13078_v2  ;;  %v5727_v53 = vpop.f32.mrb[153].mxu0  ;;  %v5953_v19 = vpop.f32.mrb[245].mxu1  ;;  %v6624_v34 = vpack.c.bf16 %v6534_v60, %v6524_v62  ;;  %v6626_v9 = vpack.c.bf16 %v6536_v30, %v6526_v54  ;;  %v11298_v62 = vld [vmem:[#allocation15 + $0x40] sm:$0xff]   ;;  %v11267_v30 = vld [vmem:[#allocation14 + $0x454] ss:$8 sps:$4 sm:$0xff]  }
 0xb7d   :  { %v10303_v31 = vadd.f32 %v5727_v53, %v13090_v48  ;;  %v10335_v12 = vadd.f32 %v5953_v19, %v13094_v28  ;;  %v5729_v61 = vpop.f32.mrb[154].mxu0  ;;  %v5955_v50 = vpop.f32.mrb[246].mxu1  ;;  %v6625_v21 = vpack.c.bf16 %v6535_v47, %v6525_v46  ;;  %v13238_v25 = vpack.c.bf16 %v6537_v16, %v6527_v10  ;;  %v11299_v54 = vld [vmem:[#allocation15] sm:$0xff]   ;;  %9728 = vmatprep.subr.bf16.mxu1 %v11298_v62  ;;  %v11265_v46 = vld [vmem:[#allocation14 + $0x450] ss:$8 sps:$4 sm:$0xff]   ;;  %v11300_v47 = vld [vmem:[#allocation15 + $0x48] sm:$0xff]  }
 0xb7e   :  { %v6384_v55 = vadd.f32 %v10302_v5, %v13082_v26  ;;  %v6386_v20 = vadd.f32 %v10334_v41, %v13086_v18  ;;  %v10304_v7 = vadd.f32 %v5729_v61, %v13074_v44  ;;  %v10336_v3 = vadd.f32 %v5955_v50, %v13078_v2  ;;  %v5731_v15 = vpop.f32.mrb[155].mxu0  ;;  %v5957_v57 = vpop.f32.mrb[247].mxu1  ;;  %7451 = vmatmul.mubr.bf16.gmra.mrb[16].mxu1 %v6624_v34  ;;  %v11262_v60 = vld [vmem:[#allocation14 + $0x440] ss:$8 sps:$4 sm:$0xff]   ;;  %v11270_v10 = vld [vmem:[#allocation14 + $0x464] ss:$8 sps:$4 sm:$0xff]  }
 0xb7f   :  { %v6385_v52 = vadd.f32 %v10303_v31, %v13098_v56  ;;  %v6387_v33 = vadd.f32 %v10335_v12, %v13102_v8  ;;  %v10305_v32 = vadd.f32 %v5731_v15, %v13090_v48  ;;  %v10337_v6 = vadd.f32 %v5957_v57, %v13094_v28  ;;  %8104 = vmatprep.mubr.bf16.mxu0 %v6626_v9  ;;  %v11301_v16 = vld [vmem:[#allocation15 + $0x8] sm:$0xff]   ;;  %v11302_v38 = vld [vmem:[#allocation15 + $0x50] sm:$0xff]   ;;  %v11304_v34 = vld [vmem:[#allocation15 + $0x58] sm:$0xff]  }
 0xb80   :  { %v6394_v14 = vadd.f32 %v10304_v7, %v13082_v26  ;;  %v6396_v45 = vadd.f32 %v10336_v3, %v13086_v18  ;;  %8105 = vmatmul.mubr.bf16.gmra.mrb[212].mxu0 %v6625_v21  ;;  %7460 = vmatprep.mubr.bf16.mxu1 %v13755_v51  ;;  %v6544_v0 = vmax.f32 %v6384_v55, 0.0  ;;  %v6546_v35 = vmax.f32 %v6386_v20, 0.0  ;;  %v11268_v37 = vld [vmem:[#allocation14 + $0x460] ss:$8 sps:$4 sm:$0xff]   ;;  %v11273_v5 = vld [vmem:[#allocation14 + $0x474] ss:$8 sps:$4 sm:$0xff]  }
 0xb81   :  { %v6395_v44 = vadd.f32 %v10305_v32, %v13098_v56  ;;  %v6397_v2 = vadd.f32 %v10337_v6, %v13102_v8  ;;  %8144 = vmatpush1.bf16.msra.mxu0 %v11253_v29  ;;  %v6545_v28 = vmax.f32 %v6385_v52, 0.0  ;;  %v6547_v59 = vmax.f32 %v6387_v33, 0.0  ;;  %v11264_v8 = vld [vmem:[#allocation14 + $0x444] ss:$8 sps:$4 sm:$0xff]   ;;  %9729 = vmatpush3.bf16.msra.mxu1 %v11299_v54  ;;  %v11303_v41 = vld [vmem:[#allocation15 + $0x10] sm:$0xff]   ;;  %v11305_v9 = vld [vmem:[#allocation15 + $0x18] sm:$0xff]  }
 0xb82   :  { %v6554_v63 = vmax.f32 %v6394_v14, 0.0  ;;  %v6556_v48 = vmax.f32 %v6396_v45, 0.0  ;;  %8145 = vmatprep.subr.bf16.mxu0 %v11258_v42  ;;  %9730 = vmatprep.subr.bf16.mxu1 %v11300_v47  ;;  %v11271_v53 = vld [vmem:[#allocation14 + $0x470] ss:$8 sps:$4 sm:$0xff]   ;;  %v11276_v19 = vld [vmem:[#allocation14 + $0x484] ss:$8 sps:$4 sm:$0xff]   ;;  %v13257_v3 = vrot.slane %v12920_v58, %v11951_v36  ;;  %v13264_v57 = vrot.slane %v12927_v24, %v11951_v36 }
 0xb83   :  { %v6555_v27 = vmax.f32 %v6395_v44, 0.0  ;;  %v6557_v26 = vmax.f32 %v6397_v2, 0.0  ;;  %v11306_v31 = vld [vmem:[#allocation15 + $0x60] sm:$0xff]   ;;  %v11308_v61 = vld [vmem:[#allocation15 + $0x68] sm:$0xff]   ;;  %v11310_v21 = vld [vmem:[#allocation15 + $0x70] sm:$0xff]  }
 0xb84   :  { %v6634_v18 = vpack.c.bf16 %v6554_v63, %v6544_v0  ;;  %v6636_v43 = vpack.c.bf16 %v6556_v48, %v6546_v35  ;;  %v11307_v12 = vld [vmem:[#allocation15 + $0x20] sm:$0xff]   ;;  %v11309_v50 = vld [vmem:[#allocation15 + $0x28] sm:$0xff]   ;;  %v11311_v29 = vld [vmem:[#allocation15 + $0x30] sm:$0xff]  }
 0xb85   :  { %v6635_v13 = vpack.c.bf16 %v6555_v27, %v6545_v28  ;;  %8146 = vmatpush1.bf16.msra.mxu0 %v11256_v11  ;;  %v13253_v56 = vpack.c.bf16 %v6557_v26, %v6547_v59  ;;  %9731 = vmatpush3.bf16.msra.mxu1 %v11301_v16  ;;  %v11312_v55 = vld [vmem:[#allocation15 + $0x78] sm:$0xff]   ;;  %v13768_v52 = vld [vmem:[#allocation48_spill] sm:$0xff] }
 0xb86   :  { %7461 = vmatmul.mubr.bf16.gmra.mrb[20].mxu1 %v6634_v18  ;;  %8114 = vmatprep.mubr.bf16.mxu0 %v6636_v43  ;;  %v11313_v20 = vld [vmem:[#allocation15 + $0x38] sm:$0xff]   ;;  %v11274_v43 = vld [vmem:[#allocation14 + $0x480] ss:$8 sps:$4 sm:$0xff]  }
 0xb87   :  { %8147 = vmatprep.subr.bf16.mxu0 %v11261_v39  ;;  %9732 = vmatprep.subr.bf16.mxu1 %v11302_v38  ;;  %v6187_v7 = vld [vmem:[#allocation17 + $0x18] sm:$0x3]  ;;  %v11279_v62 = vld [vmem:[#allocation14 + $0x494] ss:$8 sps:$4 sm:$0xff]  }
 0xb88   :  { %8115 = vmatmul.mubr.bf16.gmra.mrb[216].mxu0 %v6635_v13  ;;  %v13260_v15 = vrot.slane %v6187_v7, %v11951_v36  ;;  %v13267_v33 = vrot.slane %v6187_v7, %v13768_v52  ;;  %v11277_v16 = vld [vmem:[#allocation14 + $0x490] ss:$8 sps:$4 sm:$0xff]  }
 0xb89   :  { %8148 = vmatpush1.bf16.msra.mxu0 %v11259_v23  ;;  %9733 = vmatpush3.bf16.msra.mxu1 %v11303_v41 }
 0xb8a   :  { %8149 = vmatprep.subr.bf16.mxu0 %v11264_v8  ;;  %9734 = vmatprep.subr.bf16.mxu1 %v11304_v34 }
 0xb8d   :  { %8150 = vmatpush1.bf16.msra.mxu0 %v11262_v60  ;;  %9735 = vmatpush3.bf16.msra.mxu1 %v11305_v9 }
 0xb8e   :  { %8151 = vmatprep.subr.bf16.mxu0 %v11267_v30  ;;  %9736 = vmatprep.subr.bf16.mxu1 %v11306_v31 }
 0xb91   :  { %8152 = vmatpush1.bf16.msra.mxu0 %v11265_v46  ;;  %9737 = vmatpush3.bf16.msra.mxu1 %v11307_v12 }
 0xb92   :  { %8153 = vmatprep.subr.bf16.mxu0 %v11270_v10  ;;  %9738 = vmatprep.subr.bf16.mxu1 %v11308_v61  ;;  %v11280_v61 = vld [vmem:[#allocation14 + $0x4a0] ss:$8 sps:$4 sm:$0xff]  }
 0xb95   :  { %8154 = vmatpush1.bf16.msra.mxu0 %v11268_v37  ;;  %9739 = vmatpush3.bf16.msra.mxu1 %v11309_v50  ;;  %v11282_v37 = vld [vmem:[#allocation14 + $0x4a4] ss:$8 sps:$4 sm:$0xff]  }
 0xb96   :  { %8155 = vmatprep.subr.bf16.mxu0 %v11273_v5  ;;  %9740 = vmatprep.subr.bf16.mxu1 %v11310_v21  ;;  %v11285_v21 = vld [vmem:[#allocation14 + $0x4b4] ss:$8 sps:$4 sm:$0xff]  }
 0xb99   :  { %8156 = vmatpush1.bf16.msra.mxu0 %v11271_v53  ;;  %9741 = vmatpush3.bf16.msra.mxu1 %v11311_v29 }
 0xb9a   :  { %8238 = vmatprep.subr.bf16.mxu0 %v11276_v19  ;;  %9742 = vmatprep.subr.bf16.mxu1 %v11312_v55 }
 0xb9d   :  { %9743 = vmatpush3.bf16.msra.mxu1 %v11313_v20 }
 0xbc3   :  { %v6107_v42 = vpop.f32.mrb[156].mxu0 }
 0xbc4   :  { %v10338_v32 = vadd.f32 %v6107_v42, %v13257_v3  ;;  %v6109_v6 = vpop.f32.mrb[157].mxu0 }
 0xbc5   :  { %v10339_v14 = vadd.f32 %v6109_v6, %v13264_v57  ;;  %v6111_v45 = vpop.f32.mrb[158].mxu0 }
 0xbc6   :  { %v6248_v58 = vadd.f32 %v10338_v32, %v13260_v15  ;;  %v10340_v44 = vadd.f32 %v6111_v45, %v13257_v3  ;;  %v6113_v2 = vpop.f32.mrb[159].mxu0 }
 0xbc7   :  { %v6249_v11 = vadd.f32 %v10339_v14, %v13267_v33  ;;  %v10341_v24 = vadd.f32 %v6113_v2, %v13264_v57  ;;  %v11283_v14 = vld [vmem:[#allocation14 + $0x4b0] ss:$8 sps:$4 sm:$0xff]  }
 0xbc8   :  { %v6258_v0 = vadd.f32 %v10340_v44, %v13260_v15  ;;  %v6408_v63 = vmax.f32 %v6248_v58, 0.0  ;;  %v11288_v58 = vld [vmem:[#allocation14 + $0x4c4] ss:$8 sps:$4 sm:$0xff]  }
 0xbc9   :  { %v6259_v35 = vadd.f32 %v10341_v24, %v13267_v33  ;;  %v6409_v28 = vmax.f32 %v6249_v11, 0.0 }
 0xbca   :  { %v6418_v48 = vmax.f32 %v6258_v0, 0.0 }
 0xbcb   :  { %v6419_v59 = vmax.f32 %v6259_v35, 0.0  ;;  %v6117_v27 = vpop.f32.mrb[160].mxu0 }
 0xbcc   :  { %v10342_v26 = vadd.f32 %v6117_v27, %v13257_v3  ;;  %v6119_v39 = vpop.f32.mrb[161].mxu0  ;;  %v6568_v18 = vpack.c.bf16 %v6418_v48, %v6408_v63  ;;  %v11291_v27 = vld [vmem:[#allocation14 + $0x4d4] ss:$8 sps:$4 sm:$0xff]  }
 0xbcd   :  { %v13278_v13 = vpack.c.bf16 %v6419_v59, %v6409_v28  ;;  %v10343_v23 = vadd.f32 %v6119_v39, %v13264_v57  ;;  %v6121_v8 = vpop.f32.mrb[162].mxu0  ;;  %v11286_v28 = vld [vmem:[#allocation14 + $0x4c0] ss:$8 sps:$4 sm:$0xff]  }
 0xbce   :  { %v6268_v54 = vadd.f32 %v10342_v26, %v13260_v15  ;;  %v10344_v60 = vadd.f32 %v6121_v8, %v13257_v3  ;;  %v6123_v30 = vpop.f32.mrb[163].mxu0  ;;  %8157 = vmatprep.mubr.bf16.mxu0 %v6568_v18 }
 0xbcf   :  { %v6269_v46 = vadd.f32 %v10343_v23, %v13267_v33  ;;  %v10345_v10 = vadd.f32 %v6123_v30, %v13264_v57  ;;  %8158 = vmatmul.mubr.bf16.vlgmr.msra.gmra.mrb[188].mxu0 %v13122_v40  ;;  %v11294_v30 = vld [vmem:[#allocation14 + $0x4e4] ss:$8 sps:$4 sm:$0xff]  }
 0xbd0   :  { %v6278_v47 = vadd.f32 %v10344_v60, %v13260_v15  ;;  %8239 = vmatpush1.bf16.msra.mxu0 %v11274_v43  ;;  %v6428_v5 = vmax.f32 %v6268_v54, 0.0  ;;  %v11289_v54 = vld [vmem:[#allocation14 + $0x4d0] ss:$8 sps:$4 sm:$0xff]  }
 0xbd1   :  { %v6279_v38 = vadd.f32 %v10345_v10, %v13267_v33  ;;  %8240 = vmatprep.subr.bf16.mxu0 %v11279_v62  ;;  %v6429_v53 = vmax.f32 %v6269_v46, 0.0 }
 0xbd2   :  { %v6438_v41 = vmax.f32 %v6278_v47, 0.0 }
 0xbd3   :  { %v6439_v19 = vmax.f32 %v6279_v38, 0.0  ;;  %v6127_v34 = vpop.f32.mrb[164].mxu0 }
 0xbd4   :  { %v10346_v9 = vadd.f32 %v6127_v34, %v13257_v3  ;;  %v6129_v31 = vpop.f32.mrb[165].mxu0  ;;  %v6578_v12 = vpack.c.bf16 %v6438_v41, %v6428_v5  ;;  %8241 = vmatpush1.bf16.msra.mxu0 %v11277_v16 }
 0xbd5   :  { %v10347_v40 = vadd.f32 %v6129_v31, %v13264_v57  ;;  %v6131_v50 = vpop.f32.mrb[166].mxu0  ;;  %8242 = vmatprep.subr.bf16.mxu0 %v11282_v37  ;;  %v13290_v29 = vpack.c.bf16 %v6439_v19, %v6429_v53  ;;  %v11292_v53 = vld [vmem:[#allocation14 + $0x4e0] ss:$8 sps:$4 sm:$0xff]  }
 0xbd6   :  { %v6288_v55 = vadd.f32 %v10346_v9, %v13260_v15  ;;  %v10348_v20 = vadd.f32 %v6131_v50, %v13257_v3  ;;  %v6133_v7 = vpop.f32.mrb[167].mxu0  ;;  %8167 = vmatprep.mubr.bf16.mxu0 %v6578_v12  ;;  %v11297_v9 = vld [vmem:[#allocation14 + $0x4f4] ss:$8 sps:$4 sm:$0xff]  }
 0xbd7   :  { %v6289_v42 = vadd.f32 %v10347_v40, %v13267_v33  ;;  %v10349_v32 = vadd.f32 %v6133_v7, %v13264_v57  ;;  %8168 = vmatmul.mubr.bf16.gmra.mrb[192].mxu0 %v13143_v4 }
 0xbd8   :  { %v6298_v6 = vadd.f32 %v10348_v20, %v13260_v15  ;;  %8243 = vmatpush1.bf16.msra.mxu0 %v11280_v61  ;;  %v6448_v44 = vmax.f32 %v6288_v55, 0.0  ;;  %v11295_v20 = vld [vmem:[#allocation14 + $0x4f0] ss:$8 sps:$4 sm:$0xff]  }
 0xbd9   :  { %v6299_v45 = vadd.f32 %v10349_v32, %v13267_v33  ;;  %8244 = vmatprep.subr.bf16.mxu0 %v11285_v21  ;;  %v6449_v11 = vmax.f32 %v6289_v42, 0.0 }
 0xbda   :  { %v6458_v2 = vmax.f32 %v6298_v6, 0.0 }
 0xbdb   :  { %v6459_v24 = vmax.f32 %v6299_v45, 0.0  ;;  %v6137_v0 = vpop.f32.mrb[168].mxu0 }
 0xbdc   :  { %v10350_v35 = vadd.f32 %v6137_v0, %v13257_v3  ;;  %v6139_v63 = vpop.f32.mrb[169].mxu0  ;;  %v6588_v48 = vpack.c.bf16 %v6458_v2, %v6448_v44  ;;  %8245 = vmatpush1.bf16.msra.mxu0 %v11283_v14 }
 0xbdd   :  { %v10351_v4 = vadd.f32 %v6139_v63, %v13264_v57  ;;  %v6141_v59 = vpop.f32.mrb[170].mxu0  ;;  %8246 = vmatprep.subr.bf16.mxu0 %v11288_v58  ;;  %v13301_v26 = vpack.c.bf16 %v6459_v24, %v6449_v11 }
 0xbde   :  { %v6308_v39 = vadd.f32 %v10350_v35, %v13260_v15  ;;  %v10352_v18 = vadd.f32 %v6141_v59, %v13257_v3  ;;  %v6143_v43 = vpop.f32.mrb[171].mxu0  ;;  %8177 = vmatprep.mubr.bf16.mxu0 %v6588_v48 }
 0xbdf   :  { %v6309_v23 = vadd.f32 %v10351_v4, %v13267_v33  ;;  %v10353_v8 = vadd.f32 %v6143_v43, %v13264_v57  ;;  %8178 = vmatmul.mubr.bf16.gmra.mrb[196].mxu0 %v13162_v49  ;;  %v11314_v49 = vld [vmem:[#allocation15 + $0xc0] sm:$0xff]  }
 0xbe0   :  { %v6318_v62 = vadd.f32 %v10352_v18, %v13260_v15  ;;  %8247 = vmatpush1.bf16.msra.mxu0 %v11286_v28  ;;  %v6468_v46 = vmax.f32 %v6308_v39, 0.0  ;;  %9792 = vmatprep.subr.bf16.mxu1 %v11314_v49 }
 0xbe1   :  { %v6319_v60 = vadd.f32 %v10353_v8, %v13267_v33  ;;  %8248 = vmatprep.subr.bf16.mxu0 %v11291_v27  ;;  %v6469_v47 = vmax.f32 %v6309_v23, 0.0 }
 0xbe2   :  { %v6478_v10 = vmax.f32 %v6318_v62, 0.0 }
 0xbe3   :  { %v6479_v16 = vmax.f32 %v6319_v60, 0.0  ;;  %v6147_v38 = vpop.f32.mrb[172].mxu0 }
 0xbe4   :  { %v10354_v37 = vadd.f32 %v6147_v38, %v13257_v3  ;;  %v6149_v5 = vpop.f32.mrb[173].mxu0  ;;  %v6598_v41 = vpack.c.bf16 %v6478_v10, %v6468_v46  ;;  %8249 = vmatpush1.bf16.msra.mxu0 %v11289_v54 }
 0xbe5   :  { %v10355_v19 = vadd.f32 %v6149_v5, %v13264_v57  ;;  %v6151_v34 = vpop.f32.mrb[174].mxu0  ;;  %8250 = vmatprep.subr.bf16.mxu0 %v11294_v30  ;;  %v13312_v31 = vpack.c.bf16 %v6479_v16, %v6469_v47 }
 0xbe6   :  { %v6328_v12 = vadd.f32 %v10354_v37, %v13260_v15  ;;  %v10356_v61 = vadd.f32 %v6151_v34, %v13257_v3  ;;  %v6153_v40 = vpop.f32.mrb[175].mxu0  ;;  %8187 = vmatprep.mubr.bf16.mxu0 %v6598_v41 }
 0xbe7   :  { %v6329_v50 = vadd.f32 %v10355_v19, %v13267_v33  ;;  %v10357_v21 = vadd.f32 %v6153_v40, %v13264_v57  ;;  %8188 = vmatmul.mubr.bf16.gmra.mrb[200].mxu0 %v13181_v17 }
 0xbe8   :  { %v6338_v55 = vadd.f32 %v10356_v61, %v13260_v15  ;;  %8251 = vmatpush1.bf16.msra.mxu0 %v11292_v53  ;;  %v6488_v42 = vmax.f32 %v6328_v12, 0.0 }
 0xbe9   :  { %v6339_v7 = vadd.f32 %v10357_v21, %v13267_v33  ;;  %8252 = vmatprep.subr.bf16.mxu0 %v11297_v9  ;;  %v6489_v6 = vmax.f32 %v6329_v50, 0.0 }
 0xbea   :  { %v6498_v32 = vmax.f32 %v6338_v55, 0.0 }
 0xbeb   :  { %v6499_v14 = vmax.f32 %v6339_v7, 0.0  ;;  %v6157_v45 = vpop.f32.mrb[176].mxu0 }
 0xbec   :  { %v10358_v58 = vadd.f32 %v6157_v45, %v13257_v3  ;;  %v6159_v44 = vpop.f32.mrb[177].mxu0  ;;  %v6608_v2 = vpack.c.bf16 %v6498_v32, %v6488_v42  ;;  %8253 = vmatpush1.bf16.msra.mxu0 %v11295_v20 }
 0xbed   :  { %v10359_v11 = vadd.f32 %v6159_v44, %v13264_v57  ;;  %v6161_v17 = vpop.f32.mrb[178].mxu0  ;;  %v13323_v24 = vpack.c.bf16 %v6499_v14, %v6489_v6 }
 0xbee   :  { %v6348_v0 = vadd.f32 %v10358_v58, %v13260_v15  ;;  %v10360_v35 = vadd.f32 %v6161_v17, %v13257_v3  ;;  %v6163_v63 = vpop.f32.mrb[179].mxu0  ;;  %8197 = vmatprep.mubr.bf16.mxu0 %v6608_v2 }
 0xbef   :  { %v6349_v48 = vadd.f32 %v10359_v11, %v13267_v33  ;;  %v10361_v28 = vadd.f32 %v6163_v63, %v13264_v57  ;;  %8198 = vmatmul.mubr.bf16.gmra.mrb[204].mxu0 %v13200_v1 }
 0xbf0   :  { %v6358_v4 = vadd.f32 %v10360_v35, %v13260_v15  ;;  %v6508_v27 = vmax.f32 %v6348_v0, 0.0 }
 0xbf1   :  { %v6359_v59 = vadd.f32 %v10361_v28, %v13267_v33  ;;  %v6509_v18 = vmax.f32 %v6349_v48, 0.0 }
 0xbf2   :  { %v6518_v39 = vmax.f32 %v6358_v4, 0.0 }
 0xbf3   :  { %v6519_v43 = vmax.f32 %v6359_v59, 0.0  ;;  %v6167_v23 = vpop.f32.mrb[180].mxu0 }
 0xbf4   :  { %v10362_v8 = vadd.f32 %v6167_v23, %v13257_v3  ;;  %v6169_v62 = vpop.f32.mrb[181].mxu0  ;;  %v6618_v54 = vpack.c.bf16 %v6518_v39, %v6508_v27  ;;  %v11315_v39 = vld [vmem:[#allocation15 + $0x80] sm:$0xff]   ;;  %v11316_v23 = vld [vmem:[#allocation15 + $0xc8] sm:$0xff]  }
 0xbf5   :  { %v10363_v60 = vadd.f32 %v6169_v62, %v13264_v57  ;;  %v6171_v30 = vpop.f32.mrb[182].mxu0  ;;  %v13334_v46 = vpack.c.bf16 %v6519_v43, %v6509_v18 }
 0xbf6   :  { %v6368_v1 = vadd.f32 %v10362_v8, %v13260_v15  ;;  %v10364_v10 = vadd.f32 %v6171_v30, %v13257_v3  ;;  %v6173_v47 = vpop.f32.mrb[183].mxu0  ;;  %8207 = vmatprep.mubr.bf16.mxu0 %v6618_v54  ;;  %v11317_v30 = vld [vmem:[#allocation15 + $0x88] sm:$0xff]  }
 0xbf7   :  { %v6369_v16 = vadd.f32 %v10363_v60, %v13267_v33  ;;  %v10365_v38 = vadd.f32 %v6173_v47, %v13264_v57  ;;  %8208 = vmatmul.mubr.bf16.gmra.mrb[208].mxu0 %v13219_v22  ;;  %v11318_v47 = vld [vmem:[#allocation15 + $0xd0] sm:$0xff]  }
 0xbf8   :  { %v6378_v37 = vadd.f32 %v10364_v10, %v13260_v15  ;;  %v6528_v41 = vmax.f32 %v6368_v1, 0.0 }
 0xbf9   :  { %v6379_v5 = vadd.f32 %v10365_v38, %v13267_v33  ;;  %v6529_v49 = vmax.f32 %v6369_v16, 0.0 }
 0xbfa   :  { %v6538_v53 = vmax.f32 %v6378_v37, 0.0 }
 0xbfb   :  { %v6539_v19 = vmax.f32 %v6379_v5, 0.0  ;;  %v6177_v34 = vpop.f32.mrb[184].mxu0 }
 0xbfc   :  { %v10366_v9 = vadd.f32 %v6177_v34, %v13257_v3  ;;  %v6179_v12 = vpop.f32.mrb[185].mxu0  ;;  %v6628_v61 = vpack.c.bf16 %v6538_v53, %v6528_v41  ;;  %v11319_v53 = vld [vmem:[#allocation15 + $0x90] sm:$0xff]   ;;  %v11320_v34 = vld [vmem:[#allocation15 + $0xd8] sm:$0xff]  }
 0xbfd   :  { %v10367_v40 = vadd.f32 %v6179_v12, %v13264_v57  ;;  %v6181_v50 = vpop.f32.mrb[186].mxu0  ;;  %v13345_v21 = vpack.c.bf16 %v6539_v19, %v6529_v49 }
 0xbfe   :  { %v6388_v22 = vadd.f32 %v10366_v9, %v13260_v15  ;;  %v10368_v55 = vadd.f32 %v6181_v50, %v13257_v3  ;;  %v6183_v20 = vpop.f32.mrb[187].mxu0  ;;  %8217 = vmatprep.mubr.bf16.mxu0 %v6628_v61  ;;  %v11321_v50 = vld [vmem:[#allocation15 + $0x98] sm:$0xff]  }
 0xbff   :  { %v6389_v7 = vadd.f32 %v10367_v40, %v13267_v33  ;;  %v10369_v42 = vadd.f32 %v6183_v20, %v13264_v57  ;;  %8218 = vmatmul.mubr.bf16.gmra.mrb[212].mxu0 %v13238_v25  ;;  %v6720_v25 = vld [vmem:[#allocation17 + $0x1a] sm:$0x3]  ;;  %v11322_v20 = vld [vmem:[#allocation15 + $0xe0] sm:$0xff]  }
 0xc00   :  { %v6398_v32 = vadd.f32 %v10368_v55, %v13260_v15  ;;  %v6548_v14 = vmax.f32 %v6388_v22, 0.0  ;;  %v13363_v3 = vrot.slane %v6720_v25, %v11951_v36  ;;  %v13367_v15 = vrot.slane %v6720_v25, %v13768_v52 }
 0xc01   :  { %v6399_v6 = vadd.f32 %v10369_v42, %v13267_v33  ;;  %v6549_v58 = vmax.f32 %v6389_v7, 0.0 }
 0xc02   :  { %v6558_v45 = vmax.f32 %v6398_v32, 0.0 }
 0xc03   :  { %v6559_v44 = vmax.f32 %v6399_v6, 0.0 }
 0xc04   :  { %v6638_v2 = vpack.c.bf16 %v6558_v45, %v6548_v14  ;;  %v11323_v45 = vld [vmem:[#allocation15 + $0xa0] sm:$0xff]  }
 0xc05   :  { %v13354_v11 = vpack.c.bf16 %v6559_v44, %v6549_v58 }
 0xc06   :  { %8227 = vmatprep.mubr.bf16.mxu0 %v6638_v2  ;;  %v11324_v2 = vld [vmem:[#allocation15 + $0xe8] sm:$0xff]  }
 0xc07   :  { %8228 = vmatmul.mubr.bf16.gmra.mrb[216].mxu0 %v13253_v56 }
 0xc08   :  { %8270 = vmatprep.mubr.bf16.mxu0 %v13755_v51 }
 0xc0f   :  { %8271 = vmatmul.mubr.bf16.vlgmr.msra.gmra.mrb[188].mxu0 %v13278_v13 }
 0xc10   :  { %8280 = vmatprep.mubr.bf16.mxu0 %v13755_v51 }
 0xc17   :  { %8281 = vmatmul.mubr.bf16.gmra.mrb[192].mxu0 %v13290_v29 }
 0xc18   :  { %8290 = vmatprep.mubr.bf16.mxu0 %v13755_v51 }
 0xc1f   :  { %8291 = vmatmul.mubr.bf16.gmra.mrb[196].mxu0 %v13301_v26 }
 0xc20   :  { %8300 = vmatprep.mubr.bf16.mxu0 %v13755_v51 }
 0xc21   :  { %v7392_v56 = vpop.f32.mrb[248].mxu1 }
 0xc22   :  { %v10370_v57 = vadd.f32 %v7392_v56, %v13363_v3  ;;  %v7394_v33 = vpop.f32.mrb[249].mxu1 }
 0xc23   :  { %v10371_v13 = vadd.f32 %v7394_v33, %v13367_v15  ;;  %v7396_v29 = vpop.f32.mrb[250].mxu1 }
 0xc24   :  { %v10372_v17 = vadd.f32 %v7396_v29, %v13363_v3  ;;  %v7398_v0 = vpop.f32.mrb[251].mxu1  ;;  %v7471_v63 = vmax.f32 %v10370_v57, 0.0 }
 0xc25   :  { %v10373_v35 = vadd.f32 %v7398_v0, %v13367_v15  ;;  %v7472_v26 = vmax.f32 %v10371_v13, 0.0  ;;  %v11325_v13 = vld [vmem:[#allocation15 + $0xa8] sm:$0xff]   ;;  %v11326_v0 = vld [vmem:[#allocation15 + $0xf0] sm:$0xff]  }
 0xc26   :  { %v7473_v48 = vmax.f32 %v10372_v17, 0.0 }
 0xc27   :  { %v7474_v28 = vmax.f32 %v10373_v35, 0.0  ;;  %8301 = vmatmul.mubr.bf16.gmra.mrb[200].mxu0 %v13312_v31 }
 0xc28   :  { %v7503_v4 = vpack.c.bf16 %v7473_v48, %v7471_v63  ;;  %8310 = vmatprep.mubr.bf16.mxu0 %v13755_v51 }
 0xc29   :  { %v7504_v59 = vpack.c.bf16 %v7474_v28, %v7472_v26  ;;  %v7402_v27 = vpop.f32.mrb[252].mxu1 }
 0xc2a   :  { %v10374_v18 = vadd.f32 %v7402_v27, %v13363_v3  ;;  %v7404_v43 = vpop.f32.mrb[253].mxu1 }
 0xc2b   :  { %v10375_v8 = vadd.f32 %v7404_v43, %v13367_v15  ;;  %v7406_v62 = vpop.f32.mrb[254].mxu1  ;;  %8566 = vmatprep.mubr.bf16.mxu1 %v7504_v59 }
 0xc2c   :  { %v10376_v54 = vadd.f32 %v7406_v62, %v13363_v3  ;;  %v7408_v60 = vpop.f32.mrb[255].mxu1  ;;  %8567 = vmatmul.mubr.bf16.vlgmr.msra.gmra.mrb[24].mxu1 %v7503_v4  ;;  %v7475_v1 = vmax.f32 %v10374_v18, 0.0  ;;  %v11327_v4 = vld [vmem:[#allocation15 + $0xb0] sm:$0xff]  }
 0xc2d   :  { %v10377_v31 = vadd.f32 %v7408_v60, %v13367_v15  ;;  %9793 = vmatpush3.bf16.msra.mxu1 %v11315_v39  ;;  %v7476_v16 = vmax.f32 %v10375_v8, 0.0 }
 0xc2e   :  { %v7477_v10 = vmax.f32 %v10376_v54, 0.0  ;;  %9794 = vmatprep.subr.bf16.mxu1 %v11316_v23 }
 0xc2f   :  { %v7478_v38 = vmax.f32 %v10377_v31, 0.0  ;;  %8311 = vmatmul.mubr.bf16.gmra.mrb[204].mxu0 %v13323_v24 }
 0xc30   :  { %v7505_v37 = vpack.c.bf16 %v7477_v10, %v7475_v1  ;;  %8320 = vmatprep.mubr.bf16.mxu0 %v13755_v51 }
 0xc31   :  { %v7506_v5 = vpack.c.bf16 %v7478_v38, %v7476_v16  ;;  %v7412_v41 = vpop.f32.mrb[0].mxu1  ;;  %9795 = vmatpush3.bf16.msra.mxu1 %v11317_v30 }
 0xc32   :  { %v10378_v49 = vadd.f32 %v7412_v41, %v13363_v3  ;;  %v7414_v19 = vpop.f32.mrb[1].mxu1  ;;  %9796 = vmatprep.subr.bf16.mxu1 %v11318_v47 }
 0xc33   :  { %v10379_v9 = vadd.f32 %v7414_v19, %v13367_v15  ;;  %v7416_v12 = vpop.f32.mrb[2].mxu1  ;;  %8574 = vmatprep.mubr.bf16.mxu1 %v7506_v5 }
 0xc34   :  { %v10380_v61 = vadd.f32 %v7416_v12, %v13363_v3  ;;  %v7418_v40 = vpop.f32.mrb[3].mxu1  ;;  %8575 = vmatmul.mubr.bf16.gmra.mrb[28].mxu1 %v7505_v37  ;;  %v7479_v22 = vmax.f32 %v10378_v49, 0.0 }
 0xc35   :  { %v10381_v24 = vadd.f32 %v7418_v40, %v13367_v15  ;;  %9797 = vmatpush3.bf16.msra.mxu1 %v11319_v53  ;;  %v7480_v7 = vmax.f32 %v10379_v9, 0.0 }
 0xc36   :  { %v7481_v55 = vmax.f32 %v10380_v61, 0.0  ;;  %9798 = vmatprep.subr.bf16.mxu1 %v11320_v34 }
 0xc37   :  { %v7482_v42 = vmax.f32 %v10381_v24, 0.0  ;;  %8321 = vmatmul.mubr.bf16.gmra.mrb[208].mxu0 %v13334_v46 }
 0xc38   :  { %v7507_v32 = vpack.c.bf16 %v7481_v55, %v7479_v22  ;;  %8330 = vmatprep.mubr.bf16.mxu0 %v13755_v51 }
 0xc39   :  { %v7508_v6 = vpack.c.bf16 %v7482_v42, %v7480_v7  ;;  %v7422_v14 = vpop.f32.mrb[4].mxu1  ;;  %9799 = vmatpush3.bf16.msra.mxu1 %v11321_v50 }
 0xc3a   :  { %v10382_v58 = vadd.f32 %v7422_v14, %v13363_v3  ;;  %v7424_v44 = vpop.f32.mrb[5].mxu1  ;;  %9800 = vmatprep.subr.bf16.mxu1 %v11322_v20 }
 0xc3b   :  { %v10383_v25 = vadd.f32 %v7424_v44, %v13367_v15  ;;  %v7426_v56 = vpop.f32.mrb[6].mxu1  ;;  %8582 = vmatprep.mubr.bf16.mxu1 %v7508_v6 }
 0xc3c   :  { %v10384_v57 = vadd.f32 %v7426_v56, %v13363_v3  ;;  %v7428_v33 = vpop.f32.mrb[7].mxu1  ;;  %8583 = vmatmul.mubr.bf16.gmra.mrb[32].mxu1 %v7507_v32  ;;  %v7483_v29 = vmax.f32 %v10382_v58, 0.0 }
 0xc3d   :  { %v10385_v46 = vadd.f32 %v7428_v33, %v13367_v15  ;;  %9801 = vmatpush3.bf16.msra.mxu1 %v11323_v45  ;;  %v7484_v35 = vmax.f32 %v10383_v25, 0.0 }
 0xc3e   :  { %v7485_v17 = vmax.f32 %v10384_v57, 0.0  ;;  %9802 = vmatprep.subr.bf16.mxu1 %v11324_v2 }
 0xc3f   :  { %v7486_v63 = vmax.f32 %v10385_v46, 0.0  ;;  %8331 = vmatmul.mubr.bf16.gmra.mrb[212].mxu0 %v13345_v21 }
 0xc40   :  { %v7509_v48 = vpack.c.bf16 %v7485_v17, %v7483_v29  ;;  %8340 = vmatprep.mubr.bf16.mxu0 %v13755_v51 }
 0xc41   :  { %v7510_v26 = vpack.c.bf16 %v7486_v63, %v7484_v35  ;;  %v7432_v28 = vpop.f32.mrb[8].mxu1  ;;  %9803 = vmatpush3.bf16.msra.mxu1 %v11325_v13  ;;  %v11328_v63 = vld [vmem:[#allocation15 + $0xf8] sm:$0xff]  }
 0xc42   :  { %v10386_v59 = vadd.f32 %v7432_v28, %v13363_v3  ;;  %v7434_v27 = vpop.f32.mrb[9].mxu1  ;;  %9804 = vmatprep.subr.bf16.mxu1 %v11326_v0  ;;  %v11333_v28 = vld [vmem:[%s13658_s10 + $0x8] sm:$0xff]  }
 0xc43   :  { %v10387_v39 = vadd.f32 %v7434_v27, %v13367_v15  ;;  %v7436_v18 = vpop.f32.mrb[10].mxu1  ;;  %8590 = vmatprep.mubr.bf16.mxu1 %v7510_v26  ;;  %v11332_v26 = vld [vmem:[%s13658_s10 + $0x48] sm:$0xff]   ;;  %v11336_v27 = vld [vmem:[%s13658_s10 + $0x58] sm:$0xff]  }
 0xc44   :  { %v10388_v43 = vadd.f32 %v7436_v18, %v13363_v3  ;;  %v7438_v23 = vpop.f32.mrb[11].mxu1  ;;  %8591 = vmatmul.mubr.bf16.gmra.mrb[36].mxu1 %v7509_v48  ;;  %v7487_v51 = vmax.f32 %v10386_v59, 0.0  ;;  %v11329_v48 = vld [vmem:[#allocation15 + $0xb8] sm:$0xff]   ;;  %v11338_v18 = vld [vmem:[%s13658_s10 + $0x60] sm:$0xff]  }
 0xc45   :  { %v10389_v21 = vadd.f32 %v7438_v23, %v13367_v15  ;;  %9805 = vmatpush3.bf16.msra.mxu1 %v11327_v4  ;;  %v7488_v62 = vmax.f32 %v10387_v39, 0.0  ;;  %v11334_v4 = vld [vmem:[%s13658_s10 + $0x50] sm:$0xff]   ;;  %v11337_v39 = vld [vmem:[%s13658_s10 + $0x18] sm:$0xff]   ;;  %v11340_v23 = vld [vmem:[%s13658_s10 + $0x68] sm:$0xff]  }
 0xc46   :  { %v7489_v8 = vmax.f32 %v10388_v43, 0.0  ;;  %9806 = vmatprep.subr.bf16.mxu1 %v11328_v63  ;;  %v11335_v59 = vld [vmem:[%s13658_s10 + $0x10] sm:$0xff]   ;;  %v11339_v43 = vld [vmem:[%s13658_s10 + $0x20] sm:$0xff]  }
 0xc47   :  { %v7490_v54 = vmax.f32 %v10389_v21, 0.0  ;;  %8341 = vmatmul.mubr.bf16.gmra.mrb[216].mxu0 %v13354_v11  ;;  %v11341_v21 = vld [vmem:[%s13658_s10 + $0x28] sm:$0xff]  }
 0xc48   :  { %v7511_v60 = vpack.c.bf16 %v7489_v8, %v7487_v51  ;;  %v11342_v51 = vld [vmem:[%s13658_s10 + $0x70] sm:$0xff]  }
 0xc49   :  { %v7512_v31 = vpack.c.bf16 %v7490_v54, %v7488_v62  ;;  %v7442_v30 = vpop.f32.mrb[12].mxu1  ;;  %9807 = vmatpush3.bf16.msra.mxu1 %v11329_v48  ;;  %v11343_v8 = vld [vmem:[%s13658_s10 + $0x30] sm:$0xff]  }
 0xc4a   :  { %v10390_v1 = vadd.f32 %v7442_v30, %v13363_v3  ;;  %v7444_v10 = vpop.f32.mrb[13].mxu1  ;;  %v7600_v62 = vld [vmem:[#allocation17 + $0x1c] sm:$0x3] }
 0xc4b   :  { %v10391_v47 = vadd.f32 %v7444_v10, %v13367_v15  ;;  %v7446_v16 = vpop.f32.mrb[14].mxu1  ;;  %8598 = vmatprep.mubr.bf16.mxu1 %v7512_v31  ;;  %v13454_v54 = vrot.slane %v7600_v62, %v11951_v36 }
 0xc4c   :  { %v10392_v38 = vadd.f32 %v7446_v16, %v13363_v3  ;;  %v7448_v37 = vpop.f32.mrb[15].mxu1  ;;  %8599 = vmatmul.mubr.bf16.gmra.mrb[40].mxu1 %v7511_v60  ;;  %v7491_v41 = vmax.f32 %v10390_v1, 0.0  ;;  %v13457_v60 = vrot.slane %v7600_v62, %v13768_v52 }
 0xc4d   :  { %v10393_v5 = vadd.f32 %v7448_v37, %v13367_v15  ;;  %v7492_v49 = vmax.f32 %v10391_v47, 0.0 }
 0xc4e   :  { %v7493_v53 = vmax.f32 %v10392_v38, 0.0 }
 0xc4f   :  { %v7494_v11 = vmax.f32 %v10393_v5, 0.0 }
 0xc50   :  { %v7513_v19 = vpack.c.bf16 %v7493_v53, %v7491_v41 }
 0xc51   :  { %v7514_v34 = vpack.c.bf16 %v7494_v11, %v7492_v49  ;;  %v7452_v9 = vpop.f32.mrb[16].mxu1 }
 0xc52   :  { %v10394_v12 = vadd.f32 %v7452_v9, %v13363_v3  ;;  %v7454_v61 = vpop.f32.mrb[17].mxu1 }
 0xc53   :  { %v10395_v40 = vadd.f32 %v7454_v61, %v13367_v15  ;;  %v7456_v24 = vpop.f32.mrb[18].mxu1  ;;  %8606 = vmatprep.mubr.bf16.mxu1 %v7514_v34 }
 0xc54   :  { %v10396_v50 = vadd.f32 %v7456_v24, %v13363_v3  ;;  %v7458_v22 = vpop.f32.mrb[19].mxu1  ;;  %8607 = vmatmul.mubr.bf16.gmra.mrb[44].mxu1 %v7513_v19  ;;  %v7495_v20 = vmax.f32 %v10394_v12, 0.0 }
 0xc55   :  { %v10397_v55 = vadd.f32 %v7458_v22, %v13367_v15  ;;  %v7496_v42 = vmax.f32 %v10395_v40, 0.0 }
 0xc56   :  { %v7497_v7 = vmax.f32 %v10396_v50, 0.0 }
 0xc57   :  { %v7498_v32 = vmax.f32 %v10397_v55, 0.0 }
 0xc58   :  { %v7515_v6 = vpack.c.bf16 %v7497_v7, %v7495_v20 }
 0xc59   :  { %v7516_v14 = vpack.c.bf16 %v7498_v32, %v7496_v42  ;;  %v7462_v45 = vpop.f32.mrb[20].mxu1 }
 0xc5a   :  { %v10398_v58 = vadd.f32 %v7462_v45, %v13363_v3  ;;  %v7464_v44 = vpop.f32.mrb[21].mxu1 }
 0xc5b   :  { %v10399_v2 = vadd.f32 %v7464_v44, %v13367_v15  ;;  %v7466_v25 = vpop.f32.mrb[22].mxu1  ;;  %8614 = vmatprep.mubr.bf16.mxu1 %v7516_v14 }
 0xc5c   :  { %v10400_v56 = vadd.f32 %v7466_v25, %v13363_v3  ;;  %v7468_v57 = vpop.f32.mrb[23].mxu1  ;;  %8615 = vmatmul.mubr.bf16.gmra.mrb[48].mxu1 %v7515_v6  ;;  %v7499_v46 = vmax.f32 %v10398_v58, 0.0  ;;  %v11330_v3 = vld [vmem:[%s13658_s10 + $0x40] sm:$0xff]  }
 0xc5d   :  { %v10401_v33 = vadd.f32 %v7468_v57, %v13367_v15  ;;  %v7500_v29 = vmax.f32 %v10399_v2, 0.0  ;;  %v11331_v15 = vld [vmem:[%s13658_s10] sm:$0xff]   ;;  %9856 = vmatprep.subr.bf16.mxu0 %v11330_v3 }
 0xc5e   :  { %v7501_v13 = vmax.f32 %v10400_v56, 0.0  ;;  %9857 = vmatpush3.bf16.msra.mxu0 %v11331_v15 }
 0xc5f   :  { %v7502_v17 = vmax.f32 %v10401_v33, 0.0  ;;  %9858 = vmatprep.subr.bf16.mxu0 %v11332_v26 }
 0xc60   :  { %v7517_v0 = vpack.c.bf16 %v7501_v13, %v7499_v46 }
 0xc61   :  { %v7518_v35 = vpack.c.bf16 %v7502_v17, %v7500_v29 }
 0xc62   :  { %9859 = vmatpush3.bf16.msra.mxu0 %v11333_v28 }
 0xc63   :  { %8622 = vmatprep.mubr.bf16.mxu1 %v7518_v35  ;;  %9860 = vmatprep.subr.bf16.mxu0 %v11334_v4 }
 0xc64   :  { %8623 = vmatmul.mubr.bf16.gmra.mrb[52].mxu1 %v7517_v0 }
 0xc66   :  { %9861 = vmatpush3.bf16.msra.mxu0 %v11335_v59 }
 0xc67   :  { %9862 = vmatprep.subr.bf16.mxu0 %v11336_v27 }
 0xc6a   :  { %9863 = vmatpush3.bf16.msra.mxu0 %v11337_v39 }
 0xc6b   :  { %9864 = vmatprep.subr.bf16.mxu0 %v11338_v18 }
 0xc6e   :  { %9865 = vmatpush3.bf16.msra.mxu0 %v11339_v43  ;;  %v13475_v43 = vld [vmem:[#allocation17 + $0x1e] ss:$0 sm:$0xff] }
 0xc6f   :  { %9866 = vmatprep.subr.bf16.mxu0 %v11340_v23 }
 0xc72   :  { %9867 = vmatpush3.bf16.msra.mxu0 %v11341_v21 }
 0xc73   :  { %9868 = vmatprep.subr.bf16.mxu0 %v11342_v51 }
 0xc76   :  { %9869 = vmatpush3.bf16.msra.mxu0 %v11343_v8 }
 0xce2   :  { %v8272_v31 = vpop.f32.mrb[188].mxu0 }
 0xce3   :  { %v10402_v30 = vadd.f32 %v8272_v31, %v13454_v54  ;;  %v8274_v1 = vpop.f32.mrb[189].mxu0 }
 0xce4   :  { %v10403_v10 = vadd.f32 %v8274_v1, %v13457_v60  ;;  %v8276_v47 = vpop.f32.mrb[190].mxu0 }
 0xce5   :  { %v10404_v16 = vadd.f32 %v8276_v47, %v13454_v54  ;;  %v8278_v38 = vpop.f32.mrb[191].mxu0  ;;  %v8351_v5 = vmax.f32 %v10402_v30, 0.0 }
 0xce6   :  { %v10405_v37 = vadd.f32 %v8278_v38, %v13457_v60  ;;  %v8352_v53 = vmax.f32 %v10403_v10, 0.0 }
 0xce7   :  { %v8353_v41 = vmax.f32 %v10404_v16, 0.0 }
 0xce8   :  { %v8354_v49 = vmax.f32 %v10405_v37, 0.0 }
 0xce9   :  { %v8383_v11 = vpack.c.bf16 %v8353_v41, %v8351_v5 }
 0xcea   :  { %v8384_v19 = vpack.c.bf16 %v8354_v49, %v8352_v53  ;;  %v8282_v52 = vpop.f32.mrb[192].mxu0 }
 0xceb   :  { %v10406_v34 = vadd.f32 %v8282_v52, %v13454_v54  ;;  %v8284_v9 = vpop.f32.mrb[193].mxu0 }
 0xcec   :  { %v10407_v12 = vadd.f32 %v8284_v9, %v13457_v60  ;;  %v8286_v61 = vpop.f32.mrb[194].mxu0  ;;  %8823 = vmatprep.mubr.bf16.mxu1 %v8384_v19 }
 0xced   :  { %v10408_v40 = vadd.f32 %v8286_v61, %v13454_v54  ;;  %v8288_v24 = vpop.f32.mrb[195].mxu0  ;;  %8824 = vmatmul.mubr.bf16.vlgmr.msra.gmra.mrb[56].mxu1 %v8383_v11  ;;  %v8355_v22 = vmax.f32 %v10406_v34, 0.0 }
 0xcee   :  { %v10409_v50 = vadd.f32 %v8288_v24, %v13457_v60  ;;  %v8356_v20 = vmax.f32 %v10407_v12, 0.0 }
 0xcef   :  { %v8357_v55 = vmax.f32 %v10408_v40, 0.0 }
 0xcf0   :  { %v8358_v7 = vmax.f32 %v10409_v50, 0.0 }
 0xcf1   :  { %v8385_v42 = vpack.c.bf16 %v8357_v55, %v8355_v22 }
 0xcf2   :  { %v8386_v32 = vpack.c.bf16 %v8358_v7, %v8356_v20  ;;  %v8292_v6 = vpop.f32.mrb[196].mxu0 }
 0xcf3   :  { %v10410_v14 = vadd.f32 %v8292_v6, %v13454_v54  ;;  %v8294_v45 = vpop.f32.mrb[197].mxu0 }
 0xcf4   :  { %v10411_v58 = vadd.f32 %v8294_v45, %v13457_v60  ;;  %v8296_v44 = vpop.f32.mrb[198].mxu0  ;;  %8831 = vmatprep.mubr.bf16.mxu1 %v8386_v32 }
 0xcf5   :  { %v10412_v2 = vadd.f32 %v8296_v44, %v13454_v54  ;;  %v8298_v25 = vpop.f32.mrb[199].mxu0  ;;  %8832 = vmatmul.mubr.bf16.gmra.mrb[60].mxu1 %v8385_v42  ;;  %v8359_v57 = vmax.f32 %v10410_v14, 0.0 }
 0xcf6   :  { %v10413_v56 = vadd.f32 %v8298_v25, %v13457_v60  ;;  %v8360_v46 = vmax.f32 %v10411_v58, 0.0 }
 0xcf7   :  { %v8361_v33 = vmax.f32 %v10412_v2, 0.0 }
 0xcf8   :  { %v8362_v13 = vmax.f32 %v10413_v56, 0.0 }
 0xcf9   :  { %v8387_v29 = vpack.c.bf16 %v8361_v33, %v8359_v57 }
 0xcfa   :  { %v8388_v17 = vpack.c.bf16 %v8362_v13, %v8360_v46  ;;  %v8302_v0 = vpop.f32.mrb[200].mxu0 }
 0xcfb   :  { %v10414_v35 = vadd.f32 %v8302_v0, %v13454_v54  ;;  %v8304_v63 = vpop.f32.mrb[201].mxu0 }
 0xcfc   :  { %v10415_v48 = vadd.f32 %v8304_v63, %v13457_v60  ;;  %v8306_v3 = vpop.f32.mrb[202].mxu0  ;;  %8839 = vmatprep.mubr.bf16.mxu1 %v8388_v17 }
 0xcfd   :  { %v10416_v15 = vadd.f32 %v8306_v3, %v13454_v54  ;;  %v8308_v26 = vpop.f32.mrb[203].mxu0  ;;  %8840 = vmatmul.mubr.bf16.gmra.mrb[64].mxu1 %v8387_v29  ;;  %v8363_v4 = vmax.f32 %v10414_v35, 0.0 }
 0xcfe   :  { %v10417_v28 = vadd.f32 %v8308_v26, %v13457_v60  ;;  %v8364_v39 = vmax.f32 %v10415_v48, 0.0 }
 0xcff   :  { %v8365_v59 = vmax.f32 %v10416_v15, 0.0  ;;  %v9744_v27 = vpop.f32.mrb[24].mxu1 }
 0xd00   :  { %v8366_v18 = vmax.f32 %v10417_v28, 0.0  ;;  %v9745_v23 = vpop.f32.mrb[25].mxu1 }
 0xd01   :  { %v8389_v21 = vpack.c.bf16 %v8365_v59, %v8363_v4  ;;  %v9746_v51 = vadd.f32 %v9745_v23, %v9744_v27  ;;  %v9747_v8 = vpop.f32.mrb[26].mxu1 }
 0xd02   :  { %v8390_v62 = vpack.c.bf16 %v8366_v18, %v8364_v39  ;;  %v8312_v31 = vpop.f32.mrb[204].mxu0  ;;  %v9748_v30 = vpop.f32.mrb[27].mxu1 }
 0xd03   :  { %v8569_v1 = vadd.f32 %v9746_v51, %v13475_v43  ;;  %v10418_v10 = vadd.f32 %v8312_v31, %v13454_v54  ;;  %v9749_v47 = vadd.f32 %v9748_v30, %v9747_v8  ;;  %v8314_v16 = vpop.f32.mrb[205].mxu0 }
 0xd04   :  { %v10419_v38 = vadd.f32 %v8314_v16, %v13457_v60  ;;  %v8316_v37 = vpop.f32.mrb[206].mxu0  ;;  %8847 = vmatprep.mubr.bf16.mxu1 %v8390_v62 }
 0xd05   :  { %v8572_v5 = vadd.f32 %v9749_v47, %v13475_v43  ;;  %v10420_v41 = vadd.f32 %v8316_v37, %v13454_v54  ;;  %v8318_v53 = vpop.f32.mrb[207].mxu0  ;;  %8848 = vmatmul.mubr.bf16.gmra.mrb[68].mxu1 %v8389_v21  ;;  %v8631_v11 = vmax.f32 %v8569_v1, 0.0  ;;  %v8367_v19 = vmax.f32 %v10418_v10, 0.0 }
 0xd06   :  { %v10421_v49 = vadd.f32 %v8318_v53, %v13457_v60  ;;  %v8368_v12 = vmax.f32 %v10419_v38, 0.0 }
 0xd07   :  { %v8632_v52 = vmax.f32 %v8572_v5, 0.0  ;;  %v8369_v34 = vmax.f32 %v10420_v41, 0.0  ;;  %v9750_v9 = vpop.f32.mrb[28].mxu1 }
 0xd08   :  { %v8370_v61 = vmax.f32 %v10421_v49, 0.0  ;;  %v9751_v40 = vpop.f32.mrb[29].mxu1 }
 0xd09   :  { %v13483_v24 = vpack.c.bf16 %v8632_v52, %v8631_v11  ;;  %v8391_v50 = vpack.c.bf16 %v8369_v34, %v8367_v19  ;;  %v9752_v22 = vadd.f32 %v9751_v40, %v9750_v9  ;;  %v9753_v55 = vpop.f32.mrb[30].mxu1 }
 0xd0a   :  { %v8392_v20 = vpack.c.bf16 %v8370_v61, %v8368_v12  ;;  %v8322_v7 = vpop.f32.mrb[208].mxu0  ;;  %v9754_v42 = vpop.f32.mrb[31].mxu1 }
 0xd0b   :  { %v8577_v32 = vadd.f32 %v9752_v22, %v13475_v43  ;;  %v10422_v6 = vadd.f32 %v8322_v7, %v13454_v54  ;;  %v9755_v14 = vadd.f32 %v9754_v42, %v9753_v55  ;;  %v8324_v45 = vpop.f32.mrb[209].mxu0 }
 0xd0c   :  { %v10423_v58 = vadd.f32 %v8324_v45, %v13457_v60  ;;  %v8326_v44 = vpop.f32.mrb[210].mxu0  ;;  %8855 = vmatprep.mubr.bf16.mxu1 %v8392_v20 }
 0xd0d   :  { %v8580_v2 = vadd.f32 %v9755_v14, %v13475_v43  ;;  %v10424_v25 = vadd.f32 %v8326_v44, %v13454_v54  ;;  %v8328_v56 = vpop.f32.mrb[211].mxu0  ;;  %8856 = vmatmul.mubr.bf16.gmra.mrb[72].mxu1 %v8391_v50  ;;  %v8633_v33 = vmax.f32 %v8577_v32, 0.0  ;;  %v8371_v46 = vmax.f32 %v10422_v6, 0.0 }
 0xd0e   :  { %v10425_v57 = vadd.f32 %v8328_v56, %v13457_v60  ;;  %v8372_v0 = vmax.f32 %v10423_v58, 0.0 }
 0xd0f   :  { %v8634_v13 = vmax.f32 %v8580_v2, 0.0  ;;  %v8373_v29 = vmax.f32 %v10424_v25, 0.0  ;;  %v9756_v17 = vpop.f32.mrb[32].mxu1 }
 0xd10   :  { %v8374_v35 = vmax.f32 %v10425_v57, 0.0  ;;  %v9757_v63 = vpop.f32.mrb[33].mxu1 }
 0xd11   :  { %v8393_v48 = vpack.c.bf16 %v8373_v29, %v8371_v46  ;;  %v9758_v3 = vadd.f32 %v9757_v63, %v9756_v17  ;;  %v9759_v15 = vpop.f32.mrb[34].mxu1  ;;  %v13491_v26 = vpack.c.bf16 %v8634_v13, %v8633_v33 }
 0xd12   :  { %v8394_v28 = vpack.c.bf16 %v8374_v35, %v8372_v0  ;;  %v8332_v4 = vpop.f32.mrb[212].mxu0  ;;  %v9760_v59 = vpop.f32.mrb[35].mxu1 }
 0xd13   :  { %v8585_v27 = vadd.f32 %v9758_v3, %v13475_v43  ;;  %v10426_v39 = vadd.f32 %v8332_v4, %v13454_v54  ;;  %v9761_v18 = vadd.f32 %v9760_v59, %v9759_v15  ;;  %v8334_v23 = vpop.f32.mrb[213].mxu0 }
 0xd14   :  { %v10427_v21 = vadd.f32 %v8334_v23, %v13457_v60  ;;  %v8336_v51 = vpop.f32.mrb[214].mxu0  ;;  %8863 = vmatprep.mubr.bf16.mxu1 %v8394_v28 }
 0xd15   :  { %v8588_v8 = vadd.f32 %v9761_v18, %v13475_v43  ;;  %v10428_v62 = vadd.f32 %v8336_v51, %v13454_v54  ;;  %v8338_v31 = vpop.f32.mrb[215].mxu0  ;;  %8864 = vmatmul.mubr.bf16.gmra.mrb[76].mxu1 %v8393_v48  ;;  %v8635_v1 = vmax.f32 %v8585_v27, 0.0  ;;  %v8375_v10 = vmax.f32 %v10426_v39, 0.0 }
 0xd16   :  { %v10429_v30 = vadd.f32 %v8338_v31, %v13457_v60  ;;  %v8376_v37 = vmax.f32 %v10427_v21, 0.0 }
 0xd17   :  { %v8636_v47 = vmax.f32 %v8588_v8, 0.0  ;;  %v8377_v16 = vmax.f32 %v10428_v62, 0.0  ;;  %v9762_v38 = vpop.f32.mrb[36].mxu1 }
 0xd18   :  { %v8378_v5 = vmax.f32 %v10429_v30, 0.0  ;;  %v9763_v41 = vpop.f32.mrb[37].mxu1 }
 0xd19   :  { %v8395_v53 = vpack.c.bf16 %v8377_v16, %v8375_v10  ;;  %v9764_v49 = vadd.f32 %v9763_v41, %v9762_v38  ;;  %v9765_v11 = vpop.f32.mrb[38].mxu1  ;;  %v13499_v19 = vpack.c.bf16 %v8636_v47, %v8635_v1 }
 0xd1a   :  { %v8396_v52 = vpack.c.bf16 %v8378_v5, %v8376_v37  ;;  %v8342_v34 = vpop.f32.mrb[216].mxu0  ;;  %v9766_v9 = vpop.f32.mrb[39].mxu1 }
 0xd1b   :  { %v8593_v12 = vadd.f32 %v9764_v49, %v13475_v43  ;;  %v10430_v61 = vadd.f32 %v8342_v34, %v13454_v54  ;;  %v9767_v40 = vadd.f32 %v9766_v9, %v9765_v11  ;;  %v8344_v50 = vpop.f32.mrb[217].mxu0 }
 0xd1c   :  { %v10431_v22 = vadd.f32 %v8344_v50, %v13457_v60  ;;  %v8346_v55 = vpop.f32.mrb[218].mxu0  ;;  %8871 = vmatprep.mubr.bf16.mxu1 %v8396_v52 }
 0xd1d   :  { %v8596_v20 = vadd.f32 %v9767_v40, %v13475_v43  ;;  %v10432_v7 = vadd.f32 %v8346_v55, %v13454_v54  ;;  %v8348_v42 = vpop.f32.mrb[219].mxu0  ;;  %8872 = vmatmul.mubr.bf16.gmra.mrb[80].mxu1 %v8395_v53  ;;  %v8637_v6 = vmax.f32 %v8593_v12, 0.0  ;;  %v8379_v14 = vmax.f32 %v10430_v61, 0.0  ;;  %v11345_v55 = vld [vmem:[%s13658_s10 + $0x38] sm:$0xff]  }
 0xd1e   :  { %v10433_v32 = vadd.f32 %v8348_v42, %v13457_v60  ;;  %v8380_v2 = vmax.f32 %v10431_v22, 0.0  ;;  %v11344_v22 = vld [vmem:[%s13658_s10 + $0x78] sm:$0xff]  }
 0xd1f   :  { %v8638_v45 = vmax.f32 %v8596_v20, 0.0  ;;  %v8381_v58 = vmax.f32 %v10432_v7, 0.0  ;;  %v9768_v44 = vpop.f32.mrb[40].mxu1  ;;  %9870 = vmatprep.subr.bf16.mxu0 %v11344_v22  ;;  %v13531_v7 = vld [vmem:[#allocation17 + $0x1f] ss:$0 sm:$0xff] }
 0xd20   :  { %v8382_v25 = vmax.f32 %v10433_v32, 0.0  ;;  %v9769_v56 = vpop.f32.mrb[41].mxu1  ;;  %9871 = vmatpush3.bf16.msra.mxu0 %v11345_v55 }
 0xd21   :  { %v8397_v57 = vpack.c.bf16 %v8381_v58, %v8379_v14  ;;  %v9770_v33 = vadd.f32 %v9769_v56, %v9768_v44  ;;  %v9771_v46 = vpop.f32.mrb[42].mxu1  ;;  %v13507_v13 = vpack.c.bf16 %v8638_v45, %v8637_v6 }
 0xd22   :  { %v8398_v29 = vpack.c.bf16 %v8382_v25, %v8380_v2  ;;  %v9772_v17 = vpop.f32.mrb[43].mxu1 }
 0xd23   :  { %v8601_v54 = vadd.f32 %v9770_v33, %v13475_v43  ;;  %v9773_v0 = vadd.f32 %v9772_v17, %v9771_v46 }
 0xd24   :  { %8879 = vmatprep.mubr.bf16.mxu1 %v8398_v29 }
 0xd25   :  { %v8604_v60 = vadd.f32 %v9773_v0, %v13475_v43  ;;  %8880 = vmatmul.mubr.bf16.gmra.mrb[84].mxu1 %v8397_v57  ;;  %v8639_v35 = vmax.f32 %v8601_v54, 0.0 }
 0xd27   :  { %v8640_v63 = vmax.f32 %v8604_v60, 0.0  ;;  %v9774_v48 = vpop.f32.mrb[44].mxu1 }
 0xd28   :  { %v9775_v3 = vpop.f32.mrb[45].mxu1 }
 0xd29   :  { %v9776_v15 = vadd.f32 %v9775_v3, %v9774_v48  ;;  %v9777_v28 = vpop.f32.mrb[46].mxu1  ;;  %v13511_v4 = vpack.c.bf16 %v8640_v63, %v8639_v35 }
 0xd2a   :  { %v9778_v59 = vpop.f32.mrb[47].mxu1 }
 0xd2b   :  { %v8609_v27 = vadd.f32 %v9776_v15, %v13475_v43  ;;  %v9779_v39 = vadd.f32 %v9778_v59, %v9777_v28 }
 0xd2d   :  { %v8612_v18 = vadd.f32 %v9779_v39, %v13475_v43  ;;  %v8641_v23 = vmax.f32 %v8609_v27, 0.0 }
 0xd2f   :  { %v8642_v21 = vmax.f32 %v8612_v18, 0.0  ;;  %v9780_v51 = vpop.f32.mrb[48].mxu1 }
 0xd30   :  { %v9781_v8 = vpop.f32.mrb[49].mxu1 }
 0xd31   :  { %v9782_v62 = vadd.f32 %v9781_v8, %v9780_v51  ;;  %v9783_v31 = vpop.f32.mrb[50].mxu1  ;;  %v13515_v30 = vpack.c.bf16 %v8642_v21, %v8641_v23 }
 0xd32   :  { %v9784_v1 = vpop.f32.mrb[51].mxu1 }
 0xd33   :  { %v8617_v10 = vadd.f32 %v9782_v62, %v13475_v43  ;;  %v9785_v47 = vadd.f32 %v9784_v1, %v9783_v31 }
 0xd35   :  { %v8620_v16 = vadd.f32 %v9785_v47, %v13475_v43  ;;  %v8643_v38 = vmax.f32 %v8617_v10, 0.0 }
 0xd37   :  { %v8644_v37 = vmax.f32 %v8620_v16, 0.0  ;;  %v9786_v5 = vpop.f32.mrb[52].mxu1 }
 0xd38   :  { %v9787_v41 = vpop.f32.mrb[53].mxu1 }
 0xd39   :  { %v9788_v53 = vadd.f32 %v9787_v41, %v9786_v5  ;;  %v9789_v49 = vpop.f32.mrb[54].mxu1  ;;  %v13519_v11 = vpack.c.bf16 %v8644_v37, %v8643_v38 }
 0xd3a   :  { %v9790_v52 = vpop.f32.mrb[55].mxu1 }
 0xd3b   :  { %v8625_v34 = vadd.f32 %v9788_v53, %v13475_v43  ;;  %v9791_v9 = vadd.f32 %v9790_v52, %v9789_v49 }
 0xd3d   :  { %v8628_v12 = vadd.f32 %v9791_v9, %v13475_v43  ;;  %v8645_v61 = vmax.f32 %v8625_v34, 0.0 }
 0xd3f   :  { %v8646_v40 = vmax.f32 %v8628_v12, 0.0 }
 0xd41   :  { %v13523_v50 = vpack.c.bf16 %v8646_v40, %v8645_v61 }
 0xdc0   :  { %v9808_v20 = vpop.f32.mrb[56].mxu1 }
 0xdc1   :  { %v9809_v42 = vpop.f32.mrb[57].mxu1 }
 0xdc2   :  { %v9810_v32 = vadd.f32 %v9809_v42, %v9808_v20  ;;  %v9811_v43 = vpop.f32.mrb[58].mxu1 }
 0xdc3   :  { %v9812_v6 = vpop.f32.mrb[59].mxu1 }
 0xdc4   :  { %v8826_v14 = vadd.f32 %v9810_v32, %v13531_v7  ;;  %v9813_v45 = vadd.f32 %v9812_v6, %v9811_v43 }
 0xdc6   :  { %v8829_v58 = vadd.f32 %v9813_v45, %v13531_v7  ;;  %v8888_v44 = vmax.f32 %v8826_v14, 0.0 }
 0xdc8   :  { %v8889_v2 = vmax.f32 %v8829_v58, 0.0  ;;  %v9814_v25 = vpop.f32.mrb[60].mxu1 }
 0xdc9   :  { %v9815_v56 = vpop.f32.mrb[61].mxu1 }
 0xdca   :  { %v9816_v57 = vadd.f32 %v9815_v56, %v9814_v25  ;;  %v9817_v33 = vpop.f32.mrb[62].mxu1  ;;  %v8904_v46 = vpack.c.bf16 %v8889_v2, %v8888_v44 }
 0xdcb   :  { %v9818_v29 = vpop.f32.mrb[63].mxu1 }
 0xdcc   :  { %v8834_v17 = vadd.f32 %v9816_v57, %v13531_v7  ;;  %v9819_v54 = vadd.f32 %v9818_v29, %v9817_v33  ;;  %9079 = vmatprep.mubr.bf16.mxu0 %v8904_v46 }
 0xdcd   :  { %9080 = vmatmul.mubr.bf16.vlgmr.msra.gmra.mrb[220].mxu0 %v13483_v24 }
 0xdce   :  { %v8837_v0 = vadd.f32 %v9819_v54, %v13531_v7  ;;  %v8890_v60 = vmax.f32 %v8834_v17, 0.0 }
 0xdd0   :  { %v8891_v35 = vmax.f32 %v8837_v0, 0.0  ;;  %v9820_v63 = vpop.f32.mrb[64].mxu1 }
 0xdd1   :  { %v9821_v48 = vpop.f32.mrb[65].mxu1 }
 0xdd2   :  { %v9822_v3 = vadd.f32 %v9821_v48, %v9820_v63  ;;  %v9823_v15 = vpop.f32.mrb[66].mxu1  ;;  %v8905_v28 = vpack.c.bf16 %v8891_v35, %v8890_v60 }
 0xdd3   :  { %v9824_v59 = vpop.f32.mrb[67].mxu1 }
 0xdd4   :  { %v8842_v27 = vadd.f32 %v9822_v3, %v13531_v7  ;;  %v9825_v39 = vadd.f32 %v9824_v59, %v9823_v15  ;;  %9087 = vmatprep.mubr.bf16.mxu0 %v8905_v28 }
 0xdd5   :  { %9088 = vmatmul.mubr.bf16.gmra.mrb[224].mxu0 %v13491_v26 }
 0xdd6   :  { %v8845_v18 = vadd.f32 %v9825_v39, %v13531_v7  ;;  %v8892_v23 = vmax.f32 %v8842_v27, 0.0  ;;  %v9144_v39 = vld [vmem:[%s13659_s11] sm:$0xff] }
 0xdd8   :  { %v8893_v24 = vmax.f32 %v8845_v18, 0.0  ;;  %v9826_v21 = vpop.f32.mrb[68].mxu1  ;;  %v9145_v18 = vld [vmem:[%s13659_s11 + $0x8] sm:$0xff] }
 0xdd9   :  { %v9827_v51 = vpop.f32.mrb[69].mxu1 }
 0xdda   :  { %v9828_v8 = vadd.f32 %v9827_v51, %v9826_v21  ;;  %v9829_v62 = vpop.f32.mrb[70].mxu1  ;;  %v8906_v31 = vpack.c.bf16 %v8893_v24, %v8892_v23  ;;  %v11592_v23 = vmov 0.0|0.0   ;;  %v9147_v24 = vld [vmem:[%s13659_s11 + $0x18] sm:$0xff]  ;;  %v9148_v51 = vld [vmem:[%s13659_s11 + $0x20] sm:$0xff] }
 0xddb   :  { %v9830_v1 = vpop.f32.mrb[71].mxu1  ;;  %10058 = vmatprep.subr.bf16.mxu0 %v11592_v23 }
 0xddc   :  { %v8850_v10 = vadd.f32 %v9828_v8, %v13531_v7  ;;  %v9831_v47 = vadd.f32 %v9830_v1, %v9829_v62  ;;  %9095 = vmatprep.mubr.bf16.mxu0 %v8906_v31  ;;  %v9149_v8 = vld [vmem:[%s13659_s11 + $0x28] sm:$0xff]  ;;  %v9150_v31 = vld [vmem:[%s13659_s11 + $0x30] sm:$0xff]  ;;  %v9151_v1 = vld [vmem:[%s13659_s11 + $0x38] sm:$0xff] }
 0xddd   :  { %9096 = vmatmul.mubr.bf16.gmra.mrb[228].mxu0 %v13499_v19  ;;  %v10065_v62 = vpack.c.bf16 %v9149_v8, %v9148_v51 }
 0xdde   :  { %v8853_v16 = vadd.f32 %v9831_v47, %v13531_v7  ;;  %v8894_v38 = vmax.f32 %v8850_v10, 0.0  ;;  %v10068_v10 = vpack.c.bf16 %v9151_v1, %v9150_v31  ;;  %v9152_v47 = vld [vmem:[%s13659_s11 + $0x40] sm:$0xff] }
 0xde0   :  { %v8895_v26 = vmax.f32 %v8853_v16, 0.0  ;;  %v9832_v37 = vpop.f32.mrb[72].mxu1  ;;  %v9153_v16 = vld [vmem:[%s13659_s11 + $0x48] sm:$0xff] }
 0xde1   :  { %v9833_v5 = vpop.f32.mrb[73].mxu1 }
 0xde2   :  { %v9834_v41 = vadd.f32 %v9833_v5, %v9832_v37  ;;  %v9835_v53 = vpop.f32.mrb[74].mxu1  ;;  %v8907_v49 = vpack.c.bf16 %v8895_v26, %v8894_v38  ;;  %v10071_v38 = vpack.c.bf16 %v9153_v16, %v9152_v47  ;;  %v9154_v26 = vld [vmem:[%s13659_s11 + $0x50] sm:$0xff]  ;;  %v9155_v37 = vld [vmem:[%s13659_s11 + $0x58] sm:$0xff] }
 0xde3   :  { %v9836_v52 = vpop.f32.mrb[75].mxu1  ;;  %v10074_v5 = vpack.c.bf16 %v9155_v37, %v9154_v26 }
 0xde4   :  { %v8858_v34 = vadd.f32 %v9834_v41, %v13531_v7  ;;  %v9837_v9 = vadd.f32 %v9836_v52, %v9835_v53  ;;  %9103 = vmatprep.mubr.bf16.mxu0 %v8907_v49  ;;  %v9156_v41 = vld [vmem:[%s13659_s11 + $0x60] sm:$0xff]  ;;  %v9157_v53 = vld [vmem:[%s13659_s11 + $0x68] sm:$0xff]  ;;  %v9158_v52 = vld [vmem:[%s13659_s11 + $0x70] sm:$0xff] }
 0xde5   :  { %9104 = vmatmul.mubr.bf16.gmra.mrb[232].mxu0 %v13507_v13  ;;  %v10077_v49 = vpack.c.bf16 %v9157_v53, %v9156_v41 }
 0xde6   :  { %v8861_v12 = vadd.f32 %v9837_v9, %v13531_v7  ;;  %v8896_v61 = vmax.f32 %v8858_v34, 0.0  ;;  %v9159_v34 = vld [vmem:[%s13659_s11 + $0x78] sm:$0xff] }
 0xde7   :  { %v10080_v9 = vpack.c.bf16 %v9159_v34, %v9158_v52 }
 0xde8   :  { %v8897_v19 = vmax.f32 %v8861_v12, 0.0  ;;  %v9838_v40 = vpop.f32.mrb[76].mxu1 }
 0xde9   :  { %v9839_v22 = vpop.f32.mrb[77].mxu1 }
 0xdea   :  { %v9840_v55 = vadd.f32 %v9839_v22, %v9838_v40  ;;  %v9841_v20 = vpop.f32.mrb[78].mxu1  ;;  %v8908_v42 = vpack.c.bf16 %v8897_v19, %v8896_v61  ;;  %v13605_v19 = vld [vmem:[#allocation17 + $0x20] ss:$0 sm:$0xff] }
 0xdeb   :  { %v9842_v32 = vpop.f32.mrb[79].mxu1 }
 0xdec   :  { %v8866_v43 = vadd.f32 %v9840_v55, %v13531_v7  ;;  %v9843_v6 = vadd.f32 %v9842_v32, %v9841_v20  ;;  %9111 = vmatprep.mubr.bf16.mxu0 %v8908_v42 }
 0xded   :  { %9112 = vmatmul.mubr.bf16.gmra.mrb[236].mxu0 %v13511_v4 }
 0xdee   :  { %v8869_v14 = vadd.f32 %v9843_v6, %v13531_v7  ;;  %v8898_v45 = vmax.f32 %v8866_v43, 0.0 }
 0xdf0   :  { %v8899_v13 = vmax.f32 %v8869_v14, 0.0  ;;  %v9844_v58 = vpop.f32.mrb[80].mxu1 }
 0xdf1   :  { %v9845_v44 = vpop.f32.mrb[81].mxu1 }
 0xdf2   :  { %v9846_v2 = vadd.f32 %v9845_v44, %v9844_v58  ;;  %v9847_v25 = vpop.f32.mrb[82].mxu1  ;;  %v8909_v56 = vpack.c.bf16 %v8899_v13, %v8898_v45 }
 0xdf3   :  { %v9848_v57 = vpop.f32.mrb[83].mxu1 }
 0xdf4   :  { %v8874_v33 = vadd.f32 %v9846_v2, %v13531_v7  ;;  %v9849_v46 = vadd.f32 %v9848_v57, %v9847_v25  ;;  %9119 = vmatprep.mubr.bf16.mxu0 %v8909_v56 }
 0xdf5   :  { %9120 = vmatmul.mubr.bf16.gmra.mrb[240].mxu0 %v13515_v30 }
 0xdf6   :  { %v8877_v29 = vadd.f32 %v9849_v46, %v13531_v7  ;;  %v8900_v17 = vmax.f32 %v8874_v33, 0.0 }
 0xdf8   :  { %v8901_v4 = vmax.f32 %v8877_v29, 0.0  ;;  %v9850_v54 = vpop.f32.mrb[84].mxu1 }
 0xdf9   :  { %v9851_v0 = vpop.f32.mrb[85].mxu1 }
 0xdfa   :  { %v9852_v60 = vadd.f32 %v9851_v0, %v9850_v54  ;;  %v9853_v35 = vpop.f32.mrb[86].mxu1  ;;  %v8910_v63 = vpack.c.bf16 %v8901_v4, %v8900_v17 }
 0xdfb   :  { %v9854_v48 = vpop.f32.mrb[87].mxu1 }
 0xdfc   :  { %v8882_v3 = vadd.f32 %v9852_v60, %v13531_v7  ;;  %v9855_v15 = vadd.f32 %v9854_v48, %v9853_v35  ;;  %9127 = vmatprep.mubr.bf16.mxu0 %v8910_v63 }
 0xdfd   :  { %9128 = vmatmul.mubr.bf16.gmra.mrb[244].mxu0 %v13519_v11  ;;  %v9146_v11 = vld [vmem:[%s13659_s11 + $0x10] sm:$0xff]  ;;  %s11595_s11 = smov 125  }
 0xdfe   :  { %v8885_v28 = vadd.f32 %v9855_v15, %v13531_v7  ;;  %v8902_v59 = vmax.f32 %v8882_v3, 0.0  ;;  %v10059_v7 = vpack.c.bf16 %v9145_v18, %v9144_v39  ;;  %v10062_v21 = vpack.c.bf16 %v9147_v24, %v9146_v11 }
 0xe00   :  { %v8903_v30 = vmax.f32 %v8885_v28, 0.0  ;;  %10060 = vmatpush3.bf16.msra.mxu0 %v10059_v7 }
 0xe01   :  { %10061 = vmatprep.subr.bf16.mxu0 %v11592_v23 }
 0xe02   :  { %v8911_v27 = vpack.c.bf16 %v8903_v30, %v8902_v59 }
 0xe04   :  { %9135 = vmatprep.mubr.bf16.mxu0 %v8911_v27  ;;  %10063 = vmatpush3.bf16.msra.mxu0 %v10062_v21 }
 0xe05   :  { %9136 = vmatmul.mubr.bf16.gmra.mrb[248].mxu0 %v13523_v50  ;;  %v11594_v50 = vmov 0.0   ;;  %10064 = vmatprep.subr.bf16.mxu0 %v11592_v23 }
 0xe06   :  { %10055 = vmatprep.mubr.msk.f32.mxu0 %vm11593_vm4, %v11594_v50 }
 0xe08   :  { %10066 = vmatpush3.bf16.msra.mxu0 %v10065_v62 }
 0xe09   :  { %10067 = vmatprep.subr.bf16.mxu0 %v11592_v23 }
 0xe0c   :  { %10069 = vmatpush3.bf16.msra.mxu0 %v10068_v10 }
 0xe0d   :  { %10070 = vmatprep.subr.bf16.mxu0 %v11592_v23 }
 0xe10   :  { %10072 = vmatpush3.bf16.msra.mxu0 %v10071_v38 }
 0xe11   :  { %10073 = vmatprep.subr.bf16.mxu0 %v11592_v23 }
 0xe14   :  { %10075 = vmatpush3.bf16.msra.mxu0 %v10074_v5 }
 0xe15   :  { %10076 = vmatprep.subr.bf16.mxu0 %v11592_v23 }
 0xe18   :  { %10078 = vmatpush3.bf16.msra.mxu0 %v10077_v49 }
 0xe19   :  { %10079 = vmatprep.subr.bf16.mxu0 %v11592_v23 }
 0xe1c   :  { %10081 = vmatpush3.bf16.msra.mxu0 %v10080_v9 }
 0xea0   :  { %v9872_v12 = vpop.f32.mrb[220].mxu0 }
 0xea1   :  { %v9873_v61 = vpop.f32.mrb[221].mxu0 }
 0xea2   :  { %v9874_v40 = vadd.f32 %v9873_v61, %v9872_v12  ;;  %v9875_v22 = vpop.f32.mrb[222].mxu0 }
 0xea3   :  { %v9876_v55 = vpop.f32.mrb[223].mxu0 }
 0xea4   :  { %v9877_v20 = vadd.f32 %v9876_v55, %v9875_v22  ;;  %v9082_v42 = vadd.f32 %v9874_v40, %v13605_v19 }
 0xea6   :  { %9160 = vxpose.xlu0.b32.start [1/16] (narrow) %v9082_v42, 8  ;;  %v9085_v43 = vadd.f32 %v9877_v20, %v13605_v19  ;;  %v9262_v42 = vld [vmem:[#allocation17 + $0x21] sm:$0x1] }
 0xea8   :  { %v9878_v32 = vpop.f32.mrb[224].mxu0 }
 0xea9   :  { %v9879_v6 = vpop.f32.mrb[225].mxu0 }
 0xeaa   :  { %v9880_v14 = vadd.f32 %v9879_v6, %v9878_v32  ;;  %v9881_v45 = vpop.f32.mrb[226].mxu0  ;;  %9161 = vxpose.xlu0.b32.cont [2/16] (narrow) %v9085_v43, 8  ;;  %v9294_v43 = vrot.slane %v9262_v42, %v11951_v36 }
 0xeab   :  { %v9882_v13 = vpop.f32.mrb[227].mxu0 }
 0xeac   :  { %v9883_v58 = vadd.f32 %v9882_v13, %v9881_v45  ;;  %v9090_v44 = vadd.f32 %v9880_v14, %v13605_v19 }
 0xeae   :  { %9162 = vxpose.xlu0.b32.cont [3/16] (narrow) %v9090_v44, 8  ;;  %v9093_v25 = vadd.f32 %v9883_v58, %v13605_v19 }
 0xeb0   :  { %v9884_v2 = vpop.f32.mrb[228].mxu0 }
 0xeb1   :  { %v9885_v56 = vpop.f32.mrb[229].mxu0 }
 0xeb2   :  { %v9886_v57 = vadd.f32 %v9885_v56, %v9884_v2  ;;  %v9887_v33 = vpop.f32.mrb[230].mxu0  ;;  %9163 = vxpose.xlu0.b32.cont [4/16] (narrow) %v9093_v25, 8 }
 0xeb3   :  { %v9888_v46 = vpop.f32.mrb[231].mxu0 }
 0xeb4   :  { %v9889_v29 = vadd.f32 %v9888_v46, %v9887_v33  ;;  %v9098_v17 = vadd.f32 %v9886_v57, %v13605_v19 }
 0xeb6   :  { %9164 = vxpose.xlu0.b32.cont [5/16] (narrow) %v9098_v17, 8  ;;  %v9101_v54 = vadd.f32 %v9889_v29, %v13605_v19 }
 0xeb8   :  { %v9890_v4 = vpop.f32.mrb[232].mxu0 }
 0xeb9   :  { %v9891_v0 = vpop.f32.mrb[233].mxu0 }
 0xeba   :  { %v9892_v60 = vadd.f32 %v9891_v0, %v9890_v4  ;;  %v9893_v35 = vpop.f32.mrb[234].mxu0  ;;  %9165 = vxpose.xlu0.b32.cont [6/16] (narrow) %v9101_v54, 8 }
 0xebb   :  { %v9894_v63 = vpop.f32.mrb[235].mxu0 }
 0xebc   :  { %v9895_v48 = vadd.f32 %v9894_v63, %v9893_v35  ;;  %v9106_v3 = vadd.f32 %v9892_v60, %v13605_v19 }
 0xebe   :  { %9166 = vxpose.xlu0.b32.cont [7/16] (narrow) %v9106_v3, 8  ;;  %v9109_v28 = vadd.f32 %v9895_v48, %v13605_v19 }
 0xec0   :  { %v9896_v15 = vpop.f32.mrb[236].mxu0 }
 0xec1   :  { %v9897_v59 = vpop.f32.mrb[237].mxu0 }
 0xec2   :  { %v9898_v30 = vadd.f32 %v9897_v59, %v9896_v15  ;;  %v9899_v27 = vpop.f32.mrb[238].mxu0  ;;  %9167 = vxpose.xlu0.b32.cont [8/16] (narrow) %v9109_v28, 8 }
 0xec3   :  { %v9900_v39 = vpop.f32.mrb[239].mxu0 }
 0xec4   :  { %v9901_v18 = vadd.f32 %v9900_v39, %v9899_v27  ;;  %v9114_v11 = vadd.f32 %v9898_v30, %v13605_v19 }
 0xec6   :  { %9168 = vxpose.xlu0.b32.cont [9/16] (narrow) %v9114_v11, 8  ;;  %v9117_v7 = vadd.f32 %v9901_v18, %v13605_v19 }
 0xec8   :  { %v9902_v23 = vpop.f32.mrb[240].mxu0 }
 0xec9   :  { %v9903_v24 = vpop.f32.mrb[241].mxu0 }
 0xeca   :  { %v9904_v50 = vadd.f32 %v9903_v24, %v9902_v23  ;;  %v9905_v21 = vpop.f32.mrb[242].mxu0  ;;  %9169 = vxpose.xlu0.b32.cont [10/16] (narrow) %v9117_v7, 8 }
 0xecb   :  { %v9906_v51 = vpop.f32.mrb[243].mxu0 }
 0xecc   :  { %v9907_v8 = vadd.f32 %v9906_v51, %v9905_v21  ;;  %v9122_v62 = vadd.f32 %v9904_v50, %v13605_v19 }
 0xece   :  { %9170 = vxpose.xlu0.b32.cont [11/16] (narrow) %v9122_v62, 8  ;;  %v9125_v1 = vadd.f32 %v9907_v8, %v13605_v19 }
 0xed0   :  { %v9908_v31 = vpop.f32.mrb[244].mxu0 }
 0xed1   :  { %v9909_v10 = vpop.f32.mrb[245].mxu0 }
 0xed2   :  { %v9910_v47 = vadd.f32 %v9909_v10, %v9908_v31  ;;  %v9911_v16 = vpop.f32.mrb[246].mxu0  ;;  %9171 = vxpose.xlu0.b32.cont [12/16] (narrow) %v9125_v1, 8 }
 0xed3   :  { %v9912_v38 = vpop.f32.mrb[247].mxu0 }
 0xed4   :  { %v9913_v26 = vadd.f32 %v9912_v38, %v9911_v16  ;;  %v9130_v37 = vadd.f32 %v9910_v47, %v13605_v19 }
 0xed6   :  { %9172 = vxpose.xlu0.b32.cont [13/16] (narrow) %v9130_v37, 8  ;;  %v9133_v41 = vadd.f32 %v9913_v26, %v13605_v19 }
 0xed8   :  { %v9914_v5 = vpop.f32.mrb[248].mxu0 }
 0xed9   :  { %v9915_v53 = vpop.f32.mrb[249].mxu0 }
 0xeda   :  { %v9916_v49 = vadd.f32 %v9915_v53, %v9914_v5  ;;  %v9917_v52 = vpop.f32.mrb[250].mxu0  ;;  %9173 = vxpose.xlu0.b32.cont [14/16] (narrow) %v9133_v41, 8 }
 0xedb   :  { %v9918_v34 = vpop.f32.mrb[251].mxu0 }
 0xedc   :  { %v9919_v9 = vadd.f32 %v9918_v34, %v9917_v52  ;;  %v9138_v12 = vadd.f32 %v9916_v49, %v13605_v19 }
 0xede   :  { %9174 = vxpose.xlu0.b32.cont [15/16] (narrow) %v9138_v12, 8  ;;  %v9141_v61 = vadd.f32 %v9919_v9, %v13605_v19 }
 0xee2   :  { %9175 = vxpose.xlu0.b32.end [16/16] (narrow) %v9141_v61, 8 }
 0xf26   :  { %v9176_v40 = vpop.trf.xlu0 }
 0xf27   :  { %10056 = vmatmul.mubr.f32.vlgmr.msra.gmra.mrb[252].mxu0 %v9176_v40 }
 0xffa   :  { %v9258_v22 = vpop.f32.mrb[252].mxu0 }
 0xffb   :  { %v10057_v55 = vpop.f32.mrb[253].mxu0  ;;  %v9264_v20 = vrot.slane %v9258_v22, 1  ;;  %v9269_v32 = vrot.slane %v9258_v22, 2  ;;  %v9274_v19 = vrot.slane %v9258_v22, 3 }
 0xffd   :  { %9282 = vrot.lane.b32.xlu1 %v9264_v20, %s11595_s11 }
0x1001   :  { %9286 = vrot.lane.b32.xlu1 %v9269_v32, %s11596_s18 }
0x1005   :  { %9295 = vrot.lane.b32.xlu1 %v9294_v43, %s11597_s9 }
0x1009   :  { %9265 = vrot.lane.b32.xlu1 %v9264_v20, %s11598_s5 }
0x100d   :  { %9270 = vrot.lane.b32.xlu1 %v9269_v32, %s11599_s27 }
0x1011   :  { %9275 = vrot.lane.b32.xlu1 %v9274_v19, %s11600_s8 }
0x106f   :  { %v9283_v6 = vpop.permute.xlu1 %9282 }
0x1070   :  { %v9285_v45 = vadd.f32 %v9283_v6, %v9258_v22 }
0x1073   :  { %v9287_v14 = vpop.permute.xlu1 %9286 }
0x1074   :  { %v9289_v13 = vadd.f32 %v9287_v14, %v9285_v45 }
0x1077   :  { %v9296_v58 = vpop.permute.xlu1 %9295 }
0x1078   :  { %v9298_v44 = vadd.f32 %v9296_v58, %v9289_v13 }
0x107a   :  { %9300 = vrot.lane.b32.xlu1 %v9298_v44, %s11601_s4 }
0x107b   :  { %v9266_v2 = vpop.permute.xlu1 %9265 }
0x107c   :  { %v9268_v36 = vadd.f32 %v9266_v2, %v9258_v22 }
0x107f   :  { %v9271_v25 = vpop.permute.xlu1 %9270 }
0x1080   :  { %v9273_v56 = vadd.f32 %v9271_v25, %v9268_v36 }
0x1083   :  { %v9276_v57 = vpop.permute.xlu1 %9275 }
0x1084   :  { %v9278_v33 = vadd.f32 %v9276_v57, %v9273_v56 }
0x1086   :  { %v9279_v46 = vadd.f32 %v9278_v33, %v9262_v42 }
0x1088   :  { %9281 = vst.msk [vmem:[#allocation18] sm:$0x1] %vm9280_vm5, %v9279_v46 }
0x1089   :  { %11512 = shalt.err (!%p11509_p4)
}
0x108a   :  { %s11513_s22 = scalar_lea.hbm %s13661_s13, 16 }
0x108b   :  { %p11514_p5 = scmp.ne.s32.totalorder %s13661_s13, %s11513_s22  ;;  %p11517_p6 = scmp.lt.u32.totalorder %s11513_s22, %s13661_s13 }
0x108d   :  { %p11519_p7 = pnand %p11517_p6, %p11514_p5 }
0x108f   :  { %11522 = shalt.err (!%p11519_p7)
}
0x1090   :  { %9314 = dma.vmem_to_hbm [thread:$0]  %s9312_s21, 16, %s13661_s13, [#allocation8]   ;;  %vm9303_vm6 = vcmask 20484  }
0x1091   :  { %s11603_s0 = smov [#allocation19]  }
0x1092   :  { %s9321_s28 = sshll.u32 %s11603_s0, 4  ;;  %s9322_s28 = int_to_ptr.vmem [resolvable:$true] %s9321_s28 }
0x1093   :  { %s11523_s7 = scalar_lea.vmem %s9322_s28, 16  ;;  %s11527_s25 = scalar_lea.vmem %s9322_s28, 32 }
0x1094   :  { %p11524_p8 = scmp.ne.s32.totalorder %s9322_s28, %s11523_s7  ;;  %p11528_p9 = scmp.lt.s32.totalorder %s9322_s28, %s9322_s28 }
0x1095   :  { %p11529_p10 = scmp.lt.s32.totalorder %s11527_s25, %s11523_s7 }
0x1097   :  { %p11530_p11 = por %p11529_p10, %p11528_p9 }
0x1099   :  { %p11531_p12 = pnand %p11530_p11, %p11524_p8 }
0x10ec   :  { %v9301_v29 = vpop.permute.xlu1 %9300 }
0x10ed   :  { %9304 = vst.msk [vmem:[#allocation19 - $0x4] sm:$0x10] %vm9303_vm6, %v9301_v29 }
0x10ee   :  { %11534 = shalt.err (!%p11531_p12)
}
0x10ef   :  { %s11535_s15 = scalar_lea.hbm %s13662_s14, 16 }
0x10f0   :  { %p11536_p13 = scmp.ne.s32.totalorder %s13662_s14, %s11535_s15  ;;  %p11539_p0 = scmp.lt.u32.totalorder %s11535_s15, %s13662_s14 }
0x10f2   :  { %p11541_p1 = pnand %p11539_p0, %p11536_p13 }
0x10f4   :  { %11544 = shalt.err (!%p11541_p1)
}
0x10f5   :  { %9324 = dma.vmem_to_hbm [thread:$0]  %s9322_s28, 16, %s13662_s14, [#allocation20]  }
0x10f6   :  { %11559 = dma.done.wait [#allocation8], 16  }
0x10f7   :  { %11560 = vsyncadd [#allocation8], 4294967280 }
0x10f8   :  { %11561 = dma.done.wait [#allocation20], 16  }
0x10f9   :  { %11562 = vsyncadd [#allocation20], 4294967280 }
0x10fa   :  { %9331 = vsyncpa [#allocation7], 1 }
0x10fb   :  { %9332 = vsyncpa [#allocation10], 1 }
0x10fc   :  { %9333 = vsyncpa [#allocation13], 1 }
0x10fd   :  { %9334 = vsyncpa [#allocation16], 1 }
0x10fe   :  { %9335 = vsyncpa [#allocation8], 1 }
0x10ff   :  { %9336 = vsyncpa [#allocation20], 1 }
0x1100   :  { %9337 = vsyncmov [#allocation5] }
0x1103   :  { %s9338_s5 = vpop.sfrf %9337 }
0x1104   :  { %p9682_p2 = scmp.ne.s32.totalorder %s9338_s5, 0 }
0x1106   :  { %9342 = shalt.err (%p9682_p2)  }
0x1107   :  { %9344 = vsyncmov [#allocation5 + $0x1] }
0x110a   :  { %s9345_s27 = vpop.sfrf %9344 }
0x110b   :  { %p9683_p3 = scmp.ne.s32.totalorder %s9345_s27, 0 }
0x110d   :  { %9349 = shalt.err (%p9683_p3)  }
0x110e   :  { %9351 = vsyncmov [#allocation5 + $0x2] }
0x1111   :  { %s9352_s14 = vpop.sfrf %9351 }
0x1112   :  { %p9684_p4 = scmp.ne.s32.totalorder %s9352_s14, 0 }
0x1114   :  { %9356 = shalt.err (%p9684_p4)  }

</bundles_post_ra>
